<compile_context>
chip_gen: v6e
topology: v6e:2x2x1
jax: 0.10.0
libtpu: 0.0.40
codegen_flags: <defaults>
</compile_context>

<pallas_src>
import functools
import math

import jax
import jax.numpy as jnp
from jax import lax
from jax.experimental import pallas as pl
from jax.experimental.pallas import tpu as pltpu

LANE = 128


def _round_up(x, m):
    return (x + m - 1) // m * m


def _pick_m_tile(m, target=2048):
    for tm in (4096, 2048, 1024, 512, 256, 128, 64, 32, 16, 8):
        if tm <= target and m % tm == 0:
            return tm
    return m


# ----------------------------------------------------------------------------
# Pallas kernels
# ----------------------------------------------------------------------------
def _conv3x3_kernel(*refs, fuse_input_bn, fold_dx, h, w):
    """One (batch, cout-tile) step of a 3x3 'same' conv (+ optional fused input BN/ReLU).

    refs (in order):
      x_ref:     (1, h, w, cin)   bf16  unpadded input image
      w_ref:     (3, 3*cin, cp)   bf16  resident weight, K ordered as [dx, cin]
      [s_ref, t_ref: (1, cin) f32]      only when fuse_input_bn (previous BN scale/shift)
      y_ref:     (1, h, w, tn)    bf16  conv output tile (pre-BN)
      stats_ref: (1, 2, tn)       f32   per-tile [sum, sum-of-squares]
      xbuf_ref:  VMEM scratch: (h+2, w, 3*cin) if fold_dx else (h+2, w+2, cin)
    """
    if fuse_input_bn:
        x_ref, w_ref, s_ref, t_ref, y_ref, stats_ref, xbuf_ref = refs
    else:
        x_ref, w_ref, y_ref, stats_ref, xbuf_ref = refs

    cin = x_ref.shape[-1]
    cp = w_ref.shape[-1]
    tn = y_ref.shape[-1]
    nj = cp // tn
    j = pl.program_id(1)
    hw = h * w

    def build_xbuf():
        # bf16 straight from HBM/VMEM -- no fp32 round trip on the conv input.
        x = x_ref[0, :, :, :]                                        # (h, w, cin)
        if fuse_input_bn:
            # Fused BN(previous layer) + ReLU on the input tile (f32 affine, bf16 to MXU).
            a = jnp.maximum(x.astype(jnp.float32) * s_ref[...] + t_ref[...], 0.0)
            x = a.astype(jnp.bfloat16)
        zc = jnp.zeros((h, 1, cin), jnp.bfloat16)
        if fold_dx:
            # Fold the 3 width (dx) shifts into the contracting dim: K = 3*cin.
            body = jnp.concatenate(
                [jnp.concatenate([zc, x[:, :w - 1, :]], axis=1),     # dx = 0
                 x,                                                  # dx = 1
                 jnp.concatenate([x[:, 1:, :], zc], axis=1)],        # dx = 2
                axis=-1)                                             # (h, w, 3*cin)
            zr = jnp.zeros((1, w, 3 * cin), jnp.bfloat16)
            xbuf_ref[...] = jnp.concatenate([zr, body, zr], axis=0)  # (h+2, w, 3*cin)
        else:
            # Small-cin path (first layer): keep the spatially padded image, K = cin.
            xp = jnp.concatenate([zc, x, zc], axis=1)                # (h, w+2, cin)
            zr = jnp.zeros((1, w + 2, cin), jnp.bfloat16)
            xbuf_ref[...] = jnp.concatenate([zr, xp, zr], axis=0)    # (h+2, w+2, cin)

    if nj == 1:
        build_xbuf()
    else:
        # xbuf is reused by every cout tile of this image (grid axis 1 is "arbitrary").
        pl.when(j == 0)(build_xbuf)

    def wtap(d, k0, ksz):
        if nj == 1:
            return w_ref[d, pl.ds(k0, ksz), :]
        col = pl.multiple_of(j * tn, tn)
        return w_ref[d, pl.ds(k0, ksz), pl.ds(col, tn)]

    # Prepare all shifted windows first, then issue the dots back-to-back so the
    # partial sums can stay in the MXU result buffer (fp32 accumulation).
    if fold_dx:
        k3 = 3 * cin
        wins = [xbuf_ref[pl.ds(d, h), :, :].reshape(hw, k3) for d in range(3)]
        taps = [wtap(d, 0, k3) for d in range(3)]
    else:
        wins, taps = [], []
        for dy in range(3):
            for dx in range(3):
                wins.append(xbuf_ref[pl.ds(dy, h), pl.ds(dx, w), :].reshape(hw, cin))
                taps.append(wtap(dy, dx * cin, cin))

    acc = jnp.dot(wins[0], taps[0], preferred_element_type=jnp.float32)
    for t in range(1, len(wins)):
        acc = acc + jnp.dot(wins[t], taps[t], preferred_element_type=jnp.float32)

    # Conv output stored as bf16 (halves the HBM write + next-layer read).
    y_ref[0, :, :, :] = acc.reshape(h, w, tn).astype(y_ref.dtype)
    # Fused BatchNorm statistics partials from the fp32 accumulator.
    s = jnp.sum(acc, axis=0, keepdims=True)                          # (1, tn)
    sq = jnp.sum(acc * acc, axis=0, keepdims=True)                   # (1, tn)
    stats_ref[0, :, :] = jnp.concatenate([s, sq], axis=0)


def _scale_shift_relu_kernel(y_ref, s_ref, t_ref, o_ref):
    # o = relu(y * scale + shift); y is bf16, affine in f32.
    o_ref[...] = jnp.maximum(
        y_ref[...].astype(jnp.float32) * s_ref[...] + t_ref[...], 0.0)


# ----------------------------------------------------------------------------
# Layer wrappers (NHWC internally, Cout padded to a multiple of 128)
# ----------------------------------------------------------------------------
def _conv3x3(x, w3, scale=None, shift=None):
    """3x3 'same' conv with fused channel-statistics partials.

    x:  (N, H, W, Cin) bf16 (unpadded; zero padding is assembled in VMEM).
    w3: (3, 3*Cin, Cp) bf16 with Cp % 128 == 0, K ordered as [dx, cin].
    scale/shift: optional (Cin,) f32 -- fuse relu(x*scale + shift) (previous BN+ReLU)
                 onto the input tile right after load.
    Returns y (N, H, W, Cp) bf16 and stats (2, Cp) f32 = [sum, sum-of-squares].
    """
    n, h, w, cin = x.shape
    cp = w3.shape[-1]
    assert w3.shape == (3, 3 * cin, cp)
    # NOTE: prefer tn = 128 on v5e (4x128^2 MXU, single vst slot); 256 fits v6e/v7x MXU.
    tn = 256 if cp % 256 == 0 else LANE
    nj = cp // tn
    fuse = scale is not None
    fold_dx = (cin % LANE == 0)
    xbuf_shape = (h + 2, w, 3 * cin) if fold_dx else (h + 2, w + 2, cin)

    in_specs = [
        pl.BlockSpec((1, h, w, cin), lambda b, j: (b, 0, 0, 0)),
        # Full weight resident in VMEM (constant index_map -> fetched exactly once).
        pl.BlockSpec((3, 3 * cin, cp), lambda b, j: (0, 0, 0)),
    ]
    args = [x, w3]
    if fuse:
        in_specs += [pl.BlockSpec((1, cin), lambda b, j: (0, 0)),
                     pl.BlockSpec((1, cin), lambda b, j: (0, 0))]
        args += [scale.reshape(1, cin), shift.reshape(1, cin)]

    kernel = functools.partial(_conv3x3_kernel, fuse_input_bn=fuse,
                               fold_dx=fold_dx, h=h, w=w)

    # Working set is well under the default scoped-VMEM limit at these tile sizes, so
    # vmem_limit_bytes is left at its default (re-derive if tiles are grown).
    y, stats = pl.pallas_call(
        kernel,
        grid=(n, nj),
        in_specs=in_specs,
        out_specs=[
            pl.BlockSpec((1, h, w, tn), lambda b, j: (b, 0, 0, j)),
            pl.BlockSpec((1, 2, tn), lambda b, j: (b, 0, j)),
        ],
        out_shape=(
            jax.ShapeDtypeStruct((n, h, w, cp), jnp.bfloat16),
            jax.ShapeDtypeStruct((n, 2, cp), jnp.float32),
        ),
        scratch_shapes=[pltpu.VMEM(xbuf_shape, jnp.bfloat16)],
        compiler_params=pltpu.CompilerParams(
            # cout tiles of one image reuse the xbuf scratch -> keep axis 1 sequential.
            dimension_semantics=("parallel", "arbitrary")),
        cost_estimate=pl.CostEstimate(
            flops=2 * n * h * w * 9 * cin * cp,
            transcendentals=0,
            bytes_accessed=(x.size * 2 + w3.size * 2
                            + n * h * w * cp * 2 + n * 2 * cp * 4)),
    )(*args)
    return y, stats.sum(axis=0)


def _bn_scale_shift(stat_sums, gamma, beta, count, eps):
    """Training-mode BatchNorm folded into a per-channel (scale, shift) pair (f32)."""
    mean = stat_sums[0] / count
    # TODO(synk): E[y^2] - mean^2 in fp32; switch to a shifted/Welford reduction if
    # activation magnitudes ever grow enough for cancellation to matter.
    var = jnp.maximum(stat_sums[1] / count - mean * mean, 0.0)
    scale = gamma * lax.rsqrt(var + eps)
    shift = beta - mean * scale
    return scale, shift


def _bn_relu(y, stat_sums, gamma, beta, count, eps=1e-5):
    """Standalone BN+ReLU (only used after the last conv; BN1 is fused into conv2)."""
    n, h, w, cp = y.shape
    scale, shift = _bn_scale_shift(stat_sums, gamma, beta, count, eps)
    m = n * h * w
    tm = _pick_m_tile(m)
    out = pl.pallas_call(
        _scale_shift_relu_kernel,
        grid=(m // tm,),
        in_specs=[
            pl.BlockSpec((tm, cp), lambda i: (i, 0)),
            pl.BlockSpec((1, cp), lambda i: (0, 0)),
            pl.BlockSpec((1, cp), lambda i: (0, 0)),
        ],
        out_specs=pl.BlockSpec((tm, cp), lambda i: (i, 0)),
        out_shape=jax.ShapeDtypeStruct((m, cp), jnp.float32),
        compiler_params=pltpu.CompilerParams(dimension_semantics=("parallel",)),
    )(y.reshape(m, cp), scale.reshape(1, cp), shift.reshape(1, cp))
    return out.reshape(n, h, w, cp)


def _prep_weight(w_oihw, cin_p, cout_p):
    """Torch (Cout, Cin, 3, 3) -> (3, 3*cin_p, cout_p) bf16, K ordered as [dx, cin]."""
    cout, cin = w_oihw.shape[0], w_oihw.shape[1]
    wt = jnp.transpose(w_oihw, (2, 3, 1, 0))                         # (ky, kx, cin, cout)
    wt = jnp.pad(wt, ((0, 0), (0, 0), (0, cin_p - cin), (0, cout_p - cout)))
    return wt.reshape(3, 3 * cin_p, cout_p).astype(jnp.bfloat16)


def _pad_vec(v, n_out, value):
    return jnp.pad(v, (0, n_out - v.shape[0]), constant_values=value)


# ----------------------------------------------------------------------------
# ConvBlock2d forward
# ----------------------------------------------------------------------------
@jax.jit
def conv_block2d_forward(x_nchw, params):
    """ConvBlock2d forward: x (N, Cin, H, W) f32 -> (N, out_size, H, W) f32."""
    eps = 1e-5
    n, cin, h, w = x_nchw.shape
    out_size = params["w1"].shape[0]
    cp = _round_up(out_size, LANE)
    count = n * h * w

    # NCHW -> NHWC + bf16 cast (tiny Cin tensor).  No spatial padding / halo copies:
    # the zero-padded neighbourhood is assembled in VMEM inside the conv kernel.
    x = jnp.transpose(x_nchw, (0, 2, 3, 1)).astype(jnp.bfloat16)

    # Conv biases (params['b1'], params['b2']) are intentionally NOT applied:
    # training-mode BatchNorm subtracts the batch mean, which cancels a constant
    # per-channel bias exactly.  (Not valid for eval-mode/running-stats BN.)
    w1 = _prep_weight(params["w1"], cin, cp)
    w2 = _prep_weight(params["w2"], cp, cp)
    g1 = _pad_vec(params["gamma1"], cp, 1.0)
    bt1 = _pad_vec(params["beta1"], cp, 0.0)
    g2 = _pad_vec(params["gamma2"], cp, 1.0)
    bt2 = _pad_vec(params["beta2"], cp, 0.0)

    # conv1 (bf16 MXU, fp32 acc) with fused BN statistics partials.
    y1, s1 = _conv3x3(x, w1)
    # BN1+ReLU is folded into conv2's input path as per-channel scale/shift operands.
    sc1, sh1 = _bn_scale_shift(s1, g1, bt1, count, eps)
    y2, s2 = _conv3x3(y1, w2, scale=sc1, shift=sh1)
    a2 = _bn_relu(y2, s2, g2, bt2, count, eps)

    # TODO(synk): final NHWC->NCHW transpose + channel slice stays in XLA; fusing it into
    # the BN2 kernel would leave a W-sized (lane-sparse) last dim => masked stores.
    return jnp.transpose(a2[..., :out_size], (0, 3, 1, 2))


# ----------------------------------------------------------------------------
# Parameter init (mimics PyTorch default Conv2d / BatchNorm2d init shapes)
# ----------------------------------------------------------------------------
def init_conv_block2d_params(key, in_size, out_size):
    ks = jax.random.split(key, 4)

    def conv_init(kw, kb, cin, cout):
        bound = 1.0 / math.sqrt(cin * 9)
        wt = jax.random.uniform(kw, (cout, cin, 3, 3), jnp.float32, -bound, bound)
        bs = jax.random.uniform(kb, (cout,), jnp.float32, -bound, bound)
        return wt, bs

    w1, b1 = conv_init(ks[0], ks[1], in_size, out_size)
    w2, b2 = conv_init(ks[2], ks[3], out_size, out_size)
    return {
        "w1": w1, "b1": b1,
        "gamma1": jnp.ones((out_size,), jnp.float32),
        "beta1": jnp.zeros((out_size,), jnp.float32),
        "w2": w2, "b2": b2,
        "gamma2": jnp.ones((out_size,), jnp.float32),
        "beta2": jnp.zeros((out_size,), jnp.float32),
    }


# ----------------------------------------------------------------------------
# Pure-JAX fp32 reference (matches the PyTorch module, training-mode BN)
# ----------------------------------------------------------------------------
def _reference_forward(x_nchw, params, eps=1e-5):
    def conv_bn_relu(x, w, b, g, bt):
        y = lax.conv_general_dilated(x, w, (1, 1), ((1, 1), (1, 1)),
                                     dimension_numbers=("NCHW", "OIHW", "NCHW"))
        y = y + b[None, :, None, None]
        mean = jnp.mean(y, axis=(0, 2, 3), keepdims=True)
        var = jnp.mean((y - mean) ** 2, axis=(0, 2, 3), keepdims=True)
        yn = (y - mean) * lax.rsqrt(var + eps)
        return jnp.maximum(yn * g[None, :, None, None] + bt[None, :, None, None], 0.0)

    x = conv_bn_relu(x_nchw, params["w1"], params["b1"], params["gamma1"], params["beta1"])
    x = conv_bn_relu(x, params["w2"], params["b2"], params["gamma2"], params["beta2"])
    return x


# ----------------------------------------------------------------------------
if __name__ == "__main__":
    key = jax.random.PRNGKey(0)
    kx, kp = jax.random.split(key)

    in_size, out_size = 4, 32
    x = jax.random.normal(kx, (2, in_size, 16, 16), dtype=jnp.float32)
    params = init_conv_block2d_params(kp, in_size, out_size)

    out = conv_block2d_forward(x, params)
    out = jax.block_until_ready(out)
    assert out.shape == (2, out_size, 16, 16)
    assert bool(jnp.all(out >= 0.0))          # ReLU output

    # Numerical check vs fp32 reference (loose tolerance: bf16 MXU operands/activations).
    ref = _reference_forward(x, params)
    max_err = float(jnp.max(jnp.abs(out - ref)))
    mean_err = float(jnp.mean(jnp.abs(out - ref)))
    assert max_err < 0.25, f"max abs error vs reference too large: {max_err}"
    assert mean_err < 0.05, f"mean abs error vs reference too large: {mean_err}"

    print("KERNEL_OK")
</pallas_src>

<mosaic_0001>
module attributes {stable_mosaic.version = 11 : i64} {
  func.func @_conv3x3_kernel(%arg0: i32, %arg1: i32, %arg2: memref<1x16x16x4xbf16, #tpu.memory_space<vmem>>, %arg3: memref<3x12x128xbf16, #tpu.memory_space<vmem>>, %arg4: memref<1x16x16x128xbf16, #tpu.memory_space<vmem>>, %arg5: memref<1x2x128xf32, #tpu.memory_space<vmem>>, %arg6: memref<18x18x4xbf16, #tpu.memory_space<vmem>>) attributes {dimension_semantics = [#tpu.dimension_semantics<parallel>, #tpu.dimension_semantics<arbitrary>], iteration_bounds = array<i64: 2, 1>, scalar_prefetch = 0 : i64, scratch_operands = 1 : i64, tpu.core_type = #tpu.core_type<tc>, window_params = [{transform_indices = @transform_0, window_bounds = array<i64: 1, 16, 16, 4>}, {pipeline_mode = #tpu.pipeline_mode<synchronous>, transform_indices = @transform_1, window_bounds = array<i64: 3, 12, 128>}, {transform_indices = @transform_2, window_bounds = array<i64: 1, 16, 16, 128>}, {transform_indices = @transform_3, window_bounds = array<i64: 1, 2, 128>}]} {
    %c0 = arith.constant 0 : index
    %c0_0 = arith.constant 0 : index
    %c0_1 = arith.constant 0 : index
    %c0_2 = arith.constant 0 : index
    %0 = vector.load %arg2[%c0, %c0_0, %c0_1, %c0_2] : memref<1x16x16x4xbf16, #tpu.memory_space<vmem>>, vector<1x16x16x4xbf16>
    %1 = vector.shape_cast %0 : vector<1x16x16x4xbf16> to vector<16x16x4xbf16>
    %cst = arith.constant 0.000000e+00 : bf16
    %2 = vector.broadcast %cst : bf16 to vector<16x1x4xbf16>
    %3 = tpu.concatenate %2, %1, %2 in 1 : vector<16x1x4xbf16>, vector<16x16x4xbf16>, vector<16x1x4xbf16> -> vector<16x18x4xbf16>
    %cst_3 = arith.constant 0.000000e+00 : bf16
    %4 = vector.broadcast %cst_3 : bf16 to vector<1x18x4xbf16>
    %5 = tpu.concatenate %4, %3, %4 in 0 : vector<1x18x4xbf16>, vector<16x18x4xbf16>, vector<1x18x4xbf16> -> vector<18x18x4xbf16>
    %c0_4 = arith.constant 0 : index
    %c0_5 = arith.constant 0 : index
    %c0_6 = arith.constant 0 : index
    %6 = vector.load %arg6[%c0_4, %c0_5, %c0_6] : memref<18x18x4xbf16, #tpu.memory_space<vmem>>, vector<18x18x4xbf16>
    tpu.vector_store %arg6[%c0_4, %c0_5, %c0_6], %5 {strides = array<i32>} : memref<18x18x4xbf16, #tpu.memory_space<vmem>>, vector<18x18x4xbf16>,
    %c0_7 = arith.constant 0 : index
    %c0_8 = arith.constant 0 : index
    %c0_9 = arith.constant 0 : index
    %7 = vector.load %arg6[%c0_7, %c0_8, %c0_9] : memref<18x18x4xbf16, #tpu.memory_space<vmem>>, vector<16x16x4xbf16>
    %8 = vector.shape_cast %7 : vector<16x16x4xbf16> to vector<256x4xbf16>
    %c0_10 = arith.constant 0 : index
    %c0_11 = arith.constant 0 : index
    %c0_12 = arith.constant 0 : index
    %9 = vector.load %arg3[%c0_10, %c0_11, %c0_12] : memref<3x12x128xbf16, #tpu.memory_space<vmem>>, vector<1x4x128xbf16>
    %10 = vector.shape_cast %9 : vector<1x4x128xbf16> to vector<4x128xbf16>
    %c0_13 = arith.constant 0 : index
    %c1 = arith.constant 1 : index
    %c0_14 = arith.constant 0 : index
    %11 = vector.load %arg6[%c0_13, %c1, %c0_14] : memref<18x18x4xbf16, #tpu.memory_space<vmem>>, vector<16x16x4xbf16>
    %12 = vector.shape_cast %11 : vector<16x16x4xbf16> to vector<256x4xbf16>
    %c0_15 = arith.constant 0 : index
    %c4 = arith.constant 4 : index
    %c0_16 = arith.constant 0 : index
    %13 = vector.load %arg3[%c0_15, %c4, %c0_16] : memref<3x12x128xbf16, #tpu.memory_space<vmem>>, vector<1x4x128xbf16>
    %14 = vector.shape_cast %13 : vector<1x4x128xbf16> to vector<4x128xbf16>
    %c0_17 = arith.constant 0 : index
    %c2 = arith.constant 2 : index
    %c0_18 = arith.constant 0 : index
    %15 = vector.load %arg6[%c0_17, %c2, %c0_18] : memref<18x18x4xbf16, #tpu.memory_space<vmem>>, vector<16x16x4xbf16>
    %16 = vector.shape_cast %15 : vector<16x16x4xbf16> to vector<256x4xbf16>
    %c0_19 = arith.constant 0 : index
    %c8 = arith.constant 8 : index
    %c0_20 = arith.constant 0 : index
    %17 = vector.load %arg3[%c0_19, %c8, %c0_20] : memref<3x12x128xbf16, #tpu.memory_space<vmem>>, vector<1x4x128xbf16>
    %18 = vector.shape_cast %17 : vector<1x4x128xbf16> to vector<4x128xbf16>
    %c1_21 = arith.constant 1 : index
    %c0_22 = arith.constant 0 : index
    %c0_23 = arith.constant 0 : index
    %19 = vector.load %arg6[%c1_21, %c0_22, %c0_23] : memref<18x18x4xbf16, #tpu.memory_space<vmem>>, vector<16x16x4xbf16>
    %20 = vector.shape_cast %19 : vector<16x16x4xbf16> to vector<256x4xbf16>
    %c1_24 = arith.constant 1 : index
    %c0_25 = arith.constant 0 : index
    %c0_26 = arith.constant 0 : index
    %21 = vector.load %arg3[%c1_24, %c0_25, %c0_26] : memref<3x12x128xbf16, #tpu.memory_space<vmem>>, vector<1x4x128xbf16>
    %22 = vector.shape_cast %21 : vector<1x4x128xbf16> to vector<4x128xbf16>
    %c1_27 = arith.constant 1 : index
    %c1_28 = arith.constant 1 : index
    %c0_29 = arith.constant 0 : index
    %23 = vector.load %arg6[%c1_27, %c1_28, %c0_29] : memref<18x18x4xbf16, #tpu.memory_space<vmem>>, vector<16x16x4xbf16>
    %24 = vector.shape_cast %23 : vector<16x16x4xbf16> to vector<256x4xbf16>
    %c1_30 = arith.constant 1 : index
    %c4_31 = arith.constant 4 : index
    %c0_32 = arith.constant 0 : index
    %25 = vector.load %arg3[%c1_30, %c4_31, %c0_32] : memref<3x12x128xbf16, #tpu.memory_space<vmem>>, vector<1x4x128xbf16>
    %26 = vector.shape_cast %25 : vector<1x4x128xbf16> to vector<4x128xbf16>
    %c1_33 = arith.constant 1 : index
    %c2_34 = arith.constant 2 : index
    %c0_35 = arith.constant 0 : index
    %27 = vector.load %arg6[%c1_33, %c2_34, %c0_35] : memref<18x18x4xbf16, #tpu.memory_space<vmem>>, vector<16x16x4xbf16>
    %28 = vector.shape_cast %27 : vector<16x16x4xbf16> to vector<256x4xbf16>
    %c1_36 = arith.constant 1 : index
    %c8_37 = arith.constant 8 : index
    %c0_38 = arith.constant 0 : index
    %29 = vector.load %arg3[%c1_36, %c8_37, %c0_38] : memref<3x12x128xbf16, #tpu.memory_space<vmem>>, vector<1x4x128xbf16>
    %30 = vector.shape_cast %29 : vector<1x4x128xbf16> to vector<4x128xbf16>
    %c2_39 = arith.constant 2 : index
    %c0_40 = arith.constant 0 : index
    %c0_41 = arith.constant 0 : index
    %31 = vector.load %arg6[%c2_39, %c0_40, %c0_41] : memref<18x18x4xbf16, #tpu.memory_space<vmem>>, vector<16x16x4xbf16>
    %32 = vector.shape_cast %31 : vector<16x16x4xbf16> to vector<256x4xbf16>
    %c2_42 = arith.constant 2 : index
    %c0_43 = arith.constant 0 : index
    %c0_44 = arith.constant 0 : index
    %33 = vector.load %arg3[%c2_42, %c0_43, %c0_44] : memref<3x12x128xbf16, #tpu.memory_space<vmem>>, vector<1x4x128xbf16>
    %34 = vector.shape_cast %33 : vector<1x4x128xbf16> to vector<4x128xbf16>
    %c2_45 = arith.constant 2 : index
    %c1_46 = arith.constant 1 : index
    %c0_47 = arith.constant 0 : index
    %35 = vector.load %arg6[%c2_45, %c1_46, %c0_47] : memref<18x18x4xbf16, #tpu.memory_space<vmem>>, vector<16x16x4xbf16>
    %36 = vector.shape_cast %35 : vector<16x16x4xbf16> to vector<256x4xbf16>
    %c2_48 = arith.constant 2 : index
    %c4_49 = arith.constant 4 : index
    %c0_50 = arith.constant 0 : index
    %37 = vector.load %arg3[%c2_48, %c4_49, %c0_50] : memref<3x12x128xbf16, #tpu.memory_space<vmem>>, vector<1x4x128xbf16>
    %38 = vector.shape_cast %37 : vector<1x4x128xbf16> to vector<4x128xbf16>
    %c2_51 = arith.constant 2 : index
    %c2_52 = arith.constant 2 : index
    %c0_53 = arith.constant 0 : index
    %39 = vector.load %arg6[%c2_51, %c2_52, %c0_53] : memref<18x18x4xbf16, #tpu.memory_space<vmem>>, vector<16x16x4xbf16>
    %40 = vector.shape_cast %39 : vector<16x16x4xbf16> to vector<256x4xbf16>
    %c2_54 = arith.constant 2 : index
    %c8_55 = arith.constant 8 : index
    %c0_56 = arith.constant 0 : index
    %41 = vector.load %arg3[%c2_54, %c8_55, %c0_56] : memref<3x12x128xbf16, #tpu.memory_space<vmem>>, vector<1x4x128xbf16>
    %42 = vector.shape_cast %41 : vector<1x4x128xbf16> to vector<4x128xbf16>
    %cst_57 = arith.constant dense<0.000000e+00> : vector<256x128xf32>
    %43 = tpu.matmul %8, %10, %cst_57 {dimension_numbers = #tpu.dot_dimension_numbers<[1], [0], [0], [1], [0, 0, 1, 1], [], []>} : vector<256x4xbf16>, vector<4x128xbf16>, vector<256x128xf32> -> vector<256x128xf32>
    %cst_58 = arith.constant dense<0.000000e+00> : vector<256x128xf32>
    %44 = tpu.matmul %12, %14, %cst_58 {dimension_numbers = #tpu.dot_dimension_numbers<[1], [0], [0], [1], [0, 0, 1, 1], [], []>} : vector<256x4xbf16>, vector<4x128xbf16>, vector<256x128xf32> -> vector<256x128xf32>
    %45 = arith.addf %43, %44 : vector<256x128xf32>
    %cst_59 = arith.constant dense<0.000000e+00> : vector<256x128xf32>
    %46 = tpu.matmul %16, %18, %cst_59 {dimension_numbers = #tpu.dot_dimension_numbers<[1], [0], [0], [1], [0, 0, 1, 1], [], []>} : vector<256x4xbf16>, vector<4x128xbf16>, vector<256x128xf32> -> vector<256x128xf32>
    %47 = arith.addf %45, %46 : vector<256x128xf32>
    %cst_60 = arith.constant dense<0.000000e+00> : vector<256x128xf32>
    %48 = tpu.matmul %20, %22, %cst_60 {dimension_numbers = #tpu.dot_dimension_numbers<[1], [0], [0], [1], [0, 0, 1, 1], [], []>} : vector<256x4xbf16>, vector<4x128xbf16>, vector<256x128xf32> -> vector<256x128xf32>
    %49 = arith.addf %47, %48 : vector<256x128xf32>
    %cst_61 = arith.constant dense<0.000000e+00> : vector<256x128xf32>
    %50 = tpu.matmul %24, %26, %cst_61 {dimension_numbers = #tpu.dot_dimension_numbers<[1], [0], [0], [1], [0, 0, 1, 1], [], []>} : vector<256x4xbf16>, vector<4x128xbf16>, vector<256x128xf32> -> vector<256x128xf32>
    %51 = arith.addf %49, %50 : vector<256x128xf32>
    %cst_62 = arith.constant dense<0.000000e+00> : vector<256x128xf32>
    %52 = tpu.matmul %28, %30, %cst_62 {dimension_numbers = #tpu.dot_dimension_numbers<[1], [0], [0], [1], [0, 0, 1, 1], [], []>} : vector<256x4xbf16>, vector<4x128xbf16>, vector<256x128xf32> -> vector<256x128xf32>
    %53 = arith.addf %51, %52 : vector<256x128xf32>
    %cst_63 = arith.constant dense<0.000000e+00> : vector<256x128xf32>
    %54 = tpu.matmul %32, %34, %cst_63 {dimension_numbers = #tpu.dot_dimension_numbers<[1], [0], [0], [1], [0, 0, 1, 1], [], []>} : vector<256x4xbf16>, vector<4x128xbf16>, vector<256x128xf32> -> vector<256x128xf32>
    %55 = arith.addf %53, %54 : vector<256x128xf32>
    %cst_64 = arith.constant dense<0.000000e+00> : vector<256x128xf32>
    %56 = tpu.matmul %36, %38, %cst_64 {dimension_numbers = #tpu.dot_dimension_numbers<[1], [0], [0], [1], [0, 0, 1, 1], [], []>} : vector<256x4xbf16>, vector<4x128xbf16>, vector<256x128xf32> -> vector<256x128xf32>
    %57 = arith.addf %55, %56 : vector<256x128xf32>
    %cst_65 = arith.constant dense<0.000000e+00> : vector<256x128xf32>
    %58 = tpu.matmul %40, %42, %cst_65 {dimension_numbers = #tpu.dot_dimension_numbers<[1], [0], [0], [1], [0, 0, 1, 1], [], []>} : vector<256x4xbf16>, vector<4x128xbf16>, vector<256x128xf32> -> vector<256x128xf32>
    %59 = arith.addf %57, %58 : vector<256x128xf32>
    %60 = vector.shape_cast %59 : vector<256x128xf32> to vector<16x16x128xf32>
    %61 = arith.truncf %60 : vector<16x16x128xf32> to vector<16x16x128xbf16>
    %c0_66 = arith.constant 0 : index
    %c0_67 = arith.constant 0 : index
    %c0_68 = arith.constant 0 : index
    %c0_69 = arith.constant 0 : index
    %62 = vector.load %arg4[%c0_66, %c0_67, %c0_68, %c0_69] : memref<1x16x16x128xbf16, #tpu.memory_space<vmem>>, vector<1x16x16x128xbf16>
    %63 = vector.shape_cast %62 : vector<1x16x16x128xbf16> to vector<16x16x128xbf16>
    %64 = vector.shape_cast %61 : vector<16x16x128xbf16> to vector<1x16x16x128xbf16>
    tpu.vector_store %arg4[%c0_66, %c0_67, %c0_68, %c0_69], %64 {strides = array<i32>} : memref<1x16x16x128xbf16, #tpu.memory_space<vmem>>, vector<1x16x16x128xbf16>,
    %cst_70 = arith.constant dense<0.000000e+00> : vector<128xf32>
    %65 = vector.multi_reduction <add>, %59, %cst_70 [0] : vector<256x128xf32> to vector<128xf32>
    %66 = vector.shape_cast %65 : vector<128xf32> to vector<1x128xf32>
    %67 = arith.mulf %59, %59 : vector<256x128xf32>
    %cst_71 = arith.constant dense<0.000000e+00> : vector<128xf32>
    %68 = vector.multi_reduction <add>, %67, %cst_71 [0] : vector<256x128xf32> to vector<128xf32>
    %69 = vector.shape_cast %68 : vector<128xf32> to vector<1x128xf32>
    %70 = tpu.concatenate %66, %69 in 0 : vector<1x128xf32>, vector<1x128xf32> -> vector<2x128xf32>
    %c0_72 = arith.constant 0 : index
    %c0_73 = arith.constant 0 : index
    %c0_74 = arith.constant 0 : index
    %71 = vector.load %arg5[%c0_72, %c0_73, %c0_74] : memref<1x2x128xf32, #tpu.memory_space<vmem>>, vector<1x2x128xf32>
    %72 = vector.shape_cast %71 : vector<1x2x128xf32> to vector<2x128xf32>
    %73 = vector.shape_cast %70 : vector<2x128xf32> to vector<1x2x128xf32>
    tpu.vector_store %arg5[%c0_72, %c0_73, %c0_74], %73 {strides = array<i32>} : memref<1x2x128xf32, #tpu.memory_space<vmem>>, vector<1x2x128xf32>,
    return
  }
  func.func @transform_0(%arg0: i32, %arg1: i32) -> (i32, i32, i32, i32) {
    %c0_i32 = arith.constant 0 : i32
    %c0_i32_0 = arith.constant 0 : i32
    %c0_i32_1 = arith.constant 0 : i32
    %c0_i32_2 = arith.constant 0 : i32
    return %arg0, %c0_i32, %c0_i32_0, %c0_i32_1 : i32, i32, i32, i32
  }
  func.func @transform_1(%arg0: i32, %arg1: i32) -> (i32, i32, i32) {
    %c0_i32 = arith.constant 0 : i32
    %c0_i32_0 = arith.constant 0 : i32
    %c0_i32_1 = arith.constant 0 : i32
    %c0_i32_2 = arith.constant 0 : i32
    return %c0_i32, %c0_i32_0, %c0_i32_1 : i32, i32, i32
  }
  func.func @transform_2(%arg0: i32, %arg1: i32) -> (i32, i32, i32, i32) {
    %c0_i32 = arith.constant 0 : i32
    %c0_i32_0 = arith.constant 0 : i32
    %c0_i32_1 = arith.constant 0 : i32
    return %arg0, %c0_i32, %c0_i32_0, %arg1 : i32, i32, i32, i32
  }
  func.func @transform_3(%arg0: i32, %arg1: i32) -> (i32, i32, i32) {
    %c0_i32 = arith.constant 0 : i32
    %c0_i32_0 = arith.constant 0 : i32
    return %arg0, %c0_i32, %arg1 : i32, i32, i32
  }
}

module attributes {stable_mosaic.version = 11 : i64} {
  func.func @_conv3x3_kernel(%arg0: i32, %arg1: i32, %arg2: memref<1x16x16x128xbf16, #tpu.memory_space<vmem>>, %arg3: memref<3x384x128xbf16, #tpu.memory_space<vmem>>, %arg4: memref<1x128xf32, #tpu.memory_space<vmem>>, %arg5: memref<1x128xf32, #tpu.memory_space<vmem>>, %arg6: memref<1x16x16x128xbf16, #tpu.memory_space<vmem>>, %arg7: memref<1x2x128xf32, #tpu.memory_space<vmem>>, %arg8: memref<18x16x384xbf16, #tpu.memory_space<vmem>>) attributes {dimension_semantics = [#tpu.dimension_semantics<parallel>, #tpu.dimension_semantics<arbitrary>], iteration_bounds = array<i64: 2, 1>, scalar_prefetch = 0 : i64, scratch_operands = 1 : i64, tpu.core_type = #tpu.core_type<tc>, window_params = [{transform_indices = @transform_0, window_bounds = array<i64: 1, 16, 16, 128>}, {pipeline_mode = #tpu.pipeline_mode<synchronous>, transform_indices = @transform_1, window_bounds = array<i64: 3, 384, 128>}, {pipeline_mode = #tpu.pipeline_mode<synchronous>, transform_indices = @transform_2, window_bounds = array<i64: 1, 128>}, {pipeline_mode = #tpu.pipeline_mode<synchronous>, transform_indices = @transform_3, window_bounds = array<i64: 1, 128>}, {transform_indices = @transform_4, window_bounds = array<i64: 1, 16, 16, 128>}, {transform_indices = @transform_5, window_bounds = array<i64: 1, 2, 128>}]} {
    %c0 = arith.constant 0 : index
    %c0_0 = arith.constant 0 : index
    %c0_1 = arith.constant 0 : index
    %c0_2 = arith.constant 0 : index
    %0 = vector.load %arg2[%c0, %c0_0, %c0_1, %c0_2] : memref<1x16x16x128xbf16, #tpu.memory_space<vmem>>, vector<1x16x16x128xbf16>
    %1 = vector.shape_cast %0 : vector<1x16x16x128xbf16> to vector<16x16x128xbf16>
    %2 = arith.extf %1 : vector<16x16x128xbf16> to vector<16x16x128xf32>
    %c0_3 = arith.constant 0 : index
    %c0_4 = arith.constant 0 : index
    %3 = vector.load %arg4[%c0_3, %c0_4] : memref<1x128xf32, #tpu.memory_space<vmem>>, vector<1x128xf32>
    %4 = vector.shape_cast %3 : vector<1x128xf32> to vector<1x1x128xf32>
    %5 = vector.broadcast %4 : vector<1x1x128xf32> to vector<16x16x128xf32>
    %6 = arith.mulf %2, %5 : vector<16x16x128xf32>
    %c0_5 = arith.constant 0 : index
    %c0_6 = arith.constant 0 : index
    %7 = vector.load %arg5[%c0_5, %c0_6] : memref<1x128xf32, #tpu.memory_space<vmem>>, vector<1x128xf32>
    %8 = vector.shape_cast %7 : vector<1x128xf32> to vector<1x1x128xf32>
    %9 = vector.broadcast %8 : vector<1x1x128xf32> to vector<16x16x128xf32>
    %10 = arith.addf %6, %9 : vector<16x16x128xf32>
    %cst = arith.constant 0.000000e+00 : f32
    %11 = vector.broadcast %cst : f32 to vector<16x16x128xf32>
    %12 = arith.maximumf %10, %11 : vector<16x16x128xf32>
    %13 = arith.truncf %12 : vector<16x16x128xf32> to vector<16x16x128xbf16>
    %cst_7 = arith.constant 0.000000e+00 : bf16
    %14 = vector.broadcast %cst_7 : bf16 to vector<16x1x128xbf16>
    %15 = vector.extract_strided_slice %13 {offsets = [0, 0, 0], sizes = [16, 15, 128], strides = [1, 1, 1]} : vector<16x16x128xbf16> to vector<16x15x128xbf16>
    %16 = tpu.concatenate %14, %15 in 1 : vector<16x1x128xbf16>, vector<16x15x128xbf16> -> vector<16x16x128xbf16>
    %17 = vector.extract_strided_slice %13 {offsets = [0, 1, 0], sizes = [16, 15, 128], strides = [1, 1, 1]} : vector<16x16x128xbf16> to vector<16x15x128xbf16>
    %18 = tpu.concatenate %17, %14 in 1 : vector<16x15x128xbf16>, vector<16x1x128xbf16> -> vector<16x16x128xbf16>
    %19 = tpu.concatenate %16, %13, %18 in 2 : vector<16x16x128xbf16>, vector<16x16x128xbf16>, vector<16x16x128xbf16> -> vector<16x16x384xbf16>
    %cst_8 = arith.constant 0.000000e+00 : bf16
    %20 = vector.broadcast %cst_8 : bf16 to vector<1x16x384xbf16>
    %21 = tpu.concatenate %20, %19, %20 in 0 : vector<1x16x384xbf16>, vector<16x16x384xbf16>, vector<1x16x384xbf16> -> vector<18x16x384xbf16>
    %c0_9 = arith.constant 0 : index
    %c0_10 = arith.constant 0 : index
    %c0_11 = arith.constant 0 : index
    %22 = vector.load %arg8[%c0_9, %c0_10, %c0_11] : memref<18x16x384xbf16, #tpu.memory_space<vmem>>, vector<18x16x384xbf16>
    tpu.vector_store %arg8[%c0_9, %c0_10, %c0_11], %21 {strides = array<i32>} : memref<18x16x384xbf16, #tpu.memory_space<vmem>>, vector<18x16x384xbf16>,
    %c0_12 = arith.constant 0 : index
    %c0_13 = arith.constant 0 : index
    %c0_14 = arith.constant 0 : index
    %23 = vector.load %arg8[%c0_12, %c0_13, %c0_14] : memref<18x16x384xbf16, #tpu.memory_space<vmem>>, vector<16x16x384xbf16>
    %24 = vector.shape_cast %23 : vector<16x16x384xbf16> to vector<256x384xbf16>
    %c1 = arith.constant 1 : index
    %c0_15 = arith.constant 0 : index
    %c0_16 = arith.constant 0 : index
    %25 = vector.load %arg8[%c1, %c0_15, %c0_16] : memref<18x16x384xbf16, #tpu.memory_space<vmem>>, vector<16x16x384xbf16>
    %26 = vector.shape_cast %25 : vector<16x16x384xbf16> to vector<256x384xbf16>
    %c2 = arith.constant 2 : index
    %c0_17 = arith.constant 0 : index
    %c0_18 = arith.constant 0 : index
    %27 = vector.load %arg8[%c2, %c0_17, %c0_18] : memref<18x16x384xbf16, #tpu.memory_space<vmem>>, vector<16x16x384xbf16>
    %28 = vector.shape_cast %27 : vector<16x16x384xbf16> to vector<256x384xbf16>
    %c0_19 = arith.constant 0 : index
    %c0_20 = arith.constant 0 : index
    %c0_21 = arith.constant 0 : index
    %29 = vector.load %arg3[%c0_19, %c0_20, %c0_21] : memref<3x384x128xbf16, #tpu.memory_space<vmem>>, vector<1x384x128xbf16>
    %30 = vector.shape_cast %29 : vector<1x384x128xbf16> to vector<384x128xbf16>
    %c1_22 = arith.constant 1 : index
    %c0_23 = arith.constant 0 : index
    %c0_24 = arith.constant 0 : index
    %31 = vector.load %arg3[%c1_22, %c0_23, %c0_24] : memref<3x384x128xbf16, #tpu.memory_space<vmem>>, vector<1x384x128xbf16>
    %32 = vector.shape_cast %31 : vector<1x384x128xbf16> to vector<384x128xbf16>
    %c2_25 = arith.constant 2 : index
    %c0_26 = arith.constant 0 : index
    %c0_27 = arith.constant 0 : index
    %33 = vector.load %arg3[%c2_25, %c0_26, %c0_27] : memref<3x384x128xbf16, #tpu.memory_space<vmem>>, vector<1x384x128xbf16>
    %34 = vector.shape_cast %33 : vector<1x384x128xbf16> to vector<384x128xbf16>
    %cst_28 = arith.constant dense<0.000000e+00> : vector<256x128xf32>
    %35 = tpu.matmul %24, %30, %cst_28 {dimension_numbers = #tpu.dot_dimension_numbers<[1], [0], [0], [1], [0, 0, 1, 1], [], []>} : vector<256x384xbf16>, vector<384x128xbf16>, vector<256x128xf32> -> vector<256x128xf32>
    %cst_29 = arith.constant dense<0.000000e+00> : vector<256x128xf32>
    %36 = tpu.matmul %26, %32, %cst_29 {dimension_numbers = #tpu.dot_dimension_numbers<[1], [0], [0], [1], [0, 0, 1, 1], [], []>} : vector<256x384xbf16>, vector<384x128xbf16>, vector<256x128xf32> -> vector<256x128xf32>
    %37 = arith.addf %35, %36 : vector<256x128xf32>
    %cst_30 = arith.constant dense<0.000000e+00> : vector<256x128xf32>
    %38 = tpu.matmul %28, %34, %cst_30 {dimension_numbers = #tpu.dot_dimension_numbers<[1], [0], [0], [1], [0, 0, 1, 1], [], []>} : vector<256x384xbf16>, vector<384x128xbf16>, vector<256x128xf32> -> vector<256x128xf32>
    %39 = arith.addf %37, %38 : vector<256x128xf32>
    %40 = vector.shape_cast %39 : vector<256x128xf32> to vector<16x16x128xf32>
    %41 = arith.truncf %40 : vector<16x16x128xf32> to vector<16x16x128xbf16>
    %c0_31 = arith.constant 0 : index
    %c0_32 = arith.constant 0 : index
    %c0_33 = arith.constant 0 : index
    %c0_34 = arith.constant 0 : index
    %42 = vector.load %arg6[%c0_31, %c0_32, %c0_33, %c0_34] : memref<1x16x16x128xbf16, #tpu.memory_space<vmem>>, vector<1x16x16x128xbf16>
    %43 = vector.shape_cast %42 : vector<1x16x16x128xbf16> to vector<16x16x128xbf16>
    %44 = vector.shape_cast %41 : vector<16x16x128xbf16> to vector<1x16x16x128xbf16>
    tpu.vector_store %arg6[%c0_31, %c0_32, %c0_33, %c0_34], %44 {strides = array<i32>} : memref<1x16x16x128xbf16, #tpu.memory_space<vmem>>, vector<1x16x16x128xbf16>,
    %cst_35 = arith.constant dense<0.000000e+00> : vector<128xf32>
    %45 = vector.multi_reduction <add>, %39, %cst_35 [0] : vector<256x128xf32> to vector<128xf32>
    %46 = vector.shape_cast %45 : vector<128xf32> to vector<1x128xf32>
    %47 = arith.mulf %39, %39 : vector<256x128xf32>
    %cst_36 = arith.constant dense<0.000000e+00> : vector<128xf32>
    %48 = vector.multi_reduction <add>, %47, %cst_36 [0] : vector<256x128xf32> to vector<128xf32>
    %49 = vector.shape_cast %48 : vector<128xf32> to vector<1x128xf32>
    %50 = tpu.concatenate %46, %49 in 0 : vector<1x128xf32>, vector<1x128xf32> -> vector<2x128xf32>
    %c0_37 = arith.constant 0 : index
    %c0_38 = arith.constant 0 : index
    %c0_39 = arith.constant 0 : index
    %51 = vector.load %arg7[%c0_37, %c0_38, %c0_39] : memref<1x2x128xf32, #tpu.memory_space<vmem>>, vector<1x2x128xf32>
    %52 = vector.shape_cast %51 : vector<1x2x128xf32> to vector<2x128xf32>
    %53 = vector.shape_cast %50 : vector<2x128xf32> to vector<1x2x128xf32>
    tpu.vector_store %arg7[%c0_37, %c0_38, %c0_39], %53 {strides = array<i32>} : memref<1x2x128xf32, #tpu.memory_space<vmem>>, vector<1x2x128xf32>,
    return
  }
  func.func @transform_0(%arg0: i32, %arg1: i32) -> (i32, i32, i32, i32) {
    %c0_i32 = arith.constant 0 : i32
    %c0_i32_0 = arith.constant 0 : i32
    %c0_i32_1 = arith.constant 0 : i32
    %c0_i32_2 = arith.constant 0 : i32
    return %arg0, %c0_i32, %c0_i32_0, %c0_i32_1 : i32, i32, i32, i32
  }
  func.func @transform_1(%arg0: i32, %arg1: i32) -> (i32, i32, i32) {
    %c0_i32 = arith.constant 0 : i32
    %c0_i32_0 = arith.constant 0 : i32
    %c0_i32_1 = arith.constant 0 : i32
    %c0_i32_2 = arith.constant 0 : i32
    return %c0_i32, %c0_i32_0, %c0_i32_1 : i32, i32, i32
  }
  func.func @transform_2(%arg0: i32, %arg1: i32) -> (i32, i32) {
    %c0_i32 = arith.constant 0 : i32
    %c0_i32_0 = arith.constant 0 : i32
    %c0_i32_1 = arith.constant 0 : i32
    return %c0_i32, %c0_i32_0 : i32, i32
  }
  func.func @transform_3(%arg0: i32, %arg1: i32) -> (i32, i32) {
    %c0_i32 = arith.constant 0 : i32
    %c0_i32_0 = arith.constant 0 : i32
    %c0_i32_1 = arith.constant 0 : i32
    return %c0_i32, %c0_i32_0 : i32, i32
  }
  func.func @transform_4(%arg0: i32, %arg1: i32) -> (i32, i32, i32, i32) {
    %c0_i32 = arith.constant 0 : i32
    %c0_i32_0 = arith.constant 0 : i32
    %c0_i32_1 = arith.constant 0 : i32
    return %arg0, %c0_i32, %c0_i32_0, %arg1 : i32, i32, i32, i32
  }
  func.func @transform_5(%arg0: i32, %arg1: i32) -> (i32, i32, i32) {
    %c0_i32 = arith.constant 0 : i32
    %c0_i32_0 = arith.constant 0 : i32
    return %arg0, %c0_i32, %arg1 : i32, i32, i32
  }
}

module attributes {stable_mosaic.version = 11 : i64} {
  func.func @_scale_shift_relu_kernel(%arg0: i32, %arg1: memref<512x128xbf16, #tpu.memory_space<vmem>>, %arg2: memref<1x128xf32, #tpu.memory_space<vmem>>, %arg3: memref<1x128xf32, #tpu.memory_space<vmem>>, %arg4: memref<512x128xf32, #tpu.memory_space<vmem>>) attributes {dimension_semantics = [#tpu.dimension_semantics<parallel>], iteration_bounds = array<i64: 1>, scalar_prefetch = 0 : i64, scratch_operands = 0 : i64, tpu.core_type = #tpu.core_type<tc>, window_params = [{transform_indices = @transform_0, window_bounds = array<i64: 512, 128>}, {pipeline_mode = #tpu.pipeline_mode<synchronous>, transform_indices = @transform_1, window_bounds = array<i64: 1, 128>}, {pipeline_mode = #tpu.pipeline_mode<synchronous>, transform_indices = @transform_2, window_bounds = array<i64: 1, 128>}, {transform_indices = @transform_3, window_bounds = array<i64: 512, 128>}]} {
    %c0 = arith.constant 0 : index
    %c0_0 = arith.constant 0 : index
    %0 = vector.load %arg1[%c0, %c0_0] : memref<512x128xbf16, #tpu.memory_space<vmem>>, vector<512x128xbf16>
    %1 = arith.extf %0 : vector<512x128xbf16> to vector<512x128xf32>
    %c0_1 = arith.constant 0 : index
    %c0_2 = arith.constant 0 : index
    %2 = vector.load %arg2[%c0_1, %c0_2] : memref<1x128xf32, #tpu.memory_space<vmem>>, vector<1x128xf32>
    %3 = vector.broadcast %2 : vector<1x128xf32> to vector<512x128xf32>
    %4 = arith.mulf %1, %3 : vector<512x128xf32>
    %c0_3 = arith.constant 0 : index
    %c0_4 = arith.constant 0 : index
    %5 = vector.load %arg3[%c0_3, %c0_4] : memref<1x128xf32, #tpu.memory_space<vmem>>, vector<1x128xf32>
    %6 = vector.broadcast %5 : vector<1x128xf32> to vector<512x128xf32>
    %7 = arith.addf %4, %6 : vector<512x128xf32>
    %cst = arith.constant 0.000000e+00 : f32
    %8 = vector.broadcast %cst : f32 to vector<512x128xf32>
    %9 = arith.maximumf %7, %8 : vector<512x128xf32>
    %c0_5 = arith.constant 0 : index
    %c0_6 = arith.constant 0 : index
    %10 = vector.load %arg4[%c0_5, %c0_6] : memref<512x128xf32, #tpu.memory_space<vmem>>, vector<512x128xf32>
    tpu.vector_store %arg4[%c0_5, %c0_6], %9 {strides = array<i32>} : memref<512x128xf32, #tpu.memory_space<vmem>>, vector<512x128xf32>,
    return
  }
  func.func @transform_0(%arg0: i32) -> (i32, i32) {
    %c0_i32 = arith.constant 0 : i32
    %c0_i32_0 = arith.constant 0 : i32
    return %arg0, %c0_i32 : i32, i32
  }
  func.func @transform_1(%arg0: i32) -> (i32, i32) {
    %c0_i32 = arith.constant 0 : i32
    %c0_i32_0 = arith.constant 0 : i32
    %c0_i32_1 = arith.constant 0 : i32
    return %c0_i32, %c0_i32_0 : i32, i32
  }
  func.func @transform_2(%arg0: i32) -> (i32, i32) {
    %c0_i32 = arith.constant 0 : i32
    %c0_i32_0 = arith.constant 0 : i32
    %c0_i32_1 = arith.constant 0 : i32
    return %c0_i32, %c0_i32_0 : i32, i32
  }
  func.func @transform_3(%arg0: i32) -> (i32, i32) {
    %c0_i32 = arith.constant 0 : i32
    %c0_i32_0 = arith.constant 0 : i32
    return %arg0, %c0_i32 : i32, i32
  }
}

</mosaic_0001>

<bundles_post_ra>
// kernel: conv_block2d_forward.5
= control target key start
LH: loop header
LB: loop body
LE: loop exit
PB: predicated region body
PF: predicated region fallthrough
CT: control target
= control target key end

     0   :  { %s1023_s0 = inlined_call_operand.vmem [shape: bf16[512,128], index: 0, kind: input, shape index: {}]   ;;  %s1024_s1 = inlined_call_operand.vmem [shape: f32[1,128], index: 1, kind: input, shape index: {}]   ;;  %s1025_s2 = inlined_call_operand.vmem [shape: f32[1,128], index: 2, kind: input, shape index: {}]   ;;  %s1026_s3 = inlined_call_operand.vmem [shape: f32[512,128], index: 3, kind: output, shape index: {}]  }
   0x1   :  { %v419_v0 = vld [vmem:[%s1023_s0] sm:$0xff]   ;;  %v546_v4 = vld [vmem:[%s1023_s0 + $0x8] sm:$0xff]   ;;  %v547_v5 = vld [vmem:[%s1023_s0 + $0x10] sm:$0xff]  }
   0x2   :  { %v603_v1 = vld [vmem:[%s1024_s1] ss:$0 sm:$0xff]  ;;  %v420_v2 = vunpack.c.l.bf16 %v419_v0  ;;  %v421_v3 = vunpack.c.h.bf16 %v419_v0  ;;  %v548_v6 = vld [vmem:[%s1023_s0 + $0x18] sm:$0xff]   ;;  %v424_v8 = vunpack.c.l.bf16 %v546_v4  ;;  %v425_v9 = vunpack.c.h.bf16 %v546_v4  ;;  %v550_v33 = vld [vmem:[%s1023_s0 + $0x28] sm:$0xff]  }
   0x3   :  { %v617_v7 = vld [vmem:[%s1025_s2] ss:$0 sm:$0xff]  ;;  %v428_v10 = vunpack.c.l.bf16 %v547_v5  ;;  %v429_v11 = vunpack.c.h.bf16 %v547_v5  ;;  %v432_v14 = vunpack.c.l.bf16 %v548_v6  ;;  %v433_v15 = vunpack.c.h.bf16 %v548_v6  ;;  %v551_v34 = vld [vmem:[%s1023_s0 + $0x30] sm:$0xff]   ;;  %v552_v39 = vld [vmem:[%s1023_s0 + $0x38] sm:$0xff]  }
   0x4   :  { %v149_v12 = vmul.f32 %v420_v2, %v603_v1  ;;  %v150_v13 = vmul.f32 %v421_v3, %v603_v1  ;;  %v151_v16 = vmul.f32 %v424_v8, %v603_v1  ;;  %v152_v17 = vmul.f32 %v425_v9, %v603_v1  ;;  %v549_v28 = vld [vmem:[%s1023_s0 + $0x20] sm:$0xff]   ;;  %v554_v6 = vld [vmem:[%s1023_s0 + $0x48] sm:$0xff]   ;;  %v555_v8 = vld [vmem:[%s1023_s0 + $0x50] sm:$0xff]  }
   0x5   :  { %v153_v18 = vmul.f32 %v428_v10, %v603_v1  ;;  %v154_v19 = vmul.f32 %v429_v11, %v603_v1  ;;  %v155_v22 = vmul.f32 %v432_v14, %v603_v1  ;;  %v156_v23 = vmul.f32 %v433_v15, %v603_v1  ;;  %v553_v0 = vld [vmem:[%s1023_s0 + $0x40] sm:$0xff]  }
   0x6   :  { %v220_v20 = vadd.f32 %v617_v7, %v149_v12  ;;  %v221_v21 = vadd.f32 %v617_v7, %v150_v13  ;;  %v222_v24 = vadd.f32 %v617_v7, %v151_v16  ;;  %v223_v25 = vadd.f32 %v617_v7, %v152_v17  ;;  %v556_v13 = vld [vmem:[%s1023_s0 + $0x58] sm:$0xff]  }
   0x7   :  { %v224_v26 = vadd.f32 %v617_v7, %v153_v18  ;;  %v225_v27 = vadd.f32 %v617_v7, %v154_v19  ;;  %v226_v31 = vadd.f32 %v617_v7, %v155_v22  ;;  %v227_v32 = vadd.f32 %v617_v7, %v156_v23 }
   0x8   :  { %v284_v29 = vmax.f32 %v220_v20, 0.0  ;;  %v285_v30 = vmax.f32 %v221_v21, 0.0  ;;  %v286_v35 = vmax.f32 %v222_v24, 0.0  ;;  %v287_v36 = vmax.f32 %v223_v25, 0.0 }
   0x9   :  { %v288_v37 = vmax.f32 %v224_v26, 0.0  ;;  %v289_v38 = vmax.f32 %v225_v27, 0.0  ;;  %v290_v40 = vmax.f32 %v226_v31, 0.0  ;;  %v291_v41 = vmax.f32 %v227_v32, 0.0 }
   0xa   :  { %348 = vst [vmem:[%s1026_s3] sm:$0xff] %v284_v29  ;;  %349 = vst [vmem:[%s1026_s3 + $0x8] sm:$0xff] %v285_v30  ;;  %v436_v42 = vunpack.c.l.bf16 %v549_v28  ;;  %v437_v43 = vunpack.c.h.bf16 %v549_v28  ;;  %v440_v44 = vunpack.c.l.bf16 %v550_v33  ;;  %v441_v45 = vunpack.c.h.bf16 %v550_v33 }
   0xb   :  { %350 = vst [vmem:[%s1026_s3 + $0x10] sm:$0xff] %v286_v35  ;;  %351 = vst [vmem:[%s1026_s3 + $0x18] sm:$0xff] %v287_v36  ;;  %v444_v46 = vunpack.c.l.bf16 %v551_v34  ;;  %v445_v47 = vunpack.c.h.bf16 %v551_v34  ;;  %v448_v50 = vunpack.c.l.bf16 %v552_v39  ;;  %v449_v51 = vunpack.c.h.bf16 %v552_v39 }
   0xc   :  { %352 = vst [vmem:[%s1026_s3 + $0x20] sm:$0xff] %v288_v37  ;;  %353 = vst [vmem:[%s1026_s3 + $0x28] sm:$0xff] %v289_v38  ;;  %v157_v48 = vmul.f32 %v436_v42, %v603_v1  ;;  %v158_v49 = vmul.f32 %v437_v43, %v603_v1  ;;  %v159_v52 = vmul.f32 %v440_v44, %v603_v1  ;;  %v452_v16 = vunpack.c.l.bf16 %v553_v0  ;;  %v557_v38 = vld [vmem:[%s1023_s0 + $0x60] sm:$0xff]   ;;  %v558_v43 = vld [vmem:[%s1023_s0 + $0x68] sm:$0xff]  }
   0xd   :  { %354 = vst [vmem:[%s1026_s3 + $0x30] sm:$0xff] %v290_v40  ;;  %355 = vst [vmem:[%s1026_s3 + $0x38] sm:$0xff] %v291_v41  ;;  %v160_v53 = vmul.f32 %v441_v45, %v603_v1  ;;  %v161_v54 = vmul.f32 %v444_v46, %v603_v1  ;;  %v162_v55 = vmul.f32 %v445_v47, %v603_v1  ;;  %v453_v17 = vunpack.c.h.bf16 %v553_v0  ;;  %v559_v44 = vld [vmem:[%s1023_s0 + $0x70] sm:$0xff]  }
   0xe   :  { %v228_v56 = vadd.f32 %v617_v7, %v157_v48  ;;  %v229_v57 = vadd.f32 %v617_v7, %v158_v49  ;;  %v163_v58 = vmul.f32 %v448_v50, %v603_v1  ;;  %v164_v59 = vmul.f32 %v449_v51, %v603_v1  ;;  %v560_v49 = vld [vmem:[%s1023_s0 + $0x78] sm:$0xff]  }
   0xf   :  { %v230_v60 = vadd.f32 %v617_v7, %v159_v52  ;;  %v231_v61 = vadd.f32 %v617_v7, %v160_v53  ;;  %v232_v62 = vadd.f32 %v617_v7, %v161_v54  ;;  %v233_v63 = vadd.f32 %v617_v7, %v162_v55 }
  0x10   :  { %v292_v2 = vmax.f32 %v228_v56, 0.0  ;;  %v293_v3 = vmax.f32 %v229_v57, 0.0  ;;  %v234_v4 = vadd.f32 %v617_v7, %v163_v58  ;;  %v235_v5 = vadd.f32 %v617_v7, %v164_v59 }
  0x11   :  { %v294_v9 = vmax.f32 %v230_v60, 0.0  ;;  %v295_v10 = vmax.f32 %v231_v61, 0.0  ;;  %v296_v11 = vmax.f32 %v232_v62, 0.0  ;;  %v297_v12 = vmax.f32 %v233_v63, 0.0 }
  0x12   :  { %356 = vst [vmem:[%s1026_s3 + $0x40] sm:$0xff] %v292_v2  ;;  %357 = vst [vmem:[%s1026_s3 + $0x48] sm:$0xff] %v293_v3  ;;  %v298_v14 = vmax.f32 %v234_v4, 0.0  ;;  %v299_v15 = vmax.f32 %v235_v5, 0.0  ;;  %v456_v18 = vunpack.c.l.bf16 %v554_v6  ;;  %v457_v19 = vunpack.c.h.bf16 %v554_v6 }
  0x13   :  { %358 = vst [vmem:[%s1026_s3 + $0x50] sm:$0xff] %v294_v9  ;;  %359 = vst [vmem:[%s1026_s3 + $0x58] sm:$0xff] %v295_v10  ;;  %v460_v20 = vunpack.c.l.bf16 %v555_v8  ;;  %v461_v21 = vunpack.c.h.bf16 %v555_v8  ;;  %v165_v22 = vmul.f32 %v452_v16, %v603_v1  ;;  %v166_v23 = vmul.f32 %v453_v17, %v603_v1  ;;  %v562_v17 = vld [vmem:[%s1023_s0 + $0x88] sm:$0xff]  }
  0x14   :  { %360 = vst [vmem:[%s1026_s3 + $0x60] sm:$0xff] %v296_v11  ;;  %361 = vst [vmem:[%s1026_s3 + $0x68] sm:$0xff] %v297_v12  ;;  %v464_v24 = vunpack.c.l.bf16 %v556_v13  ;;  %v465_v25 = vunpack.c.h.bf16 %v556_v13  ;;  %v167_v26 = vmul.f32 %v456_v18, %v603_v1  ;;  %v168_v27 = vmul.f32 %v457_v19, %v603_v1  ;;  %v561_v12 = vld [vmem:[%s1023_s0 + $0x80] sm:$0xff]   ;;  %v563_v18 = vld [vmem:[%s1023_s0 + $0x90] sm:$0xff]  }
  0x15   :  { %362 = vst [vmem:[%s1026_s3 + $0x70] sm:$0xff] %v298_v14  ;;  %363 = vst [vmem:[%s1026_s3 + $0x78] sm:$0xff] %v299_v15  ;;  %v169_v28 = vmul.f32 %v460_v20, %v603_v1  ;;  %v170_v29 = vmul.f32 %v461_v21, %v603_v1  ;;  %v236_v30 = vadd.f32 %v617_v7, %v165_v22  ;;  %v468_v52 = vunpack.c.l.bf16 %v557_v38 }
  0x16   :  { %v237_v31 = vadd.f32 %v617_v7, %v166_v23  ;;  %v171_v32 = vmul.f32 %v464_v24, %v603_v1  ;;  %v172_v33 = vmul.f32 %v465_v25, %v603_v1  ;;  %v238_v34 = vadd.f32 %v617_v7, %v167_v26  ;;  %v564_v23 = vld [vmem:[%s1023_s0 + $0x98] sm:$0xff]  }
  0x17   :  { %v239_v35 = vadd.f32 %v617_v7, %v168_v27  ;;  %v240_v36 = vadd.f32 %v617_v7, %v169_v28  ;;  %v241_v37 = vadd.f32 %v617_v7, %v170_v29  ;;  %v300_v39 = vmax.f32 %v236_v30, 0.0 }
  0x18   :  { %v301_v40 = vmax.f32 %v237_v31, 0.0  ;;  %v242_v41 = vadd.f32 %v617_v7, %v171_v32  ;;  %v243_v42 = vadd.f32 %v617_v7, %v172_v33  ;;  %v302_v45 = vmax.f32 %v238_v34, 0.0 }
  0x19   :  { %v303_v46 = vmax.f32 %v239_v35, 0.0  ;;  %v304_v47 = vmax.f32 %v240_v36, 0.0  ;;  %v305_v48 = vmax.f32 %v241_v37, 0.0  ;;  %364 = vst [vmem:[%s1026_s3 + $0x80] sm:$0xff] %v300_v39  ;;  %v469_v53 = vunpack.c.h.bf16 %v557_v38 }
  0x1a   :  { %365 = vst [vmem:[%s1026_s3 + $0x88] sm:$0xff] %v301_v40  ;;  %v306_v50 = vmax.f32 %v242_v41, 0.0  ;;  %v307_v51 = vmax.f32 %v243_v42, 0.0  ;;  %366 = vst [vmem:[%s1026_s3 + $0x90] sm:$0xff] %v302_v45  ;;  %v472_v54 = vunpack.c.l.bf16 %v558_v43  ;;  %v473_v55 = vunpack.c.h.bf16 %v558_v43 }
  0x1b   :  { %367 = vst [vmem:[%s1026_s3 + $0x98] sm:$0xff] %v303_v46  ;;  %368 = vst [vmem:[%s1026_s3 + $0xa0] sm:$0xff] %v304_v47  ;;  %v476_v56 = vunpack.c.l.bf16 %v559_v44  ;;  %v477_v57 = vunpack.c.h.bf16 %v559_v44  ;;  %v173_v58 = vmul.f32 %v468_v52, %v603_v1  ;;  %v174_v59 = vmul.f32 %v469_v53, %v603_v1  ;;  %v566_v53 = vld [vmem:[%s1023_s0 + $0xa8] sm:$0xff]  }
  0x1c   :  { %369 = vst [vmem:[%s1026_s3 + $0xa8] sm:$0xff] %v305_v48  ;;  %370 = vst [vmem:[%s1026_s3 + $0xb0] sm:$0xff] %v306_v50  ;;  %v480_v60 = vunpack.c.l.bf16 %v560_v49  ;;  %v481_v61 = vunpack.c.h.bf16 %v560_v49  ;;  %v175_v62 = vmul.f32 %v472_v54, %v603_v1  ;;  %v176_v63 = vmul.f32 %v473_v55, %v603_v1  ;;  %v565_v48 = vld [vmem:[%s1023_s0 + $0xa0] sm:$0xff]   ;;  %v567_v54 = vld [vmem:[%s1023_s0 + $0xb0] sm:$0xff]  }
  0x1d   :  { %371 = vst [vmem:[%s1026_s3 + $0xb8] sm:$0xff] %v307_v51  ;;  %v177_v0 = vmul.f32 %v476_v56, %v603_v1  ;;  %v178_v2 = vmul.f32 %v477_v57, %v603_v1  ;;  %v244_v3 = vadd.f32 %v617_v7, %v173_v58  ;;  %v245_v4 = vadd.f32 %v617_v7, %v174_v59  ;;  %v568_v59 = vld [vmem:[%s1023_s0 + $0xb8] sm:$0xff]  }
  0x1e   :  { %v179_v5 = vmul.f32 %v480_v60, %v603_v1  ;;  %v180_v6 = vmul.f32 %v481_v61, %v603_v1  ;;  %v246_v8 = vadd.f32 %v617_v7, %v175_v62  ;;  %v247_v9 = vadd.f32 %v617_v7, %v176_v63 }
  0x1f   :  { %v248_v10 = vadd.f32 %v617_v7, %v177_v0  ;;  %v249_v11 = vadd.f32 %v617_v7, %v178_v2  ;;  %v308_v13 = vmax.f32 %v244_v3, 0.0  ;;  %v309_v14 = vmax.f32 %v245_v4, 0.0 }
  0x20   :  { %v250_v15 = vadd.f32 %v617_v7, %v179_v5  ;;  %v251_v16 = vadd.f32 %v617_v7, %v180_v6  ;;  %v310_v19 = vmax.f32 %v246_v8, 0.0  ;;  %v311_v20 = vmax.f32 %v247_v9, 0.0 }
  0x21   :  { %v312_v21 = vmax.f32 %v248_v10, 0.0  ;;  %v313_v22 = vmax.f32 %v249_v11, 0.0  ;;  %372 = vst [vmem:[%s1026_s3 + $0xc0] sm:$0xff] %v308_v13  ;;  %373 = vst [vmem:[%s1026_s3 + $0xc8] sm:$0xff] %v309_v14  ;;  %v484_v26 = vunpack.c.l.bf16 %v561_v12  ;;  %v485_v27 = vunpack.c.h.bf16 %v561_v12 }
  0x22   :  { %v314_v24 = vmax.f32 %v250_v15, 0.0  ;;  %v315_v25 = vmax.f32 %v251_v16, 0.0  ;;  %374 = vst [vmem:[%s1026_s3 + $0xd0] sm:$0xff] %v310_v19  ;;  %375 = vst [vmem:[%s1026_s3 + $0xd8] sm:$0xff] %v311_v20  ;;  %v488_v28 = vunpack.c.l.bf16 %v562_v17  ;;  %v489_v29 = vunpack.c.h.bf16 %v562_v17 }
  0x23   :  { %376 = vst [vmem:[%s1026_s3 + $0xe0] sm:$0xff] %v312_v21  ;;  %377 = vst [vmem:[%s1026_s3 + $0xe8] sm:$0xff] %v313_v22  ;;  %v492_v30 = vunpack.c.l.bf16 %v563_v18  ;;  %v493_v31 = vunpack.c.h.bf16 %v563_v18  ;;  %v181_v32 = vmul.f32 %v484_v26, %v603_v1  ;;  %v182_v33 = vmul.f32 %v485_v27, %v603_v1  ;;  %v569_v22 = vld [vmem:[%s1023_s0 + $0xc0] sm:$0xff]   ;;  %v570_v27 = vld [vmem:[%s1023_s0 + $0xc8] sm:$0xff]  }
  0x24   :  { %378 = vst [vmem:[%s1026_s3 + $0xf0] sm:$0xff] %v314_v24  ;;  %379 = vst [vmem:[%s1026_s3 + $0xf8] sm:$0xff] %v315_v25  ;;  %v496_v34 = vunpack.c.l.bf16 %v564_v23  ;;  %v497_v35 = vunpack.c.h.bf16 %v564_v23  ;;  %v183_v36 = vmul.f32 %v488_v28, %v603_v1  ;;  %v184_v37 = vmul.f32 %v489_v29, %v603_v1  ;;  %v571_v28 = vld [vmem:[%s1023_s0 + $0xd0] sm:$0xff]  }
  0x25   :  { %v185_v38 = vmul.f32 %v492_v30, %v603_v1  ;;  %v186_v39 = vmul.f32 %v493_v31, %v603_v1  ;;  %v252_v40 = vadd.f32 %v617_v7, %v181_v32  ;;  %v253_v41 = vadd.f32 %v617_v7, %v182_v33  ;;  %v572_v33 = vld [vmem:[%s1023_s0 + $0xd8] sm:$0xff]  }
  0x26   :  { %v187_v42 = vmul.f32 %v496_v34, %v603_v1  ;;  %v188_v43 = vmul.f32 %v497_v35, %v603_v1  ;;  %v254_v44 = vadd.f32 %v617_v7, %v183_v36  ;;  %v255_v45 = vadd.f32 %v617_v7, %v184_v37 }
  0x27   :  { %v256_v46 = vadd.f32 %v617_v7, %v185_v38  ;;  %v257_v47 = vadd.f32 %v617_v7, %v186_v39  ;;  %v316_v49 = vmax.f32 %v252_v40, 0.0  ;;  %v317_v50 = vmax.f32 %v253_v41, 0.0 }
  0x28   :  { %v258_v51 = vadd.f32 %v617_v7, %v187_v42  ;;  %v259_v52 = vadd.f32 %v617_v7, %v188_v43  ;;  %v318_v55 = vmax.f32 %v254_v44, 0.0  ;;  %v319_v56 = vmax.f32 %v255_v45, 0.0 }
  0x29   :  { %v320_v57 = vmax.f32 %v256_v46, 0.0  ;;  %v321_v58 = vmax.f32 %v257_v47, 0.0  ;;  %380 = vst [vmem:[%s1026_s3 + $0x100] sm:$0xff] %v316_v49  ;;  %381 = vst [vmem:[%s1026_s3 + $0x108] sm:$0xff] %v317_v50  ;;  %v500_v62 = vunpack.c.l.bf16 %v565_v48  ;;  %v501_v63 = vunpack.c.h.bf16 %v565_v48 }
  0x2a   :  { %v322_v60 = vmax.f32 %v258_v51, 0.0  ;;  %v323_v61 = vmax.f32 %v259_v52, 0.0  ;;  %382 = vst [vmem:[%s1026_s3 + $0x110] sm:$0xff] %v318_v55  ;;  %383 = vst [vmem:[%s1026_s3 + $0x118] sm:$0xff] %v319_v56  ;;  %v504_v0 = vunpack.c.l.bf16 %v566_v53  ;;  %v505_v2 = vunpack.c.h.bf16 %v566_v53 }
  0x2b   :  { %384 = vst [vmem:[%s1026_s3 + $0x120] sm:$0xff] %v320_v57  ;;  %385 = vst [vmem:[%s1026_s3 + $0x128] sm:$0xff] %v321_v58  ;;  %v508_v3 = vunpack.c.l.bf16 %v567_v54  ;;  %v509_v4 = vunpack.c.h.bf16 %v567_v54  ;;  %v189_v5 = vmul.f32 %v500_v62, %v603_v1  ;;  %v190_v6 = vmul.f32 %v501_v63, %v603_v1  ;;  %v573_v58 = vld [vmem:[%s1023_s0 + $0xe0] sm:$0xff]   ;;  %v574_v63 = vld [vmem:[%s1023_s0 + $0xe8] sm:$0xff]  }
  0x2c   :  { %386 = vst [vmem:[%s1026_s3 + $0x130] sm:$0xff] %v322_v60  ;;  %387 = vst [vmem:[%s1026_s3 + $0x138] sm:$0xff] %v323_v61  ;;  %v512_v8 = vunpack.c.l.bf16 %v568_v59  ;;  %v513_v9 = vunpack.c.h.bf16 %v568_v59  ;;  %v191_v10 = vmul.f32 %v504_v0, %v603_v1  ;;  %v192_v11 = vmul.f32 %v505_v2, %v603_v1  ;;  %v575_v0 = vld [vmem:[%s1023_s0 + $0xf0] sm:$0xff]  }
  0x2d   :  { %v193_v12 = vmul.f32 %v508_v3, %v603_v1  ;;  %v194_v13 = vmul.f32 %v509_v4, %v603_v1  ;;  %v260_v14 = vadd.f32 %v617_v7, %v189_v5  ;;  %v261_v15 = vadd.f32 %v617_v7, %v190_v6  ;;  %v576_v6 = vld [vmem:[%s1023_s0 + $0xf8] sm:$0xff]  }
  0x2e   :  { %v195_v16 = vmul.f32 %v512_v8, %v603_v1  ;;  %v196_v17 = vmul.f32 %v513_v9, %v603_v1  ;;  %v262_v18 = vadd.f32 %v617_v7, %v191_v10  ;;  %v263_v19 = vadd.f32 %v617_v7, %v192_v11 }
  0x2f   :  { %v264_v20 = vadd.f32 %v617_v7, %v193_v12  ;;  %v265_v21 = vadd.f32 %v617_v7, %v194_v13  ;;  %v324_v23 = vmax.f32 %v260_v14, 0.0  ;;  %v325_v24 = vmax.f32 %v261_v15, 0.0 }
  0x30   :  { %v266_v25 = vadd.f32 %v617_v7, %v195_v16  ;;  %v267_v26 = vadd.f32 %v617_v7, %v196_v17  ;;  %v326_v29 = vmax.f32 %v262_v18, 0.0  ;;  %v327_v30 = vmax.f32 %v263_v19, 0.0 }
  0x31   :  { %v328_v31 = vmax.f32 %v264_v20, 0.0  ;;  %v329_v32 = vmax.f32 %v265_v21, 0.0  ;;  %388 = vst [vmem:[%s1026_s3 + $0x140] sm:$0xff] %v324_v23  ;;  %389 = vst [vmem:[%s1026_s3 + $0x148] sm:$0xff] %v325_v24  ;;  %v516_v36 = vunpack.c.l.bf16 %v569_v22  ;;  %v517_v37 = vunpack.c.h.bf16 %v569_v22 }
  0x32   :  { %v330_v34 = vmax.f32 %v266_v25, 0.0  ;;  %v331_v35 = vmax.f32 %v267_v26, 0.0  ;;  %390 = vst [vmem:[%s1026_s3 + $0x150] sm:$0xff] %v326_v29  ;;  %391 = vst [vmem:[%s1026_s3 + $0x158] sm:$0xff] %v327_v30  ;;  %v520_v38 = vunpack.c.l.bf16 %v570_v27  ;;  %v521_v39 = vunpack.c.h.bf16 %v570_v27 }
  0x33   :  { %392 = vst [vmem:[%s1026_s3 + $0x160] sm:$0xff] %v328_v31  ;;  %393 = vst [vmem:[%s1026_s3 + $0x168] sm:$0xff] %v329_v32  ;;  %v524_v40 = vunpack.c.l.bf16 %v571_v28  ;;  %v525_v41 = vunpack.c.h.bf16 %v571_v28  ;;  %v197_v42 = vmul.f32 %v516_v36, %v603_v1  ;;  %v198_v43 = vmul.f32 %v517_v37, %v603_v1 }
  0x34   :  { %394 = vst [vmem:[%s1026_s3 + $0x170] sm:$0xff] %v330_v34  ;;  %395 = vst [vmem:[%s1026_s3 + $0x178] sm:$0xff] %v331_v35  ;;  %v528_v44 = vunpack.c.l.bf16 %v572_v33  ;;  %v529_v45 = vunpack.c.h.bf16 %v572_v33  ;;  %v199_v46 = vmul.f32 %v520_v38, %v603_v1  ;;  %v200_v47 = vmul.f32 %v521_v39, %v603_v1 }
  0x35   :  { %v201_v48 = vmul.f32 %v524_v40, %v603_v1  ;;  %v202_v49 = vmul.f32 %v525_v41, %v603_v1  ;;  %v268_v50 = vadd.f32 %v617_v7, %v197_v42  ;;  %v269_v51 = vadd.f32 %v617_v7, %v198_v43 }
  0x36   :  { %v203_v52 = vmul.f32 %v528_v44, %v603_v1  ;;  %v204_v53 = vmul.f32 %v529_v45, %v603_v1  ;;  %v270_v54 = vadd.f32 %v617_v7, %v199_v46  ;;  %v271_v55 = vadd.f32 %v617_v7, %v200_v47 }
  0x37   :  { %v272_v56 = vadd.f32 %v617_v7, %v201_v48  ;;  %v273_v57 = vadd.f32 %v617_v7, %v202_v49  ;;  %v332_v59 = vmax.f32 %v268_v50, 0.0  ;;  %v333_v60 = vmax.f32 %v269_v51, 0.0 }
  0x38   :  { %v274_v61 = vadd.f32 %v617_v7, %v203_v52  ;;  %v275_v62 = vadd.f32 %v617_v7, %v204_v53  ;;  %v334_v2 = vmax.f32 %v270_v54, 0.0  ;;  %v335_v3 = vmax.f32 %v271_v55, 0.0 }
  0x39   :  { %v336_v4 = vmax.f32 %v272_v56, 0.0  ;;  %v337_v5 = vmax.f32 %v273_v57, 0.0  ;;  %396 = vst [vmem:[%s1026_s3 + $0x180] sm:$0xff] %v332_v59  ;;  %397 = vst [vmem:[%s1026_s3 + $0x188] sm:$0xff] %v333_v60  ;;  %v532_v10 = vunpack.c.l.bf16 %v573_v58  ;;  %v533_v11 = vunpack.c.h.bf16 %v573_v58 }
  0x3a   :  { %v338_v8 = vmax.f32 %v274_v61, 0.0  ;;  %v339_v9 = vmax.f32 %v275_v62, 0.0  ;;  %398 = vst [vmem:[%s1026_s3 + $0x190] sm:$0xff] %v334_v2  ;;  %399 = vst [vmem:[%s1026_s3 + $0x198] sm:$0xff] %v335_v3  ;;  %v536_v12 = vunpack.c.l.bf16 %v574_v63  ;;  %v537_v13 = vunpack.c.h.bf16 %v574_v63 }
  0x3b   :  { %400 = vst [vmem:[%s1026_s3 + $0x1a0] sm:$0xff] %v336_v4  ;;  %401 = vst [vmem:[%s1026_s3 + $0x1a8] sm:$0xff] %v337_v5  ;;  %v540_v14 = vunpack.c.l.bf16 %v575_v0  ;;  %v541_v15 = vunpack.c.h.bf16 %v575_v0  ;;  %v205_v16 = vmul.f32 %v532_v10, %v603_v1  ;;  %v206_v17 = vmul.f32 %v533_v11, %v603_v1 }
  0x3c   :  { %402 = vst [vmem:[%s1026_s3 + $0x1b0] sm:$0xff] %v338_v8  ;;  %403 = vst [vmem:[%s1026_s3 + $0x1b8] sm:$0xff] %v339_v9  ;;  %v544_v18 = vunpack.c.l.bf16 %v576_v6  ;;  %v545_v19 = vunpack.c.h.bf16 %v576_v6  ;;  %v207_v20 = vmul.f32 %v536_v12, %v603_v1  ;;  %v208_v21 = vmul.f32 %v537_v13, %v603_v1 }
  0x3d   :  { %v209_v22 = vmul.f32 %v540_v14, %v603_v1  ;;  %v210_v23 = vmul.f32 %v541_v15, %v603_v1  ;;  %v276_v24 = vadd.f32 %v617_v7, %v205_v16  ;;  %v277_v25 = vadd.f32 %v617_v7, %v206_v17 }
  0x3e   :  { %v211_v26 = vmul.f32 %v544_v18, %v603_v1  ;;  %v212_v27 = vmul.f32 %v545_v19, %v603_v1  ;;  %v278_v28 = vadd.f32 %v617_v7, %v207_v20  ;;  %v279_v29 = vadd.f32 %v617_v7, %v208_v21 }
  0x3f   :  { %v280_v30 = vadd.f32 %v617_v7, %v209_v22  ;;  %v281_v31 = vadd.f32 %v617_v7, %v210_v23  ;;  %v340_v32 = vmax.f32 %v276_v24, 0.0  ;;  %v341_v33 = vmax.f32 %v277_v25, 0.0 }
  0x40   :  { %v282_v34 = vadd.f32 %v617_v7, %v211_v26  ;;  %v283_v35 = vadd.f32 %v617_v7, %v212_v27  ;;  %v342_v36 = vmax.f32 %v278_v28, 0.0  ;;  %v343_v37 = vmax.f32 %v279_v29, 0.0 }
  0x41   :  { %v344_v38 = vmax.f32 %v280_v30, 0.0  ;;  %v345_v39 = vmax.f32 %v281_v31, 0.0  ;;  %404 = vst [vmem:[%s1026_s3 + $0x1c0] sm:$0xff] %v340_v32  ;;  %405 = vst [vmem:[%s1026_s3 + $0x1c8] sm:$0xff] %v341_v33 }
  0x42   :  { %v346_v1 = vmax.f32 %v282_v34, 0.0  ;;  %v347_v40 = vmax.f32 %v283_v35, 0.0  ;;  %406 = vst [vmem:[%s1026_s3 + $0x1d0] sm:$0xff] %v342_v36  ;;  %407 = vst [vmem:[%s1026_s3 + $0x1d8] sm:$0xff] %v343_v37 }
  0x43   :  { %408 = vst [vmem:[%s1026_s3 + $0x1e0] sm:$0xff] %v344_v38  ;;  %409 = vst [vmem:[%s1026_s3 + $0x1e8] sm:$0xff] %v345_v39 }
  0x44   :  { %410 = vst [vmem:[%s1026_s3 + $0x1f0] sm:$0xff] %v346_v1  ;;  %411 = vst [vmem:[%s1026_s3 + $0x1f8] sm:$0xff] %v347_v40 }

// kernel: conv_block2d_forward.4
= control target key start
LH: loop header
LB: loop body
LE: loop exit
PB: predicated region body
PF: predicated region fallthrough
CT: control target
= control target key end

     0   :  { %s5392_s18 = smov 0   ;;  %s5394_s19 = smov 0   ;;  %s6582_s0 = inlined_call_operand.vmem [shape: bf16[2,16,16,128], index: 0, kind: input, shape index: {}]   ;;  %s6583_s1 = inlined_call_operand.vmem [shape: bf16[3,384,128], index: 1, kind: input, shape index: {}]   ;;  %s6584_s2 = inlined_call_operand.vmem [shape: f32[1,128], index: 2, kind: input, shape index: {}]   ;;  %s6585_s3 = inlined_call_operand.vmem [shape: f32[1,128], index: 3, kind: input, shape index: {}]   ;;  %s6586_s4 = inlined_call_operand.vmem [shape: bf16[2,16,16,128], index: 4, kind: output, shape index: {0}]   ;;  %s6587_s5 = inlined_call_operand.vmem [shape: f32[2,2,128], index: 5, kind: output, shape index: {1}]  }
   0x1   :  { %s5396_s20 = smov 0  }
   0x2 LB: > { %s28_s21 = sadd.s32 1, %s5355_s19  ;;  %p3949_p0 = scmp.ge.s32.totalorder %s5359_s20, 1  ;;  %s5359_s20 = sphi %s5396_s20, %s16_s20   ;;  %s5355_s19 = sphi %s5394_s19, %s6643_s19   ;;  %s5351_s18 = sphi %s5392_s18, %s6642_s18  }
   0x3   : > { %p30_p1 = scmp.ge.s32.totalorder %s28_s21, 2  ;;  %p206_p2 = scmp.lt.s32.totalorder %s5359_s20, 3 }
   0x5   : > { %s6645_s21 = smov (%p30_p1, %s28_s21), 0  ;;  %p207_p3 = pnand %p3949_p0, %p206_p2 }
   0x7   : > { %210 = sbr.rel (%p207_p3) target bundleno = 553 (0x229), region = 36 }
   0xc   : > { %v5170_v0 = vld [vmem:[%s6583_s1 + $0x138] sm:$0xff]   ;;  %v5172_v2 = vld [vmem:[%s6583_s1 + $0x130] sm:$0xff]   ;;  %p244_p4 = scmp.lt.s32.totalorder %s5351_s18, 1  ;;  %v5174_v4 = vld [vmem:[%s6583_s1 + $0x128] sm:$0xff]   ;;  %v5361_v5 = vmov 0   ;;  %vm583_vm0 = vcmask 1040384  }
   0xd   : > { %v5171_v1 = vld [vmem:[%s6583_s1 + $0xf8] sm:$0xff]   ;;  %5129 = vmatprep.subr.bf16.mxu1 %v5170_v0  ;;  %4577 = vmatprep.subr.bf16.mxu0 %v5170_v0  ;;  %v5173_v3 = vld [vmem:[%s6583_s1 + $0xf0] sm:$0xff]   ;;  %v3957_v6 = vcombine.low %v5361_v5, %v5361_v5  ;;  %v3958_v7 = vcombine.high %v5361_v5, %v5361_v5  ;;  %v5175_v8 = vld [vmem:[%s6583_s1 + $0xe8] sm:$0xff]   ;;  %vm584_vm1 = vsmask.f32 256  ;;  %vm650_vm3 = vcmask 1047552  }
   0xe   : > { %5137 = vmatpush3.bf16.msra.mxu1 %v5171_v1  ;;  %4578 = vmatpush3.bf16.msra.mxu0 %v5171_v1  ;;  %s6647_s18 = smov (!%p244_p4, %s5351_s18), 1  ;;  %v5176_v9 = vld [vmem:[%s6583_s1 + $0x120] sm:$0xff]   ;;  %v5178_v11 = vld [vmem:[%s6583_s1 + $0x118] sm:$0xff]   ;;  %v5180_v13 = vld [vmem:[%s6583_s1 + $0x110] sm:$0xff]   ;;  %vm651_vm4 = vsmask.f32 7424 }
   0xf   : > { %5130 = vmatprep.subr.bf16.mxu1 %v5172_v2  ;;  %4579 = vmatprep.subr.bf16.mxu0 %v5172_v2  ;;  %949 = vst [vmem:[#allocation2 + $0x8] sm:$0xf] %v3957_v6  ;;  %951 = vst [vmem:[#allocation2 + $0x14] sm:$0xf] %v3958_v7  ;;  %s4369_s11 = sshll.u32 %s6647_s18, 7  ;;  %v5177_v10 = vld [vmem:[%s6583_s1 + $0xe0] sm:$0xff]  }
  0x10   : > { %1016 = vst [vmem:[#allocation2 + $0x198] sm:$0xff] %v3957_v6  ;;  %1017 = vst [vmem:[#allocation2 + $0x1a0] sm:$0xf] %v3957_v6  ;;  %s5449_s22 = scalar_lea.vmem %s6582_s0, %s4369_s11  ;;  %v5179_v12 = vld [vmem:[%s6583_s1 + $0xd8] sm:$0xff]   ;;  %v5461_v15 = vld [vmem:[%s6584_s2] ss:$0 sm:$0xff]  ;;  %s6429_s17 = scalar_lea.vmem %s6586_s4, %s4369_s11 }
  0x11   : > { %1018 = vst [vmem:[#allocation2 + $0x1a4] sm:$0xff] %v3958_v7  ;;  %1019 = vst [vmem:[#allocation2 + $0x1ac] sm:$0xf] %v3958_v7  ;;  %v4404_v14 = vld [vmem:[%s5449_s22] sm:$0xff]   ;;  %v5181_v22 = vld [vmem:[%s6583_s1 + $0xd0] sm:$0xff]   ;;  %s3954_s11 = sshll.u32 %s6647_s18, 1 }
  0x12   : > { %5138 = vmatpush3.bf16.msra.mxu1 %v5173_v3  ;;  %4580 = vmatpush3.bf16.msra.mxu0 %v5173_v3  ;;  %v4405_v16 = vunpack.c.l.bf16 %v4404_v14  ;;  %v4406_v17 = vunpack.c.h.bf16 %v4404_v14  ;;  %v4558_v18 = vld [vmem:[%s5449_s22 + $0x60] sm:$0xff]   ;;  %v5182_v25 = vld [vmem:[%s6583_s1 + $0x108] sm:$0xff]   ;;  %v4548_v48 = vld [vmem:[%s5449_s22 + $0x10] sm:$0xff]   ;;  %s263_s25 = scalar_lea.vmem %s6587_s5, %s3954_s11 }
  0x13   : > { %5131 = vmatprep.subr.bf16.mxu1 %v5174_v4  ;;  %4581 = vmatprep.subr.bf16.mxu0 %v5174_v4  ;;  %v5467_v19 = vld [vmem:[%s6585_s3] ss:$0 sm:$0xff]  ;;  %v4453_v20 = vunpack.c.l.bf16 %v4558_v18  ;;  %v4454_v21 = vunpack.c.h.bf16 %v4558_v18  ;;  %v4547_v28 = vld [vmem:[%s5449_s22 + $0x8] sm:$0xff]   ;;  %v4413_v52 = vunpack.c.l.bf16 %v4548_v48  ;;  %v4414_v57 = vunpack.c.h.bf16 %v4548_v48  ;;  %v5512_v60 = vld [vmem:[%s6583_s1 + $0x178] sm:$0xff]  }
  0x14   : > { %v336_v23 = vmul.f32 %v4405_v16, %v5461_v15  ;;  %v337_v24 = vmul.f32 %v4406_v17, %v5461_v15  ;;  %v4409_v31 = vunpack.c.l.bf16 %v4547_v28  ;;  %v4410_v32 = vunpack.c.h.bf16 %v4547_v28  ;;  %v4559_v33 = vld [vmem:[%s5449_s22 + $0x68] sm:$0xff]   ;;  %v5184_v43 = vld [vmem:[%s6583_s1 + $0x100] sm:$0xff]   ;;  %v5517_v61 = vld [vmem:[%s6583_s1 + $0xb8] sm:$0xff]  }
  0x15   : > { %v360_v26 = vmul.f32 %v4453_v20, %v5461_v15  ;;  %v361_v27 = vmul.f32 %v4454_v21, %v5461_v15  ;;  %v4457_v36 = vunpack.c.l.bf16 %v4559_v33  ;;  %v4458_v37 = vunpack.c.h.bf16 %v4559_v33  ;;  %v5183_v38 = vld [vmem:[%s6583_s1 + $0xc8] sm:$0xff]   ;;  %v5185_v53 = vld [vmem:[%s6583_s1 + $0xc0] sm:$0xff]   ;;  %vm5530_vm2 = vmand %vm583_vm0, %vm584_vm1 }
  0x16   : > { %5139 = vmatpush3.bf16.msra.mxu1 %v5175_v8  ;;  %4582 = vmatpush3.bf16.msra.mxu0 %v5175_v8  ;;  %v375_v29 = vadd.f32 %v5467_v19, %v336_v23  ;;  %v376_v30 = vadd.f32 %v5467_v19, %v337_v24  ;;  %v338_v41 = vmul.f32 %v4409_v31, %v5461_v15  ;;  %v4561_v48 = vld [vmem:[%s5449_s22 + $0x78] sm:$0xff]   ;;  %vm5629_vm5 = vmand %vm650_vm3, %vm651_vm4 }
  0x17   : > { %5132 = vmatprep.subr.bf16.mxu1 %v5176_v9  ;;  %4583 = vmatprep.subr.bf16.mxu0 %v5176_v9  ;;  %v399_v34 = vadd.f32 %v5467_v19, %v360_v26  ;;  %v400_v35 = vadd.f32 %v5467_v19, %v361_v27  ;;  %v339_v42 = vmul.f32 %v4410_v32, %v5461_v15  ;;  %v4560_v32 = vld [vmem:[%s5449_s22 + $0x70] sm:$0xff]  }
  0x18   : > { %v407_v39 = vmax.f32 %v375_v29, 0.0  ;;  %v408_v40 = vmax.f32 %v376_v30, 0.0  ;;  %v362_v46 = vmul.f32 %v4457_v36, %v5461_v15  ;;  %v363_v47 = vmul.f32 %v4458_v37, %v5461_v15  ;;  %v5188_v37 = vld [vmem:[%s6583_s1 + $0x170] sm:$0xff]  }
  0x19   : > { %v431_v44 = vmax.f32 %v399_v34, 0.0  ;;  %v432_v45 = vmax.f32 %v400_v35, 0.0  ;;  %v377_v50 = vadd.f32 %v5467_v19, %v338_v41  ;;  %v378_v51 = vadd.f32 %v5467_v19, %v339_v42  ;;  %v5191_v41 = vld [vmem:[%s6583_s1 + $0xb0] sm:$0xff]  }
  0x1a   : > { %5140 = vmatpush3.bf16.msra.mxu1 %v5177_v10  ;;  %4584 = vmatpush3.bf16.msra.mxu0 %v5177_v10  ;;  %v5496_v49 = vpack.c.bf16 %v408_v40, %v407_v39  ;;  %v401_v55 = vadd.f32 %v5467_v19, %v362_v46  ;;  %v402_v56 = vadd.f32 %v5467_v19, %v363_v47  ;;  %v4461_v42 = vunpack.c.l.bf16 %v4560_v32  ;;  %v4549_v47 = vld [vmem:[%s5449_s22 + $0x18] sm:$0xff]  }
  0x1b   : > { %5133 = vmatprep.subr.bf16.mxu1 %v5178_v11  ;;  %4585 = vmatprep.subr.bf16.mxu0 %v5178_v11  ;;  %v5503_v54 = vpack.c.bf16 %v432_v45, %v431_v44  ;;  %v409_v62 = vmax.f32 %v377_v50, 0.0  ;;  %v410_v63 = vmax.f32 %v378_v51, 0.0  ;;  %v340_v8 = vmul.f32 %v4413_v52, %v5461_v15 }
  0x1c   : > { %v456_v58 = vshrl.u32 %v5496_v49, 16  ;;  %v459_v59 = vshll.u32 %v5496_v49, 16  ;;  %v433_v2 = vmax.f32 %v401_v55, 0.0  ;;  %v434_v3 = vmax.f32 %v402_v56, 0.0  ;;  %1792 = vmatprep.mubr.bf16.mxu0 %v5496_v49  ;;  %v4550_v55 = vld [vmem:[%s5449_s22 + $0x20] sm:$0xff]  }
  0x1d   : > { %v540_v0 = vshrl.u32 %v5503_v54, 16  ;;  %v543_v1 = vshll.u32 %v5503_v54, 16  ;;  %v5525_v7 = vpack.c.bf16 %v410_v63, %v409_v62  ;;  %v379_v18 = vadd.f32 %v5467_v19, %v340_v8  ;;  %1888 = vmatprep.mubr.bf16.mxu1 %v5503_v54  ;;  %v5195_v63 = vld [vmem:[%s6583_s1 + $0xa8] sm:$0xff]  }
  0x1e   : > { %5141 = vmatpush3.bf16.msra.mxu1 %v5179_v12  ;;  %4586 = vmatpush3.bf16.msra.mxu0 %v5179_v12  ;;  %v458_v4 = vrot.slane %v456_v58, 7  ;;  %v5523_v6 = vrot.slane %v459_v59, 1  ;;  %v5538_v12 = vpack.c.bf16 %v434_v3, %v433_v2  ;;  %v4462_v52 = vunpack.c.h.bf16 %v4560_v32 }
  0x1f   : > { %5134 = vmatprep.subr.bf16.mxu1 %v5180_v13  ;;  %4587 = vmatprep.subr.bf16.mxu0 %v5180_v13  ;;  %v542_v10 = vrot.slane %v540_v0, 7  ;;  %v5536_v11 = vrot.slane %v543_v1, 1  ;;  %v341_v13 = vmul.f32 %v4414_v57, %v5461_v15  ;;  %v463_v16 = vshrl.u32 %v5525_v7, 16 }
  0x20   : > { %v461_v14 = vor.u32 %v459_v59, %v458_v4  ;;  %v466_v17 = vshll.u32 %v5525_v7, 16  ;;  %v547_v21 = vshrl.u32 %v5538_v12, 16  ;;  %v411_v27 = vmax.f32 %v379_v18, 0.0 }
  0x21   : > { %v545_v20 = vor.u32 %v543_v1, %v542_v10  ;;  %v380_v23 = vadd.f32 %v5467_v19, %v341_v13  ;;  %v365_v59 = vmul.f32 %v4462_v52, %v5461_v15  ;;  %v4417_v62 = vunpack.c.l.bf16 %v4549_v47 }
  0x22   : > { %5142 = vmatpush3.bf16.msra.mxu1 %v5181_v22  ;;  %4588 = vmatpush3.bf16.msra.mxu0 %v5181_v22  ;;  %v550_v22 = vshll.u32 %v5538_v12, 16  ;;  %v586_v24 = vsel %vm5530_vm2, 0, %v461_v14  ;;  %v604_v26 = vrot.slane %v466_v17, 1  ;;  %v549_v31 = vrot.slane %v547_v21, 7 }
  0x23   : > { %5135 = vmatprep.subr.bf16.mxu1 %v5182_v25  ;;  %4589 = vmatprep.subr.bf16.mxu0 %v5182_v25  ;;  %v465_v25 = vrot.slane %v463_v16, 7  ;;  %v3959_v28 = vcombine.low %v586_v24, %v5496_v49  ;;  %v3961_v29 = vcombine.high %v586_v24, %v5496_v49  ;;  %v598_v30 = vsel %vm5530_vm2, 0, %v545_v20 }
  0x24   : > { %v4007_v33 = vcombine.low %v598_v30, %v5503_v54  ;;  %v4009_v34 = vcombine.high %v598_v30, %v5503_v54  ;;  %v5560_v36 = vor.u32 %v604_v26, %v463_v16  ;;  %v412_v39 = vmax.f32 %v380_v23, 0.0  ;;  %v5190_v26 = vld [vmem:[%s6583_s1 + $0x160] sm:$0xff]  }
  0x25   : > { %v468_v35 = vor.u32 %v466_v17, %v465_v25  ;;  %952 = vst [vmem:[#allocation2 + $0x18] sm:$0xff] %v3959_v28  ;;  %954 = vst [vmem:[#allocation2 + $0x24] sm:$0xff] %v3961_v29  ;;  %v4418_v2 = vunpack.c.h.bf16 %v4549_v47  ;;  %v4465_v3 = vunpack.c.l.bf16 %v4561_v48  ;;  %v404_v4 = vadd.f32 %v5467_v19, %v365_v59  ;;  %v5201_v25 = vld [vmem:[%s6583_s1 + $0xa0] sm:$0xff]  }
  0x26   : > { %5143 = vmatpush3.bf16.msra.mxu1 %v5183_v38  ;;  %4590 = vmatpush3.bf16.msra.mxu0 %v5183_v38  ;;  %v552_v38 = vor.u32 %v550_v22, %v549_v31  ;;  %1000 = vst [vmem:[#allocation2 + $0x138] sm:$0xff] %v4007_v33  ;;  %1002 = vst [vmem:[#allocation2 + $0x144] sm:$0xff] %v4009_v34  ;;  %v5577_v46 = vpack.c.bf16 %v412_v39, %v411_v27  ;;  %v4466_v10 = vunpack.c.h.bf16 %v4561_v48  ;;  %v5231_v54 = vld [vmem:[%s6583_s1 + $0x40] sm:$0xff]  }
  0x27   : > { %5136 = vmatprep.subr.bf16.mxu1 %v5184_v43  ;;  %4591 = vmatprep.subr.bf16.mxu0 %v5184_v43  ;;  %v587_v40 = vsel %vm5530_vm2, 0, %v468_v35  ;;  %v342_v8 = vmul.f32 %v4417_v62, %v5461_v15  ;;  %v4421_v13 = vunpack.c.l.bf16 %v4550_v55  ;;  %v343_v16 = vmul.f32 %v4418_v2, %v5461_v15  ;;  %v5193_v2 = vld [vmem:[%s6583_s1 + $0x150] sm:$0xff]  }
  0x28   : > { %v3963_v43 = vcombine.low %v587_v40, %v5525_v7  ;;  %v3965_v44 = vcombine.high %v587_v40, %v5525_v7  ;;  %v599_v45 = vsel %vm5530_vm2, 0, %v552_v38  ;;  %v470_v56 = vshrl.u32 %v5577_v46, 16 }
  0x29   : > { %v4011_v50 = vcombine.low %v599_v45, %v5538_v12  ;;  %v4013_v51 = vcombine.high %v599_v45, %v5538_v12  ;;  %v473_v57 = vshll.u32 %v5577_v46, 16  ;;  %v366_v17 = vmul.f32 %v4465_v3, %v5461_v15 }
  0x2a   : > { %5144 = vmatpush3.bf16.msra.mxu1 %v5185_v53  ;;  %4592 = vmatpush3.bf16.msra.mxu0 %v5185_v53  ;;  %v364_v53 = vmul.f32 %v4461_v42, %v5461_v15  ;;  %956 = vst [vmem:[#allocation2 + $0x30] sm:$0xff] %v3963_v43  ;;  %958 = vst [vmem:[#allocation2 + $0x3c] sm:$0xff] %v3965_v44  ;;  %v436_v18 = vmax.f32 %v404_v4, 0.0  ;;  %v381_v20 = vadd.f32 %v5467_v19, %v342_v8  ;;  %v5210_v44 = vld [vmem:[%s6583_s1 + $0x98] sm:$0xff]  }
  0x2b   : > { %4985 = vmatprep.subr.bf16.mxu1 %v5512_v60  ;;  %5033 = vmatprep.subr.bf16.mxu0 %v5517_v61  ;;  %1004 = vst [vmem:[#allocation2 + $0x150] sm:$0xff] %v4011_v50  ;;  %1006 = vst [vmem:[#allocation2 + $0x15c] sm:$0xff] %v4013_v51  ;;  %v367_v23 = vmul.f32 %v4466_v10, %v5461_v15  ;;  %v382_v28 = vadd.f32 %v5467_v19, %v343_v16 }
  0x2c   : > { %v403_v1 = vadd.f32 %v5467_v19, %v364_v53  ;;  %v405_v29 = vadd.f32 %v5467_v19, %v366_v17  ;;  %v413_v34 = vmax.f32 %v381_v20, 0.0  ;;  %v603_v53 = vor.u32 %v5523_v6, %v456_v58 }
  0x2d   : > { %1793 = vmatmul.mubr.bf16.vlgmr.msra.gmra.mxu0 %v586_v24  ;;  %1889 = vmatmul.mubr.bf16.vlgmr.msra.gmra.mxu1 %v598_v30  ;;  %v4422_v24 = vunpack.c.h.bf16 %v4550_v55  ;;  %v344_v30 = vmul.f32 %v4421_v13, %v5461_v15  ;;  %v414_v35 = vmax.f32 %v382_v28, 0.0  ;;  %v654_v55 = vsel %vm5629_vm5, %v5560_v36, 0  ;;  %v5215_v36 = vld [vmem:[%s6583_s1 + $0x90] sm:$0xff]  }
  0x2e   : > { %5034 = vmatpush3.bf16.msra.mxu0 %v5517_v61  ;;  %4986 = vmatpush3.bf16.msra.mxu1 %v5512_v60  ;;  %v5189_v61 = vld [vmem:[%s6583_s1 + $0x168] sm:$0xff]   ;;  %v472_v60 = vrot.slane %v470_v56, 7  ;;  %v435_v14 = vmax.f32 %v403_v1, 0.0  ;;  %v437_v38 = vmax.f32 %v405_v29, 0.0  ;;  %v653_v58 = vsel %vm5629_vm5, %v603_v53, 0 }
  0x2f   : > { %5035 = vmatprep.subr.bf16.mxu0 %v5191_v41  ;;  %4987 = vmatprep.subr.bf16.mxu1 %v5188_v37  ;;  %v345_v39 = vmul.f32 %v4422_v24, %v5461_v15  ;;  %v5644_v47 = vpack.c.bf16 %v414_v35, %v413_v34  ;;  %v383_v50 = vadd.f32 %v5467_v19, %v344_v30  ;;  %v5224_v30 = vld [vmem:[%s6583_s1 + $0x88] sm:$0xff]  }
  0x30   : > { %1800 = vmatprep.mubr.bf16.mxu0 %v5525_v7  ;;  %1896 = vmatprep.mubr.bf16.mxu1 %v5538_v12  ;;  %v475_v7 = vor.u32 %v473_v57, %v472_v60  ;;  %v5623_v33 = vpack.c.bf16 %v436_v18, %v435_v14  ;;  %v3964_v6 = vcombine.low %v654_v55, %v654_v55  ;;  %v5194_v34 = vld [vmem:[%s6583_s1 + $0x148] sm:$0xff]  }
  0x31   : > { %v384_v51 = vadd.f32 %v5467_v19, %v345_v39  ;;  %v477_v62 = vshrl.u32 %v5644_v47, 16  ;;  %v415_v60 = vmax.f32 %v383_v50, 0.0  ;;  %v3960_v10 = vcombine.low %v653_v58, %v653_v58 }
  0x32   : > { %5036 = vmatpush3.bf16.msra.mxu0 %v5191_v41  ;;  %4988 = vmatpush3.bf16.msra.mxu1 %v5188_v37  ;;  %v588_v27 = vsel %vm5530_vm2, 0, %v475_v7  ;;  %v406_v37 = vadd.f32 %v5467_v19, %v367_v23  ;;  %v554_v42 = vshrl.u32 %v5623_v33, 16  ;;  %v557_v43 = vshll.u32 %v5623_v33, 16  ;;  %957 = vst [vmem:[#allocation2 + $0x38] sm:$0xf] %v3964_v6 }
  0x33   : > { %5037 = vmatprep.subr.bf16.mxu0 %v5195_v63  ;;  %4989 = vmatprep.subr.bf16.mxu1 %v5189_v61  ;;  %v3967_v31 = vcombine.low %v588_v27, %v5577_v46  ;;  %v3969_v32 = vcombine.high %v588_v27, %v5577_v46  ;;  %v416_v1 = vmax.f32 %v384_v51, 0.0  ;;  %v479_v3 = vrot.slane %v477_v62, 7  ;;  %953 = vst [vmem:[#allocation2 + $0x20] sm:$0xf] %v3960_v10 }
  0x34   : > { %v438_v48 = vmax.f32 %v406_v37, 0.0  ;;  %v556_v52 = vrot.slane %v554_v42, 7  ;;  %v3962_v14 = vcombine.high %v653_v58, %v653_v58  ;;  %v3966_v16 = vcombine.high %v654_v55, %v654_v55 }
  0x35   : > { %1801 = vmatmul.mubr.bf16.gmra.mxu0 %v587_v40  ;;  %1897 = vmatmul.mubr.bf16.gmra.mxu1 %v599_v45  ;;  %v5634_v40 = vld [vmem:[%s5449_s22 + $0x28] sm:$0xff]   ;;  %960 = vst [vmem:[#allocation2 + $0x48] sm:$0xff] %v3967_v31  ;;  %962 = vst [vmem:[#allocation2 + $0x54] sm:$0xff] %v3969_v32  ;;  %v5192_v45 = vld [vmem:[%s6583_s1 + $0x158] sm:$0xff]   ;;  %v5678_v7 = vpack.c.bf16 %v416_v1, %v415_v60 }
  0x36   : > { %5038 = vmatpush3.bf16.msra.mxu0 %v5195_v63  ;;  %4990 = vmatpush3.bf16.msra.mxu1 %v5189_v61  ;;  %v4425_v59 = vunpack.c.l.bf16 %v5634_v40  ;;  %v480_v63 = vshll.u32 %v5644_v47, 16  ;;  %v5660_v61 = vpack.c.bf16 %v438_v48, %v437_v38  ;;  %v559_v49 = vor.u32 %v557_v43, %v556_v52  ;;  %955 = vst [vmem:[#allocation2 + $0x2c] sm:$0xf] %v3962_v14  ;;  %v4552_v38 = vld [vmem:[%s5449_s22 + $0x30] sm:$0xff]   ;;  %v5711_v48 = vld [vmem:[%s5449_s22 + $0x38] sm:$0xff]   ;;  %v5196_v52 = vld [vmem:[%s6583_s1 + $0x140] sm:$0xff]  }
  0x37   : > { %5039 = vmatprep.subr.bf16.mxu0 %v5201_v25  ;;  %4991 = vmatprep.subr.bf16.mxu1 %v5190_v26  ;;  %v484_v24 = vshrl.u32 %v5678_v7, 16  ;;  %959 = vst [vmem:[#allocation2 + $0x44] sm:$0xf] %v3966_v16  ;;  %v4429_v60 = vunpack.c.l.bf16 %v4552_v38  ;;  %v4430_v58 = vunpack.c.h.bf16 %v4552_v38 }
  0x38   : > { %1808 = vmatprep.mubr.bf16.mxu0 %v5577_v46  ;;  %v561_v4 = vshrl.u32 %v5660_v61, 16  ;;  %v564_v8 = vshll.u32 %v5660_v61, 16  ;;  %v600_v13 = vsel %vm5530_vm2, 0, %v559_v49  ;;  %v482_v20 = vor.u32 %v480_v63, %v479_v3  ;;  %1904 = vmatprep.mubr.bf16.mxu1 %v5623_v33 }
  0x39   : > { %v4015_v17 = vcombine.low %v600_v13, %v5623_v33  ;;  %v4017_v18 = vcombine.high %v600_v13, %v5623_v33  ;;  %v486_v35 = vrot.slane %v484_v24, 7  ;;  %v4433_v46 = vunpack.c.l.bf16 %v5711_v48 }
  0x3a   : > { %5040 = vmatpush3.bf16.msra.mxu0 %v5201_v25  ;;  %4992 = vmatpush3.bf16.msra.mxu1 %v5190_v26  ;;  %v563_v23 = vrot.slane %v561_v4, 7  ;;  %v487_v25 = vshll.u32 %v5678_v7, 16  ;;  %v4426_v26 = vunpack.c.h.bf16 %v5634_v40  ;;  %v589_v28 = vsel %vm5530_vm2, 0, %v482_v20 }
  0x3b   : > { %5041 = vmatprep.subr.bf16.mxu0 %v5210_v44  ;;  %4993 = vmatprep.subr.bf16.mxu1 %v5192_v45  ;;  %1008 = vst [vmem:[#allocation2 + $0x168] sm:$0xff] %v4015_v17  ;;  %1010 = vst [vmem:[#allocation2 + $0x174] sm:$0xff] %v4017_v18  ;;  %v3971_v31 = vcombine.low %v589_v28, %v5644_v47  ;;  %v3973_v32 = vcombine.high %v589_v28, %v5644_v47  ;;  %v5198_v17 = vld [vmem:[%s6583_s1 + $0x78] sm:$0xff]  }
  0x3c   : > { %v566_v29 = vor.u32 %v564_v8, %v563_v23  ;;  %v347_v37 = vmul.f32 %v4426_v26, %v5461_v15  ;;  %v489_v53 = vor.u32 %v487_v25, %v486_v35  ;;  %v348_v20 = vmul.f32 %v4429_v60, %v5461_v15  ;;  %v4555_v60 = vld [vmem:[%s5449_s22 + $0x48] sm:$0xff]  }
  0x3d   : > { %1809 = vmatmul.mubr.bf16.gmra.mxu0 %v588_v27  ;;  %v346_v27 = vmul.f32 %v4425_v59, %v5461_v15  ;;  %1905 = vmatmul.mubr.bf16.gmra.mxu1 %v600_v13  ;;  %964 = vst [vmem:[#allocation2 + $0x60] sm:$0xff] %v3971_v31  ;;  %966 = vst [vmem:[#allocation2 + $0x6c] sm:$0xff] %v3973_v32  ;;  %v5197_v3 = vld [vmem:[#allocation2 + $0x20] ss:$12 sps:$4 sm:$0xff]   ;;  %v4434_v31 = vunpack.c.h.bf16 %v5711_v48  ;;  %v350_v32 = vmul.f32 %v4433_v46, %v5461_v15  ;;  %v5200_v48 = vld [vmem:[%s6583_s1 + $0x38] sm:$0xff]  }
  0x3e   : > { %5042 = vmatpush3.bf16.msra.mxu0 %v5210_v44  ;;  %4994 = vmatpush3.bf16.msra.mxu1 %v5192_v45  ;;  %v601_v39 = vsel %vm5530_vm2, 0, %v566_v29  ;;  %v606_v44 = vrot.slane %v473_v57, 1  ;;  %v608_v45 = vrot.slane %v480_v63, 1  ;;  %v386_v57 = vadd.f32 %v5467_v19, %v347_v37  ;;  %v5237_v29 = vld [vmem:[%s6583_s1 + $0x1f8] sm:$0xff]  }
  0x3f   : > { %5043 = vmatprep.subr.bf16.mxu0 %v5215_v36  ;;  %4995 = vmatprep.subr.bf16.mxu1 %v5193_v2  ;;  %v385_v40 = vadd.f32 %v5467_v19, %v346_v27  ;;  %v4019_v50 = vcombine.low %v601_v39, %v5660_v61  ;;  %v4021_v51 = vcombine.high %v601_v39, %v5660_v61  ;;  %v590_v49 = vsel %vm5530_vm2, 0, %v489_v53  ;;  %v5203_v53 = vld [vmem:[%s6583_s1 + $0x70] sm:$0xff]  }
  0x40   : > { %v607_v59 = vor.u32 %v606_v44, %v470_v56  ;;  %1816 = vmatprep.mubr.bf16.mxu0 %v5644_v47  ;;  %v609_v63 = vor.u32 %v608_v45, %v477_v62  ;;  %v418_v1 = vmax.f32 %v386_v57, 0.0  ;;  %v5229_v56 = vld [vmem:[%s6583_s1 + $0x80] sm:$0xff]   ;;  %1912 = vmatprep.mubr.bf16.mxu1 %v5660_v61  ;;  %v3975_v6 = vcombine.low %v590_v49, %v5678_v7 }
  0x41   : > { %v417_v55 = vmax.f32 %v385_v40, 0.0  ;;  %1012 = vst [vmem:[#allocation2 + $0x180] sm:$0xff] %v4019_v50  ;;  %1014 = vst [vmem:[#allocation2 + $0x18c] sm:$0xff] %v4021_v51  ;;  %v3977_v47 = vcombine.high %v590_v49, %v5678_v7  ;;  %v349_v27 = vmul.f32 %v4430_v58, %v5461_v15  ;;  %v351_v40 = vmul.f32 %v4434_v31, %v5461_v15 }
  0x42   : > { %5044 = vmatpush3.bf16.msra.mxu0 %v5215_v36  ;;  %4996 = vmatpush3.bf16.msra.mxu1 %v5193_v2  ;;  %v655_v62 = vsel %vm5629_vm5, %v607_v59, 0  ;;  %v656_v36 = vsel %vm5629_vm5, %v609_v63, 0  ;;  %v5740_v2 = vld [vmem:[%s5449_s22 + $0x40] sm:$0xff]   ;;  %968 = vst [vmem:[#allocation2 + $0x78] sm:$0xff] %v3975_v6  ;;  %v389_v44 = vadd.f32 %v5467_v19, %v350_v32 }
  0x43   : > { %5045 = vmatprep.subr.bf16.mxu0 %v5224_v30  ;;  %4997 = vmatprep.subr.bf16.mxu1 %v5194_v34  ;;  %v5742_v10 = vpack.c.bf16 %v418_v1, %v417_v55  ;;  %v3968_v13 = vcombine.low %v655_v62, %v655_v62  ;;  %v3970_v14 = vcombine.high %v655_v62, %v655_v62  ;;  %v4438_v45 = vunpack.c.h.bf16 %v5740_v2 }
  0x44   : > { %v3972_v16 = vcombine.low %v656_v36, %v656_v36  ;;  %970 = vst [vmem:[#allocation2 + $0x84] sm:$0xff] %v3977_v47  ;;  %v3974_v18 = vcombine.high %v656_v36, %v656_v36  ;;  %v388_v35 = vadd.f32 %v5467_v19, %v349_v27  ;;  %v390_v59 = vadd.f32 %v5467_v19, %v351_v40 }
  0x45   : > { %1817 = vmatmul.mubr.bf16.gmra.mxu0 %v589_v28  ;;  %v491_v23 = vshrl.u32 %v5742_v10, 16  ;;  %v494_v26 = vshll.u32 %v5742_v10, 16  ;;  %961 = vst [vmem:[#allocation2 + $0x50] sm:$0xf] %v3968_v13  ;;  %963 = vst [vmem:[#allocation2 + $0x5c] sm:$0xf] %v3970_v14  ;;  %1913 = vmatmul.mubr.bf16.gmra.mxu1 %v601_v39  ;;  %v4441_v13 = vunpack.c.l.bf16 %v4555_v60  ;;  %v4442_v14 = vunpack.c.h.bf16 %v4555_v60 }
  0x46   : > { %5046 = vmatpush3.bf16.msra.mxu0 %v5224_v30  ;;  %4998 = vmatpush3.bf16.msra.mxu1 %v5194_v34  ;;  %965 = vst [vmem:[#allocation2 + $0x68] sm:$0xf] %v3972_v16  ;;  %v610_v28 = vrot.slane %v487_v25, 1  ;;  %967 = vst [vmem:[#allocation2 + $0x74] sm:$0xf] %v3974_v18  ;;  %v387_v30 = vadd.f32 %v5467_v19, %v348_v20  ;;  %v4437_v34 = vunpack.c.l.bf16 %v5740_v2  ;;  %v420_v51 = vmax.f32 %v388_v35, 0.0 }
  0x47   : > { %4999 = vmatprep.subr.bf16.mxu1 %v5196_v52  ;;  %5047 = vmatprep.subr.bf16.mxu0 %v5229_v56  ;;  %v493_v25 = vrot.slane %v491_v23, 7  ;;  %v612_v38 = vrot.slane %v494_v26, 1  ;;  %v421_v63 = vmax.f32 %v389_v44, 0.0  ;;  %v353_v2 = vmul.f32 %v4438_v45, %v5461_v15  ;;  %v4556_v16 = vld [vmem:[%s5449_s22 + $0x50] sm:$0xff]   ;;  %v5209_v35 = vld [vmem:[%s6583_s1 + $0x28] sm:$0xff]  }
  0x48   : > { %1824 = vmatprep.mubr.bf16.mxu0 %v5678_v7  ;;  %5001 = vmatprep.mubr.bf16.mxu1 %v5197_v3  ;;  %v611_v37 = vor.u32 %v610_v28, %v484_v24  ;;  %v419_v39 = vmax.f32 %v387_v30, 0.0  ;;  %v352_v46 = vmul.f32 %v4437_v34, %v5461_v15  ;;  %v5205_v20 = vld [vmem:[%s6583_s1 + $0x30] sm:$0xff]   ;;  %v354_v28 = vmul.f32 %v4441_v13, %v5461_v15  ;;  %v5207_v30 = vld [vmem:[%s6583_s1 + $0x68] sm:$0xff]  }
  0x49   : > { %v496_v50 = vor.u32 %v494_v26, %v493_v25  ;;  %v613_v24 = vor.u32 %v612_v38, %v491_v23  ;;  %v422_v23 = vmax.f32 %v390_v59, 0.0  ;;  %v392_v26 = vadd.f32 %v5467_v19, %v353_v2  ;;  %v5802_v25 = vld [vmem:[%s5449_s22 + $0x58] sm:$0xff]  }
  0x4a   : > { %5000 = vmatpush3.bf16.msra.mxu1 %v5196_v52  ;;  %5048 = vmatpush3.bf16.msra.mxu0 %v5229_v56  ;;  %v657_v7 = vsel %vm5629_vm5, %v611_v37, 0  ;;  %v5199_v52 = vld [vmem:[#allocation2 + $0x38] ss:$12 sps:$4 sm:$0xff]   ;;  %v5779_v1 = vpack.c.bf16 %v420_v51, %v419_v39  ;;  %v391_v3 = vadd.f32 %v5467_v19, %v352_v46  ;;  %v355_v32 = vmul.f32 %v4442_v14, %v5461_v15 }
  0x4b   : > { %4713 = vmatprep.subr.bf16.mxu1 %v5198_v17  ;;  %4849 = vmatprep.subr.bf16.mxu0 %v5237_v29  ;;  %v3976_v57 = vcombine.low %v657_v7, %v657_v7  ;;  %v3978_v55 = vcombine.high %v657_v7, %v657_v7  ;;  %v658_v58 = vsel %vm5629_vm5, %v613_v24, 0  ;;  %v4445_v34 = vunpack.c.l.bf16 %v4556_v16  ;;  %v5212_v15 = vld [vmem:[%s6583_s1 + $0x60] sm:$0xff]   ;;  %v5217_v2 = vld [vmem:[%s6583_s1 + $0x58] sm:$0xff]  }
  0x4c   : > { %v5202_v47 = vld [vmem:[#allocation2 + $0x50] ss:$12 sps:$4 sm:$0xff]   ;;  %v3980_v62 = vcombine.low %v658_v58, %v658_v58  ;;  %v3982_v36 = vcombine.high %v658_v58, %v658_v58  ;;  %v498_v17 = vshrl.u32 %v5779_v1, 16  ;;  %v501_v18 = vshll.u32 %v5779_v1, 16 }
  0x4d   : > { %1825 = vmatmul.mubr.bf16.gmra.mxu0 %v590_v49  ;;  %v591_v49 = vsel %vm5530_vm2, 0, %v496_v50  ;;  %969 = vst [vmem:[#allocation2 + $0x80] sm:$0xf] %v3976_v57  ;;  %971 = vst [vmem:[#allocation2 + $0x8c] sm:$0xf] %v3978_v55  ;;  %5002 = vmatmul.mubr.bf16.vlgmr.msra.gmra.mxu1 %v5199_v52  ;;  %v423_v27 = vmax.f32 %v391_v3, 0.0  ;;  %v5807_v37 = vpack.c.bf16 %v422_v23, %v421_v63  ;;  %v4446_v39 = vunpack.c.h.bf16 %v4556_v16 }
  0x4e   : > { %v3979_v56 = vcombine.low %v591_v49, %v5742_v10  ;;  %v3981_v6 = vcombine.high %v591_v49, %v5742_v10  ;;  %973 = vst [vmem:[#allocation2 + $0x98] sm:$0xf] %v3980_v62  ;;  %975 = vst [vmem:[#allocation2 + $0xa4] sm:$0xf] %v3982_v36  ;;  %4714 = vmatpush3.bf16.msra.mxu1 %v5200_v48  ;;  %5005 = vmatprep.mubr.bf16.mxu1 %v5202_v47  ;;  %v500_v29 = vrot.slane %v498_v17, 7  ;;  %v5214_v36 = vld [vmem:[%s6583_s1 + $0x20] sm:$0xff]  }
  0x4f   : > { %1832 = vmatprep.mubr.bf16.mxu0 %v5742_v10  ;;  %4715 = vmatprep.subr.bf16.mxu1 %v5203_v53  ;;  %v614_v31 = vrot.slane %v501_v18, 1  ;;  %v424_v10 = vmax.f32 %v392_v26, 0.0  ;;  %v393_v38 = vadd.f32 %v5467_v19, %v354_v28  ;;  %v5204_v40 = vld [vmem:[#allocation2 + $0x68] ss:$12 sps:$4 sm:$0xff]   ;;  %v394_v48 = vadd.f32 %v5467_v19, %v355_v32  ;;  %v5817_v50 = vld [vmem:[%s6584_s2] ss:$0 sm:$0xff] }
  0x50   : > { %972 = vst [vmem:[#allocation2 + $0x90] sm:$0xff] %v3979_v56  ;;  %974 = vst [vmem:[#allocation2 + $0x9c] sm:$0xff] %v3981_v6  ;;  %v503_v44 = vor.u32 %v501_v18, %v500_v29  ;;  %v356_v51 = vmul.f32 %v5817_v50, %v4445_v34  ;;  %v357_v52 = vmul.f32 %v5817_v50, %v4446_v39  ;;  %v4449_v53 = vunpack.c.l.bf16 %v5802_v25  ;;  %v5219_v23 = vld [vmem:[%s6583_s1 + $0x18] sm:$0xff]   ;;  %v5336_v26 = vld [vmem:[%s6585_s3] ss:$0 sm:$0xff] }
  0x51   : > { %v615_v45 = vor.u32 %v614_v31, %v498_v17  ;;  %v5820_v24 = vpack.c.bf16 %v424_v10, %v423_v27  ;;  %v4450_v57 = vunpack.c.h.bf16 %v5802_v25  ;;  %v505_v55 = vshrl.u32 %v5807_v37, 16  ;;  %v5226_v25 = vld [vmem:[%s6583_s1 + $0x48] sm:$0xff]  }
  0x52   : > { %4716 = vmatpush3.bf16.msra.mxu1 %v5205_v20  ;;  %v592_v19 = vsel %vm5530_vm2, 0, %v503_v44  ;;  %v508_v59 = vshll.u32 %v5807_v37, 16  ;;  %v425_v3 = vmax.f32 %v393_v38, 0.0  ;;  %v426_v13 = vmax.f32 %v394_v48, 0.0  ;;  %v5221_v48 = vld [vmem:[%s6583_s1 + $0x50] sm:$0xff]  }
  0x53   : > { %4717 = vmatprep.subr.bf16.mxu1 %v5207_v30  ;;  %v659_v63 = vsel %vm5629_vm5, %v615_v45, 0  ;;  %v3983_v60 = vcombine.low %v592_v19, %v5779_v1  ;;  %v507_v56 = vrot.slane %v505_v55, 7  ;;  %v512_v47 = vshrl.u32 %v5820_v24, 16 }
  0x54   : > { %v5206_v7 = vld [vmem:[#allocation2 + $0x80] ss:$12 sps:$4 sm:$0xff]   ;;  %v3984_v58 = vcombine.low %v659_v63, %v659_v63  ;;  %v3986_v46 = vcombine.high %v659_v63, %v659_v63  ;;  %v616_v6 = vrot.slane %v508_v59, 1  ;;  %v515_v62 = vshll.u32 %v5820_v24, 16 }
  0x55   : > { %1833 = vmatmul.mubr.bf16.gmra.mxu0 %v591_v49  ;;  %v3985_v49 = vcombine.high %v592_v19, %v5779_v1  ;;  %5006 = vmatmul.mubr.bf16.gmra.mxu1 %v5204_v40  ;;  %976 = vst [vmem:[#allocation2 + $0xa8] sm:$0xff] %v3983_v60  ;;  %v510_v14 = vor.u32 %v508_v59, %v507_v56  ;;  %v514_v17 = vrot.slane %v512_v47, 7  ;;  %v5208_v30 = vld [vmem:[#allocation2 + $0x98] ss:$12 sps:$4 sm:$0xff]  }
  0x56   : > { %5009 = vmatprep.mubr.bf16.mxu1 %v5206_v7  ;;  %4718 = vmatpush3.bf16.msra.mxu1 %v5209_v35  ;;  %977 = vst [vmem:[#allocation2 + $0xb0] sm:$0xf] %v3984_v58  ;;  %979 = vst [vmem:[#allocation2 + $0xbc] sm:$0xf] %v3986_v46  ;;  %v617_v16 = vor.u32 %v616_v6, %v505_v55  ;;  %v618_v18 = vrot.slane %v515_v62, 1  ;;  %v5842_v20 = vpack.c.bf16 %v426_v13, %v425_v3 }
  0x57   : > { %978 = vst [vmem:[#allocation2 + $0xb4] sm:$0xff] %v3985_v49  ;;  %4719 = vmatprep.subr.bf16.mxu1 %v5212_v15  ;;  %1840 = vmatprep.mubr.bf16.mxu0 %v5779_v1  ;;  %v395_v27 = vadd.f32 %v5336_v26, %v356_v51  ;;  %v396_v28 = vadd.f32 %v5336_v26, %v357_v52  ;;  %v5853_v31 = vsel %vm5530_vm2, 0, %v510_v14  ;;  %v5223_v52 = vld [vmem:[%s6583_s1 + $0x10] sm:$0xff]   ;;  %v630_v13 = vrot.slane %v557_v43, 1 }
  0x58   : > { %v358_v29 = vmul.f32 %v5817_v50, %v4449_v53  ;;  %v660_v1 = vsel %vm5629_vm5, %v617_v16, 0  ;;  %v517_v32 = vor.u32 %v515_v62, %v514_v17  ;;  %v619_v34 = vor.u32 %v618_v18, %v512_v47 }
  0x59   : > { %v3987_v35 = vcombine.low %v5853_v31, %v5807_v37  ;;  %v3989_v10 = vcombine.high %v5853_v31, %v5807_v37  ;;  %v3988_v38 = vcombine.low %v660_v1, %v660_v1  ;;  %v3990_v39 = vcombine.high %v660_v1, %v660_v1 }
  0x5a   : > { %4720 = vmatpush3.bf16.msra.mxu1 %v5214_v36  ;;  %v5863_v40 = vsel %vm5530_vm2, 0, %v517_v32  ;;  %v661_v44 = vsel %vm5629_vm5, %v619_v34, 0  ;;  %v519_v45 = vshrl.u32 %v5842_v20, 16  ;;  %v522_v15 = vshll.u32 %v5842_v20, 16  ;;  %v5228_v36 = vld [vmem:[%s6583_s1 + $0x8] sm:$0xff]  }
  0x5b   : > { %4721 = vmatprep.subr.bf16.mxu1 %v5217_v2  ;;  %980 = vst [vmem:[#allocation2 + $0xc0] sm:$0xff] %v3987_v35  ;;  %982 = vst [vmem:[#allocation2 + $0xcc] sm:$0xff] %v3989_v10  ;;  %v3991_v51 = vcombine.low %v5863_v40, %v5820_v24  ;;  %v3993_v7 = vcombine.high %v5863_v40, %v5820_v24  ;;  %v3994_v55 = vcombine.high %v661_v44, %v661_v44 }
  0x5c   : > { %981 = vst [vmem:[#allocation2 + $0xc8] sm:$0xf] %v3988_v38  ;;  %983 = vst [vmem:[#allocation2 + $0xd4] sm:$0xf] %v3990_v39  ;;  %v359_v59 = vmul.f32 %v5817_v50, %v4450_v57  ;;  %v397_v63 = vadd.f32 %v5336_v26, %v358_v29  ;;  %v620_v60 = vrot.slane %v522_v15, 1  ;;  %v521_v49 = vrot.slane %v519_v45, 7 }
  0x5d   : > { %1841 = vmatmul.mubr.bf16.gmra.mxu0 %v592_v19  ;;  %5010 = vmatmul.mubr.bf16.gmra.mxu1 %v5208_v30  ;;  %v5211_v53 = vld [vmem:[#allocation2 + $0xb0] ss:$12 sps:$4 sm:$0xff]   ;;  %v3992_v19 = vcombine.low %v661_v44, %v661_v44  ;;  %984 = vst [vmem:[#allocation2 + $0xd8] sm:$0xff] %v3991_v51  ;;  %986 = vst [vmem:[#allocation2 + $0xe4] sm:$0xff] %v3993_v7  ;;  %v427_v58 = vmax.f32 %v395_v27, 0.0  ;;  %v428_v46 = vmax.f32 %v396_v28, 0.0 }
  0x5e   : > { %1848 = vmatprep.mubr.bf16.mxu0 %v5807_v37  ;;  %4722 = vmatpush3.bf16.msra.mxu1 %v5219_v23  ;;  %987 = vst [vmem:[#allocation2 + $0xec] sm:$0xf] %v3994_v55  ;;  %v398_v56 = vadd.f32 %v5336_v26, %v359_v59  ;;  %v429_v6 = vmax.f32 %v397_v63, 0.0  ;;  %v621_v50 = vor.u32 %v620_v60, %v519_v45  ;;  %v628_v62 = vrot.slane %v550_v22, 1  ;;  %v5233_v30 = vld [vmem:[%s6583_s1] sm:$0xff]  }
  0x5f   : > { %5013 = vmatprep.mubr.bf16.mxu1 %v5211_v53  ;;  %985 = vst [vmem:[#allocation2 + $0xe0] sm:$0xf] %v3992_v19  ;;  %4723 = vmatprep.subr.bf16.mxu1 %v5221_v48  ;;  %v524_v57 = vor.u32 %v522_v15, %v521_v49  ;;  %v627_v47 = vor.u32 %v5536_v11, %v540_v0  ;;  %v632_v0 = vrot.slane %v564_v8, 1 }
  0x60   : > { %v5895_v2 = vpack.c.bf16 %v428_v46, %v427_v58  ;;  %v430_v3 = vmax.f32 %v398_v56, 0.0  ;;  %v662_v11 = vsel %vm5629_vm5, %v621_v50, 0  ;;  %v629_v14 = vor.u32 %v628_v62, %v547_v21  ;;  %v5234_v62 = vld [vmem:[#allocation2 + $0x8] ss:$12 sps:$4 sm:$0xff]  }
  0x61   : > { %v5909_v22 = vsel %vm5530_vm2, 0, %v524_v57  ;;  %v665_v43 = vsel %vm5629_vm5, %v627_v47, 0  ;;  %v3996_v17 = vcombine.low %v662_v11, %v662_v11  ;;  %v3998_v18 = vcombine.high %v662_v11, %v662_v11  ;;  %v5244_v11 = vld [vmem:[%s6583_s1 + $0x1f0] sm:$0xff]  }
  0x62   : > { %4724 = vmatpush3.bf16.msra.mxu1 %v5223_v52  ;;  %v3995_v8 = vcombine.low %v5909_v22, %v5842_v20  ;;  %v3997_v23 = vcombine.high %v5909_v22, %v5842_v20  ;;  %v529_v26 = vshll.u32 %v5895_v2, 16  ;;  %v5920_v27 = vpack.c.bf16 %v430_v3, %v429_v6  ;;  %v5236_v3 = vld [vmem:[#allocation2 + $0x20] ss:$12 sps:$4 sm:$0xff]  }
  0x63   : > { %v5213_v16 = vld [vmem:[#allocation2 + $0xc8] ss:$12 sps:$4 sm:$0xff]   ;;  %4725 = vmatprep.subr.bf16.mxu1 %v5226_v25  ;;  %v4008_v28 = vcombine.low %v665_v43, %v665_v43  ;;  %989 = vst [vmem:[#allocation2 + $0xf8] sm:$0xf] %v3996_v17  ;;  %991 = vst [vmem:[#allocation2 + $0x104] sm:$0xf] %v3998_v18  ;;  %v4010_v21 = vcombine.high %v665_v43, %v665_v43  ;;  %v631_v35 = vor.u32 %v630_v13, %v554_v42 }
  0x64   : > { %988 = vst [vmem:[#allocation2 + $0xf0] sm:$0xff] %v3995_v8  ;;  %990 = vst [vmem:[#allocation2 + $0xfc] sm:$0xff] %v3997_v23  ;;  %v526_v12 = vshrl.u32 %v5895_v2, 16  ;;  %v666_v29 = vsel %vm5629_vm5, %v629_v14, 0  ;;  %v633_v10 = vor.u32 %v632_v0, %v561_v4  ;;  %v622_v38 = vrot.slane %v529_v26, 1  ;;  %v5941_v42 = vld [vmem:[%s6583_s1 + $0x238] sm:$0xff]  }
  0x65   : > { %1849 = vmatmul.mubr.bf16.gmra.mxu0 %v5853_v31  ;;  %5014 = vmatmul.mubr.bf16.gmra.mxu1 %v5213_v16  ;;  %1001 = vst [vmem:[#allocation2 + $0x140] sm:$0xf] %v4008_v28  ;;  %v4012_v32 = vcombine.low %v666_v29, %v666_v29  ;;  %v4014_v34 = vcombine.high %v666_v29, %v666_v29  ;;  %v533_v39 = vshrl.u32 %v5920_v27, 16  ;;  %v536_v44 = vshll.u32 %v5920_v27, 16  ;;  %v5238_v13 = vld [vmem:[%s6583_s1 + $0x1b8] sm:$0xff]   ;;  %v5245_v43 = vld [vmem:[%s6583_s1 + $0x1b0] sm:$0xff]  }
  0x66   : > { %1856 = vmatprep.mubr.bf16.mxu0 %v5820_v24  ;;  %v5216_v1 = vld [vmem:[#allocation2 + $0xe0] ss:$12 sps:$4 sm:$0xff]   ;;  %4726 = vmatpush3.bf16.msra.mxu1 %v5228_v36  ;;  %v528_v45 = vrot.slane %v526_v12, 7  ;;  %1003 = vst [vmem:[#allocation2 + $0x14c] sm:$0xf] %v4010_v21  ;;  %v667_v15 = vsel %vm5629_vm5, %v631_v35, 0  ;;  %v623_v61 = vor.u32 %v622_v38, %v526_v12 }
  0x67   : > { %4727 = vmatprep.subr.bf16.mxu1 %v5231_v54  ;;  %5017 = vmatprep.mubr.bf16.mxu1 %v5216_v1  ;;  %1005 = vst [vmem:[#allocation2 + $0x158] sm:$0xf] %v4012_v32  ;;  %1007 = vst [vmem:[#allocation2 + $0x164] sm:$0xf] %v4014_v34  ;;  %v668_v33 = vsel %vm5629_vm5, %v633_v10, 0  ;;  %v624_v4 = vrot.slane %v536_v44, 1  ;;  %v4016_v7 = vcombine.low %v667_v15, %v667_v15 }
  0x68   : > { %v531_v48 = vor.u32 %v529_v26, %v528_v45  ;;  %v535_v51 = vrot.slane %v533_v39, 7  ;;  %v4018_v52 = vcombine.high %v667_v15, %v667_v15  ;;  %v4020_v53 = vcombine.low %v668_v33, %v668_v33  ;;  %v5241_v0 = vld [vmem:[#allocation2 + $0x38] ss:$12 sps:$4 sm:$0xff]   ;;  %v5252_v14 = vld [vmem:[%s6583_s1 + $0x1e8] sm:$0xff]   ;;  %v5243_v17 = vld [vmem:[#allocation2 + $0x50] ss:$12 sps:$4 sm:$0xff]  }
  0x69   : > { %v4022_v19 = vcombine.high %v668_v33, %v668_v33  ;;  %v663_v55 = vsel %vm5629_vm5, %v623_v61, 0  ;;  %v625_v59 = vor.u32 %v624_v4, %v533_v39  ;;  %1009 = vst [vmem:[#allocation2 + $0x170] sm:$0xf] %v4016_v7  ;;  %v5239_v16 = vld [vmem:[#allocation2 + $0x1c] ss:$12 sps:$4 sm:$0xff]   ;;  %v5249_v8 = vld [vmem:[%s6583_s1 + $0x230] sm:$0xff]  }
  0x6a   : > { %v5949_v63 = vsel %vm5530_vm2, 0, %v531_v48  ;;  %v538_v60 = vor.u32 %v536_v44, %v535_v51  ;;  %4728 = vmatpush3.bf16.msra.mxu1 %v5233_v30  ;;  %v5218_v49 = vld [vmem:[#allocation2 + $0xf8] ss:$12 sps:$4 sm:$0xff]   ;;  %v4000_v58 = vcombine.low %v663_v55, %v663_v55  ;;  %v4002_v46 = vcombine.high %v663_v55, %v663_v55  ;;  %1011 = vst [vmem:[#allocation2 + $0x17c] sm:$0xf] %v4018_v52  ;;  %v5253_v23 = vld [vmem:[%s6583_s1 + $0x1a8] sm:$0xff]  }
  0x6b   : > { %1013 = vst [vmem:[#allocation2 + $0x188] sm:$0xf] %v4020_v53  ;;  %1015 = vst [vmem:[#allocation2 + $0x194] sm:$0xf] %v4022_v19  ;;  %5081 = vmatprep.subr.bf16.mxu1 %v5941_v42  ;;  %v664_v56 = vsel %vm5629_vm5, %v625_v59, 0  ;;  %v5259_v26 = vld [vmem:[%s6583_s1 + $0x1e0] sm:$0xff]  }
  0x6c   : > { %v5956_v6 = vsel %vm5530_vm2, 0, %v538_v60  ;;  %993 = vst [vmem:[#allocation2 + $0x110] sm:$0xf] %v4000_v58  ;;  %995 = vst [vmem:[#allocation2 + $0x11c] sm:$0xf] %v4002_v46  ;;  %v4004_v25 = vcombine.low %v664_v56, %v664_v56  ;;  %v4006_v50 = vcombine.high %v664_v56, %v664_v56  ;;  %v5264_v28 = vld [vmem:[%s6583_s1 + $0x228] sm:$0xff]  }
  0x6d   : > { %1857 = vmatmul.mubr.bf16.gmra.mxu0 %v5863_v40  ;;  %5018 = vmatmul.mubr.bf16.gmra.mxu1 %v5218_v49  ;;  %v5225_v47 = vld [vmem:[#allocation2 + $0x140] ss:$12 sps:$4 sm:$0xff]   ;;  %v5248_v18 = vld [vmem:[#allocation2 + $0x68] ss:$12 sps:$4 sm:$0xff]   ;;  %v5242_v12 = vld [vmem:[#allocation2 + $0x18] ss:$12 sps:$4 sm:$0xff]  }
  0x6e   : > { %1864 = vmatprep.mubr.bf16.mxu0 %v5842_v20  ;;  %997 = vst [vmem:[#allocation2 + $0x128] sm:$0xf] %v4004_v25  ;;  %999 = vst [vmem:[#allocation2 + $0x134] sm:$0xf] %v4006_v50  ;;  %v5227_v9 = vld [vmem:[#allocation2 + $0x158] ss:$12 sps:$4 sm:$0xff]  }
  0x6f   : > { %v5251_v21 = vld [vmem:[#allocation2 + $0x80] ss:$12 sps:$4 sm:$0xff]   ;;  %v5256_v30 = vld [vmem:[#allocation2 + $0x98] ss:$12 sps:$4 sm:$0xff]   ;;  %v5274_v35 = vld [vmem:[%s6583_s1 + $0x1d0] sm:$0xff]  }
  0x70   : > { %v5990_v29 = vld [vmem:[#allocation2 + $0x34] ss:$12 sps:$4 sm:$0xff]   ;;  %v5267_v1 = vld [vmem:[%s6583_s1 + $0x1d8] sm:$0xff]   ;;  %v5282_v33 = vld [vmem:[%s6583_s1 + $0x1c8] sm:$0xff]  }
  0x71   : > { %v5230_v36 = vld [vmem:[#allocation2 + $0x170] ss:$12 sps:$4 sm:$0xff]   ;;  %v5279_v34 = vld [vmem:[%s6583_s1 + $0x220] sm:$0xff]   ;;  %v5254_v45 = vld [vmem:[#allocation2 + $0x4c] ss:$12 sps:$4 sm:$0xff]  }
  0x72   : > { %v5232_v54 = vld [vmem:[#allocation2 + $0x188] ss:$12 sps:$4 sm:$0xff]   ;;  %v5268_v32 = vld [vmem:[%s6583_s1 + $0x198] sm:$0xff]   ;;  %v5289_v4 = vld [vmem:[%s6583_s1 + $0x1c0] sm:$0xff]  }
  0x73   : > { %v5220_v57 = vld [vmem:[#allocation2 + $0x110] ss:$12 sps:$4 sm:$0xff]   ;;  %v5263_v15 = vld [vmem:[#allocation2 + $0xc8] ss:$12 sps:$4 sm:$0xff]   ;;  %v5290_v48 = vld [vmem:[%s6583_s1 + $0x180] sm:$0xff]  }
  0x74   : > { %5021 = vmatprep.mubr.bf16.mxu1 %v5220_v57  ;;  %v5275_v10 = vld [vmem:[%s6583_s1 + $0x190] sm:$0xff]   ;;  %v5291_v38 = vld [vmem:[%s6583_s1 + $0x218] sm:$0xff]   ;;  %v5293_v51 = vld [vmem:[%s6583_s1 + $0x208] sm:$0xff]  }
  0x75   : > { %1865 = vmatmul.mubr.bf16.gmra.mxu0 %v5909_v22  ;;  %v5222_v41 = vld [vmem:[#allocation2 + $0x128] ss:$12 sps:$4 sm:$0xff]   ;;  %v5250_v39 = vld [vmem:[#allocation2 + $0x30] ss:$12 sps:$4 sm:$0xff]   ;;  %v5266_v52 = vld [vmem:[#allocation2 + $0xe0] ss:$12 sps:$4 sm:$0xff]  }
  0x76   : > { %1872 = vmatprep.mubr.bf16.mxu0 %v5895_v2  ;;  %5022 = vmatmul.mubr.bf16.gmra.mxu1 %v5222_v41  ;;  %v5258_v44 = vld [vmem:[#allocation2 + $0xb0] ss:$12 sps:$4 sm:$0xff]   ;;  %v5257_v7 = vld [vmem:[#allocation2 + $0x48] ss:$12 sps:$4 sm:$0xff]   ;;  %v5271_v19 = vld [vmem:[#allocation2 + $0xf8] ss:$12 sps:$4 sm:$0xff]  }
  0x77   : > { %5025 = vmatprep.mubr.bf16.mxu1 %v5225_v47  ;;  %v5292_v61 = vld [vmem:[%s6583_s1 + $0x210] sm:$0xff]   ;;  %v5301_v55 = vld [vmem:[%s6583_s1 + $0x200] sm:$0xff]   ;;  %v5269_v49 = vld [vmem:[#allocation2 + $0x7c] ss:$12 sps:$4 sm:$0xff]  }
  0x78   : > { %v5261_v53 = vld [vmem:[#allocation2 + $0x64] ss:$12 sps:$4 sm:$0xff]   ;;  %v5265_v59 = vld [vmem:[#allocation2 + $0x60] ss:$12 sps:$4 sm:$0xff]   ;;  %v5278_v58 = vld [vmem:[#allocation2 + $0x128] ss:$12 sps:$4 sm:$0xff]  }
  0x79   : > { %v5273_v60 = vld [vmem:[#allocation2 + $0x110] ss:$12 sps:$4 sm:$0xff]   ;;  %v5272_v46 = vld [vmem:[#allocation2 + $0x78] ss:$12 sps:$4 sm:$0xff]   ;;  %v5281_v56 = vld [vmem:[#allocation2 + $0x140] ss:$12 sps:$4 sm:$0xff]  }
  0x7a   : > { %v5276_v25 = vld [vmem:[#allocation2 + $0x94] ss:$12 sps:$4 sm:$0xff]   ;;  %v5286_v50 = vld [vmem:[#allocation2 + $0x158] ss:$12 sps:$4 sm:$0xff]   ;;  %v5280_v57 = vld [vmem:[#allocation2 + $0x90] ss:$12 sps:$4 sm:$0xff]  }
  0x7b   : > { %v5288_v47 = vld [vmem:[#allocation2 + $0x170] ss:$12 sps:$4 sm:$0xff]   ;;  %v5284_v41 = vld [vmem:[#allocation2 + $0xac] ss:$12 sps:$4 sm:$0xff]  }
  0x7d   : > { %1873 = vmatmul.mubr.bf16.gmra.mxu0 %v5949_v63 }
  0x7e   : > { %1880 = vmatprep.mubr.bf16.mxu0 %v5920_v27  ;;  %5026 = vmatmul.mubr.bf16.gmra.mxu1 %v5227_v9  ;;  %v5287_v9 = vld [vmem:[#allocation2 + $0xa8] ss:$12 sps:$4 sm:$0xff]  }
  0x7f   : > { %5029 = vmatprep.mubr.bf16.mxu1 %v5230_v36 }
  0x85   : > { %1881 = vmatmul.mubr.bf16.gmra.mxu0 %v5956_v6 }
  0x86   : > { %5049 = vmatprep.mubr.bf16.mxu0 %v5234_v62  ;;  %5030 = vmatmul.mubr.bf16.gmra.mxu1 %v5232_v54 }
  0x87   : > { %2514 = vmatprep.mubr.bf16.mxu1 %v5361_v5 }
  0x8d   : > { %5050 = vmatmul.mubr.bf16.vlgmr.msra.gmra.mxu0 %v5236_v3 }
  0x8e   : > { %4850 = vmatpush3.bf16.msra.mxu0 %v5238_v13  ;;  %5053 = vmatprep.mubr.bf16.mxu0 %v5241_v0  ;;  %v6051_v0 = vld [vmem:[#allocation2 + $0x13c] ss:$12 sps:$4 sm:$0xff]  }
  0x8f   : > { %4851 = vmatprep.subr.bf16.mxu0 %v5244_v11  ;;  %2515 = vmatmul.mubr.bf16.vlgmr.msra.gmra.mxu1 %v5361_v5  ;;  %v5260_v5 = vld [vmem:[%s6583_s1 + $0x1a0] sm:$0xff]  }
  0x90   : > { %5082 = vmatpush3.bf16.msra.mxu1 %v5941_v42  ;;  %2522 = vmatprep.mubr.bf16.mxu1 %v5239_v16  ;;  %v5283_v42 = vld [vmem:[%s6583_s1 + $0x188] sm:$0xff]   ;;  %v5299_v11 = vld [vmem:[#allocation2 + $0xc4] ss:$12 sps:$4 sm:$0xff]  }
  0x91   : > { %5083 = vmatprep.subr.bf16.mxu1 %v5249_v8 }
  0x92   : > { %4852 = vmatpush3.bf16.msra.mxu0 %v5245_v43 }
  0x93   : > { %4853 = vmatprep.subr.bf16.mxu0 %v5252_v14 }
  0x94   : > { %5084 = vmatpush3.bf16.msra.mxu1 %v5249_v8 }
  0x95   : > { %5054 = vmatmul.mubr.bf16.gmra.mxu0 %v5243_v17  ;;  %5085 = vmatprep.subr.bf16.mxu1 %v5264_v28 }
  0x96   : > { %5057 = vmatprep.mubr.bf16.mxu0 %v5248_v18  ;;  %4854 = vmatpush3.bf16.msra.mxu0 %v5253_v23 }
  0x97   : > { %4855 = vmatprep.subr.bf16.mxu0 %v5259_v26  ;;  %2523 = vmatmul.mubr.bf16.gmra.mxu1 %v5242_v12  ;;  %v6061_v12 = vld [vmem:[#allocation2 + $0x138] ss:$12 sps:$4 sm:$0xff]  }
  0x98   : > { %2530 = vmatprep.mubr.bf16.mxu1 %v5990_v29  ;;  %5086 = vmatpush3.bf16.msra.mxu1 %v5264_v28 }
  0x99   : > { %5087 = vmatprep.subr.bf16.mxu1 %v5279_v34 }
  0x9a   : > { %4856 = vmatpush3.bf16.msra.mxu0 %v5260_v5 }
  0x9b   : > { %4857 = vmatprep.subr.bf16.mxu0 %v5267_v1  ;;  %v6065_v1 = vld [vmem:[#allocation2 + $0x154] ss:$12 sps:$4 sm:$0xff]  }
  0x9c   : > { %5088 = vmatpush3.bf16.msra.mxu1 %v5279_v34 }
  0x9d   : > { %5058 = vmatmul.mubr.bf16.gmra.mxu0 %v5251_v21  ;;  %5089 = vmatprep.subr.bf16.mxu1 %v5291_v38 }
  0x9e   : > { %5061 = vmatprep.mubr.bf16.mxu0 %v5256_v30  ;;  %4858 = vmatpush3.bf16.msra.mxu0 %v5268_v32  ;;  %v5306_v32 = vld [vmem:[#allocation2 + $0xdc] ss:$12 sps:$4 sm:$0xff]  }
  0x9f   : > { %4859 = vmatprep.subr.bf16.mxu0 %v5274_v35  ;;  %2531 = vmatmul.mubr.bf16.gmra.mxu1 %v5250_v39 }
  0xa0   : > { %2538 = vmatprep.mubr.bf16.mxu1 %v5254_v45  ;;  %5090 = vmatpush3.bf16.msra.mxu1 %v5291_v38 }
  0xa1   : > { %5091 = vmatprep.subr.bf16.mxu1 %v5292_v61 }
  0xa2   : > { %4860 = vmatpush3.bf16.msra.mxu0 %v5275_v10 }
  0xa3   : > { %4861 = vmatprep.subr.bf16.mxu0 %v5282_v33  ;;  %v5309_v33 = vld [vmem:[#allocation2 + $0xd8] ss:$12 sps:$4 sm:$0xff]  }
  0xa4   : > { %5092 = vmatpush3.bf16.msra.mxu1 %v5292_v61  ;;  %v6077_v61 = vld [vmem:[#allocation2 + $0x16c] ss:$12 sps:$4 sm:$0xff]  }
  0xa5   : > { %5062 = vmatmul.mubr.bf16.gmra.mxu0 %v5258_v44  ;;  %5093 = vmatprep.subr.bf16.mxu1 %v5293_v51 }
  0xa6   : > { %5065 = vmatprep.mubr.bf16.mxu0 %v5263_v15  ;;  %4862 = vmatpush3.bf16.msra.mxu0 %v5283_v42 }
  0xa7   : > { %4863 = vmatprep.subr.bf16.mxu0 %v5289_v4  ;;  %2539 = vmatmul.mubr.bf16.gmra.mxu1 %v5257_v7  ;;  %v5312_v4 = vld [vmem:[#allocation2 + $0xf4] ss:$12 sps:$4 sm:$0xff]  }
  0xa8   : > { %2546 = vmatprep.mubr.bf16.mxu1 %v5261_v53  ;;  %5094 = vmatpush3.bf16.msra.mxu1 %v5293_v51 }
  0xa9   : > { %5095 = vmatprep.subr.bf16.mxu1 %v5301_v55 }
  0xaa   : > { %4864 = vmatpush3.bf16.msra.mxu0 %v5290_v48 }
  0xac   : > { %5096 = vmatpush3.bf16.msra.mxu1 %v5301_v55 }
  0xad   : > { %5066 = vmatmul.mubr.bf16.gmra.mxu0 %v5266_v52 }
  0xae   : > { %5069 = vmatprep.mubr.bf16.mxu0 %v5271_v19 }
  0xaf   : > { %2547 = vmatmul.mubr.bf16.gmra.mxu1 %v5265_v59 }
  0xb0   : > { %2554 = vmatprep.mubr.bf16.mxu1 %v5269_v49 }
  0xb5   : > { %5070 = vmatmul.mubr.bf16.gmra.mxu0 %v5273_v60 }
  0xb6   : > { %5073 = vmatprep.mubr.bf16.mxu0 %v5278_v58  ;;  %v6085_v58 = vld [vmem:[#allocation2 + $0x168] ss:$12 sps:$4 sm:$0xff]  }
  0xb7   : > { %2555 = vmatmul.mubr.bf16.gmra.mxu1 %v5272_v46 }
  0xb8   : > { %2562 = vmatprep.mubr.bf16.mxu1 %v5276_v25 }
  0xbd   : > { %5074 = vmatmul.mubr.bf16.gmra.mxu0 %v5281_v56 }
  0xbe   : > { %5077 = vmatprep.mubr.bf16.mxu0 %v5286_v50 }
  0xbf   : > { %2563 = vmatmul.mubr.bf16.gmra.mxu1 %v5280_v57 }
  0xc0   : > { %2570 = vmatprep.mubr.bf16.mxu1 %v5284_v41 }
  0xc5   : > { %5078 = vmatmul.mubr.bf16.gmra.mxu0 %v5288_v47 }
  0xc6   : > { %3236 = vmatprep.mubr.bf16.mxu0 %v5990_v29  ;;  %v5303_v29 = vld [vmem:[#allocation2 + $0xc0] ss:$12 sps:$4 sm:$0xff]  }
  0xc7   : > { %2571 = vmatmul.mubr.bf16.gmra.mxu1 %v5287_v9 }
  0xc8   : > { %2578 = vmatprep.mubr.bf16.mxu1 %v5807_v37 }
  0xcd   : > { %3237 = vmatmul.mubr.bf16.vlgmr.msra.gmra.mxu0 %v5250_v39 }
  0xce   : > { %3244 = vmatprep.mubr.bf16.mxu0 %v5254_v45  ;;  %v6073_v45 = vld [vmem:[#allocation2 + $0x150] ss:$12 sps:$4 sm:$0xff]  }
  0xcf   : > { %2579 = vmatmul.mubr.bf16.gmra.mxu1 %v5853_v31 }
  0xd0   : > { %2586 = vmatprep.mubr.bf16.mxu1 %v5820_v24 }
  0xd5   : > { %3245 = vmatmul.mubr.bf16.gmra.mxu0 %v5257_v7 }
  0xd6   : > { %3252 = vmatprep.mubr.bf16.mxu0 %v5261_v53 }
  0xd7   : > { %2587 = vmatmul.mubr.bf16.gmra.mxu1 %v5863_v40 }
  0xd8   : > { %2594 = vmatprep.mubr.bf16.mxu1 %v5842_v20 }
  0xdd   : > { %3253 = vmatmul.mubr.bf16.gmra.mxu0 %v5265_v59 }
  0xde   : > { %3260 = vmatprep.mubr.bf16.mxu0 %v5269_v49 }
  0xdf   : > { %2595 = vmatmul.mubr.bf16.gmra.mxu1 %v5909_v22 }
  0xe0   : > { %2602 = vmatprep.mubr.bf16.mxu1 %v5895_v2 }
  0xe5   : > { %3261 = vmatmul.mubr.bf16.gmra.mxu0 %v5272_v46  ;;  %v5310_v46 = vld [vmem:[#allocation2 + $0xf0] ss:$12 sps:$4 sm:$0xff]  }
  0xe6   : > { %3268 = vmatprep.mubr.bf16.mxu0 %v5276_v25  ;;  %v5313_v25 = vld [vmem:[#allocation2 + $0x38] ss:$12 sps:$4 sm:$0xff]  }
  0xe7   : > { %2603 = vmatmul.mubr.bf16.gmra.mxu1 %v5949_v63 }
  0xe8   : > { %2610 = vmatprep.mubr.bf16.mxu1 %v5920_v27 }
  0xed   : > { %v4593_v37 = vpop.f32.mrf.mxu0  ;;  %v4665_v62 = vpop.f32.mrf.mxu1  ;;  %3269 = vmatmul.mubr.bf16.gmra.mxu0 %v5280_v57 }
  0xee   : > { %3276 = vmatprep.mubr.bf16.mxu0 %v5284_v41 }
  0xef   : > { %v4594_v31 = vpop.f32.mrf.mxu0  ;;  %v4666_v40 = vpop.f32.mrf.mxu1  ;;  %2611 = vmatmul.mubr.bf16.gmra.mxu1 %v5956_v6 }
  0xf0   : > { %v6045_v24 = vadd.f32 %v4594_v31, %v4593_v37  ;;  %v6047_v20 = vadd.f32 %v4666_v40, %v4665_v62  ;;  %2618 = vmatprep.mubr.bf16.mxu1 %v6051_v0 }
  0xf1   : > { %v4596_v36 = vpop.f32.mrf.mxu0  ;;  %v4668_v22 = vpop.f32.mrf.mxu1 }
  0xf3   : > { %v4597_v3 = vpop.f32.mrf.mxu0  ;;  %v4669_v54 = vpop.f32.mrf.mxu1 }
  0xf4   : > { %v6049_v13 = vadd.f32 %v4597_v3, %v4596_v36  ;;  %v6053_v43 = vadd.f32 %v4669_v54, %v4668_v22  ;;  %v5314_v3 = vld [vmem:[#allocation2 + $0x50] ss:$12 sps:$4 sm:$0xff]  }
  0xf5   : > { %v4599_v14 = vpop.f32.mrf.mxu0  ;;  %v4671_v16 = vpop.f32.mrf.mxu1  ;;  %3277 = vmatmul.mubr.bf16.gmra.mxu0 %v5287_v9 }
  0xf6   : > { %3284 = vmatprep.mubr.bf16.mxu0 %v5299_v11 }
  0xf7   : > { %v4600_v17 = vpop.f32.mrf.mxu0  ;;  %v4672_v8 = vpop.f32.mrf.mxu1  ;;  %2619 = vmatmul.mubr.bf16.gmra.mxu1 %v6061_v12 }
  0xf8   : > { %v6057_v18 = vadd.f32 %v4600_v17, %v4599_v14  ;;  %v6059_v23 = vadd.f32 %v4672_v8, %v4671_v16  ;;  %2626 = vmatprep.mubr.bf16.mxu1 %v6065_v1  ;;  %v5315_v14 = vld [vmem:[#allocation2 + $0x68] ss:$12 sps:$4 sm:$0xff]  }
  0xf9   : > { %v4602_v26 = vpop.f32.mrf.mxu0  ;;  %v4674_v28 = vpop.f32.mrf.mxu1 }
  0xfb   : > { %v4603_v21 = vpop.f32.mrf.mxu0  ;;  %v4675_v5 = vpop.f32.mrf.mxu1 }
  0xfc   : > { %v6063_v30 = vadd.f32 %v4603_v21, %v4602_v26  ;;  %v6067_v34 = vadd.f32 %v4675_v5, %v4674_v28 }
  0xfd   : > { %v4605_v35 = vpop.f32.mrf.mxu0  ;;  %3285 = vmatmul.mubr.bf16.gmra.mxu0 %v5303_v29  ;;  %v4677_v44 = vpop.f32.mrf.mxu1 }
  0xfe   : > { %3292 = vmatprep.mubr.bf16.mxu0 %v5306_v32 }
  0xff   : > { %v4606_v10 = vpop.f32.mrf.mxu0  ;;  %v4678_v48 = vpop.f32.mrf.mxu1  ;;  %2627 = vmatmul.mubr.bf16.gmra.mxu1 %v6073_v45 }
 0x100   : > { %v6071_v38 = vadd.f32 %v4606_v10, %v4605_v35  ;;  %v6079_v51 = vadd.f32 %v4678_v48, %v4677_v44  ;;  %2634 = vmatprep.mubr.bf16.mxu1 %v6077_v61  ;;  %v5316_v35 = vld [vmem:[#allocation2 + $0x80] ss:$12 sps:$4 sm:$0xff]   ;;  %v5317_v44 = vld [vmem:[#allocation2 + $0x98] ss:$12 sps:$4 sm:$0xff]  }
 0x101   : > { %v4608_v39 = vpop.f32.mrf.mxu0  ;;  %v4680_v52 = vpop.f32.mrf.mxu1 }
 0x103   : > { %v4609_v15 = vpop.f32.mrf.mxu0  ;;  %v4681_v19 = vpop.f32.mrf.mxu1 }
 0x104   : > { %v6075_v42 = vadd.f32 %v4609_v15, %v4608_v39  ;;  %v6083_v59 = vadd.f32 %v4681_v19, %v4680_v52  ;;  %v5318_v19 = vld [vmem:[#allocation2 + $0xb0] ss:$12 sps:$4 sm:$0xff]  }
 0x105   : > { %v4611_v7 = vpop.f32.mrf.mxu0  ;;  %3293 = vmatmul.mubr.bf16.gmra.mxu0 %v5309_v33  ;;  %v4683_v49 = vpop.f32.mrf.mxu1 }
 0x106   : > { %3300 = vmatprep.mubr.bf16.mxu0 %v5312_v4 }
 0x107   : > { %v4612_v53 = vpop.f32.mrf.mxu0  ;;  %v4684_v50 = vpop.f32.mrf.mxu1  ;;  %2635 = vmatmul.mubr.bf16.gmra.mxu1 %v6085_v58 }
 0x108   : > { %v4613_v55 = vadd.f32 %v4612_v53, %v4611_v7  ;;  %v6087_v47 = vadd.f32 %v4684_v50, %v4683_v49  ;;  %5097 = vmatprep.mubr.bf16.mxu1 %v5313_v25 }
 0x109   : > { %v4614_v60 = vpop.f32.mrf.mxu0  ;;  %v4686_v9 = vpop.f32.mrf.mxu1 }
 0x10b   : > { %v4615_v56 = vpop.f32.mrf.mxu0  ;;  %v4687_v62 = vpop.f32.mrf.mxu1 }
 0x10c   : > { %v4616_v57 = vadd.f32 %v4615_v56, %v4614_v60  ;;  %v6091_v40 = vadd.f32 %v4687_v62, %v4686_v9  ;;  %v5319_v60 = vld [vmem:[#allocation2 + $0xc8] ss:$12 sps:$4 sm:$0xff]   ;;  %v5320_v62 = vld [vmem:[#allocation2 + $0xe0] ss:$12 sps:$4 sm:$0xff]  }
 0x10d   : > { %v4617_v41 = vpop.f32.mrf.mxu0  ;;  %3301 = vmatmul.mubr.bf16.gmra.mxu0 %v5310_v46  ;;  %v5003_v22 = vpop.f32.mrf.mxu1 }
 0x10e   : > { %3308 = vmatprep.mubr.bf16.mxu0 %v5895_v2  ;;  %v6094_v54 = vadd.f32 %v5003_v22, %v6057_v18  ;;  %v5321_v22 = vld [vmem:[#allocation2 + $0xf8] ss:$12 sps:$4 sm:$0xff]  }
 0x10f   : > { %v4618_v37 = vpop.f32.mrf.mxu0  ;;  %v1955_v16 = vpop.f32.mrf.mxu1  ;;  %5098 = vmatmul.mubr.bf16.vlgmr.msra.gmra.mxu1 %v5314_v3 }
 0x110   : > { %v4619_v31 = vadd.f32 %v4618_v37, %v4617_v41  ;;  %v6097_v8 = vadd.f32 %v6045_v24, %v1955_v16  ;;  %5101 = vmatprep.mubr.bf16.mxu1 %v5315_v14 }
 0x111   : > { %v4620_v36 = vpop.f32.mrf.mxu0  ;;  %v5004_v2 = vpop.f32.mrf.mxu1 }
 0x112   : > { %v6101_v28 = vadd.f32 %v5004_v2, %v6063_v30 }
 0x113   : > { %v4621_v11 = vpop.f32.mrf.mxu0  ;;  %v1958_v18 = vpop.f32.mrf.mxu1 }
 0x114   : > { %v4622_v17 = vadd.f32 %v4621_v11, %v4620_v36  ;;  %v6105_v5 = vadd.f32 %v6049_v13, %v1958_v18 }
 0x115   : > { %v4623_v26 = vpop.f32.mrf.mxu0  ;;  %3309 = vmatmul.mubr.bf16.gmra.mxu0 %v5949_v63  ;;  %v5007_v24 = vpop.f32.mrf.mxu1 }
 0x116   : > { %3316 = vmatprep.mubr.bf16.mxu0 %v5920_v27  ;;  %v6107_v10 = vadd.f32 %v5007_v24, %v4613_v55 }
 0x117   : > { %v4624_v21 = vpop.f32.mrf.mxu0  ;;  %v1971_v63 = vpop.f32.mrf.mxu1  ;;  %5102 = vmatmul.mubr.bf16.gmra.mxu1 %v5316_v35  ;;  %v5323_v35 = vld [vmem:[#allocation2 + $0x128] ss:$12 sps:$4 sm:$0xff]  }
 0x118   : > { %v4625_v29 = vadd.f32 %v4624_v21, %v4623_v26  ;;  %v6110_v30 = vadd.f32 %v6071_v38, %v1971_v63  ;;  %5105 = vmatprep.mubr.bf16.mxu1 %v5317_v44 }
 0x119   : > { %v4626_v32 = vpop.f32.mrf.mxu0  ;;  %v5008_v33 = vpop.f32.mrf.mxu1 }
 0x11a   : > { %v6113_v4 = vadd.f32 %v5008_v33, %v4616_v57 }
 0x11b   : > { %v4627_v39 = vpop.f32.mrf.mxu0  ;;  %v1974_v13 = vpop.f32.mrf.mxu1 }
 0x11c   : > { %v4628_v15 = vadd.f32 %v4627_v39, %v4626_v32  ;;  %v6117_v7 = vadd.f32 %v6075_v42, %v1974_v13  ;;  %v5327_v39 = vld [vmem:[#allocation2 + $0x184] ss:$12 sps:$4 sm:$0xff]  }
 0x11d   : > { %v4629_v27 = vpop.f32.mrf.mxu0  ;;  %3317 = vmatmul.mubr.bf16.gmra.mxu0 %v5956_v6  ;;  %v5011_v53 = vpop.f32.mrf.mxu1 }
 0x11e   : > { %3324 = vmatprep.mubr.bf16.mxu0 %v6051_v0  ;;  %v6119_v55 = vadd.f32 %v5011_v53, %v4625_v29  ;;  %v5322_v29 = vld [vmem:[#allocation2 + $0x110] ss:$12 sps:$4 sm:$0xff]   ;;  %v5324_v53 = vld [vmem:[#allocation2 + $0x140] ss:$12 sps:$4 sm:$0xff]  }
 0x11f   : > { %v4630_v48 = vpop.f32.mrf.mxu0  ;;  %v1987_v49 = vpop.f32.mrf.mxu1  ;;  %5106 = vmatmul.mubr.bf16.gmra.mxu1 %v5318_v19 }
 0x120   : > { %v4631_v52 = vadd.f32 %v4630_v48, %v4629_v27  ;;  %v6121_v6 = vadd.f32 %v4619_v31, %v1987_v49  ;;  %5109 = vmatprep.mubr.bf16.mxu1 %v5319_v60  ;;  %v5328_v49 = vld [vmem:[#allocation2 + $0x158] ss:$12 sps:$4 sm:$0xff]  }
 0x121   : > { %v4632_v38 = vpop.f32.mrf.mxu0  ;;  %v5012_v25 = vpop.f32.mrf.mxu1 }
 0x122   : > { %v6124_v50 = vadd.f32 %v5012_v25, %v4628_v15 }
 0x123   : > { %v4633_v46 = vpop.f32.mrf.mxu0  ;;  %v1990_v42 = vpop.f32.mrf.mxu1 }
 0x124   : > { %v4634_v56 = vadd.f32 %v4633_v46, %v4632_v38  ;;  %v6127_v41 = vadd.f32 %v4622_v17, %v1990_v42  ;;  %v5325_v38 = vld [vmem:[#allocation2 + $0x180] ss:$12 sps:$4 sm:$0xff]   ;;  %v5332_v46 = vld [vmem:[#allocation2 + $0x19c] ss:$12 sps:$4 sm:$0xff]  }
 0x125   : > { %v4635_v0 = vpop.f32.mrf.mxu0  ;;  %3325 = vmatmul.mubr.bf16.gmra.mxu0 %v6061_v12  ;;  %v5015_v37 = vpop.f32.mrf.mxu1 }
 0x126   : > { %3332 = vmatprep.mubr.bf16.mxu0 %v6065_v1 }
 0x127   : > { %v4636_v57 = vpop.f32.mrf.mxu0  ;;  %v2003_v3 = vpop.f32.mrf.mxu1  ;;  %5110 = vmatmul.mubr.bf16.gmra.mxu1 %v5320_v62 }
 0x128   : > { %v4637_v9 = vadd.f32 %v4636_v57, %v4635_v0  ;;  %v6131_v14 = vadd.f32 %v4631_v52, %v2003_v3  ;;  %5113 = vmatprep.mubr.bf16.mxu1 %v5321_v22  ;;  %v5330_v3 = vld [vmem:[#allocation2 + $0x198] ss:$12 sps:$4 sm:$0xff]  }
 0x129   : > { %v4638_v31 = vpop.f32.mrf.mxu0  ;;  %v5016_v16 = vpop.f32.mrf.mxu1 }
 0x12a   : > { %v6129_v36 = vadd.f32 %v5015_v37, %v4637_v9 }
 0x12b   : > { %v4639_v11 = vpop.f32.mrf.mxu0  ;;  %v2006_v17 = vpop.f32.mrf.mxu1 }
 0x12c   : > { %v4640_v12 = vadd.f32 %v4639_v11, %v4638_v31  ;;  %v6137_v21 = vadd.f32 %v4634_v56, %v2006_v17  ;;  %v5329_v31 = vld [vmem:[#allocation2 + $0x170] ss:$12 sps:$4 sm:$0xff]  }
 0x12d   : > { %v4641_v26 = vpop.f32.mrf.mxu0  ;;  %3333 = vmatmul.mubr.bf16.gmra.mxu0 %v6073_v45  ;;  %v5019_v24 = vpop.f32.mrf.mxu1 }
 0x12e   : > { %v6134_v1 = vadd.f32 %v5016_v16, %v4640_v12  ;;  %3340 = vmatprep.mubr.bf16.mxu0 %v6077_v61  ;;  %v5333_v12 = vld [vmem:[#allocation2 + $0x188] ss:$12 sps:$4 sm:$0xff]  }
 0x12f   : > { %v4642_v2 = vpop.f32.mrf.mxu0  ;;  %v2019_v63 = vpop.f32.mrf.mxu1  ;;  %5114 = vmatmul.mubr.bf16.gmra.mxu1 %v5322_v29 }
 0x130   : > { %v4643_v18 = vadd.f32 %v4642_v2, %v4641_v26  ;;  %5117 = vmatprep.mubr.bf16.mxu1 %v5323_v35 }
 0x131   : > { %v4644_v32 = vpop.f32.mrf.mxu0  ;;  %v5020_v61 = vpop.f32.mrf.mxu1 }
 0x132   : > { %v6139_v45 = vadd.f32 %v4643_v18, %v2019_v63 }
 0x133   : > { %v4645_v44 = vpop.f32.mrf.mxu0  ;;  %v2022_v13 = vpop.f32.mrf.mxu1 }
 0x134   : > { %v4646_v15 = vadd.f32 %v4645_v44, %v4644_v32 }
 0x135   : > { %v4647_v33 = vpop.f32.mrf.mxu0  ;;  %3341 = vmatmul.mubr.bf16.gmra.mxu0 %v6085_v58 }
 0x136   : > { %3348 = vmatprep.mubr.bf16.mxu0 %v5327_v39  ;;  %v6142_v52 = vadd.f32 %v4646_v15, %v2022_v13  ;;  %v5023_v0 = vpop.f32.mrf.mxu1  ;;  %v5334_v15 = vld [vmem:[#allocation2 + $0x1a0] ss:$12 sps:$4 sm:$0xff]  }
 0x137   : > { %v4648_v27 = vpop.f32.mrf.mxu0  ;;  %5118 = vmatmul.mubr.bf16.gmra.mxu1 %v5324_v53 }
 0x138   : > { %v4649_v48 = vadd.f32 %v4648_v27, %v4647_v33  ;;  %5121 = vmatprep.mubr.bf16.mxu1 %v5328_v49  ;;  %v2035_v57 = vpop.f32.mrf.mxu1 }
 0x139   : > { %v4650_v19 = vpop.f32.mrf.mxu0 }
 0x13a   : > { %v6144_v60 = vadd.f32 %v5019_v24, %v4649_v48  ;;  %v5024_v62 = vpop.f32.mrf.mxu1 }
 0x13b   : > { %v4651_v56 = vpop.f32.mrf.mxu0 }
 0x13c   : > { %v4652_v25 = vadd.f32 %v4651_v56, %v4650_v19  ;;  %v2038_v16 = vpop.f32.mrf.mxu1 }
 0x13d   : > { %v4653_v58 = vpop.f32.mrf.mxu0  ;;  %3349 = vmatmul.mubr.bf16.gmra.mxu0 %v5325_v38 }
 0x13e   : > { %v6146_v42 = vadd.f32 %v5020_v61, %v4652_v25  ;;  %3356 = vmatprep.mubr.bf16.mxu0 %v5332_v46  ;;  %v5027_v2 = vpop.f32.mrf.mxu1 }
 0x13f   : > { %v4654_v9 = vpop.f32.mrf.mxu0  ;;  %5122 = vmatmul.mubr.bf16.gmra.mxu1 %v5329_v31  ;;  %v6151_v29 = vadd.f32 %v5027_v2, %v6059_v23 }
 0x140   : > { %v4655_v37 = vadd.f32 %v4654_v9, %v4653_v58  ;;  %5125 = vmatprep.mubr.bf16.mxu1 %v5333_v12  ;;  %v2051_v24 = vpop.f32.mrf.mxu1 }
 0x141   : > { %v4656_v22 = vpop.f32.mrf.mxu0  ;;  %v6156_v39 = vadd.f32 %v6047_v20, %v2051_v24 }
 0x142   : > { %v6148_v11 = vadd.f32 %v4655_v37, %v2035_v57  ;;  %v5028_v63 = vpop.f32.mrf.mxu1 }
 0x143   : > { %v4657_v26 = vpop.f32.mrf.mxu0  ;;  %v6159_v61 = vadd.f32 %v5028_v63, %v6067_v34 }
 0x144   : > { %v4658_v17 = vadd.f32 %v4657_v26, %v4656_v22  ;;  %v2054_v13 = vpop.f32.mrf.mxu1 }
 0x145   : > { %v4659_v18 = vpop.f32.mrf.mxu0  ;;  %3357 = vmatmul.mubr.bf16.gmra.mxu0 %v5330_v3  ;;  %v6164_v48 = vadd.f32 %v6053_v43, %v2054_v13 }
 0x146   : > { %v6153_v32 = vadd.f32 %v4658_v17, %v2038_v16  ;;  %v5031_v19 = vpop.f32.mrf.mxu1 }
 0x147   : > { %v4660_v35 = vpop.f32.mrf.mxu0  ;;  %5126 = vmatmul.mubr.bf16.gmra.mxu1 %v5334_v15  ;;  %v6167_v20 = vadd.f32 %v5031_v19, %v6087_v47 }
 0x148   : > { %v4661_v44 = vadd.f32 %v4660_v35, %v4659_v18  ;;  %v2067_v46 = vpop.f32.mrf.mxu1 }
 0x149   : > { %v4662_v33 = vpop.f32.mrf.mxu0  ;;  %v6172_v34 = vadd.f32 %v6079_v51, %v2067_v46 }
 0x14a   : > { %v6161_v27 = vadd.f32 %v5023_v0, %v4661_v44  ;;  %v5032_v25 = vpop.f32.mrf.mxu1 }
 0x14b   : > { %v4663_v23 = vpop.f32.mrf.mxu0  ;;  %v6175_v58 = vadd.f32 %v5032_v25, %v6091_v40 }
 0x14c   : > { %v4664_v53 = vadd.f32 %v4663_v23, %v4662_v33  ;;  %v2070_v43 = vpop.f32.mrf.mxu1 }
 0x14d   : > { %v5051_v38 = vpop.f32.mrf.mxu0  ;;  %6592 = vst [vmem:[#allocation3_spill] sm:$0xff] %v6175_v58  ;;  %v6178_v9 = vadd.f32 %v6083_v59, %v2070_v43 }
 0x14e   : > { %v6169_v49 = vadd.f32 %v5024_v62, %v4664_v53 }
 0x14f   : > { %v2677_v56 = vpop.f32.mrf.mxu0  ;;  %v4729_v37 = vpop.f32.mrf.mxu1 }
 0x151   : > { %v5052_v0 = vpop.f32.mrf.mxu0  ;;  %v4730_v31 = vpop.f32.mrf.mxu1 }
 0x152   : > { %v4731_v22 = vadd.f32 %v4730_v31, %v4729_v37 }
 0x153   : > { %v2680_v57 = vpop.f32.mrf.mxu0  ;;  %v4732_v3 = vpop.f32.mrf.mxu1 }
 0x154   : > { %v2517_v51 = vadd.f32 %v4731_v22, %v6097_v8 }
 0x155   : > { %v5055_v47 = vpop.f32.mrf.mxu0  ;;  %v4733_v16 = vpop.f32.mrf.mxu1 }
 0x156   : > { %v6181_v17 = vadd.f32 %v2677_v56, %v2517_v51  ;;  %v4734_v40 = vadd.f32 %v4733_v16, %v4732_v3 }
 0x157   : > { %v2693_v62 = vpop.f32.mrf.mxu0  ;;  %v4735_v2 = vpop.f32.mrf.mxu1 }
 0x158   : > { %v2520_v59 = vadd.f32 %v4734_v40, %v6105_v5 }
 0x159   : > { %v5056_v12 = vpop.f32.mrf.mxu0  ;;  %v4736_v24 = vpop.f32.mrf.mxu1 }
 0x15a   : > { %v6186_v44 = vadd.f32 %v2680_v57, %v2520_v59  ;;  %v4737_v63 = vadd.f32 %v4736_v24, %v4735_v2 }
 0x15b   : > { %v2696_v26 = vpop.f32.mrf.mxu0  ;;  %v4738_v15 = vpop.f32.mrf.mxu1 }
 0x15c   : > { %v2525_v8 = vadd.f32 %v4737_v63, %v6094_v54 }
 0x15d   : > { %v6183_v18 = vpop.f32.mrf.mxu0  ;;  %v4739_v13 = vpop.f32.mrf.mxu1 }
 0x15e   : > { %v4740_v53 = vadd.f32 %v4739_v13, %v4738_v15  ;;  %v6191_v19 = vadd.f32 %v5051_v38, %v2525_v8 }
 0x15f   : > { %v2709_v35 = vpop.f32.mrf.mxu0  ;;  %v4741_v46 = vpop.f32.mrf.mxu1 }
 0x160   : > { %v2528_v5 = vadd.f32 %v4740_v53, %v6101_v28 }
 0x161   : > { %v6188_v33 = vpop.f32.mrf.mxu0  ;;  %v4742_v25 = vpop.f32.mrf.mxu1 }
 0x162   : > { %v4743_v57 = vadd.f32 %v4742_v25, %v4741_v46  ;;  %v6198_v37 = vadd.f32 %v5052_v0, %v2528_v5 }
 0x163   : > { %v2712_v23 = vpop.f32.mrf.mxu0  ;;  %v4744_v31 = vpop.f32.mrf.mxu1 }
 0x164   : > { %v2533_v54 = vadd.f32 %v4743_v57, %v6110_v30 }
 0x165   : > { %v6193_v56 = vpop.f32.mrf.mxu0  ;;  %v4745_v3 = vpop.f32.mrf.mxu1 }
 0x166   : > { %v4746_v38 = vadd.f32 %v4745_v3, %v4744_v31  ;;  %v6205_v16 = vadd.f32 %v2693_v62, %v2533_v54 }
 0x167   : > { %v6196_v43 = vpop.f32.mrf.mxu0  ;;  %v4747_v40 = vpop.f32.mrf.mxu1 }
 0x168   : > { %v2536_v28 = vadd.f32 %v4746_v38, %v6117_v7 }
 0x169   : > { %v6200_v22 = vpop.f32.mrf.mxu0  ;;  %v4748_v59 = vpop.f32.mrf.mxu1 }
 0x16a   : > { %v4749_v0 = vadd.f32 %v4748_v59, %v4747_v40  ;;  %v6212_v63 = vadd.f32 %v2696_v26, %v2536_v28 }
 0x16b   : > { %v6203_v51 = vpop.f32.mrf.mxu0  ;;  %v4750_v15 = vpop.f32.mrf.mxu1 }
 0x16c   : > { %v2541_v30 = vadd.f32 %v4749_v0, %v6107_v10 }
 0x16d   : > { %v6207_v2 = vpop.f32.mrf.mxu0  ;;  %v4751_v13 = vpop.f32.mrf.mxu1 }
 0x16e   : > { %v4752_v62 = vadd.f32 %v4751_v13, %v4750_v15  ;;  %v6219_v46 = vadd.f32 %v5055_v47, %v2541_v30 }
 0x16f   : > { %v6210_v24 = vpop.f32.mrf.mxu0  ;;  %v4753_v5 = vpop.f32.mrf.mxu1 }
 0x170   : > { %v2544_v7 = vadd.f32 %v4752_v62, %v6113_v4 }
 0x171   : > { %v6214_v8 = vpop.f32.mrf.mxu0  ;;  %v4754_v57 = vpop.f32.mrf.mxu1 }
 0x172   : > { %v4755_v26 = vadd.f32 %v4754_v57, %v4753_v5  ;;  %v6226_v54 = vadd.f32 %v5056_v12, %v2544_v7 }
 0x173   : > { %v6217_v53 = vpop.f32.mrf.mxu0  ;;  %v4756_v3 = vpop.f32.mrf.mxu1 }
 0x174   : > { %v2549_v10 = vadd.f32 %v4755_v26, %v6121_v6 }
 0x175   : > { %v6221_v25 = vpop.f32.mrf.mxu0  ;;  %v4757_v40 = vpop.f32.mrf.mxu1 }
 0x176   : > { %v4758_v47 = vadd.f32 %v4757_v40, %v4756_v3  ;;  %v6233_v59 = vadd.f32 %v2709_v35, %v2549_v10 }
 0x177   : > { %v6224_v31 = vpop.f32.mrf.mxu0  ;;  %v4759_v0 = vpop.f32.mrf.mxu1 }
 0x178   : > { %v2552_v4 = vadd.f32 %v4758_v47, %v6127_v41 }
 0x179   : > { %v6228_v38 = vpop.f32.mrf.mxu0  ;;  %v4760_v30 = vpop.f32.mrf.mxu1 }
 0x17a   : > { %v4761_v12 = vadd.f32 %v4760_v30, %v4759_v0  ;;  %v6240_v62 = vadd.f32 %v2712_v23, %v2552_v4 }
 0x17b   : > { %v6231_v28 = vpop.f32.mrf.mxu0  ;;  %v4762_v5 = vpop.f32.mrf.mxu1 }
 0x17c   : > { %v2557_v6 = vadd.f32 %v4761_v12, %v6119_v55 }
 0x17d   : > { %v6235_v15 = vpop.f32.mrf.mxu0  ;;  %v4763_v57 = vpop.f32.mrf.mxu1 }
 0x17e   : > { %6593 = vst [vmem:[#allocation4_spill] sm:$0xff] %v6235_v15  ;;  %v4764_v35 = vadd.f32 %v4763_v57, %v4762_v5  ;;  %v6248_v3 = vadd.f32 %v6183_v18, %v2557_v6 }
 0x17f   : > { %v6238_v13 = vpop.f32.mrf.mxu0  ;;  %v4765_v10 = vpop.f32.mrf.mxu1 }
 0x180   : > { %v2560_v40 = vadd.f32 %v4764_v35, %v6124_v50 }
 0x181   : > { %v6242_v7 = vpop.f32.mrf.mxu0  ;;  %v4766_v47 = vpop.f32.mrf.mxu1 }
 0x182   : > { %6594 = vst [vmem:[#allocation5_spill] sm:$0xff] %v6242_v7  ;;  %v4767_v0 = vadd.f32 %v4766_v47, %v4765_v10  ;;  %v6256_v4 = vadd.f32 %v6188_v33, %v2560_v40 }
 0x183   : > { %v6245_v26 = vpop.f32.mrf.mxu0  ;;  %v4768_v55 = vpop.f32.mrf.mxu1 }
 0x184   : > { %v2565_v12 = vadd.f32 %v4767_v0, %v6131_v14 }
 0x185   : > { %v6250_v41 = vpop.f32.mrf.mxu0  ;;  %v4769_v5 = vpop.f32.mrf.mxu1 }
 0x186   : > { %6595 = vst [vmem:[#allocation6_spill] sm:$0xff] %v6250_v41  ;;  %v4770_v6 = vadd.f32 %v4769_v5, %v4768_v55  ;;  %v6264_v57 = vadd.f32 %v6196_v43, %v2565_v12 }
 0x187   : > { %v6253_v23 = vpop.f32.mrf.mxu0  ;;  %v4771_v50 = vpop.f32.mrf.mxu1 }
 0x188   : > { %6596 = vst [vmem:[#allocation7_spill] sm:$0xff] %v6253_v23  ;;  %v2568_v41 = vadd.f32 %v4770_v6, %v6137_v21 }
 0x189   : > { %v6258_v30 = vpop.f32.mrf.mxu0  ;;  %v4772_v10 = vpop.f32.mrf.mxu1 }
 0x18a   : > { %6597 = vst [vmem:[#allocation8_spill] sm:$0xff] %v6258_v30  ;;  %v4773_v33 = vadd.f32 %v4772_v10, %v4771_v50  ;;  %v6270_v30 = vadd.f32 %v6203_v51, %v2568_v41 }
 0x18b   : > { %v6261_v18 = vpop.f32.mrf.mxu0  ;;  %v4774_v14 = vpop.f32.mrf.mxu1 }
 0x18c   : > { %6598 = vst [vmem:[#allocation9_spill] sm:$0xff] %v6261_v18  ;;  %v2573_v18 = vadd.f32 %v4773_v33, %v6129_v36 }
 0x18d   : > { %v4865_v35 = vpop.f32.mrf.mxu0  ;;  %v4775_v55 = vpop.f32.mrf.mxu1 }
 0x18e   : > { %v4776_v43 = vadd.f32 %v4775_v55, %v4774_v14  ;;  %v6276_v23 = vadd.f32 %v6193_v56, %v2573_v18 }
 0x18f   : > { %v4866_v47 = vpop.f32.mrf.mxu0  ;;  %v4777_v21 = vpop.f32.mrf.mxu1 }
 0x190   : > { %v6267_v40 = vadd.f32 %v4866_v47, %v4865_v35  ;;  %v2576_v50 = vadd.f32 %v4776_v43, %v6134_v1 }
 0x191   : > { %v4868_v0 = vpop.f32.mrf.mxu0  ;;  %v4778_v35 = vpop.f32.mrf.mxu1 }
 0x192   : > { %v4779_v41 = vadd.f32 %v4778_v35, %v4777_v21  ;;  %v6284_v10 = vadd.f32 %v6200_v22, %v2576_v50 }
 0x193   : > { %v4869_v5 = vpop.f32.mrf.mxu0  ;;  %v4780_v36 = vpop.f32.mrf.mxu1 }
 0x194   : > { %v6273_v12 = vadd.f32 %v4869_v5, %v4868_v0  ;;  %v2581_v33 = vadd.f32 %v4779_v41, %v6139_v45 }
 0x195   : > { %v6278_v6 = vpop.f32.mrf.mxu0  ;;  %v4781_v14 = vpop.f32.mrf.mxu1 }
 0x196   : > { %v4782_v18 = vadd.f32 %v4781_v14, %v4780_v36  ;;  %v6292_v0 = vadd.f32 %v6210_v24, %v2581_v33 }
 0x197   : > { %v6281_v51 = vpop.f32.mrf.mxu0  ;;  %v4783_v1 = vpop.f32.mrf.mxu1 }
 0x198   : > { %6599 = vst [vmem:[#allocation10_spill] sm:$0xff] %v6292_v0  ;;  %v2584_v5 = vadd.f32 %v4782_v18, %v6142_v52 }
 0x199   : > { %v6286_v47 = vpop.f32.mrf.mxu0  ;;  %v4784_v43 = vpop.f32.mrf.mxu1 }
 0x19a   : > { %v4785_v21 = vadd.f32 %v4784_v43, %v4783_v1  ;;  %v6300_v50 = vadd.f32 %v6217_v53, %v2584_v5 }
 0x19b   : > { %v6289_v56 = vpop.f32.mrf.mxu0  ;;  %v4786_v45 = vpop.f32.mrf.mxu1 }
 0x19c   : > { %6600 = vst [vmem:[#allocation11_spill] sm:$0xff] %v6300_v50  ;;  %v2589_v41 = vadd.f32 %v4785_v21, %v6144_v60 }
 0x19d   : > { %v6294_v55 = vpop.f32.mrf.mxu0  ;;  %v4787_v36 = vpop.f32.mrf.mxu1 }
 0x19e   : > { %v4788_v33 = vadd.f32 %v4787_v36, %v4786_v45  ;;  %v6308_v14 = vadd.f32 %v6207_v2, %v2589_v41 }
 0x19f   : > { %v6297_v22 = vpop.f32.mrf.mxu0  ;;  %v4789_v52 = vpop.f32.mrf.mxu1 }
 0x1a0   : > { %6601 = vst [vmem:[#allocation12_spill] sm:$0xff] %v6308_v14  ;;  %v2592_v1 = vadd.f32 %v4788_v33, %v6146_v42 }
 0x1a1   : > { %v6302_v35 = vpop.f32.mrf.mxu0  ;;  %v4790_v43 = vpop.f32.mrf.mxu1 }
 0x1a2   : > { %v4791_v5 = vadd.f32 %v4790_v43, %v4789_v52  ;;  %v6316_v58 = vadd.f32 %v6214_v8, %v2592_v1 }
 0x1a3   : > { %v6305_v24 = vpop.f32.mrf.mxu0  ;;  %v4792_v60 = vpop.f32.mrf.mxu1 }
 0x1a4   : > { %6602 = vst [vmem:[#allocation13_spill] sm:$0xff] %v6316_v58  ;;  %v2597_v45 = vadd.f32 %v4791_v5, %v6148_v11 }
 0x1a5   : > { %v6310_v18 = vpop.f32.mrf.mxu0  ;;  %v4793_v36 = vpop.f32.mrf.mxu1 }
 0x1a6   : > { %v4794_v41 = vadd.f32 %v4793_v36, %v4792_v60  ;;  %v6324_v7 = vadd.f32 %v6224_v31, %v2597_v45 }
 0x1a7   : > { %v6313_v53 = vpop.f32.mrf.mxu0  ;;  %v4795_v42 = vpop.f32.mrf.mxu1 }
 0x1a8   : > { %6603 = vst [vmem:[#allocation14_spill] sm:$0xff] %v6324_v7  ;;  %v2600_v52 = vadd.f32 %v4794_v41, %v6153_v32 }
 0x1a9   : > { %v6318_v21 = vpop.f32.mrf.mxu0  ;;  %v4796_v43 = vpop.f32.mrf.mxu1 }
 0x1aa   : > { %v4797_v1 = vadd.f32 %v4796_v43, %v4795_v42  ;;  %v6332_v15 = vadd.f32 %v6231_v28, %v2600_v52 }
 0x1ab   : > { %v6321_v2 = vpop.f32.mrf.mxu0  ;;  %v4798_v11 = vpop.f32.mrf.mxu1 }
 0x1ac   : > { %6604 = vst [vmem:[#allocation15_spill] sm:$0xff] %v6332_v15  ;;  %v2605_v60 = vadd.f32 %v4797_v1, %v6161_v27 }
 0x1ad   : > { %v6326_v33 = vpop.f32.mrf.mxu0  ;;  %v4799_v36 = vpop.f32.mrf.mxu1 }
 0x1ae   : > { %v4800_v45 = vadd.f32 %v4799_v36, %v4798_v11  ;;  %v6340_v7 = vadd.f32 %v6221_v25, %v2605_v60 }
 0x1af   : > { %v6329_v8 = vpop.f32.mrf.mxu0  ;;  %v4801_v32 = vpop.f32.mrf.mxu1 }
 0x1b0   : > { %6605 = vst [vmem:[#allocation16_spill] sm:$0xff] %v6340_v7  ;;  %v2608_v42 = vadd.f32 %v4800_v45, %v6169_v49 }
 0x1b1   : > { %v6334_v5 = vpop.f32.mrf.mxu0  ;;  %v4802_v43 = vpop.f32.mrf.mxu1 }
 0x1b2   : > { %v4803_v52 = vadd.f32 %v4802_v43, %v4801_v32  ;;  %v6348_v15 = vadd.f32 %v6228_v38, %v2608_v42 }
 0x1b3   : > { %v6337_v31 = vpop.f32.mrf.mxu0  ;;  %v4804_v27 = vpop.f32.mrf.mxu1 }
 0x1b4   : > { %6606 = vst [vmem:[#allocation17_spill] sm:$0xff] %v6348_v15  ;;  %v2613_v11 = vadd.f32 %v4803_v52, %v6156_v39 }
 0x1b5   : > { %v6342_v41 = vpop.f32.mrf.mxu0  ;;  %v4805_v36 = vpop.f32.mrf.mxu1 }
 0x1b6   : > { %v4806_v60 = vadd.f32 %v4805_v36, %v4804_v27  ;;  %v6356_v7 = vadd.f32 %v6238_v13, %v2613_v11 }
 0x1b7   : > { %v6345_v28 = vpop.f32.mrf.mxu0  ;;  %v4807_v49 = vpop.f32.mrf.mxu1 }
 0x1b8   : > { %6607 = vst [vmem:[#allocation18_spill] sm:$0xff] %v6356_v7  ;;  %v2616_v32 = vadd.f32 %v4806_v60, %v6164_v48 }
 0x1b9   : > { %v6350_v1 = vpop.f32.mrf.mxu0  ;;  %v4808_v43 = vpop.f32.mrf.mxu1 }
 0x1ba   : > { %v4809_v42 = vadd.f32 %v4808_v43, %v4807_v49  ;;  %v6364_v15 = vadd.f32 %v6245_v26, %v2616_v32 }
 0x1bb   : > { %v6353_v25 = vpop.f32.mrf.mxu0  ;;  %v4810_v39 = vpop.f32.mrf.mxu1 }
 0x1bc   : > { %6608 = vst [vmem:[#allocation19_spill] sm:$0xff] %v6364_v15  ;;  %v6369_v27 = vadd.f32 %v4809_v42, %v6151_v29 }
 0x1bd   : > { %v6358_v45 = vpop.f32.mrf.mxu0  ;;  %v4811_v13 = vpop.f32.mrf.mxu1 }
 0x1be   : > { %6609 = vst [vmem:[#allocation20_spill] sm:$0xff] %v6369_v27  ;;  %v4812_v36 = vadd.f32 %v4811_v13, %v4810_v39 }
 0x1bf   : > { %v6361_v38 = vpop.f32.mrf.mxu0  ;;  %v4813_v7 = vpop.f32.mrf.mxu1 }
 0x1c0   : > { %v6376_v48 = vadd.f32 %v4812_v36, %v6159_v61 }
 0x1c1   : > { %v6366_v52 = vpop.f32.mrf.mxu0  ;;  %v4814_v60 = vpop.f32.mrf.mxu1 }
 0x1c2   : > { %6610 = vst [vmem:[#allocation21_spill] sm:$0xff] %v6376_v48  ;;  %v4815_v26 = vadd.f32 %v4814_v60, %v4813_v7 }
 0x1c3   : > { %v6371_v11 = vpop.f32.mrf.mxu0  ;;  %v4816_v32 = vpop.f32.mrf.mxu1 }
 0x1c4   : > { %v6383_v29 = vadd.f32 %v4815_v26, %v6172_v34 }
 0x1c5   : > { %v6373_v50 = vpop.f32.mrf.mxu0  ;;  %v4817_v42 = vpop.f32.mrf.mxu1 }
 0x1c6   : > { %6611 = vst [vmem:[#allocation22_spill] sm:$0xff] %v6383_v29  ;;  %v4818_v39 = vadd.f32 %v4817_v42, %v4816_v32 }
 0x1c7   : > { %v6378_v49 = vpop.f32.mrf.mxu0  ;;  %v4819_v13 = vpop.f32.mrf.mxu1 }
 0x1c8   : > { %v6390_v61 = vadd.f32 %v4818_v39, %v6178_v9  ;;  %v4873_v9 = vadd.f32 %v6281_v51, %v6278_v6 }
 0x1c9   : > { %v6380_v43 = vpop.f32.mrf.mxu0  ;;  %v4820_v36 = vpop.f32.mrf.mxu1 }
 0x1ca   : > { %6612 = vst [vmem:[#allocation23_spill] sm:$0xff] %v6390_v61  ;;  %v4821_v7 = vadd.f32 %v4820_v36, %v4819_v13  ;;  %v4876_v36 = vadd.f32 %v6289_v56, %v6286_v47  ;;  %v4885_v47 = vadd.f32 %v6313_v53, %v6310_v18 }
 0x1cb   : > { %v6385_v15 = vpop.f32.mrf.mxu0  ;;  %v6394_v60 = vpop.f32.mrf.mxu1 }
 0x1cc   : > { %6613 = vst [vmem:[#allocation24_spill] sm:$0xff] %v6394_v60  ;;  %v6399_v34 = vadd.f32 %v4821_v7, %v6167_v20 }
 0x1cd   : > { %v6387_v27 = vpop.f32.mrf.mxu0  ;;  %v6401_v26 = vpop.f32.mrf.mxu1 }
 0x1ce   : > { %6614 = vst [vmem:[#allocation25_spill] sm:$0xff] %v6399_v34  ;;  %6615 = vst [vmem:[#allocation26_spill] sm:$0xff] %v6401_v26 }
 0x1cf   : > { %v6392_v48 = vpop.f32.mrf.mxu0  ;;  %v5099_v42 = vpop.f32.mrf.mxu1 }
 0x1d0   : > { %v3408_v61 = vadd.f32 %v5099_v42, %v4873_v9 }
 0x1d1   : > { %v6396_v58 = vpop.f32.mrf.mxu0  ;;  %v3399_v39 = vpop.f32.mrf.mxu1 }
 0x1d2   : > { %v3400_v20 = vadd.f32 %v6267_v40, %v3399_v39  ;;  %v3528_v6 = vadd.f32 %v3408_v61, %v6191_v19  ;;  %v4882_v39 = vadd.f32 %v6305_v24, %v6302_v35 }
 0x1d3   : > { %v6403_v32 = vpop.f32.mrf.mxu0  ;;  %v5100_v7 = vpop.f32.mrf.mxu1 }
 0x1d4   : > { %6616 = vst [vmem:[#allocation27_spill] sm:$0xff] %v6403_v32  ;;  %v3526_v26 = vadd.f32 %v3400_v20, %v6181_v17  ;;  %v3411_v60 = vadd.f32 %v5100_v7, %v4876_v36 }
 0x1d5   : > { %v6405_v29 = vpop.f32.mrf.mxu0  ;;  %v3402_v14 = vpop.f32.mrf.mxu1 }
 0x1d6   : > { %v3529_v51 = vadd.f32 %v3411_v60, %v6198_v37  ;;  %v3403_v32 = vadd.f32 %v6273_v12, %v3402_v14  ;;  %v4879_v37 = vadd.f32 %v6297_v22, %v6294_v55  ;;  %v4888_v12 = vadd.f32 %v6321_v2, %v6318_v21 }
 0x1d7   : > { %v6409_v13 = vpop.f32.mrf.mxu0  ;;  %v5103_v17 = vpop.f32.mrf.mxu1  ;;  %v3755_v61 = vmul.f32 %v3526_v26, %v3526_v26  ;;  %v3757_v55 = vmul.f32 %v3528_v6, %v3528_v6 }
 0x1d8   : > { %v4475_v56 = vpack.c.bf16 %v3529_v51, %v3528_v6  ;;  %v3527_v19 = vadd.f32 %v3403_v32, %v6186_v44  ;;  %v3424_v14 = vadd.f32 %v5103_v17, %v4885_v47  ;;  %v3758_v20 = vmul.f32 %v3529_v51, %v3529_v51 }
 0x1d9   : > { %v6414_v34 = vpop.f32.mrf.mxu0  ;;  %v3415_v18 = vpop.f32.mrf.mxu1 }
 0x1da   : > { %4562 = vst [vmem:[%s6429_s17 + $0x8] sm:$0xff] %v4475_v56   ;;  %v4470_v60 = vpack.c.bf16 %v3527_v19, %v3526_v26  ;;  %v3718_v42 = vadd.f32 %v3527_v19, %v3526_v26  ;;  %v3756_v9 = vmul.f32 %v3527_v19, %v3527_v19  ;;  %v3416_v44 = vadd.f32 %v4879_v37, %v3415_v18 }
 0x1db   : > { %v6417_v0 = vpop.f32.mrf.mxu0  ;;  %v5104_v32 = vpop.f32.mrf.mxu1  ;;  %v3532_v7 = vadd.f32 %v3424_v14, %v6219_v46  ;;  %v4891_v37 = vadd.f32 %v6329_v8, %v6326_v33 }
 0x1dc   : > { %4471 = vst [vmem:[%s6429_s17] sm:$0xff] %v4470_v60   ;;  %v3719_v22 = vadd.f32 %v3718_v42, %v3528_v6  ;;  %v3787_v21 = vadd.f32 %v3756_v9, %v3755_v61  ;;  %v3427_v2 = vadd.f32 %v5104_v32, %v4888_v12  ;;  %v3530_v47 = vadd.f32 %v3416_v44, %v6205_v16 }
 0x1dd   : > { %v6431_v40 = vpop.f32.mrf.mxu0  ;;  %v3418_v17 = vpop.f32.mrf.mxu1  ;;  %v4897_v6 = vadd.f32 %v6345_v28, %v6342_v41 }
 0x1de   : > { %v3788_v56 = vadd.f32 %v3787_v21, %v3757_v55  ;;  %v3720_v19 = vadd.f32 %v3719_v22, %v3529_v51  ;;  %v3533_v35 = vadd.f32 %v3427_v2, %v6226_v54  ;;  %v3419_v24 = vadd.f32 %v4882_v39, %v3418_v17 }
 0x1df   : > { %v6438_v53 = vpop.f32.mrf.mxu0  ;;  %v5107_v12 = vpop.f32.mrf.mxu1  ;;  %v3759_v16 = vmul.f32 %v3530_v47, %v3530_v47  ;;  %v4900_v54 = vadd.f32 %v6353_v25, %v6350_v1  ;;  %v3761_v22 = vmul.f32 %v3532_v7, %v3532_v7 }
 0x1e0   : > { %v3721_v46 = vadd.f32 %v3720_v19, %v3530_v47  ;;  %v3789_v14 = vadd.f32 %v3788_v56, %v3758_v20  ;;  %v4485_v61 = vpack.c.bf16 %v3533_v35, %v3532_v7  ;;  %v3531_v60 = vadd.f32 %v3419_v24, %v6212_v63 }
 0x1e1   : > { %v6443_v36 = vpop.f32.mrf.mxu0  ;;  %v3431_v51 = vpop.f32.mrf.mxu1  ;;  %v3440_v8 = vadd.f32 %v5107_v12, %v4897_v6  ;;  %v4894_v63 = vadd.f32 %v6337_v31, %v6334_v5  ;;  %v3762_v19 = vmul.f32 %v3533_v35, %v3533_v35 }
 0x1e2   : > { %v3790_v33 = vadd.f32 %v3789_v14, %v3759_v16  ;;  %4564 = vst [vmem:[%s6429_s17 + $0x18] sm:$0xff] %v4485_v61   ;;  %v3432_v41 = vadd.f32 %v4891_v37, %v3431_v51  ;;  %v4480_v28 = vpack.c.bf16 %v3531_v60, %v3530_v47  ;;  %v3722_v9 = vadd.f32 %v3721_v46, %v3531_v60 }
 0x1e3   : > { %v6448_v26 = vpop.f32.mrf.mxu0  ;;  %v3760_v39 = vmul.f32 %v3531_v60, %v3531_v60  ;;  %v5108_v44 = vpop.f32.mrf.mxu1  ;;  %v3536_v47 = vadd.f32 %v3440_v8, %v6248_v3  ;;  %v4912_v3 = vadd.f32 %v6385_v15, %v6380_v43  ;;  %v4906_v15 = vadd.f32 %v6371_v11, %v6366_v52 }
 0x1e4   : > { %v3443_v55 = vadd.f32 %v5108_v44, %v4900_v54  ;;  %4563 = vst [vmem:[%s6429_s17 + $0x10] sm:$0xff] %v4480_v28   ;;  %v3723_v21 = vadd.f32 %v3722_v9, %v3532_v7  ;;  %v3534_v1 = vadd.f32 %v3432_v41, %v6233_v59  ;;  %v4903_v7 = vadd.f32 %v6361_v38, %v6358_v45 }
 0x1e5   : > { %v6455_v18 = vpop.f32.mrf.mxu0  ;;  %v3791_v2 = vadd.f32 %v3790_v33, %v3760_v39  ;;  %v3434_v25 = vpop.f32.mrf.mxu1  ;;  %v4909_v59 = vadd.f32 %v6378_v49, %v6373_v50  ;;  %v3765_v43 = vmul.f32 %v3536_v47, %v3536_v47 }
 0x1e6   : > { %v3537_v17 = vadd.f32 %v3443_v55, %v6256_v4  ;;  %v3435_v56 = vadd.f32 %v4894_v63, %v3434_v25  ;;  %v3724_v37 = vadd.f32 %v3723_v21, %v3533_v35  ;;  %v3763_v46 = vmul.f32 %v3534_v1, %v3534_v1 }
 0x1e7   : > { %v6458_v42 = vpop.f32.mrf.mxu0  ;;  %v3792_v24 = vadd.f32 %v3791_v2, %v3761_v22  ;;  %v5111_v5 = vpop.f32.mrf.mxu1  ;;  %v4915_v2 = vadd.f32 %v6392_v48, %v6387_v27 }
 0x1e8   : > { %v4495_v6 = vpack.c.bf16 %v3537_v17, %v3536_v47  ;;  %v3535_v12 = vadd.f32 %v3435_v56, %v6240_v62  ;;  %v3725_v4 = vadd.f32 %v3724_v37, %v3534_v1  ;;  %v3456_v45 = vadd.f32 %v5111_v5, %v4909_v59 }
 0x1e9   : > { %v6463_v32 = vpop.f32.mrf.mxu0  ;;  %v3793_v16 = vadd.f32 %v3792_v24, %v3762_v19  ;;  %v3447_v35 = vpop.f32.mrf.mxu1  ;;  %v3766_v55 = vmul.f32 %v3537_v17, %v3537_v17 }
 0x1ea   : > { %4566 = vst [vmem:[%s6429_s17 + $0x28] sm:$0xff] %v4495_v6   ;;  %v4490_v61 = vpack.c.bf16 %v3535_v12, %v3534_v1  ;;  %v3764_v60 = vmul.f32 %v3535_v12, %v3535_v12  ;;  %v3448_v38 = vadd.f32 %v4903_v7, %v3447_v35  ;;  %v3726_v50 = vadd.f32 %v3725_v4, %v3535_v12  ;;  %v6619_v35 = vld [vmem:[#allocation12_spill] sm:$0xff] }
 0x1eb   : > { %v6469_v20 = vpop.f32.mrf.mxu0  ;;  %v3794_v51 = vadd.f32 %v3793_v16, %v3763_v46  ;;  %v5112_v49 = vpop.f32.mrf.mxu1  ;;  %v3540_v39 = vadd.f32 %v3456_v45, %v6276_v23  ;;  %v4924_v23 = vadd.f32 %v6417_v0, %v6414_v34 }
 0x1ec   : > { %4565 = vst [vmem:[%s6429_s17 + $0x20] sm:$0xff] %v4490_v61   ;;  %v3459_v62 = vadd.f32 %v5112_v49, %v4912_v3  ;;  %v3727_v33 = vadd.f32 %v3726_v50, %v3536_v47  ;;  %v3538_v41 = vadd.f32 %v3448_v38, %v6264_v57  ;;  %v4921_v57 = vadd.f32 %v6409_v13, %v6405_v29  ;;  %v6618_v3 = vld [vmem:[#allocation10_spill] sm:$0xff] }
 0x1ed   : > { %v6473_v31 = vpop.f32.mrf.mxu0  ;;  %v3795_v8 = vadd.f32 %v3794_v51, %v3764_v60  ;;  %v3450_v28 = vpop.f32.mrf.mxu1  ;;  %v3769_v34 = vmul.f32 %v3540_v39, %v3540_v39  ;;  %v6620_v60 = vld [vmem:[#allocation13_spill] sm:$0xff] }
 0x1ee   : > { %v3541_v44 = vadd.f32 %v3459_v62, %v6284_v10  ;;  %v3451_v63 = vadd.f32 %v4906_v15, %v3450_v28  ;;  %v3728_v21 = vadd.f32 %v3727_v33, %v3537_v17  ;;  %v3767_v47 = vmul.f32 %v3538_v41, %v3538_v41 }
 0x1ef   : > { %v6482_v14 = vpop.f32.mrf.mxu0  ;;  %v3796_v22 = vadd.f32 %v3795_v8, %v3765_v43  ;;  %v5115_v52 = vpop.f32.mrf.mxu1  ;;  %v4927_v62 = vadd.f32 %v6438_v53, %v6431_v40  ;;  %v4933_v43 = vadd.f32 %v6458_v42, %v6455_v18  ;;  %v6621_v8 = vld [vmem:[#allocation11_spill] sm:$0xff]  ;;  %v4936_v28 = vadd.f32 %v6469_v20, %v6463_v32 }
 0x1f0   : > { %v4505_v1 = vpack.c.bf16 %v3541_v44, %v3540_v39  ;;  %v3539_v25 = vadd.f32 %v3451_v63, %v6270_v30  ;;  %v3729_v10 = vadd.f32 %v3728_v21, %v3538_v41  ;;  %v3472_v27 = vadd.f32 %v5115_v52, %v4921_v57  ;;  %v6617_v30 = vld [vmem:[#allocation27_spill] sm:$0xff] }
 0x1f1   : > { %v6485_v54 = vpop.f32.mrf.mxu0  ;;  %v3797_v56 = vadd.f32 %v3796_v22, %v3766_v55  ;;  %v3463_v17 = vpop.f32.mrf.mxu1  ;;  %v4918_v59 = vadd.f32 %v6617_v30, %v6396_v58  ;;  %v3770_v51 = vmul.f32 %v3541_v44, %v3541_v44  ;;  %v4930_v32 = vadd.f32 %v6448_v26, %v6443_v36 }
 0x1f2   : > { %4568 = vst [vmem:[%s6429_s17 + $0x38] sm:$0xff] %v4505_v1   ;;  %v4500_v24 = vpack.c.bf16 %v3539_v25, %v3538_v41  ;;  %v3768_v37 = vmul.f32 %v3539_v25, %v3539_v25  ;;  %v3464_v48 = vadd.f32 %v4915_v2, %v3463_v17  ;;  %v3730_v29 = vadd.f32 %v3729_v10, %v3539_v25  ;;  %v6622_v10 = vld [vmem:[#allocation14_spill] sm:$0xff] }
 0x1f3   : > { %v6491_v9 = vpop.f32.mrf.mxu0  ;;  %v3798_v5 = vadd.f32 %v3797_v56, %v3767_v47  ;;  %v5116_v13 = vpop.f32.mrf.mxu1  ;;  %v3544_v61 = vadd.f32 %v3472_v27, %v6619_v35  ;;  %v6624_v27 = vld [vmem:[#allocation17_spill] sm:$0xff] }
 0x1f4   : > { %4567 = vst [vmem:[%s6429_s17 + $0x30] sm:$0xff] %v4500_v24   ;;  %v3475_v0 = vadd.f32 %v5116_v13, %v4924_v23  ;;  %v3731_v6 = vadd.f32 %v3730_v29, %v3540_v39  ;;  %v3542_v4 = vadd.f32 %v3464_v48, %v6618_v3  ;;  %v6623_v24 = vld [vmem:[#allocation16_spill] sm:$0xff] }
 0x1f5   : > { %v6495_v11 = vpop.f32.mrf.mxu0  ;;  %v3799_v12 = vadd.f32 %v3798_v5, %v3768_v37  ;;  %v3466_v46 = vpop.f32.mrf.mxu1  ;;  %v3773_v1 = vmul.f32 %v3544_v61, %v3544_v61 }
 0x1f6   : > { %v3545_v45 = vadd.f32 %v3475_v0, %v6620_v60  ;;  %v3467_v38 = vadd.f32 %v4918_v59, %v3466_v46  ;;  %v3732_v49 = vadd.f32 %v3731_v6, %v3541_v44  ;;  %v3771_v63 = vmul.f32 %v3542_v4, %v3542_v4  ;;  %v6625_v6 = vld [vmem:[#allocation15_spill] sm:$0xff] }
 0x1f7   : > { %v6504_v19 = vpop.f32.mrf.mxu0  ;;  %v3800_v50 = vadd.f32 %v3799_v12, %v3769_v34  ;;  %v5119_v15 = vpop.f32.mrf.mxu1  ;;  %v4939_v59 = vadd.f32 %v6482_v14, %v6473_v31  ;;  %v6627_v31 = vld [vmem:[#allocation26_spill] sm:$0xff] }
 0x1f8   : > { %v4515_v33 = vpack.c.bf16 %v3545_v45, %v3544_v61  ;;  %v3543_v41 = vadd.f32 %v3467_v38, %v6621_v8  ;;  %v3733_v39 = vadd.f32 %v3732_v49, %v3542_v4  ;;  %v3488_v40 = vadd.f32 %v5119_v15, %v4933_v43  ;;  %v6626_v49 = vld [vmem:[#allocation24_spill] sm:$0xff]  ;;  %v6630_v8 = vld [vmem:[#allocation21_spill] sm:$0xff] }
 0x1f9   : > { %v4946_v7 = vpop.f32.mrf.mxu0  ;;  %v3801_v55 = vadd.f32 %v3800_v50, %v3770_v51  ;;  %v3479_v44 = vpop.f32.mrf.mxu1  ;;  %v3774_v29 = vmul.f32 %v3545_v45, %v3545_v45  ;;  %v4945_v0 = vadd.f32 %v6504_v19, %v6495_v11  ;;  %v4824_v14 = vadd.f32 %v6627_v31, %v6626_v49 }
 0x1fa   : > { %4570 = vst [vmem:[%s6429_s17 + $0x48] sm:$0xff] %v4515_v33   ;;  %v4510_v21 = vpack.c.bf16 %v3543_v41, %v3542_v4  ;;  %v3772_v52 = vmul.f32 %v3543_v41, %v3543_v41  ;;  %v3480_v53 = vadd.f32 %v4927_v62, %v3479_v44  ;;  %v3734_v18 = vadd.f32 %v3733_v39, %v3543_v41  ;;  %v6628_v33 = vld [vmem:[#allocation20_spill] sm:$0xff]  ;;  %v6631_v41 = vld [vmem:[#allocation5_spill] sm:$0xff] }
 0x1fb   : > { %v4947_v16 = vpop.f32.mrf.mxu0  ;;  %v3802_v2 = vadd.f32 %v3801_v55, %v3771_v63  ;;  %v5120_v42 = vpop.f32.mrf.mxu1  ;;  %v3548_v37 = vadd.f32 %v3488_v40, %v6623_v24  ;;  %v4942_v43 = vadd.f32 %v6491_v9, %v6485_v54  ;;  %v6633_v9 = vld [vmem:[#allocation3_spill] sm:$0xff] }
 0x1fc   : > { %4569 = vst [vmem:[%s6429_s17 + $0x40] sm:$0xff] %v4510_v21   ;;  %v3491_v20 = vadd.f32 %v5120_v42, %v4936_v28  ;;  %v3735_v25 = vadd.f32 %v3734_v18, %v3544_v61  ;;  %v3546_v47 = vadd.f32 %v3480_v53, %v6622_v10  ;;  %v4948_v35 = vadd.f32 %v4947_v16, %v4946_v7  ;;  %v6629_v7 = vld [vmem:[#allocation4_spill] sm:$0xff]  ;;  %v6632_v21 = vld [vmem:[#allocation18_spill] sm:$0xff] }
 0x1fd   : > { %v6513_v58 = vpop.f32.mrf.mxu0  ;;  %v3803_v23 = vadd.f32 %v3802_v2, %v3772_v52  ;;  %v3482_v56 = vpop.f32.mrf.mxu1  ;;  %v2782_v16 = vadd.f32 %v6629_v7, %v6628_v33  ;;  %v2785_v28 = vadd.f32 %v6631_v41, %v6630_v8  ;;  %v3777_v63 = vmul.f32 %v3548_v37, %v3548_v37 }
 0x1fe   : > { %v3549_v48 = vadd.f32 %v3491_v20, %v6624_v27  ;;  %v3483_v5 = vadd.f32 %v4930_v32, %v3482_v56  ;;  %v3736_v30 = vadd.f32 %v3735_v25, %v3545_v45  ;;  %v3775_v4 = vmul.f32 %v3546_v47, %v3546_v47  ;;  %v6634_v56 = vld [vmem:[#allocation19_spill] sm:$0xff] }
 0x1ff   : > { %v6522_v22 = vpop.f32.mrf.mxu0  ;;  %v3804_v13 = vadd.f32 %v3803_v23, %v3773_v1  ;;  %v5123_v36 = vpop.f32.mrf.mxu1  ;;  %v2640_v32 = vadd.f32 %v4824_v14, %v6633_v9 }
 0x200   : > { %v4525_v34 = vpack.c.bf16 %v3549_v48, %v3548_v37  ;;  %v3547_v12 = vadd.f32 %v3483_v5, %v6625_v6  ;;  %v3737_v3 = vadd.f32 %v3736_v30, %v3546_v47  ;;  %v3504_v51 = vadd.f32 %v5123_v36, %v4945_v0  ;;  %v6636_v6 = vld [vmem:[#allocation7_spill] sm:$0xff] }
 0x201   : > { %v6525_v57 = vpop.f32.mrf.mxu0  ;;  %v3805_v46 = vadd.f32 %v3804_v13, %v3774_v29  ;;  %v3495_v61 = vpop.f32.mrf.mxu1  ;;  %v3778_v20 = vmul.f32 %v3549_v48, %v3549_v48  ;;  %v4951_v10 = vadd.f32 %v6522_v22, %v6513_v58  ;;  %v6637_v22 = vld [vmem:[#allocation25_spill] sm:$0xff] }
 0x202   : > { %4572 = vst [vmem:[%s6429_s17 + $0x58] sm:$0xff] %v4525_v34   ;;  %v4520_v45 = vpack.c.bf16 %v3547_v12, %v3546_v47  ;;  %v3776_v38 = vmul.f32 %v3547_v12, %v3547_v12  ;;  %v3496_v50 = vadd.f32 %v4939_v59, %v3495_v61  ;;  %v3738_v11 = vadd.f32 %v3737_v3, %v3547_v12  ;;  %v6635_v34 = vld [vmem:[#allocation22_spill] sm:$0xff] }
 0x203   : > { %v6531_v17 = vpop.f32.mrf.mxu0  ;;  %v3806_v15 = vadd.f32 %v3805_v46, %v3775_v4  ;;  %v5124_v19 = vpop.f32.mrf.mxu1  ;;  %v3552_v2 = vadd.f32 %v3504_v51, %v2782_v16  ;;  %v2790_v12 = vadd.f32 %v6636_v6, %v6635_v34  ;;  %v6638_v3 = vld [vmem:[#allocation6_spill] sm:$0xff]  ;;  %v6639_v46 = vld [vmem:[#allocation8_spill] sm:$0xff] }
 0x204   : > { %4571 = vst [vmem:[%s6429_s17 + $0x50] sm:$0xff] %v4520_v45   ;;  %v3507_v39 = vadd.f32 %v5124_v19, %v4948_v35  ;;  %v3739_v55 = vadd.f32 %v3738_v11, %v3548_v37  ;;  %v3550_v52 = vadd.f32 %v3496_v50, %v6632_v21  ;;  %v2798_v4 = vadd.f32 %v6638_v3, %v6637_v22  ;;  %v6641_v11 = vld [vmem:[#allocation9_spill] sm:$0xff] }
 0x205   : > { %v4955_v26 = vpop.f32.mrf.mxu0  ;;  %v3807_v44 = vadd.f32 %v3806_v15, %v3776_v38  ;;  %v3498_v40 = vpop.f32.mrf.mxu1  ;;  %v2801_v35 = vadd.f32 %v6639_v46, %v2640_v32  ;;  %v4954_v61 = vadd.f32 %v6531_v17, %v6525_v57  ;;  %v3781_v45 = vmul.f32 %v3552_v2, %v3552_v2  ;;  %v6640_v15 = vld [vmem:[#allocation23_spill] sm:$0xff] }
 0x206   : > { %v3553_v18 = vadd.f32 %v3507_v39, %v2785_v28  ;;  %v3499_v42 = vadd.f32 %v4942_v43, %v3498_v40  ;;  %v3740_v25 = vadd.f32 %v3739_v55, %v3549_v48  ;;  %v3779_v5 = vmul.f32 %v3550_v52, %v3550_v52 }
 0x207   : > { %v4956_v60 = vpop.f32.mrf.mxu0  ;;  %v3808_v1 = vadd.f32 %v3807_v44, %v3777_v63  ;;  %v5127_v23 = vpop.f32.mrf.mxu1  ;;  %v2793_v19 = vadd.f32 %v6641_v11, %v6640_v15 }
 0x208   : > { %v4957_v54 = vadd.f32 %v4956_v60, %v4955_v26  ;;  %v4535_v47 = vpack.c.bf16 %v3553_v18, %v3552_v2  ;;  %v3551_v24 = vadd.f32 %v3499_v42, %v6634_v56  ;;  %v3741_v27 = vadd.f32 %v3740_v25, %v3550_v52 }
 0x209   : > { %v4958_v62 = vpop.f32.mrf.mxu0  ;;  %v3809_v29 = vadd.f32 %v3808_v1, %v3778_v20  ;;  %v3511_v13 = vpop.f32.mrf.mxu1  ;;  %v3782_v43 = vmul.f32 %v3553_v18, %v3553_v18 }
 0x20a   : > { %4574 = vst [vmem:[%s6429_s17 + $0x68] sm:$0xff] %v4535_v47   ;;  %v4530_v30 = vpack.c.bf16 %v3551_v24, %v3550_v52  ;;  %v3780_v36 = vmul.f32 %v3551_v24, %v3551_v24  ;;  %v3520_v26 = vadd.f32 %v5127_v23, %v4957_v54  ;;  %v3512_v59 = vadd.f32 %v4951_v10, %v3511_v13 }
 0x20b   : > { %v4959_v53 = vpop.f32.mrf.mxu0  ;;  %v3810_v0 = vadd.f32 %v3809_v29, %v3779_v5  ;;  %v3742_v48 = vadd.f32 %v3741_v27, %v3551_v24  ;;  %v5128_v58 = vpop.f32.mrf.mxu1 }
 0x20c   : > { %v4960_v37 = vadd.f32 %v4959_v53, %v4958_v62  ;;  %4573 = vst [vmem:[%s6429_s17 + $0x60] sm:$0xff] %v4530_v30   ;;  %v3554_v50 = vadd.f32 %v3512_v59, %v2790_v12  ;;  %v3556_v31 = vadd.f32 %v3520_v26, %v2798_v4 }
 0x20d   : > { %v3743_v38 = vadd.f32 %v3742_v48, %v3552_v2  ;;  %v3811_v51 = vadd.f32 %v3810_v0, %v3780_v36  ;;  %v3514_v49 = vpop.f32.mrf.mxu1 }
 0x20e   : > { %v3523_v60 = vadd.f32 %v5128_v58, %v4960_v37  ;;  %v3515_v62 = vadd.f32 %v4954_v61, %v3514_v49  ;;  %v3783_v8 = vmul.f32 %v3554_v50, %v3554_v50  ;;  %v3785_v44 = vmul.f32 %v3556_v31, %v3556_v31 }
 0x20f   : > { %v3812_v33 = vadd.f32 %v3811_v51, %v3781_v45  ;;  %v3744_v7 = vadd.f32 %v3743_v38, %v3553_v18 }
 0x210   : > { %v3557_v14 = vadd.f32 %v3523_v60, %v2801_v35  ;;  %v3555_v57 = vadd.f32 %v3515_v62, %v2793_v19 }
 0x211   : > { %v3745_v17 = vadd.f32 %v3744_v7, %v3554_v50  ;;  %v3813_v41 = vadd.f32 %v3812_v33, %v3782_v43 }
 0x212   : > { %v4545_v16 = vpack.c.bf16 %v3557_v14, %v3556_v31  ;;  %v4540_v28 = vpack.c.bf16 %v3555_v57, %v3554_v50  ;;  %v3784_v39 = vmul.f32 %v3555_v57, %v3555_v57  ;;  %v3786_v40 = vmul.f32 %v3557_v14, %v3557_v14 }
 0x213   : > { %v3814_v63 = vadd.f32 %v3813_v41, %v3783_v8  ;;  %v3746_v55 = vadd.f32 %v3745_v17, %v3555_v57 }
 0x214   : > { %4576 = vst [vmem:[%s6429_s17 + $0x78] sm:$0xff] %v4545_v16   ;;  %4575 = vst [vmem:[%s6429_s17 + $0x70] sm:$0xff] %v4540_v28  }
 0x215   : > { %v3747_v21 = vadd.f32 %v3746_v55, %v3556_v31  ;;  %v3815_v52 = vadd.f32 %v3814_v63, %v3784_v39 }
 0x217   : > { %v3748_v53 = vadd.f32 %v3747_v21, %v3557_v14  ;;  %v3816_v2 = vadd.f32 %v3815_v52, %v3785_v44 }
 0x219   : > { %v3749_v42 = vrot.slane %v3748_v53, 4  ;;  %v3817_v18 = vadd.f32 %v3816_v2, %v3786_v40 }
 0x21b   : > { %v3750_v54 = vadd.f32 %v3749_v42, %v3748_v53  ;;  %v3818_v9 = vrot.slane %v3817_v18, 4 }
 0x21d   : > { %v3751_v32 = vrot.slane %v3750_v54, 2  ;;  %v3819_v20 = vadd.f32 %v3818_v9, %v3817_v18 }
 0x21f   : > { %v3752_v1 = vadd.f32 %v3751_v32, %v3750_v54  ;;  %v3820_v25 = vrot.slane %v3819_v20, 2 }
 0x221   : > { %v3753_v23 = vrot.slane %v3752_v1, 1  ;;  %v3821_v10 = vadd.f32 %v3820_v25, %v3819_v20 }
 0x223   : > { %v3822_v47 = vrot.slane %v3821_v10, 1  ;;  %v3754_v56 = vadd.f32 %v3753_v23, %v3752_v1 }
 0x225   : > { %v3823_v24 = vadd.f32 %v3822_v47, %v3821_v10 }
 0x227   : > { %v3825_v37 = vsel %vm583_vm0, %v3754_v56, %v3823_v24 }
 0x228   : > { %3826 = vst [vmem:[%s263_s25] sm:$0x3] %v3825_v37 }
 0x229 PF: > { %s16_s20 = sadd.s32 1, %s5359_s20   ;;  %s6642_s18 = smov %s5355_s19 }
 0x22a   : > { %p13_p5 = scmp.ge.s32.totalorder %s16_s20, 4   ;;  %s6643_s19 = smov %s6645_s21 }
 0x22c   :  { %15 = sbr.rel (!%p13_p5) target bundleno = 2 (0x2), region = 82 }

// kernel: conv_block2d_forward.3
= control target key start
LH: loop header
LB: loop body
LE: loop exit
PB: predicated region body
PF: predicated region fallthrough
CT: control target
= control target key end

     0   :  { %s6782_s12 = smov 0   ;;  %s6784_s13 = smov 0   ;;  %s9632_s0 = inlined_call_operand.vmem [shape: bf16[2,16,16,4], index: 0, kind: input, shape index: {}]   ;;  %s9633_s1 = inlined_call_operand.vmem [shape: bf16[3,12,128], index: 1, kind: input, shape index: {}]   ;;  %s9634_s2 = inlined_call_operand.vmem [shape: bf16[2,16,16,128], index: 2, kind: output, shape index: {0}]   ;;  %s9635_s3 = inlined_call_operand.vmem [shape: f32[2,2,128], index: 3, kind: output, shape index: {1}]  }
   0x1   :  { %s6786_s14 = smov 0  }
   0x2 LB: > { %s26_s15 = sadd.s32 1, %s6755_s13  ;;  %p5601_p0 = scmp.ge.s32.totalorder %s6759_s14, 1  ;;  %s6759_s14 = sphi %s6786_s14, %s14_s14   ;;  %s6755_s13 = sphi %s6784_s13, %s10030_s13   ;;  %s6751_s12 = sphi %s6782_s12, %s10029_s12  }
   0x3   : > { %p28_p1 = scmp.ge.s32.totalorder %s26_s15, 2  ;;  %p156_p2 = scmp.lt.s32.totalorder %s6759_s14, 3 }
   0x5   : > { %s10032_s15 = smov (%p28_p1, %s26_s15), 0  ;;  %p157_p3 = pnand %p5601_p0, %p156_p2 }
   0x7   : > { %160 = sbr.rel (%p157_p3) target bundleno = 625 (0x271), region = 28 }
   0xc   : > { %v6677_v0 = vld [vmem:[%s9633_s1] ss:$0 sps:$4 sm:$0xcc]   ;;  %vm2685_vm0 = vcmask 1041408   ;;  %vm685_vm1 = vcmask 27648   ;;  %vm688_vm2 = vcmask 24576  }
   0xd   : > { %p190_p4 = scmp.lt.s32.totalorder %s6751_s12, 1  ;;  %v2635_v1 = vrot.slane %v6677_v0, 2  ;;  %v6761_v2 = vmov 0   ;;  %v773_v5 = vld [vmem:[%s9633_s1] sm:$0x3]  ;;  %vm467_vm6 = vcmask 1040384  }
   0xe   : > { %v5623_v3 = vcombine.low %v6761_v2, %v6761_v2  ;;  %v5624_v4 = vcombine.high %v6761_v2, %v6761_v2  ;;  %v1357_v7 = vld [vmem:[%s9633_s1 + $0x4] sm:$0x3]  ;;  %vm790_vm3 = vsmask.f32 3328  ;;  %vm791_vm4 = vsmask.f32 7440 }
   0xf   : > { %s10034_s12 = smov (!%p190_p4, %s6751_s12), 1  ;;  %6642 = vmatprep.subr.msk.bf16.mxu0 %vm2685_vm0, %v2635_v1  ;;  %6643 = vmatprep.subr.msk.bf16.mxu1 %vm2685_vm0, %v2635_v1  ;;  %v2687_v6 = vsel %vm2685_vm0, %v2635_v1, 0  ;;  %vm468_vm5 = vsmask.f32 256  ;;  %v6833_v11 = vsel %vm2685_vm0, %v773_v5, 0  ;;  %v6836_v15 = vsel %vm2685_vm0, %v1357_v7, 0  ;;  %vm6856_vm9 = vmor %vm790_vm3, %vm791_vm4 }
  0x10   : > { %686 = vst.msk [vmem:[#allocation2] sm:$0xf] %vm685_vm1, %v5623_v3  ;;  %687 = vst.msk [vmem:[#allocation2 + $0x4] sm:$0xf] %vm685_vm1, %v5624_v4  ;;  %6335 = vmatpush3.bf16.msra.mxu0 %v2687_v6  ;;  %6641 = vmatpush3.bf16.msra.mxu1 %v2687_v6  ;;  %s6052_s22 = sshll.u32 %s10034_s12, 7  ;;  %vm2636_vm7 = vcmask 31744  }
  0x11   : > { %689 = vst.msk [vmem:[#allocation2 + $0x8] sm:$0x1] %vm688_vm2, %v5623_v3  ;;  %740 = vst.msk [vmem:[#allocation2 + $0xd4] sm:$0x1] %vm688_vm2, %v5623_v3  ;;  %s6826_s25 = scalar_lea.vmem %s9632_s0, %s6052_s22  ;;  %6644 = vmatprep.subr.msk.bf16.mxu1 %vm2685_vm0, %v773_v5  ;;  %6645 = vmatprep.subr.msk.bf16.mxu0 %vm2685_vm0, %v1357_v7  ;;  %v9685_v31 = vmov 0  ;;  %v9688_v42 = vmov 0  ;;  %s9491_s17 = scalar_lea.vmem %s9634_s2, %s6052_s22 }
  0x12   : > { %738 = vst.msk [vmem:[#allocation2 + $0xcc] sm:$0xf] %vm685_vm1, %v5623_v3  ;;  %739 = vst.msk [vmem:[#allocation2 + $0xd0] sm:$0xf] %vm685_vm1, %v5624_v4  ;;  %v6678_v8 = vld [vmem:[%s6826_s25] sm:$0xff]   ;;  %v6679_v9 = vld [vmem:[%s6826_s25 + $0x38] sm:$0xff]  }
  0x13   : > { %v324_v10 = vshrl.u32 %v6678_v8, 16  ;;  %v327_v12 = vshll.u32 %v6678_v8, 16  ;;  %v373_v13 = vshrl.u32 %v6679_v9, 16  ;;  %v376_v14 = vshll.u32 %v6679_v9, 16  ;;  %v6680_v26 = vld [vmem:[%s6826_s25 + $0x40] sm:$0xff]   ;;  %vm6844_vm8 = vmand %vm467_vm6, %vm468_vm5  ;;  %v6681_v36 = vld [vmem:[%s6826_s25 + $0x8] sm:$0xff]  }
  0x14   : > { %v9686_v31 = vsel %vm6844_vm8, 4294967295, %v9685_v31  ;;  %v6682_v41 = vld [vmem:[%s6826_s25 + $0x10] sm:$0xff]   ;;  %v9689_v42 = vsel %vm6856_vm9, 4294967295, %v9688_v42  ;;  %v380_v46 = vshrl.u32 %v6680_v26, 16  ;;  %v6865_v47 = vld [vmem:[%s6826_s25 + $0x48] sm:$0xff]   ;;  %v383_v55 = vshll.u32 %v6680_v26, 16 }
  0x15   : > { %v326_v24 = vrot.slane %v324_v10, 7  ;;  %v375_v25 = vrot.slane %v373_v13, 7  ;;  %9687 = vst [vmem:[#allocation3_spill] sm:$0xff] %v9686_v31  ;;  %9690 = vst [vmem:[#allocation4_spill] sm:$0xff] %v9689_v42  ;;  %v331_v58 = vshrl.u32 %v6681_v36, 16  ;;  %v334_v59 = vshll.u32 %v6681_v36, 16 }
  0x16   : > { %v382_v54 = vrot.slane %v380_v46, 7  ;;  %v6876_v60 = vld [vmem:[%s6826_s25 + $0x50] sm:$0xff]   ;;  %v338_v0 = vshrl.u32 %v6682_v41, 16  ;;  %v341_v4 = vshll.u32 %v6682_v41, 16  ;;  %v387_v7 = vshrl.u32 %v6865_v47, 16  ;;  %s5606_s18 = sshll.u32 %s10034_s12, 1 }
  0x17   : > { %v741_v16 = vld [vmem:[#allocation2] sm:$0xf]  ;;  %v742_v17 = vld [vmem:[#allocation2 + $0x4] sm:$0xf]  ;;  %v329_v33 = vor.u32 %v327_v12, %v326_v24  ;;  %v486_v34 = vsel %vm6844_vm8, %v326_v24, 0  ;;  %v378_v35 = vor.u32 %v376_v14, %v375_v25  ;;  %v493_v40 = vsel %vm6844_vm8, %v375_v25, 0  ;;  %s209_s21 = scalar_lea.vmem %s9635_s3, %s5606_s18 }
  0x18   : > { %v6838_v18 = vld [vmem:[#allocation2 + $0x8] sm:$0x1]  ;;  %v794_v19 = vshrl.u32 %v741_v16, 16  ;;  %v797_v20 = vshll.u32 %v741_v16, 16  ;;  %v803_v21 = vshll.u32 %v742_v17, 16  ;;  %v807_v22 = vshrl.u32 %v742_v17, 16 }
  0x19   : > { %v813_v23 = vshll.u32 %v6838_v18, 16  ;;  %v5627_v39 = vcombine.low %v486_v34, %v486_v34  ;;  %v470_v43 = vsel %vm6844_vm8, 0, %v329_v33  ;;  %v477_v44 = vsel %vm6844_vm8, 0, %v378_v35 }
  0x1a   : > { %v796_v27 = vrot.slane %v794_v19, 4  ;;  %v799_v28 = vrot.slane %v797_v20, 5  ;;  %v805_v29 = vrot.slane %v803_v21, 5  ;;  %v809_v30 = vrot.slane %v807_v22, 4 }
  0x1b   : > { %v815_v32 = vrot.slane %v813_v23, 5  ;;  %v5648_v45 = vcombine.low %v493_v40, %v493_v40  ;;  %v5625_v50 = vcombine.low %v470_v43, %v470_v43  ;;  %v5626_v51 = vcombine.high %v470_v43, %v470_v43  ;;  %692 = vst.msk [vmem:[#allocation2 + $0x14] sm:$0x1] %vm688_vm2, %v5627_v39 }
  0x1c   : > { %v800_v37 = vor.u32 %v799_v28, %v796_v27  ;;  %v810_v38 = vor.u32 %v809_v30, %v805_v29  ;;  %v5646_v52 = vcombine.low %v477_v44, %v477_v44  ;;  %v5647_v53 = vcombine.high %v477_v44, %v477_v44 }
  0x1d   : > { %713 = vst.msk [vmem:[#allocation2 + $0x68] sm:$0x1] %vm688_vm2, %v5648_v45  ;;  %v385_v62 = vor.u32 %v383_v55, %v382_v54  ;;  %v494_v63 = vsel %vm6844_vm8, %v382_v54, 0  ;;  %v333_v3 = vrot.slane %v331_v58, 7  ;;  %v340_v6 = vrot.slane %v338_v0, 7 }
  0x1e   : > { %v801_v48 = vrot.slane %v800_v37, 4  ;;  %v811_v49 = vrot.slane %v810_v38, 4  ;;  %690 = vst.msk [vmem:[#allocation2 + $0xc] sm:$0xf] %vm685_vm1, %v5625_v50  ;;  %691 = vst.msk [vmem:[#allocation2 + $0x10] sm:$0xf] %vm685_vm1, %v5626_v51  ;;  %v5651_v2 = vcombine.low %v494_v63, %v494_v63 }
  0x1f   : > { %711 = vst.msk [vmem:[#allocation2 + $0x60] sm:$0xf] %vm685_vm1, %v5646_v52  ;;  %712 = vst.msk [vmem:[#allocation2 + $0x64] sm:$0xf] %vm685_vm1, %v5647_v53  ;;  %v478_v5 = vsel %vm6844_vm8, 0, %v385_v62  ;;  %v390_v8 = vshll.u32 %v6865_v47, 16  ;;  %v336_v12 = vor.u32 %v334_v59, %v333_v3  ;;  %v6901_v23 = vor.u32 %v341_v4, %v340_v6 }
  0x20   : > { %v806_v56 = vsel %vm6856_vm9, %v801_v48, %v805_v29  ;;  %v816_v57 = vsel %vm6856_vm9, %v811_v49, %v815_v32  ;;  %v5649_v9 = vcombine.low %v478_v5, %v478_v5  ;;  %v5650_v10 = vcombine.high %v478_v5, %v478_v5  ;;  %716 = vst.msk [vmem:[#allocation2 + $0x74] sm:$0x1] %vm688_vm2, %v5651_v2 }
  0x21   : > { %v5727_v61 = vcombine.low %v806_v56, %v816_v57  ;;  %v487_v13 = vsel %vm6844_vm8, %v333_v3, 0  ;;  %v488_v17 = vsel %vm6844_vm8, %v340_v6, 0  ;;  %v394_v19 = vshrl.u32 %v6876_v60, 16 }
  0x22   : > { %v6891_v14 = vld [vmem:[#allocation2 + $0x14] sm:$0x1]  ;;  %v5630_v16 = vcombine.low %v487_v13, %v487_v13  ;;  %714 = vst.msk [vmem:[#allocation2 + $0x6c] sm:$0xf] %vm685_vm1, %v5649_v9  ;;  %715 = vst.msk [vmem:[#allocation2 + $0x70] sm:$0xf] %vm685_vm1, %v5650_v10  ;;  %v5633_v24 = vcombine.low %v488_v17, %v488_v17 }
  0x23   : > { %6336 = vmatprep.mubr.msk.bf16.mxu0 %vm2636_vm7, %v5727_v61  ;;  %v837_v20 = vshll.u32 %v6891_v14, 16  ;;  %v471_v22 = vsel %vm6844_vm8, 0, %v336_v12  ;;  %v6908_v30 = vrot.slane %v387_v7, 7  ;;  %vm1242_vm10 = vcmask 1042432  }
  0x24   : > { %v782_v21 = vld [vmem:[#allocation2 + $0x68] sm:$0x1]  ;;  %v5628_v28 = vcombine.low %v471_v22, %v471_v22  ;;  %v5629_v29 = vcombine.high %v471_v22, %v471_v22  ;;  %695 = vst.msk [vmem:[#allocation2 + $0x20] sm:$0x1] %vm688_vm2, %v5630_v16  ;;  %698 = vst.msk [vmem:[#allocation2 + $0x2c] sm:$0x1] %vm688_vm2, %v5633_v24 }
  0x25   : > { %v6903_v25 = vld [vmem:[#allocation2 + $0xc] sm:$0xf]  ;;  %v6905_v26 = vld [vmem:[#allocation2 + $0x10] sm:$0xf]  ;;  %v1005_v27 = vshll.u32 %v782_v21, 16  ;;  %v839_v37 = vrot.slane %v837_v20, 5  ;;  %v392_v62 = vor.u32 %v390_v8, %v6908_v30 }
  0x26   : > { %v818_v32 = vshrl.u32 %v6903_v25, 16  ;;  %v821_v33 = vshll.u32 %v6903_v25, 16  ;;  %v827_v34 = vshll.u32 %v6905_v26, 16  ;;  %v831_v35 = vshrl.u32 %v6905_v26, 16  ;;  %v757_v36 = vld [vmem:[#allocation2 + $0x60] sm:$0xf] }
  0x27   : > { %v758_v39 = vld [vmem:[#allocation2 + $0x64] sm:$0xf]  ;;  %v986_v40 = vshrl.u32 %v757_v36, 16  ;;  %v989_v41 = vshll.u32 %v757_v36, 16  ;;  %693 = vst.msk [vmem:[#allocation2 + $0x18] sm:$0xf] %vm685_vm1, %v5628_v28 }
  0x28   : > { %694 = vst.msk [vmem:[#allocation2 + $0x1c] sm:$0xf] %vm685_vm1, %v5629_v29  ;;  %v820_v43 = vrot.slane %v818_v32, 4  ;;  %v823_v44 = vrot.slane %v821_v33, 5  ;;  %v829_v45 = vrot.slane %v827_v34, 5  ;;  %v833_v46 = vrot.slane %v831_v35, 4 }
  0x29   : > { %v988_v47 = vrot.slane %v986_v40, 4  ;;  %v991_v48 = vrot.slane %v989_v41, 5  ;;  %v995_v49 = vshll.u32 %v758_v39, 16  ;;  %v999_v50 = vshrl.u32 %v758_v39, 16  ;;  %v783_v51 = vld [vmem:[#allocation2 + $0x74] sm:$0x1] }
  0x2a   : > { %v824_v52 = vor.u32 %v823_v44, %v820_v43  ;;  %v834_v53 = vor.u32 %v833_v46, %v829_v45  ;;  %v1007_v54 = vrot.slane %v1005_v27, 5  ;;  %v1029_v55 = vshll.u32 %v783_v51, 16  ;;  %v759_v59 = vld [vmem:[#allocation2 + $0x6c] sm:$0xf]  ;;  %v6918_v61 = vld [vmem:[#allocation2 + $0x70] sm:$0xf] }
  0x2b   : > { %v992_v56 = vor.u32 %v991_v48, %v988_v47  ;;  %v997_v57 = vrot.slane %v995_v49, 5  ;;  %v1001_v58 = vrot.slane %v999_v50, 4  ;;  %v1010_v2 = vshrl.u32 %v759_v59, 16  ;;  %v6933_v29 = vld [vmem:[#allocation2 + $0x20] sm:$0x1] }
  0x2c   : > { %v825_v63 = vrot.slane %v824_v52, 4  ;;  %v835_v0 = vrot.slane %v834_v53, 4  ;;  %v1013_v3 = vshll.u32 %v759_v59, 16  ;;  %v1019_v6 = vshll.u32 %v6918_v61, 16 }
  0x2d   : > { %v993_v4 = vrot.slane %v992_v56, 4  ;;  %v1002_v5 = vor.u32 %v1001_v58, %v997_v57  ;;  %v1023_v7 = vshrl.u32 %v6918_v61, 16  ;;  %v1012_v12 = vrot.slane %v1010_v2, 4 }
  0x2e   : > { %v830_v9 = vsel %vm6856_vm9, %v825_v63, %v829_v45  ;;  %v840_v10 = vsel %vm6856_vm9, %v835_v0, %v839_v37  ;;  %v1015_v13 = vrot.slane %v1013_v3, 5  ;;  %v6927_v16 = vld [vmem:[#allocation2 + $0x18] sm:$0xf]  ;;  %v1021_v22 = vrot.slane %v1019_v6, 5  ;;  %v6942_v37 = vld [vmem:[#allocation2 + $0x2c] sm:$0x1] }
  0x2f   : > { %v6929_v8 = vld [vmem:[#allocation2 + $0x1c] sm:$0xf]  ;;  %v5728_v17 = vcombine.low %v830_v9, %v840_v10  ;;  %v998_v20 = vsel %vm6856_vm9, %v993_v4, %v997_v57  ;;  %v1003_v21 = vrot.slane %v1002_v5, 4  ;;  %v1025_v27 = vrot.slane %v1023_v7, 4  ;;  %v6686_v63 = vld [vmem:[%s6826_s25 + $0x20] sm:$0xff]  }
  0x30   : > { %v1016_v24 = vor.u32 %v1015_v13, %v1012_v12  ;;  %v1031_v28 = vrot.slane %v1029_v55, 5  ;;  %v842_v32 = vshrl.u32 %v6927_v16, 16  ;;  %v845_v34 = vshll.u32 %v6927_v16, 16  ;;  %v6685_v55 = vld [vmem:[%s6826_s25 + $0x18] sm:$0xff]   ;;  %v6977_v10 = vld [vmem:[%s9633_s1 + $0x8] sm:$0x3] }
  0x31   : > { %6337 = vmatmul.mubr.msk.bf16.vlgmr.msra.gmra.mxu0 %vm2636_vm7, %v5728_v17  ;;  %v1008_v33 = vsel %vm6856_vm9, %v1003_v21, %v1007_v54  ;;  %v851_v35 = vshll.u32 %v6929_v8, 16  ;;  %v855_v36 = vshrl.u32 %v6929_v8, 16  ;;  %v1026_v41 = vor.u32 %v1025_v27, %v1021_v22  ;;  %v6969_v9 = vld [vmem:[%s6826_s25 + $0x58] sm:$0xff]  }
  0x32   : > { %v5735_v39 = vcombine.low %v998_v20, %v1008_v33  ;;  %v1017_v40 = vrot.slane %v1016_v24, 4  ;;  %6403 = vmatpush3.bf16.msra.mxu0 %v6836_v15  ;;  %v844_v43 = vrot.slane %v842_v32, 4  ;;  %v847_v44 = vrot.slane %v845_v34, 5 }
  0x33   : > { %v853_v45 = vrot.slane %v851_v35, 5  ;;  %v857_v46 = vrot.slane %v855_v36, 4  ;;  %v861_v47 = vshll.u32 %v6933_v29, 16  ;;  %v1027_v49 = vrot.slane %v1026_v41, 4 }
  0x34   : > { %6352 = vmatprep.mubr.msk.bf16.mxu1 %vm2636_vm7, %v5735_v39  ;;  %v1022_v48 = vsel %vm6856_vm9, %v1017_v40, %v1021_v22  ;;  %v472_v50 = vsel %vm6844_vm8, 0, %v6901_v23  ;;  %v885_v51 = vshll.u32 %v6942_v37, 16  ;;  %v848_v15 = vor.u32 %v847_v44, %v844_v43 }
  0x35   : > { %v858_v52 = vor.u32 %v857_v46, %v853_v45  ;;  %v863_v53 = vrot.slane %v861_v47, 5  ;;  %v5631_v54 = vcombine.low %v472_v50, %v472_v50  ;;  %v1032_v56 = vsel %vm6856_vm9, %v1027_v49, %v1031_v28 }
  0x36   : > { %v5632_v57 = vcombine.high %v472_v50, %v472_v50  ;;  %v6956_v58 = vrot.slane %v885_v51, 5  ;;  %v479_v59 = vsel %vm6844_vm8, 0, %v392_v62  ;;  %v5736_v23 = vcombine.low %v1022_v48, %v1032_v56  ;;  %v6972_v62 = vld [vmem:[%s6826_s25 + $0x60] sm:$0xff]  }
  0x37   : > { %v849_v0 = vrot.slane %v848_v15, 4  ;;  %v859_v2 = vrot.slane %v858_v52, 4  ;;  %696 = vst.msk [vmem:[#allocation2 + $0x24] sm:$0xf] %vm685_vm1, %v5631_v54  ;;  %v495_v3 = vsel %vm6844_vm8, %v6908_v30, 0  ;;  %v5652_v4 = vcombine.low %v479_v59, %v479_v59 }
  0x38   : > { %697 = vst.msk [vmem:[#allocation2 + $0x28] sm:$0xf] %vm685_vm1, %v5632_v57  ;;  %v5653_v5 = vcombine.high %v479_v59, %v479_v59  ;;  %v5654_v6 = vcombine.low %v495_v3, %v495_v3  ;;  %v396_v7 = vrot.slane %v394_v19, 7  ;;  %6353 = vmatmul.mubr.msk.bf16.vlgmr.msra.gmra.mxu1 %vm2636_vm7, %v5736_v23  ;;  %v397_v13 = vshll.u32 %v6876_v60, 16 }
  0x39   : > { %v854_v30 = vsel %vm6856_vm9, %v849_v0, %v853_v45  ;;  %v864_v12 = vsel %vm6856_vm9, %v859_v2, %v863_v53  ;;  %v345_v19 = vshrl.u32 %v6685_v55, 16  ;;  %6369 = vmatpush3.bf16.msra.mxu1 %v6833_v11  ;;  %717 = vst.msk [vmem:[#allocation2 + $0x78] sm:$0xf] %vm685_vm1, %v5652_v4  ;;  %v348_v21 = vshll.u32 %v6685_v55, 16 }
  0x3a   : > { %v5729_v17 = vcombine.low %v854_v30, %v864_v12  ;;  %718 = vst.msk [vmem:[#allocation2 + $0x7c] sm:$0xf] %vm685_vm1, %v5653_v5  ;;  %v496_v20 = vsel %vm6844_vm8, %v396_v7, 0  ;;  %v352_v22 = vshrl.u32 %v6686_v63, 16  ;;  %v399_v24 = vor.u32 %v397_v13, %v396_v7  ;;  %6646 = vmatprep.subr.msk.bf16.mxu1 %vm2685_vm0, %v6977_v10 }
  0x3b   : > { %719 = vst.msk [vmem:[#allocation2 + $0x80] sm:$0x1] %vm688_vm2, %v5654_v6  ;;  %v5657_v27 = vcombine.low %v496_v20, %v496_v20  ;;  %v347_v28 = vrot.slane %v345_v19, 7  ;;  %v355_v32 = vshll.u32 %v6686_v63, 16  ;;  %v401_v60 = vshrl.u32 %v6969_v9, 16 }
  0x3c   : > { %6340 = vmatprep.mubr.msk.bf16.mxu0 %vm2636_vm7, %v5729_v17  ;;  %v354_v11 = vrot.slane %v352_v22, 7  ;;  %v404_v33 = vshll.u32 %v6969_v9, 16  ;;  %v408_v34 = vshrl.u32 %v6972_v62, 16  ;;  %v480_v35 = vsel %vm6844_vm8, 0, %v399_v24 }
  0x3d   : > { %722 = vst.msk [vmem:[#allocation2 + $0x8c] sm:$0x1] %vm688_vm2, %v5657_v27  ;;  %v350_v36 = vor.u32 %v348_v21, %v347_v28  ;;  %v489_v39 = vsel %vm6844_vm8, %v347_v28, 0  ;;  %v411_v40 = vshll.u32 %v6972_v62, 16  ;;  %v5655_v43 = vcombine.low %v480_v35, %v480_v35 }
  0x3e   : > { %v7003_v41 = vld [vmem:[#allocation2 + $0x24] sm:$0xf]  ;;  %v5656_v44 = vcombine.high %v480_v35, %v480_v35  ;;  %v5636_v45 = vcombine.low %v489_v39, %v489_v39  ;;  %v357_v46 = vor.u32 %v355_v32, %v354_v11  ;;  %v490_v51 = vsel %vm6844_vm8, %v354_v11, 0 }
  0x3f   : > { %v7005_v47 = vld [vmem:[#allocation2 + $0x28] sm:$0xf]  ;;  %v866_v48 = vshrl.u32 %v7003_v41, 16  ;;  %v869_v49 = vshll.u32 %v7003_v41, 16  ;;  %v473_v50 = vsel %vm6844_vm8, 0, %v350_v36  ;;  %v5639_v63 = vcombine.low %v490_v51, %v490_v51 }
  0x40   : > { %v875_v15 = vshll.u32 %v7005_v47, 16  ;;  %v879_v52 = vshrl.u32 %v7005_v47, 16  ;;  %720 = vst.msk [vmem:[#allocation2 + $0x84] sm:$0xf] %vm685_vm1, %v5655_v43  ;;  %721 = vst.msk [vmem:[#allocation2 + $0x88] sm:$0xf] %vm685_vm1, %v5656_v44  ;;  %v5634_v53 = vcombine.low %v473_v50, %v473_v50  ;;  %v5635_v54 = vcombine.high %v473_v50, %v473_v50 }
  0x41   : > { %701 = vst.msk [vmem:[#allocation2 + $0x38] sm:$0x1] %vm688_vm2, %v5636_v45  ;;  %v868_v55 = vrot.slane %v866_v48, 4  ;;  %v871_v56 = vrot.slane %v869_v49, 5  ;;  %v7018_v57 = vld [vmem:[#allocation2 + $0x78] sm:$0xf] }
  0x42   : > { %9691 = vst [vmem:[#allocation5_spill] sm:$0xff] %v7018_v57  ;;  %v7020_v59 = vld [vmem:[#allocation2 + $0x7c] sm:$0xf]  ;;  %v877_v23 = vrot.slane %v875_v15, 5  ;;  %v881_v0 = vrot.slane %v879_v52, 4  ;;  %v1034_v3 = vshrl.u32 %v7018_v57, 16 }
  0x43   : > { %v7022_v2 = vld [vmem:[#allocation2 + $0x80] sm:$0x1]  ;;  %v1037_v4 = vshll.u32 %v7018_v57, 16  ;;  %699 = vst.msk [vmem:[#allocation2 + $0x30] sm:$0xf] %vm685_vm1, %v5634_v53  ;;  %v872_v5 = vor.u32 %v871_v56, %v868_v55  ;;  %v1043_v6 = vshll.u32 %v7020_v59, 16 }
  0x44   : > { %700 = vst.msk [vmem:[#allocation2 + $0x34] sm:$0xf] %vm685_vm1, %v5635_v54  ;;  %v1047_v7 = vshrl.u32 %v7020_v59, 16  ;;  %v1053_v30 = vshll.u32 %v7022_v2, 16  ;;  %v882_v12 = vor.u32 %v881_v0, %v877_v23  ;;  %v1036_v13 = vrot.slane %v1034_v3, 4 }
  0x45   : > { %704 = vst.msk [vmem:[#allocation2 + $0x44] sm:$0x1] %vm688_vm2, %v5639_v63  ;;  %v1039_v19 = vrot.slane %v1037_v4, 5  ;;  %v7032_v17 = vld [vmem:[#allocation2 + $0x8c] sm:$0x1]  ;;  %v474_v20 = vsel %vm6844_vm8, 0, %v357_v46 }
  0x46   : > { %v873_v21 = vrot.slane %v872_v5, 4  ;;  %v1045_v22 = vrot.slane %v1043_v6, 5  ;;  %v1049_v24 = vrot.slane %v1047_v7, 4  ;;  %v1055_v27 = vrot.slane %v1053_v30, 5 }
  0x47   : > { %v883_v28 = vrot.slane %v882_v12, 4  ;;  %v1040_v32 = vor.u32 %v1039_v19, %v1036_v13  ;;  %v1077_v11 = vshll.u32 %v7032_v17, 16  ;;  %v5637_v35 = vcombine.low %v474_v20, %v474_v20  ;;  %v7039_v43 = vld [vmem:[#allocation2 + $0x84] sm:$0xf]  ;;  %v7041_v44 = vld [vmem:[#allocation2 + $0x88] sm:$0xf] }
  0x48   : > { %v878_v36 = vsel %vm6856_vm9, %v873_v21, %v877_v23  ;;  %v1050_v39 = vor.u32 %v1049_v24, %v1045_v22  ;;  %9692 = vst [vmem:[#allocation6_spill] sm:$0xff] %v7039_v43  ;;  %v5638_v45 = vcombine.high %v474_v20, %v474_v20  ;;  %v1058_v50 = vshrl.u32 %v7039_v43, 16  ;;  %v7050_v15 = vld [vmem:[#allocation2 + $0x38] sm:$0x1] }
  0x49   : > { %v888_v48 = vsel %vm6856_vm9, %v883_v28, %v6956_v58  ;;  %v1041_v49 = vrot.slane %v1040_v32, 4  ;;  %v1061_v51 = vshll.u32 %v7039_v43, 16  ;;  %702 = vst.msk [vmem:[#allocation2 + $0x3c] sm:$0xf] %vm685_vm1, %v5637_v35  ;;  %v1067_v54 = vshll.u32 %v7041_v44, 16 }
  0x4a   : > { %v5730_v52 = vcombine.low %v878_v36, %v888_v48  ;;  %v1051_v53 = vrot.slane %v1050_v39, 4  ;;  %v1071_v55 = vshrl.u32 %v7041_v44, 16  ;;  %v7055_v56 = vld [vmem:[#allocation2 + $0x30] sm:$0xf]  ;;  %703 = vst.msk [vmem:[#allocation2 + $0x40] sm:$0xf] %vm685_vm1, %v5638_v45 }
  0x4b   : > { %v1046_v58 = vsel %vm6856_vm9, %v1041_v49, %v1045_v22  ;;  %v1060_v63 = vrot.slane %v1058_v50, 4  ;;  %v1063_v23 = vrot.slane %v1061_v51, 5  ;;  %v1079_v0 = vrot.slane %v1077_v11, 5  ;;  %v7060_v3 = vld [vmem:[#allocation2 + $0x34] sm:$0xf] }
  0x4c   : > { %6341 = vmatmul.mubr.msk.bf16.gmra.mxu0 %vm2636_vm7, %v5730_v52  ;;  %v1056_v4 = vsel %vm6856_vm9, %v1051_v53, %v1055_v27  ;;  %v1069_v5 = vrot.slane %v1067_v54, 5  ;;  %v1073_v6 = vrot.slane %v1071_v55, 4  ;;  %v890_v7 = vshrl.u32 %v7055_v56, 16  ;;  %v7066_v30 = vld [vmem:[#allocation2 + $0x44] sm:$0x1] }
  0x4d   : > { %v5737_v12 = vcombine.low %v1046_v58, %v1056_v4  ;;  %v1064_v13 = vor.u32 %v1063_v23, %v1060_v63  ;;  %v893_v19 = vshll.u32 %v7055_v56, 16  ;;  %v899_v20 = vshll.u32 %v7060_v3, 16  ;;  %v1797_v42 = vld [vmem:[#allocation2 + $0x30] sm:$0xe] }
  0x4e   : > { %v1074_v21 = vor.u32 %v1073_v6, %v1069_v5  ;;  %v892_v22 = vrot.slane %v890_v7, 4  ;;  %v903_v24 = vshrl.u32 %v7060_v3, 16  ;;  %v909_v28 = vshll.u32 %v7050_v15, 16  ;;  %v6689_v7 = vld [vmem:[%s6826_s25 + $0x28] sm:$0xff]  }
  0x4f   : > { %6356 = vmatprep.mubr.msk.bf16.mxu1 %vm2636_vm7, %v5737_v12  ;;  %v1065_v27 = vrot.slane %v1064_v13, 4  ;;  %v895_v32 = vrot.slane %v893_v19, 5  ;;  %v901_v11 = vrot.slane %v899_v20, 5  ;;  %v933_v35 = vshll.u32 %v7066_v30, 16 }
  0x50   : > { %v1075_v36 = vrot.slane %v1074_v21, 4  ;;  %v905_v39 = vrot.slane %v903_v24, 4  ;;  %v911_v45 = vrot.slane %v909_v28, 5  ;;  %v7074_v48 = vld [vmem:[#allocation2 + $0x3c] sm:$0xf]  ;;  %v403_v49 = vrot.slane %v401_v60, 7 }
  0x51   : > { %v1070_v50 = vsel %vm6856_vm9, %v1065_v27, %v1069_v5  ;;  %v896_v51 = vor.u32 %v895_v32, %v892_v22  ;;  %v7080_v52 = vld [vmem:[#allocation2 + $0x40] sm:$0xf]  ;;  %v914_v53 = vshrl.u32 %v7074_v48, 16  ;;  %v917_v54 = vshll.u32 %v7074_v48, 16 }
  0x52   : > { %v1080_v55 = vsel %vm6856_vm9, %v1075_v36, %v1079_v0  ;;  %v906_v58 = vor.u32 %v905_v39, %v901_v11  ;;  %v923_v63 = vshll.u32 %v7080_v52, 16  ;;  %v927_v23 = vshrl.u32 %v7080_v52, 16  ;;  %v6690_v36 = vld [vmem:[%s6826_s25 + $0x30] sm:$0xff]  }
  0x53   : > { %v5738_v4 = vcombine.low %v1070_v50, %v1080_v55  ;;  %v897_v60 = vrot.slane %v896_v51, 4  ;;  %v916_v6 = vrot.slane %v914_v53, 4  ;;  %v919_v5 = vrot.slane %v917_v54, 5 }
  0x54   : > { %v907_v12 = vrot.slane %v906_v58, 4  ;;  %v925_v13 = vrot.slane %v923_v63, 5  ;;  %v929_v19 = vrot.slane %v927_v23, 4  ;;  %v935_v20 = vrot.slane %v933_v35, 5  ;;  %v6692_v63 = vld [vmem:[%s6826_s25 + $0x70] sm:$0xff]  }
  0x55   : > { %6357 = vmatmul.mubr.msk.bf16.gmra.mxu1 %vm2636_vm7, %v5738_v4  ;;  %v902_v0 = vsel %vm6856_vm9, %v897_v60, %v901_v11  ;;  %v920_v21 = vor.u32 %v919_v5, %v916_v6  ;;  %v406_v22 = vor.u32 %v404_v33, %v403_v49  ;;  %v497_v24 = vsel %vm6844_vm8, %v403_v49, 0  ;;  %v6691_v49 = vld [vmem:[%s6826_s25 + $0x68] sm:$0xff]  }
  0x56   : > { %v912_v28 = vsel %vm6856_vm9, %v907_v12, %v911_v45  ;;  %v930_v27 = vor.u32 %v929_v19, %v925_v13  ;;  %v5660_v32 = vcombine.low %v497_v24, %v497_v24  ;;  %v410_v35 = vrot.slane %v408_v34, 7 }
  0x57   : > { %v5731_v39 = vcombine.low %v902_v0, %v912_v28  ;;  %v921_v11 = vrot.slane %v920_v21, 4  ;;  %v481_v9 = vsel %vm6844_vm8, 0, %v406_v22  ;;  %v359_v33 = vshrl.u32 %v6689_v7, 16  ;;  %v7127_v28 = vld [vmem:[#allocation2] sm:$0xe] }
  0x58   : > { %v931_v50 = vrot.slane %v930_v27, 4  ;;  %v5658_v51 = vcombine.low %v481_v9, %v481_v9  ;;  %v5659_v53 = vcombine.high %v481_v9, %v481_v9  ;;  %725 = vst.msk [vmem:[#allocation2 + $0x98] sm:$0x1] %vm688_vm2, %v5660_v32  ;;  %v413_v45 = vor.u32 %v411_v40, %v410_v35 }
  0x59   : > { %6344 = vmatprep.mubr.msk.bf16.mxu0 %vm2636_vm7, %v5731_v39  ;;  %v926_v34 = vsel %vm6856_vm9, %v921_v11, %v925_v13  ;;  %v498_v54 = vsel %vm6844_vm8, %v410_v35, 0  ;;  %v361_v55 = vrot.slane %v359_v33, 7  ;;  %v362_v58 = vshll.u32 %v6689_v7, 16 }
  0x5a   : > { %v936_v23 = vsel %vm6856_vm9, %v931_v50, %v935_v20  ;;  %723 = vst.msk [vmem:[#allocation2 + $0x90] sm:$0xf] %vm685_vm1, %v5658_v51  ;;  %724 = vst.msk [vmem:[#allocation2 + $0x94] sm:$0xf] %vm685_vm1, %v5659_v53  ;;  %v482_v62 = vsel %vm6844_vm8, 0, %v413_v45  ;;  %v5663_v40 = vcombine.low %v498_v54, %v498_v54  ;;  %v366_v4 = vshrl.u32 %v6690_v36, 16 }
  0x5b   : > { %v5732_v60 = vcombine.low %v926_v34, %v936_v23  ;;  %v5661_v6 = vcombine.low %v482_v62, %v482_v62  ;;  %v5662_v5 = vcombine.high %v482_v62, %v482_v62  ;;  %v364_v12 = vor.u32 %v362_v58, %v361_v55 }
  0x5c   : > { %728 = vst.msk [vmem:[#allocation2 + $0xa4] sm:$0x1] %vm688_vm2, %v5663_v40  ;;  %v491_v7 = vsel %vm6844_vm8, %v361_v55, 0  ;;  %v368_v13 = vrot.slane %v366_v4, 7  ;;  %v369_v19 = vshll.u32 %v6690_v36, 16  ;;  %v415_v20 = vshrl.u32 %v6691_v49, 16 }
  0x5d   : > { %6345 = vmatmul.mubr.msk.bf16.gmra.mxu0 %vm2636_vm7, %v5732_v60  ;;  %726 = vst.msk [vmem:[#allocation2 + $0x9c] sm:$0xf] %vm685_vm1, %v5661_v6  ;;  %727 = vst.msk [vmem:[#allocation2 + $0xa0] sm:$0xf] %vm685_vm1, %v5662_v5  ;;  %v475_v0 = vsel %vm6844_vm8, 0, %v364_v12  ;;  %v5642_v21 = vcombine.low %v491_v7, %v491_v7  ;;  %v418_v22 = vshll.u32 %v6691_v49, 16 }
  0x5e   : > { %v422_v24 = vshrl.u32 %v6692_v63, 16  ;;  %v5640_v27 = vcombine.low %v475_v0, %v475_v0  ;;  %v5641_v32 = vcombine.high %v475_v0, %v475_v0  ;;  %v371_v35 = vor.u32 %v369_v19, %v368_v13 }
  0x5f   : > { %v492_v36 = vsel %vm6844_vm8, %v368_v13, 0  ;;  %v7131_v39 = vld [vmem:[#allocation2 + $0x98] sm:$0x1]  ;;  %707 = vst.msk [vmem:[#allocation2 + $0x50] sm:$0x1] %vm688_vm2, %v5642_v21  ;;  %v417_v9 = vrot.slane %v415_v20, 7 }
  0x60   : > { %9693 = vst [vmem:[#allocation7_spill] sm:$0xff] %v7131_v39  ;;  %v5645_v11 = vcombine.low %v492_v36, %v492_v36  ;;  %v7134_v33 = vrot.slane %v422_v24, 7  ;;  %v425_v50 = vshll.u32 %v6692_v63, 16  ;;  %v1101_v53 = vshll.u32 %v7131_v39, 16  ;;  %705 = vst.msk [vmem:[#allocation2 + $0x48] sm:$0xf] %vm685_vm1, %v5640_v27 }
  0x61   : > { %706 = vst.msk [vmem:[#allocation2 + $0x4c] sm:$0xf] %vm685_vm1, %v5641_v32  ;;  %v476_v45 = vsel %vm6844_vm8, 0, %v371_v35  ;;  %v7143_v34 = vld [vmem:[#allocation2 + $0x90] sm:$0xf]  ;;  %v420_v63 = vor.u32 %v418_v22, %v417_v9  ;;  %v499_v23 = vsel %vm6844_vm8, %v417_v9, 0 }
  0x62   : > { %v7145_v54 = vld [vmem:[#allocation2 + $0x94] sm:$0xf]  ;;  %v5643_v55 = vcombine.low %v476_v45, %v476_v45  ;;  %v5644_v58 = vcombine.high %v476_v45, %v476_v45  ;;  %710 = vst.msk [vmem:[#allocation2 + $0x5c] sm:$0x1] %vm688_vm2, %v5645_v11  ;;  %v1082_v62 = vshrl.u32 %v7143_v34, 16  ;;  %v1085_v40 = vshll.u32 %v7143_v34, 16 }
  0x63   : > { %v1091_v4 = vshll.u32 %v7145_v54, 16  ;;  %v1095_v60 = vshrl.u32 %v7145_v54, 16  ;;  %v1103_v6 = vrot.slane %v1101_v53, 5  ;;  %v7154_v5 = vld [vmem:[#allocation2 + $0xa4] sm:$0x1]  ;;  %v7160_v12 = vsel %vm6844_vm8, 0, %v420_v63 }
  0x64   : > { %708 = vst.msk [vmem:[#allocation2 + $0x54] sm:$0xf] %vm685_vm1, %v5643_v55  ;;  %709 = vst.msk [vmem:[#allocation2 + $0x58] sm:$0xf] %vm685_vm1, %v5644_v58  ;;  %v5666_v7 = vcombine.low %v499_v23, %v499_v23  ;;  %v7163_v13 = vor.u32 %v425_v50, %v7134_v33  ;;  %v1084_v19 = vrot.slane %v1082_v62, 4  ;;  %v1087_v20 = vrot.slane %v1085_v40, 5 }
  0x65   : > { %v1093_v0 = vrot.slane %v1091_v4, 5  ;;  %v1097_v21 = vrot.slane %v1095_v60, 4  ;;  %v7165_v22 = vld [vmem:[#allocation2 + $0x9c] sm:$0xf]  ;;  %v7167_v24 = vld [vmem:[#allocation2 + $0xa0] sm:$0xf]  ;;  %v5664_v36 = vcombine.low %v7160_v12, %v7160_v12 }
  0x66   : > { %v1106_v27 = vshrl.u32 %v7165_v22, 16  ;;  %v1109_v32 = vshll.u32 %v7165_v22, 16  ;;  %v1125_v35 = vshll.u32 %v7154_v5, 16  ;;  %731 = vst.msk [vmem:[#allocation2 + $0xb0] sm:$0x1] %vm688_vm2, %v5666_v7  ;;  %v1088_v11 = vor.u32 %v1087_v20, %v1084_v19 }
  0x67   : > { %v1098_v9 = vor.u32 %v1097_v21, %v1093_v0  ;;  %v1115_v50 = vshll.u32 %v7167_v24, 16  ;;  %v1119_v53 = vshrl.u32 %v7167_v24, 16  ;;  %v7177_v45 = vld [vmem:[#allocation2 + $0x50] sm:$0x1]  ;;  %v7179_v23 = vld [vmem:[#allocation2 + $0x48] sm:$0xf] }
  0x68   : > { %v1108_v55 = vrot.slane %v1106_v27, 4  ;;  %v1111_v58 = vrot.slane %v1109_v32, 5  ;;  %v1127_v63 = vrot.slane %v1125_v35, 5  ;;  %v957_v62 = vshll.u32 %v7177_v45, 16  ;;  %729 = vst.msk [vmem:[#allocation2 + $0xa8] sm:$0xf] %vm685_vm1, %v5664_v36 }
  0x69   : > { %v1089_v40 = vrot.slane %v1088_v11, 4  ;;  %v1099_v4 = vrot.slane %v1098_v9, 4  ;;  %v1117_v60 = vrot.slane %v1115_v50, 5  ;;  %v1121_v7 = vrot.slane %v1119_v53, 4  ;;  %v7183_v19 = vld [vmem:[#allocation2 + $0x4c] sm:$0xf] }
  0x6a   : > { %vm1243_vm11 = vcmask 1046532   ;;  %v1112_v20 = vor.u32 %v1111_v58, %v1108_v55  ;;  %v938_v21 = vshrl.u32 %v7179_v23, 16  ;;  %v941_v27 = vshll.u32 %v7179_v23, 16 }
  0x6b   : > { %v947_v32 = vshll.u32 %v7183_v19, 16  ;;  %v1094_v35 = vsel %vm6856_vm9, %v1089_v40, %v1093_v0  ;;  %v1104_v36 = vsel %vm6856_vm9, %v1099_v4, %v1103_v6  ;;  %v1122_v11 = vor.u32 %v1121_v7, %v1117_v60  ;;  %v7193_v50 = vld [vmem:[#allocation2 + $0x54] sm:$0xf]  ;;  %v7195_v38 = vld [vmem:[#allocation2 + $0x58] sm:$0xf]  ;;  %vm7225_vm12 = vmor %vm1242_vm10, %vm1243_vm11 }
  0x6c   : > { %v951_v9 = vshrl.u32 %v7183_v19, 16  ;;  %v5739_v53 = vcombine.low %v1094_v35, %v1104_v36  ;;  %v1113_v46 = vrot.slane %v1112_v20, 4  ;;  %v940_v55 = vrot.slane %v938_v21, 4  ;;  %v7200_v40 = vld [vmem:[#allocation2 + $0x5c] sm:$0x1] }
  0x6d   : > { %v943_v58 = vrot.slane %v941_v27, 5  ;;  %v1123_v1 = vrot.slane %v1122_v11, 4  ;;  %v949_v51 = vrot.slane %v947_v32, 5  ;;  %v959_v43 = vrot.slane %v957_v62, 5 }
  0x6e   : > { %v953_v49 = vrot.slane %v951_v9, 4  ;;  %6360 = vmatprep.mubr.msk.bf16.mxu1 %vm2636_vm7, %v5739_v53  ;;  %v1118_v6 = vsel %vm6856_vm9, %v1113_v46, %v1117_v60  ;;  %v962_v4 = vshrl.u32 %v7193_v50, 16  ;;  %v965_v7 = vshll.u32 %v7193_v50, 16 }
  0x6f   : > { %v944_v0 = vor.u32 %v943_v58, %v940_v55  ;;  %v1128_v20 = vsel %vm6856_vm9, %v1123_v1, %v1127_v63  ;;  %v971_v27 = vshll.u32 %v7195_v38, 16  ;;  %v975_v62 = vshrl.u32 %v7195_v38, 16  ;;  %v7208_v32 = vld [vmem:[#allocation2 + $0xa8] sm:$0xf] }
  0x70   : > { %v954_v21 = vor.u32 %v953_v49, %v949_v51  ;;  %v5740_v35 = vcombine.low %v1118_v6, %v1128_v20  ;;  %v964_v46 = vrot.slane %v962_v4, 4  ;;  %v967_v60 = vrot.slane %v965_v7, 5  ;;  %v7219_v7 = vld [vmem:[#allocation2 + $0xb0] sm:$0x1] }
  0x71   : > { %v945_v36 = vrot.slane %v944_v0, 4  ;;  %v973_v9 = vrot.slane %v971_v27, 5  ;;  %v977_v53 = vrot.slane %v975_v62, 4  ;;  %v981_v55 = vshll.u32 %v7200_v40, 16  ;;  %9694 = vst [vmem:[#allocation8_spill] sm:$0xff] %v7219_v7 }
  0x72   : > { %v955_v11 = vrot.slane %v954_v21, 4  ;;  %6361 = vmatmul.mubr.msk.bf16.gmra.mxu1 %vm2636_vm7, %v5740_v35  ;;  %v968_v49 = vor.u32 %v967_v60, %v964_v46  ;;  %v5665_v63 = vcombine.high %v7160_v12, %v7160_v12  ;;  %v1130_v58 = vshrl.u32 %v7208_v32, 16  ;;  %v7229_v62 = vld [vmem:[#allocation2 + $0x4] sm:$0xf] }
  0x73   : > { %v950_v1 = vsel %vm6856_vm9, %v945_v36, %v949_v51  ;;  %v978_v0 = vor.u32 %v977_v53, %v973_v9  ;;  %v983_v4 = vrot.slane %v981_v55, 5  ;;  %v1133_v20 = vshll.u32 %v7208_v32, 16  ;;  %v6693_v35 = vld [vmem:[%s9633_s1 + $0x8] ss:$0 sps:$4 sm:$0xcc]  }
  0x74   : > { %v960_v6 = vsel %vm6856_vm9, %v955_v11, %v959_v43  ;;  %v969_v27 = vrot.slane %v968_v49, 4  ;;  %730 = vst.msk [vmem:[#allocation2 + $0xac] sm:$0xf] %vm685_vm1, %v5665_v63  ;;  %v1132_v51 = vrot.slane %v1130_v58, 4  ;;  %v9695_v12 = vmov 0 }
  0x75   : > { %v5733_v21 = vcombine.low %v950_v1, %v960_v6  ;;  %v9696_v12 = vsel %vm7225_vm12, 4294967295, %v9695_v12  ;;  %v1247_v43 = vrot.slane %v7229_v62, 5  ;;  %v979_v36 = vrot.slane %v978_v0, 4  ;;  %v1179_v53 = vld [vmem:[#allocation2 + $0xc] sm:$0xe] }
  0x76   : > { %9697 = vst [vmem:[#allocation9_spill] sm:$0xff] %v9696_v12  ;;  %v1135_v46 = vrot.slane %v1133_v20, 5  ;;  %v484_v60 = vsel %vm6844_vm8, 0, %v7163_v13  ;;  %v500_v11 = vsel %vm6844_vm8, %v7134_v33, 0  ;;  %v974_v55 = vsel %vm6856_vm9, %v969_v27, %v973_v9  ;;  %v1180_v58 = vld [vmem:[#allocation2 + $0x18] sm:$0xe] }
  0x77   : > { %6348 = vmatprep.mubr.msk.bf16.mxu0 %vm2636_vm7, %v5733_v21  ;;  %v1149_v1 = vshll.u32 %v7219_v7, 16  ;;  %v5667_v49 = vcombine.low %v484_v60, %v484_v60  ;;  %v5668_v63 = vcombine.high %v484_v60, %v484_v60  ;;  %v984_v6 = vsel %vm6856_vm9, %v979_v36, %v983_v4  ;;  %v7539_v12 = vld [vmem:[#allocation2 + $0x40] sm:$0xf] }
  0x78   : > { %v1136_v0 = vor.u32 %v1135_v46, %v1132_v51  ;;  %v5669_v13 = vcombine.low %v500_v11, %v500_v11  ;;  %v9698_v20 = vrot.slane %v7127_v28, 9  ;;  %v5734_v31 = vcombine.low %v974_v55, %v984_v6 }
  0x79   : > { %732 = vst.msk [vmem:[#allocation2 + $0xb4] sm:$0xf] %vm685_vm1, %v5667_v49  ;;  %733 = vst.msk [vmem:[#allocation2 + $0xb8] sm:$0xf] %vm685_vm1, %v5668_v63  ;;  %v1249_v9 = vrot.slane %v1247_v43, 4  ;;  %v5674_v21 = vrot.slane %v1179_v53, 9 }
  0x7a   : > { %v1248_v33 = vsel %vm7225_vm12, %v9698_v20, %v1247_v43  ;;  %v9699_v27 = vrot.slane %v6905_v26, 5  ;;  %734 = vst.msk [vmem:[#allocation2 + $0xbc] sm:$0x1] %vm688_vm2, %v5669_v13  ;;  %v3777_v4 = vrot.slane %v6693_v35, 2  ;;  %v5675_v51 = vrot.slane %v1180_v58, 9  ;;  %6349 = vmatmul.mubr.msk.bf16.gmra.mxu0 %vm2636_vm7, %v5734_v31 }
  0x7b   : > { %v1261_v36 = vrot.slane %v6929_v8, 5  ;;  %v9700_v28 = vrot.slane %v6838_v18, 5  ;;  %v9702_v53 = vrot.slane %v6891_v14, 5  ;;  %v1264_v55 = vrot.slane %v6933_v29, 5  ;;  %v1181_v49 = vld [vmem:[#allocation2 + $0x24] sm:$0xe] }
  0x7c   : > { %v1256_v60 = vrot.slane %v9699_v27, 4  ;;  %v9701_v11 = vmov %v9699_v27  ;;  %v7271_v63 = vld [vmem:[#allocation2 + $0xac] sm:$0xf]  ;;  %v1137_v31 = vrot.slane %v1136_v0, 4  ;;  %v1151_v18 = vrot.slane %v1149_v1, 5  ;;  %6647 = vmatprep.subr.msk.bf16.mxu0 %vm2685_vm0, %v3777_v4 }
  0x7d   : > { %v1251_v46 = vsel %vm7225_vm12, %v1249_v9, %v9700_v28  ;;  %v1255_v43 = vsel %vm7225_vm12, %v5674_v21, %v9701_v11  ;;  %v1139_v13 = vshll.u32 %v7271_v63, 16  ;;  %v1143_v20 = vshrl.u32 %v7271_v63, 16  ;;  %v1182_v21 = vld [vmem:[#allocation2 + $0x30] sm:$0xe] }
  0x7e   : > { %v1258_v35 = vsel %vm7225_vm12, %v1256_v60, %v9702_v53  ;;  %v5792_v58 = vcombine.low %v1248_v33, %v1251_v46  ;;  %v1262_v14 = vsel %vm7225_vm12, %v5675_v51, %v1261_v36  ;;  %v1263_v9 = vrot.slane %v1261_v36, 4 }
  0x7f   : > { %v5793_v6 = vcombine.low %v1255_v43, %v1258_v35  ;;  %v5676_v29 = vrot.slane %v1181_v49, 9  ;;  %v1268_v27 = vrot.slane %v7005_v47, 5  ;;  %v1271_v1 = vrot.slane %v6942_v37, 5 }
  0x80   : > { %6404 = vmatprep.mubr.msk.bf16.mxu0 %vm2636_vm7, %v5792_v58  ;;  %v1141_v33 = vrot.slane %v1139_v13, 5  ;;  %v1145_v60 = vrot.slane %v1143_v20, 4  ;;  %v3827_v28 = vsel %vm2685_vm0, %v3777_v4, 0  ;;  %v1265_v46 = vsel %vm7225_vm12, %v1263_v9, %v1264_v55  ;;  %v7286_v51 = vld [vmem:[#allocation2 + $0xb4] sm:$0xf] }
  0x81   : > { %v7288_v36 = vld [vmem:[#allocation2 + $0xb8] sm:$0xf]  ;;  %v5794_v11 = vcombine.low %v1262_v14, %v1265_v46  ;;  %v1269_v43 = vsel %vm7225_vm12, %v5676_v29, %v1268_v27  ;;  %v1270_v53 = vrot.slane %v1268_v27, 4  ;;  %v5677_v37 = vrot.slane %v1182_v21, 9  ;;  %v7292_v49 = vld [vmem:[#allocation2 + $0xbc] sm:$0x1] }
  0x82   : > { %v1146_v35 = vor.u32 %v1145_v60, %v1141_v33  ;;  %9703 = vst [vmem:[#allocation10_spill] sm:$0xff] %v7292_v49  ;;  %v1154_v58 = vshrl.u32 %v7286_v51, 16  ;;  %v1157_v4 = vshll.u32 %v7286_v51, 16  ;;  %v1275_v13 = vrot.slane %v7060_v3, 5  ;;  %v7305_v21 = vld [vmem:[%s9633_s1 + $0x10] sm:$0x3]  ;;  %6405 = vmatmul.mubr.msk.bf16.vlgmr.msra.gmra.mxu0 %vm2636_vm7, %v5793_v6 }
  0x83   : > { %v1163_v55 = vshll.u32 %v7288_v36, 16  ;;  %v1167_v20 = vshrl.u32 %v7288_v36, 16  ;;  %v1173_v14 = vshll.u32 %v7292_v49, 16  ;;  %v1272_v9 = vsel %vm7225_vm12, %v1270_v53, %v1271_v1  ;;  %6471 = vmatpush3.bf16.msra.mxu0 %v3827_v28  ;;  %6408 = vmatprep.mubr.msk.bf16.mxu0 %vm2636_vm7, %v5794_v11  ;;  %v1183_v53 = vld [vmem:[#allocation2 + $0x3c] sm:$0xe] }
  0x84   : > { %v1142_v29 = vsel %vm6856_vm9, %v1137_v31, %v1141_v33  ;;  %v1147_v27 = vrot.slane %v1146_v35, 4  ;;  %v1156_v60 = vrot.slane %v1154_v58, 4  ;;  %v1159_v46 = vrot.slane %v1157_v4, 5  ;;  %6649 = vmatprep.subr.msk.bf16.mxu0 %vm2685_vm0, %v7305_v21 }
  0x85   : > { %v1165_v0 = vrot.slane %v1163_v55, 5  ;;  %v1169_v57 = vrot.slane %v1167_v20, 4  ;;  %v5795_v49 = vcombine.low %v1269_v43, %v1272_v9  ;;  %v1276_v1 = vsel %vm7225_vm12, %v5677_v37, %v1275_v13  ;;  %v1184_v43 = vld [vmem:[#allocation2 + $0x48] sm:$0xe] }
  0x86   : > { %v1152_v7 = vsel %vm6856_vm9, %v1147_v27, %v1151_v18  ;;  %v1160_v39 = vor.u32 %v1159_v46, %v1156_v60  ;;  %v1277_v31 = vrot.slane %v1275_v13, 4  ;;  %v1278_v33 = vrot.slane %v7050_v15, 5 }
  0x87   : > { %v5741_v6 = vcombine.low %v1142_v29, %v1152_v7  ;;  %v1170_v35 = vor.u32 %v1169_v57, %v1165_v0  ;;  %v1175_v28 = vrot.slane %v1173_v14, 5  ;;  %v5764_v11 = vcombine.low %v7055_v56, %v7060_v3  ;;  %v6730_v29 = vld [vmem:[#allocation2] sm:$0xf] }
  0x88   : > { %v1161_v58 = vrot.slane %v1160_v39, 4  ;;  %v1279_v37 = vsel %vm7225_vm12, %v1277_v31, %v1278_v33  ;;  %v5678_v4 = vrot.slane %v1183_v53, 9  ;;  %v1282_v18 = vrot.slane %v7080_v52, 5  ;;  %v7346_v31 = vld [vmem:[#allocation2 + $0x64] sm:$0xf] }
  0x89   : > { %6364 = vmatprep.mubr.msk.bf16.mxu1 %vm2636_vm7, %v5741_v6  ;;  %v1171_v15 = vrot.slane %v1170_v35, 4  ;;  %v5796_v13 = vcombine.low %v1276_v1, %v1279_v37  ;;  %v1285_v55 = vrot.slane %v7066_v30, 5  ;;  %v5765_v57 = vcombine.low %v7074_v48, %v7080_v52  ;;  %v1186_v6 = vld [vmem:[#allocation2 + $0x60] sm:$0xe]  ;;  %v9709_v56 = vld [vmem:[#allocation10_spill] sm:$0xff] }
  0x8a   : > { %v1166_v7 = vsel %vm6856_vm9, %v1161_v58, %v1165_v0  ;;  %v1284_v20 = vrot.slane %v1282_v18, 4  ;;  %v5679_v39 = vrot.slane %v1184_v43, 9  ;;  %v1289_v14 = vrot.slane %v7183_v19, 5  ;;  %6409 = vmatmul.mubr.msk.bf16.gmra.mxu0 %vm2636_vm7, %v5795_v49  ;;  %v1185_v49 = vld [vmem:[#allocation2 + $0x54] sm:$0xe] }
  0x8b   : > { %v1176_v9 = vsel %vm6856_vm9, %v1171_v15, %v1175_v28  ;;  %v5760_v27 = vcombine.low %v6730_v29, %v7229_v62  ;;  %v1292_v60 = vrot.slane %v7177_v45, 5  ;;  %6412 = vmatprep.mubr.msk.bf16.mxu0 %vm2636_vm7, %v5796_v13  ;;  %v1283_v0 = vsel %vm7225_vm12, %v5678_v4, %v1282_v18  ;;  %v6732_v4 = vld [vmem:[#allocation2 + $0x68] sm:$0x1] }
  0x8c   : > { %v5742_v46 = vcombine.low %v1166_v7, %v1176_v9  ;;  %v1291_v30 = vrot.slane %v1289_v14, 4  ;;  %v1286_v1 = vsel %vm7225_vm12, %v1284_v20, %v1285_v55  ;;  %v1296_v53 = vrot.slane %v7195_v38, 5  ;;  %v1187_v55 = vld [vmem:[#allocation2 + $0x6c] sm:$0xe]  ;;  %v1191_v9 = vld [vmem:[#allocation2 + $0x9c] sm:$0xe] }
  0x8d   : > { %v1290_v62 = vsel %vm7225_vm12, %v5679_v39, %v1289_v14  ;;  %v1303_v33 = vrot.slane %v7346_v31, 5  ;;  %v5797_v35 = vcombine.low %v1283_v0, %v1286_v1  ;;  %v5680_v43 = vrot.slane %v1185_v49, 9  ;;  %v1188_v14 = vld [vmem:[#allocation2 + $0x78] sm:$0xe] }
  0x8e   : > { %6365 = vmatmul.mubr.msk.bf16.gmra.mxu1 %vm2636_vm7, %v5742_v46  ;;  %v1293_v45 = vsel %vm7225_vm12, %v1291_v30, %v1292_v60  ;;  %v1298_v58 = vrot.slane %v1296_v53, 4  ;;  %v1299_v37 = vrot.slane %v7200_v40, 5  ;;  %v1306_v18 = vrot.slane %v6732_v4, 5  ;;  %v6733_v30 = vld [vmem:[#allocation2 + $0x74] sm:$0x1] }
  0x8f   : > { %6370 = vmatprep.mubr.msk.bf16.mxu1 %vm2636_vm7, %v5760_v27  ;;  %v5798_v28 = vcombine.low %v1290_v62, %v1293_v45  ;;  %v5681_v15 = vrot.slane %v1186_v6, 9  ;;  %v1305_v13 = vrot.slane %v1303_v33, 4  ;;  %v1310_v7 = vrot.slane %v6918_v61, 5 }
  0x90   : > { %v5762_v20 = vcombine.low %v6927_v16, %v6929_v8  ;;  %v3531_v39 = vsel %vm2685_vm0, %v6977_v10, 0  ;;  %v1297_v40 = vsel %vm7225_vm12, %v5680_v43, %v1296_v53  ;;  %v1300_v29 = vsel %vm7225_vm12, %v1298_v58, %v1299_v37  ;;  %v7366_v16 = vld [vmem:[%s9633_s1 + $0xc] sm:$0x3]  ;;  %v1189_v58 = vld [vmem:[#allocation2 + $0x84] sm:$0xe] }
  0x91   : > { %v5682_v27 = vrot.slane %v1187_v55, 9  ;;  %v1317_v61 = vrot.slane %v7020_v59, 5  ;;  %v9704_v8 = vcombine.low %v6903_v25, %v6905_v26  ;;  %v1304_v10 = vsel %vm7225_vm12, %v5681_v15, %v1303_v33  ;;  %v7446_v55 = vld [vmem:[#allocation2 + $0x6c] sm:$0xf] }
  0x92   : > { %6413 = vmatmul.mubr.msk.bf16.gmra.mxu0 %vm2636_vm7, %v5797_v35  ;;  %v1307_v60 = vsel %vm7225_vm12, %v1305_v13, %v1306_v18  ;;  %v1312_v46 = vrot.slane %v1310_v7, 4  ;;  %v1313_v0 = vrot.slane %v6733_v30, 5  ;;  %v5683_v1 = vrot.slane %v1188_v14, 9  ;;  %v7399_v13 = vld [vmem:[#allocation2 + $0x60] sm:$0xf] }
  0x93   : > { %6416 = vmatprep.mubr.msk.bf16.mxu0 %vm2636_vm7, %v5798_v28  ;;  %v5686_v62 = vrot.slane %v1191_v9, 9  ;;  %v5799_v25 = vcombine.low %v1297_v40, %v1300_v29  ;;  %v1338_v26 = vrot.slane %v7167_v24, 5  ;;  %v1341_v45 = vrot.slane %v7154_v5, 5  ;;  %v7414_v40 = vld [vmem:[#allocation2 + $0xc] sm:$0xf] }
  0x94   : > { %v5800_v33 = vcombine.low %v1304_v10, %v1307_v60  ;;  %v1311_v6 = vsel %vm7225_vm12, %v5682_v27, %v1310_v7  ;;  %v1319_v35 = vrot.slane %v1317_v61, 4  ;;  %v1320_v28 = vrot.slane %v7022_v2, 5  ;;  %v1192_v10 = vld [vmem:[#allocation2 + $0xa8] sm:$0xe] }
  0x95   : > { %v1314_v43 = vsel %vm7225_vm12, %v1312_v46, %v1313_v0  ;;  %v1324_v37 = vrot.slane %v7041_v44, 5  ;;  %v7393_v5 = vsel %vm7225_vm12, %v5686_v62, %v1338_v26  ;;  %v1340_v4 = vrot.slane %v1338_v26, 4  ;;  %v9706_v26 = vld [vmem:[#allocation7_spill] sm:$0xff] }
  0x96   : > { %6371 = vmatmul.mubr.msk.bf16.vlgmr.msra.gmra.mxu1 %vm2636_vm7, %v9704_v8  ;;  %v5766_v18 = vcombine.low %v7179_v23, %v7183_v19  ;;  %v1318_v7 = vsel %vm7225_vm12, %v5683_v1, %v1317_v61  ;;  %v1345_v9 = vrot.slane %v7271_v63, 5  ;;  %v5801_v29 = vcombine.low %v1311_v6, %v1314_v43  ;;  %v1193_v1 = vld [vmem:[#allocation2 + $0xb4] sm:$0xe] }
  0x97   : > { %6437 = vmatpush3.bf16.msra.mxu1 %v3531_v39  ;;  %6374 = vmatprep.mubr.msk.bf16.mxu1 %vm2636_vm7, %v5762_v20  ;;  %v1190_v20 = vld [vmem:[#allocation2 + $0x90] sm:$0xe]  ;;  %v1331_v39 = vrot.slane %v7145_v54, 5  ;;  %v7411_v14 = vsel %vm7225_vm12, %v1340_v4, %v1341_v45  ;;  %v5684_v27 = vrot.slane %v1189_v58, 9  ;;  %v1352_v61 = vrot.slane %v7288_v36, 5 }
  0x98   : > { %6648 = vmatprep.subr.msk.bf16.mxu1 %vm2685_vm0, %v7366_v16  ;;  %v9705_v60 = vcombine.low %v7003_v41, %v7005_v47  ;;  %v1321_v46 = vsel %vm7225_vm12, %v1319_v35, %v1320_v28  ;;  %v1326_v30 = vrot.slane %v1324_v37, 4  ;;  %v1327_v0 = vrot.slane %v7032_v17, 5  ;;  %v7434_v47 = vld [vmem:[#allocation2 + $0x10] sm:$0xf]  ;;  %v9708_v28 = vld [vmem:[#allocation8_spill] sm:$0xff] }
  0x99   : > { %v1334_v41 = vrot.slane %v9706_v26, 5  ;;  %9707 = vst [vmem:[#allocation7_spill] sm:$0xff] %v7434_v47  ;;  %v1410_v45 = vshrl.u32 %v7414_v40, 16  ;;  %v1333_v6 = vrot.slane %v1331_v39, 4  ;;  %v5687_v17 = vrot.slane %v1192_v10, 9 }
  0x9a   : > { %6417 = vmatmul.mubr.msk.bf16.gmra.mxu0 %vm2636_vm7, %v5799_v25  ;;  %v5685_v25 = vrot.slane %v1190_v20, 9  ;;  %v1347_v35 = vrot.slane %v1345_v9, 4  ;;  %v1348_v43 = vrot.slane %v9708_v28, 5  ;;  %v5802_v58 = vcombine.low %v1318_v7, %v1321_v46  ;;  %v7448_v10 = vld [vmem:[#allocation2 + $0x70] sm:$0xf]  ;;  %v9710_v46 = vld [vmem:[#allocation5_spill] sm:$0xff] }
  0x9b   : > { %6420 = vmatprep.mubr.msk.bf16.mxu0 %vm2636_vm7, %v5800_v33  ;;  %v1413_v33 = vshll.u32 %v7414_v40, 16  ;;  %v5688_v4 = vrot.slane %v1193_v1, 9  ;;  %v1355_v3 = vrot.slane %v9709_v56, 5  ;;  %v1328_v20 = vsel %vm7225_vm12, %v1326_v30, %v1327_v0  ;;  %v7454_v28 = vld [vmem:[#allocation2 + $0x14] sm:$0x1] }
  0x9c   : > { %v1419_v26 = vshll.u32 %v7434_v47, 16  ;;  %v1423_v62 = vshrl.u32 %v7434_v47, 16  ;;  %9711 = vst [vmem:[#allocation8_spill] sm:$0xff] %v7454_v28  ;;  %v7456_v56 = vld [vmem:[#allocation2 + $0x18] sm:$0xf]  ;;  %v1332_v30 = vsel %vm7225_vm12, %v5685_v25, %v1331_v39  ;;  %v1335_v0 = vsel %vm7225_vm12, %v1333_v6, %v1334_v41 }
  0x9d   : > { %v7465_v49 = vsel %vm7225_vm12, %v5687_v17, %v1345_v9  ;;  %v7469_v53 = vsel %vm7225_vm12, %v1347_v35, %v1348_v43  ;;  %v7476_v39 = vsel %vm7225_vm12, %v5688_v4, %v1352_v61  ;;  %v7482_v9 = vld [vmem:[#allocation2 + $0x1c] sm:$0xf]  ;;  %v7484_v41 = vld [vmem:[#allocation2 + $0x24] sm:$0xf]  ;;  %v1429_v35 = vshll.u32 %v7454_v28, 16 }
  0x9e   : > { %6375 = vmatmul.mubr.msk.bf16.gmra.mxu1 %vm2636_vm7, %v9705_v60  ;;  %v1354_v60 = vrot.slane %v1352_v61, 4  ;;  %9713 = vst [vmem:[#allocation10_spill] sm:$0xff] %v7482_v9  ;;  %v7490_v6 = vrot.slane %v1419_v26, 5  ;;  %v1425_v17 = vrot.slane %v1423_v62, 4  ;;  %v1434_v61 = vshrl.u32 %v7456_v56, 16 }
  0x9f   : > { %6378 = vmatprep.mubr.msk.bf16.mxu1 %vm2636_vm7, %v5764_v11  ;;  %v1325_v11 = vsel %vm7225_vm12, %v5684_v27, %v1324_v37  ;;  %v1412_v37 = vrot.slane %v1410_v45, 4  ;;  %v1415_v27 = vrot.slane %v1413_v33, 5  ;;  %v9712_v33 = vld [vmem:[#allocation6_spill] sm:$0xff]  ;;  %v7494_v43 = vld [vmem:[#allocation2 + $0x28] sm:$0xf]  ;;  %v1447_v23 = vshrl.u32 %v7482_v9, 16 }
  0xa0   : > { %v5803_v45 = vcombine.low %v1325_v11, %v1328_v20  ;;  %v7480_v25 = vsel %vm7225_vm12, %v1354_v60, %v1355_v3  ;;  %v7503_v4 = vld [vmem:[#allocation2 + $0x30] sm:$0xf]  ;;  %v7507_v60 = vld [vmem:[#allocation2 + $0x20] sm:$0x1]  ;;  %v1443_v3 = vshll.u32 %v7482_v9, 16  ;;  %v1458_v19 = vshrl.u32 %v7484_v41, 16 }
  0xa1   : > { %v1416_v52 = vor.u32 %v1415_v27, %v1412_v37  ;;  %9714 = vst [vmem:[#allocation5_spill] sm:$0xff] %v7507_v60  ;;  %v1461_v11 = vshll.u32 %v7484_v41, 16  ;;  %v1467_v20 = vshll.u32 %v7494_v43, 16  ;;  %v1471_v26 = vshrl.u32 %v7494_v43, 16  ;;  %v7517_v37 = vld [vmem:[#allocation2 + $0x34] sm:$0xf] }
  0xa2   : > { %6421 = vmatmul.mubr.msk.bf16.gmra.mxu0 %vm2636_vm7, %v5801_v29  ;;  %v1426_v27 = vor.u32 %v1425_v17, %v7490_v6  ;;  %v1482_v29 = vshrl.u32 %v7503_v4, 16  ;;  %v7526_v7 = vld [vmem:[#allocation2 + $0x2c] sm:$0x1]  ;;  %v1485_v48 = vshll.u32 %v7503_v4, 16  ;;  %v7530_v8 = vrot.slane %v1443_v3, 5 }
  0xa3   : > { %6424 = vmatprep.mubr.msk.bf16.mxu0 %vm2636_vm7, %v5802_v58  ;;  %v5804_v58 = vcombine.low %v1332_v30, %v1335_v0  ;;  %v7520_v30 = vrot.slane %v1429_v35, 5  ;;  %v1436_v0 = vrot.slane %v1434_v61, 4  ;;  %v7523_v62 = vrot.slane %v1416_v52, 4  ;;  %9715 = vst [vmem:[#allocation6_spill] sm:$0xff] %v7526_v7  ;;  %v7533_v61 = vld [vmem:[#allocation2 + $0x3c] sm:$0xf] }
  0xa4   : > { %v1449_v2 = vrot.slane %v1447_v23, 4  ;;  %v1460_v17 = vrot.slane %v1458_v19, 4  ;;  %v1491_v35 = vshll.u32 %v7517_v37, 16  ;;  %v1463_v52 = vrot.slane %v1461_v11, 5  ;;  %v7547_v23 = vld [vmem:[#allocation2 + $0x38] sm:$0x1] }
  0xa5   : > { %v1473_v15 = vrot.slane %v1471_v26, 4  ;;  %v1484_v19 = vrot.slane %v1482_v29, 4  ;;  %v1427_v26 = vrot.slane %v1426_v27, 4  ;;  %v1509_v3 = vshll.u32 %v7533_v61, 16 }
  0xa6   : > { %6379 = vmatmul.mubr.msk.bf16.gmra.mxu1 %vm2636_vm7, %v5765_v57  ;;  %v1437_v57 = vshll.u32 %v7456_v56, 16  ;;  %v7549_v11 = vrot.slane %v1491_v35, 5  ;;  %v1515_v29 = vshll.u32 %v7539_v12, 16 }
  0xa7   : > { %6382 = vmatprep.mubr.msk.bf16.mxu1 %vm2636_vm7, %v5766_v18  ;;  %v1453_v18 = vshll.u32 %v7507_v60, 16  ;;  %v1495_v60 = vshrl.u32 %v7517_v37, 16 }
  0xa8   : > { %v1439_v1 = vrot.slane %v1437_v57, 5  ;;  %v7536_v57 = vrot.slane %v1467_v20, 5  ;;  %v9717_v20 = vcombine.low %v7399_v13, %v7346_v31  ;;  %v1501_v31 = vshll.u32 %v7547_v23, 16 }
  0xa9   : > { %v1497_v47 = vrot.slane %v1495_v60, 4  ;;  %v1519_v13 = vshrl.u32 %v7539_v12, 16  ;;  %v1455_v27 = vrot.slane %v1453_v18, 5  ;;  %v7570_v9 = vrot.slane %v1515_v29, 5 }
  0xaa   : > { %6425 = vmatmul.mubr.msk.bf16.gmra.mxu0 %vm2636_vm7, %v5803_v45  ;;  %v9716_v45 = vcombine.low %v7193_v50, %v7195_v38  ;;  %v1440_v28 = vor.u32 %v1439_v1, %v1436_v0  ;;  %v1506_v38 = vshrl.u32 %v7533_v61, 16  ;;  %v1450_v50 = vor.u32 %v1449_v2, %v7530_v8  ;;  %v7568_v0 = vld [vmem:[#allocation2 + $0x44] sm:$0x1] }
  0xab   : > { %6428 = vmatprep.mubr.msk.bf16.mxu0 %vm2636_vm7, %v5804_v58  ;;  %v1487_v58 = vrot.slane %v1485_v48, 5  ;;  %v1464_v48 = vor.u32 %v1463_v52, %v1460_v17  ;;  %v1474_v35 = vor.u32 %v1473_v15, %v7536_v57  ;;  %v7565_v1 = vsel %vm2685_vm0, %v7366_v16, 0  ;;  %v7572_v15 = vld [vmem:[#allocation2 + $0x48] sm:$0xf] }
  0xac   : > { %v1498_v2 = vor.u32 %v1497_v47, %v7549_v11  ;;  %v1521_v17 = vrot.slane %v1519_v13, 4  ;;  %v9718_v52 = vcombine.low %v7393_v5, %v7411_v14  ;;  %v1422_v16 = vsel %vm6856_vm9, %v7523_v62, %v7490_v6  ;;  %v7591_v13 = vld [vmem:[#allocation2 + $0x54] sm:$0xf] }
  0xad   : > { %v1488_v60 = vor.u32 %v1487_v58, %v1484_v19  ;;  %v1432_v47 = vsel %vm6856_vm9, %v1427_v26, %v7520_v30  ;;  %v1441_v18 = vrot.slane %v1440_v28, 4  ;;  %v7585_v19 = vld [vmem:[#allocation2 + $0x4c] sm:$0xf]  ;;  %v9719_v58 = vcombine.low %v7465_v49, %v7469_v53 }
  0xae   : > { %6383 = vmatmul.mubr.msk.bf16.gmra.mxu1 %vm2636_vm7, %v9716_v45  ;;  %v1477_v45 = vshll.u32 %v7526_v7, 16  ;;  %v1511_v7 = vrot.slane %v1509_v3, 5  ;;  %v1451_v3 = vrot.slane %v1450_v50, 4  ;;  %v1465_v5 = vrot.slane %v1464_v48, 4 }
  0xaf   : > { %6386 = vmatprep.mubr.msk.bf16.mxu1 %vm2636_vm7, %v9717_v20  ;;  %v1508_v20 = vrot.slane %v1506_v38, 4  ;;  %v1475_v14 = vrot.slane %v1474_v35, 4  ;;  %v1503_v29 = vrot.slane %v1501_v31, 5  ;;  %v9720_v6 = vcombine.low %v7446_v55, %v7448_v10 }
  0xb0   : > { %v1479_v38 = vrot.slane %v1477_v45, 5  ;;  %v1489_v28 = vrot.slane %v1488_v60, 4  ;;  %v1499_v62 = vrot.slane %v1498_v2, 4  ;;  %v1525_v30 = vshll.u32 %v7568_v0, 16  ;;  %v7619_v2 = vld [vmem:[#allocation2 + $0x58] sm:$0xf] }
  0xb1   : > { %v1530_v26 = vshrl.u32 %v7572_v15, 16  ;;  %v9721_v53 = vcombine.low %v9710_v46, %v7020_v59  ;;  %v1512_v49 = vor.u32 %v1511_v7, %v1508_v20  ;;  %v1522_v50 = vor.u32 %v1521_v17, %v7570_v9 }
  0xb2   : > { %6429 = vmatmul.mubr.msk.bf16.gmra.mxu0 %vm2636_vm7, %v9718_v52  ;;  %v1533_v45 = vshll.u32 %v7572_v15, 16  ;;  %v1539_v55 = vshll.u32 %v7585_v19, 16  ;;  %v5856_v10 = vcombine.low %v1422_v16, %v1432_v47  ;;  %v1543_v48 = vshrl.u32 %v7585_v19, 16 }
  0xb3   : > { %6432 = vmatprep.mubr.msk.bf16.mxu0 %vm2636_vm7, %v9719_v58  ;;  %v1554_v35 = vshrl.u32 %v7591_v13, 16  ;;  %v1557_v31 = vshll.u32 %v7591_v13, 16  ;;  %v1446_v59 = vsel %vm6856_vm9, %v1441_v18, %v7530_v8  ;;  %v1456_v7 = vsel %vm6856_vm9, %v1451_v3, %v1455_v27  ;;  %v7632_v3 = vld [vmem:[#allocation2 + $0x50] sm:$0x1] }
  0xb4   : > { %v1470_v46 = vsel %vm6856_vm9, %v1465_v5, %v7536_v57  ;;  %v1480_v60 = vsel %vm6856_vm9, %v1475_v14, %v1479_v38  ;;  %v1494_v20 = vsel %vm6856_vm9, %v1489_v28, %v7549_v11  ;;  %v1504_v17 = vsel %vm6856_vm9, %v1499_v62, %v1503_v29  ;;  %9723 = vst [vmem:[#allocation11_spill] sm:$0xff] %v7632_v3 }
  0xb5   : > { %v1527_v8 = vrot.slane %v1525_v30, 5  ;;  %v1532_v52 = vrot.slane %v1530_v26, 4  ;;  %v1513_v16 = vrot.slane %v1512_v49, 4  ;;  %v1523_v27 = vrot.slane %v1522_v50, 4 }
  0xb6   : > { %6387 = vmatmul.mubr.msk.bf16.gmra.mxu1 %vm2636_vm7, %v9720_v6  ;;  %v1535_v47 = vrot.slane %v1533_v45, 5  ;;  %v7626_v18 = vrot.slane %v1539_v55, 5  ;;  %v9722_v57 = vcombine.low %v7476_v39, %v7480_v25  ;;  %v1545_v58 = vrot.slane %v1543_v48, 4  ;;  %v7641_v25 = vld [vmem:[#allocation2 + $0x60] sm:$0xf] }
  0xb7   : > { %6390 = vmatprep.mubr.msk.bf16.mxu1 %vm2636_vm7, %v9721_v53  ;;  %v1556_v5 = vrot.slane %v1554_v35, 4  ;;  %v1559_v11 = vrot.slane %v1557_v31, 5  ;;  %v1563_v14 = vshll.u32 %v7619_v2, 16  ;;  %v5857_v38 = vcombine.low %v1446_v59, %v1456_v7  ;;  %v7653_v53 = vld [vmem:[#allocation2 + $0x64] sm:$0xf] }
  0xb8   : > { %v4427_v29 = vsel %vm2685_vm0, %v7305_v21, 0  ;;  %v1567_v39 = vshrl.u32 %v7619_v2, 16  ;;  %v9724_v28 = vcombine.low %v9712_v33, %v7041_v44  ;;  %v5858_v62 = vcombine.low %v1470_v46, %v1480_v60  ;;  %v7665_v55 = vld [vmem:[#allocation2 + $0x6c] sm:$0xf]  ;;  %v7673_v31 = vld [vmem:[#allocation2 + $0x5c] sm:$0x1] }
  0xb9   : > { %v7647_v30 = vcombine.low %v1494_v20, %v1504_v17  ;;  %v9725_v49 = vcombine.low %v7143_v34, %v7145_v54  ;;  %v1518_v44 = vsel %vm6856_vm9, %v1513_v16, %v7570_v9  ;;  %v1528_v33 = vsel %vm6856_vm9, %v1523_v27, %v1527_v8  ;;  %9726 = vst [vmem:[#allocation12_spill] sm:$0xff] %v7673_v31 }
  0xba   : > { %6433 = vmatmul.mubr.msk.bf16.gmra.mxu0 %vm2636_vm7, %v9722_v57  ;;  %v1536_v50 = vor.u32 %v1535_v47, %v1532_v52  ;;  %v1549_v45 = vshll.u32 %v7632_v3, 16  ;;  %v1546_v48 = vor.u32 %v1545_v58, %v7626_v18  ;;  %v1560_v35 = vor.u32 %v1559_v11, %v1556_v5  ;;  %v7688_v57 = vld [vmem:[#allocation2 + $0x78] sm:$0xf]  ;;  %v7693_v58 = vld [vmem:[%s9633_s1 + $0x14] sm:$0x3] }
  0xbb   : > { %6472 = vmatprep.mubr.msk.bf16.mxu0 %vm2636_vm7, %v5856_v10  ;;  %v7667_v10 = vld [vmem:[#allocation2 + $0x70] sm:$0xf]  ;;  %v7670_v34 = vrot.slane %v1563_v14, 5  ;;  %v1578_v54 = vshrl.u32 %v7641_v25, 16  ;;  %v1569_v9 = vrot.slane %v1567_v39, 4  ;;  %v1581_v59 = vshll.u32 %v7641_v25, 16 }
  0xbc   : > { %v1587_v7 = vshll.u32 %v7653_v53, 16  ;;  %v1591_v46 = vshrl.u32 %v7653_v53, 16  ;;  %v1602_v60 = vshrl.u32 %v7665_v55, 16  ;;  %v1605_v20 = vshll.u32 %v7665_v55, 16 }
  0xbd   : > { %v1611_v17 = vshll.u32 %v7667_v10, 16  ;;  %v1615_v8 = vshrl.u32 %v7667_v10, 16  ;;  %v5860_v52 = vcombine.low %v1518_v44, %v1528_v33  ;;  %v7682_v16 = vrot.slane %v1536_v50, 4  ;;  %v7703_v44 = vld [vmem:[#allocation2 + $0x68] sm:$0x1] }
  0xbe   : > { %6391 = vmatmul.mubr.msk.bf16.gmra.mxu1 %vm2636_vm7, %v9724_v28  ;;  %v7684_v27 = vrot.slane %v1549_v45, 5  ;;  %v1547_v5 = vrot.slane %v1546_v48, 4  ;;  %v7696_v11 = vrot.slane %v1560_v35, 4  ;;  %v1573_v14 = vshll.u32 %v7673_v31, 16  ;;  %v7699_v28 = vld [vmem:[#allocation2 + $0x7c] sm:$0xf] }
  0xbf   : > { %6394 = vmatprep.mubr.msk.bf16.mxu1 %vm2636_vm7, %v9725_v49  ;;  %v1580_v39 = vrot.slane %v1578_v54, 4  ;;  %v1570_v49 = vor.u32 %v1569_v9, %v7670_v34  ;;  %9727 = vst [vmem:[#allocation13_spill] sm:$0xff] %v7703_v44  ;;  %v1583_v33 = vrot.slane %v1581_v59, 5  ;;  %v7705_v50 = vrot.slane %v1587_v7, 5  ;;  %v7711_v48 = vld [vmem:[#allocation2 + $0x74] sm:$0x1] }
  0xc0   : > { %v1593_v45 = vrot.slane %v1591_v46, 4  ;;  %9729 = vst [vmem:[#allocation14_spill] sm:$0xff] %v7711_v48  ;;  %v1604_v35 = vrot.slane %v1602_v60, 4  ;;  %v1607_v54 = vrot.slane %v1605_v20, 5  ;;  %v9730_v9 = vcombine.low %v7208_v32, %v7271_v63  ;;  %v7728_v46 = vld [vmem:[#allocation2 + $0x84] sm:$0xf] }
  0xc1   : > { %v1629_v59 = vshll.u32 %v7688_v57, 16  ;;  %v1635_v7 = vshll.u32 %v7699_v28, 16  ;;  %v1552_v60 = vsel %vm6856_vm9, %v1547_v5, %v7684_v27  ;;  %v1575_v32 = vrot.slane %v1573_v14, 5 }
  0xc2   : > { %6473 = vmatmul.mubr.msk.bf16.vlgmr.msra.gmra.mxu0 %vm2636_vm7, %v5857_v38  ;;  %v9728_v38 = vcombine.low %v7165_v22, %v7167_v24  ;;  %v1542_v22 = vsel %vm6856_vm9, %v7682_v16, %v7626_v18  ;;  %v1626_v24 = vshrl.u32 %v7688_v57, 16  ;;  %v1597_v63 = vshll.u32 %v7703_v44, 16 }
  0xc3   : > { %6539 = vmatpush3.bf16.msra.mxu0 %v4427_v29  ;;  %6476 = vmatprep.mubr.msk.bf16.mxu0 %vm2636_vm7, %v5858_v62  ;;  %v7713_v29 = vrot.slane %v1611_v17, 5  ;;  %v1617_v62 = vrot.slane %v1615_v8, 4  ;;  %v1639_v20 = vshrl.u32 %v7699_v28, 16  ;;  %v1566_v18 = vsel %vm6856_vm9, %v7696_v11, %v7670_v34 }
  0xc4   : > { %6651 = vmatprep.subr.msk.bf16.mxu0 %vm2685_vm0, %v7693_v58  ;;  %v1571_v17 = vrot.slane %v1570_v49, 4  ;;  %v1584_v8 = vor.u32 %v1583_v33, %v1580_v39  ;;  %v1594_v16 = vor.u32 %v1593_v45, %v7705_v50  ;;  %v1621_v27 = vshll.u32 %v7711_v48, 16  ;;  %v6710_v48 = vld [vmem:[%s6826_s25 + $0x78] sm:$0xff]  }
  0xc5   : > { %v1618_v47 = vor.u32 %v1617_v62, %v7713_v29  ;;  %v1650_v5 = vshrl.u32 %v7728_v46, 16  ;;  %v1628_v14 = vrot.slane %v1626_v24, 4  ;;  %v1631_v21 = vrot.slane %v1629_v59, 5 }
  0xc6   : > { %6395 = vmatmul.mubr.msk.bf16.gmra.mxu1 %vm2636_vm7, %v9728_v38  ;;  %v7740_v38 = vld [vmem:[#allocation2 + $0x88] sm:$0xf]  ;;  %v7745_v26 = vrot.slane %v1635_v7, 5  ;;  %v1653_v6 = vshll.u32 %v7728_v46, 16  ;;  %v1641_v34 = vrot.slane %v1639_v20, 4  ;;  %v1585_v33 = vrot.slane %v1584_v8, 4 }
  0xc7   : > { %6398 = vmatprep.mubr.msk.bf16.mxu1 %vm2636_vm7, %v9730_v9  ;;  %v1608_v9 = vor.u32 %v1607_v54, %v1604_v35  ;;  %v1652_v11 = vrot.slane %v1650_v5, 4  ;;  %v1659_v39 = vshll.u32 %v7740_v38, 16  ;;  %v1663_v49 = vshrl.u32 %v7740_v38, 16  ;;  %v7753_v54 = vld [vmem:[#allocation2 + $0x80] sm:$0x1]  ;;  %v9733_v5 = vld [vmem:[#allocation7_spill] sm:$0xff] }
  0xc8   : > { %v1595_v45 = vrot.slane %v1594_v16, 4  ;;  %v1599_v35 = vrot.slane %v1597_v63, 5  ;;  %9731 = vst [vmem:[#allocation15_spill] sm:$0xff] %v7753_v54  ;;  %v1655_v62 = vrot.slane %v1653_v6, 5  ;;  %v9732_v24 = vcombine.low %v7286_v51, %v7288_v36  ;;  %v7767_v8 = vld [vmem:[#allocation2 + $0x8c] sm:$0x1] }
  0xc9   : > { %v1609_v59 = vrot.slane %v1608_v9, 4  ;;  %v1619_v7 = vrot.slane %v1618_v47, 4  ;;  %v1623_v20 = vrot.slane %v1621_v27, 5  ;;  %v5861_v63 = vcombine.low %v1542_v22, %v1552_v60  ;;  %9735 = vst [vmem:[#allocation7_spill] sm:$0xff] %v7767_v8  ;;  %v7771_v16 = vld [vmem:[#allocation2 + $0x90] sm:$0xf] }
  0xca   : > { %6477 = vmatmul.mubr.msk.bf16.gmra.mxu0 %vm2636_vm7, %v7647_v30  ;;  %v1576_v30 = vsel %vm6856_vm9, %v1571_v17, %v1575_v32  ;;  %v7769_v51 = vrot.slane %v1659_v39, 5  ;;  %v1665_v36 = vrot.slane %v1663_v49, 4  ;;  %v1632_v32 = vor.u32 %v1631_v21, %v1628_v14  ;;  %v9737_v39 = vld [vmem:[#allocation10_spill] sm:$0xff] }
  0xcb   : > { %6480 = vmatprep.mubr.msk.bf16.mxu0 %vm2636_vm7, %v5860_v52  ;;  %v9734_v52 = vcombine.low %v7414_v40, %v9733_v5  ;;  %v1642_v47 = vor.u32 %v1641_v34, %v7745_v26  ;;  %v1645_v17 = vshll.u32 %v7753_v54, 16  ;;  %v1656_v9 = vor.u32 %v1655_v62, %v1652_v11  ;;  %v7775_v40 = vld [vmem:[#allocation2 + $0x94] sm:$0xf]  ;;  %v7791_v11 = vld [vmem:[#allocation2 + $0x9c] sm:$0xf] }
  0xcc   : > { %v5862_v27 = vcombine.low %v1566_v18, %v1576_v30  ;;  %v1590_v22 = vsel %vm6856_vm9, %v1585_v33, %v7705_v50  ;;  %v1600_v60 = vsel %vm6856_vm9, %v1595_v45, %v1599_v35  ;;  %v1614_v21 = vsel %vm6856_vm9, %v1609_v59, %v7713_v29  ;;  %v7797_v35 = vld [vmem:[#allocation2 + $0xa0] sm:$0xf] }
  0xcd   : > { %v1624_v14 = vsel %vm6856_vm9, %v1619_v7, %v1623_v20  ;;  %v1669_v34 = vshll.u32 %v7767_v8, 16  ;;  %v1674_v18 = vshrl.u32 %v7771_v16, 16  ;;  %v1666_v50 = vor.u32 %v1665_v36, %v7769_v51  ;;  %v7801_v20 = vld [vmem:[#allocation2 + $0x98] sm:$0x1] }
  0xce   : > { %6399 = vmatmul.mubr.msk.bf16.gmra.mxu1 %vm2636_vm7, %v9732_v24  ;;  %v1677_v49 = vshll.u32 %v7771_v16, 16  ;;  %v1683_v33 = vshll.u32 %v7775_v40, 16  ;;  %v1687_v45 = vshrl.u32 %v7775_v40, 16  ;;  %v1633_v29 = vrot.slane %v1632_v32, 4  ;;  %9736 = vst [vmem:[#allocation16_spill] sm:$0xff] %v7801_v20 }
  0xcf   : > { %6438 = vmatprep.mubr.msk.bf16.mxu1 %vm2636_vm7, %v9734_v52  ;;  %v1643_v62 = vrot.slane %v1642_v47, 4  ;;  %v1647_v24 = vrot.slane %v1645_v17, 5  ;;  %v1657_v30 = vrot.slane %v1656_v9, 4  ;;  %v5863_v59 = vcombine.low %v1590_v22, %v1600_v60  ;;  %v7811_v9 = vld [vmem:[#allocation2 + $0xa8] sm:$0xf] }
  0xd0   : > { %v5864_v7 = vcombine.low %v1614_v21, %v1624_v14  ;;  %v1698_v52 = vshrl.u32 %v7791_v11, 16  ;;  %v1701_v36 = vshll.u32 %v7791_v11, 16  ;;  %v9738_v6 = vcombine.low %v7456_v56, %v9737_v39  ;;  %v7820_v21 = vld [vmem:[#allocation2 + $0xac] sm:$0xf] }
  0xd1   : > { %v1676_v32 = vrot.slane %v1674_v18, 4  ;;  %v1707_v47 = vshll.u32 %v7797_v35, 16  ;;  %v1711_v17 = vshrl.u32 %v7797_v35, 16  ;;  %v1667_v22 = vrot.slane %v1666_v50, 4  ;;  %v7831_v18 = vld [vmem:[#allocation2 + $0xa4] sm:$0x1] }
  0xd2   : > { %6481 = vmatmul.mubr.msk.bf16.gmra.mxu0 %vm2636_vm7, %v5861_v63  ;;  %v1671_v63 = vrot.slane %v1669_v34, 5  ;;  %v1679_v60 = vrot.slane %v1677_v49, 5  ;;  %v7818_v56 = vrot.slane %v1683_v33, 5  ;;  %v1638_v14 = vsel %vm6856_vm9, %v1633_v29, %v7745_v26 }
  0xd3   : > { %6484 = vmatprep.mubr.msk.bf16.mxu0 %vm2636_vm7, %v5862_v27  ;;  %v9739_v27 = vcombine.low %v7484_v41, %v7494_v43  ;;  %v1648_v34 = vsel %vm6856_vm9, %v1643_v62, %v1647_v24  ;;  %v1662_v41 = vsel %vm6856_vm9, %v1657_v30, %v7769_v51  ;;  %v1700_v50 = vrot.slane %v1698_v52, 4  ;;  %v7841_v24 = vld [vmem:[#allocation2 + $0xb8] sm:$0xf] }
  0xd4   : > { %v1703_v49 = vrot.slane %v1701_v36, 5  ;;  %v1722_v33 = vshrl.u32 %v7811_v9, 16  ;;  %v7837_v26 = vrot.slane %v1707_v47, 5  ;;  %v1713_v29 = vrot.slane %v1711_v17, 4 }
  0xd5   : > { %v1731_v62 = vshll.u32 %v7820_v21, 16  ;;  %v1735_v51 = vshrl.u32 %v7820_v21, 16  ;;  %v1672_v30 = vsel %vm6856_vm9, %v1667_v22, %v1671_v63  ;;  %v1680_v52 = vor.u32 %v1679_v60, %v1676_v32 }
  0xd6   : > { %6439 = vmatmul.mubr.msk.bf16.vlgmr.msra.gmra.mxu1 %vm2636_vm7, %v9738_v6  ;;  %v1689_v6 = vrot.slane %v1687_v45, 4  ;;  %v1725_v45 = vshll.u32 %v7811_v9, 16  ;;  %v5865_v8 = vcombine.low %v1638_v14, %v1648_v34  ;;  %v1704_v44 = vor.u32 %v1703_v49, %v1700_v50  ;;  %v7864_v50 = vld [vmem:[#allocation2 + $0xb0] sm:$0x1]  ;;  %v7867_v49 = vld [vmem:[#allocation2 + $0xbc] sm:$0x1] }
  0xd7   : > { %6505 = vmatpush3.bf16.msra.mxu1 %v7565_v1  ;;  %6442 = vmatprep.mubr.msk.bf16.mxu1 %vm2636_vm7, %v9739_v27  ;;  %v1693_v1 = vshll.u32 %v7801_v20, 16  ;;  %v7835_v27 = vld [vmem:[#allocation2 + $0xb4] sm:$0xf]  ;;  %v1717_v20 = vshll.u32 %v7831_v18, 16  ;;  %v1724_v31 = vrot.slane %v1722_v33, 4  ;;  %v1755_v63 = vshll.u32 %v7841_v24, 16 }
  0xd8   : > { %v1690_v36 = vor.u32 %v1689_v6, %v7818_v56  ;;  %v1746_v17 = vshrl.u32 %v7835_v27, 16  ;;  %v1749_v54 = vshll.u32 %v7835_v27, 16  ;;  %v1727_v3 = vrot.slane %v1725_v45, 5 }
  0xd9   : > { %v1695_v47 = vrot.slane %v1693_v1, 5  ;;  %v9740_v32 = vcombine.low %v7503_v4, %v7517_v37  ;;  %v1714_v22 = vor.u32 %v1713_v29, %v7837_v26  ;;  %v7858_v60 = vrot.slane %v1731_v62, 5 }
  0xda   : > { %6485 = vmatmul.mubr.msk.bf16.gmra.mxu0 %vm2636_vm7, %v5863_v59  ;;  %v5866_v59 = vcombine.low %v1662_v41, %v1672_v30  ;;  %v1737_v6 = vrot.slane %v1735_v51, 4  ;;  %v9741_v14 = vcombine.low %v7533_v61, %v7539_v12  ;;  %v1691_v34 = vrot.slane %v1690_v36, 4 }
  0xdb   : > { %6488 = vmatprep.mubr.msk.bf16.mxu0 %vm2636_vm7, %v5864_v7  ;;  %v1681_v7 = vrot.slane %v1680_v52, 4  ;;  %v1719_v1 = vrot.slane %v1717_v20, 5  ;;  %v1759_v4 = vshrl.u32 %v7841_v24, 16  ;;  %v1748_v41 = vrot.slane %v1746_v17, 4 }
  0xdc   : > { %v1751_v33 = vrot.slane %v1749_v54, 5  ;;  %v7869_v45 = vrot.slane %v1755_v63, 5  ;;  %v429_v29 = vshrl.u32 %v6710_v48, 16  ;;  %v1705_v62 = vrot.slane %v1704_v44, 4 }
  0xdd   : > { %v1728_v51 = vor.u32 %v1727_v3, %v1724_v31  ;;  %v1761_v30 = vrot.slane %v1759_v4, 4  ;;  %v432_v61 = vshll.u32 %v6710_v48, 16  ;;  %v1738_v52 = vor.u32 %v1737_v6, %v7858_v60 }
  0xde   : > { %6443 = vmatmul.mubr.msk.bf16.gmra.mxu1 %vm2636_vm7, %v9740_v32  ;;  %v1715_v32 = vrot.slane %v1714_v22, 4  ;;  %v1741_v20 = vshll.u32 %v7864_v50, 16  ;;  %v431_v36 = vrot.slane %v429_v29, 7  ;;  %v1686_v54 = vsel %vm6856_vm9, %v1681_v7, %v7818_v56 }
  0xdf   : > { %6446 = vmatprep.mubr.msk.bf16.mxu1 %vm2636_vm7, %v9741_v14  ;;  %v5832_v14 = vcombine.low %v7665_v55, %v7667_v10  ;;  %v1696_v17 = vsel %vm6856_vm9, %v1691_v34, %v1695_v47  ;;  %v1765_v3 = vshll.u32 %v7867_v49, 16  ;;  %v1752_v31 = vor.u32 %v1751_v33, %v1748_v41 }
  0xe0   : > { %v1762_v44 = vor.u32 %v1761_v30, %v7869_v45  ;;  %v434_v48 = vor.u32 %v432_v61, %v431_v36  ;;  %v501_v22 = vsel %vm6844_vm8, %v431_v36, 0  ;;  %v1710_v56 = vsel %vm6856_vm9, %v1705_v62, %v7837_v26 }
  0xe1   : > { %v1729_v47 = vrot.slane %v1728_v51, 4  ;;  %v5672_v7 = vcombine.low %v501_v22, %v501_v22  ;;  %v1720_v34 = vsel %vm6856_vm9, %v1715_v32, %v1719_v1  ;;  %v1739_v4 = vrot.slane %v1738_v52, 4  ;;  %v1794_v32 = vld [vmem:[#allocation2 + $0xc] sm:$0xe] }
  0xe2   : > { %6489 = vmatmul.mubr.msk.bf16.gmra.mxu0 %vm2636_vm7, %v5865_v8  ;;  %v9743_v8 = vcombine.low %v7572_v15, %v7585_v19  ;;  %v1743_v41 = vrot.slane %v1741_v20, 5  ;;  %v485_v33 = vsel %vm6844_vm8, 0, %v434_v48  ;;  %v9744_v26 = vcombine.low %v7591_v13, %v7619_v2 }
  0xe3   : > { %6492 = vmatprep.mubr.msk.bf16.mxu0 %vm2636_vm7, %v5866_v59  ;;  %v7902_v59 = vld [vmem:[%s9633_s1 + $0x10] ss:$0 sps:$4 sm:$0xcc]   ;;  %v5867_v29 = vcombine.low %v1686_v54, %v1696_v17  ;;  %v5670_v1 = vcombine.low %v485_v33, %v485_v33  ;;  %v5671_v62 = vcombine.high %v485_v33, %v485_v33  ;;  %737 = vst.msk [vmem:[#allocation2 + $0xc8] sm:$0x1] %vm688_vm2, %v5672_v7  ;;  %v1753_v51 = vrot.slane %v1752_v31, 4 }
  0xe4   : > { %v1763_v30 = vrot.slane %v1762_v44, 4  ;;  %v1767_v61 = vrot.slane %v1765_v3, 5  ;;  %v1860_v52 = vrot.slane %v9733_v5, 5  ;;  %v5868_v13 = vcombine.low %v1710_v56, %v1720_v34  ;;  %v7921_v17 = vld [vmem:[#allocation2 + $0x18] sm:$0xf] }
  0xe5   : > { %v1734_v54 = vsel %vm6856_vm9, %v1729_v47, %v7858_v60  ;;  %735 = vst.msk [vmem:[#allocation2 + $0xc0] sm:$0xf] %vm685_vm1, %v5670_v1  ;;  %736 = vst.msk [vmem:[#allocation2 + $0xc4] sm:$0xf] %vm685_vm1, %v5671_v62  ;;  %v7923_v3 = vld [vmem:[#allocation2 + $0x24] sm:$0xf]  ;;  %v1744_v5 = vsel %vm6856_vm9, %v1739_v4, %v1743_v41  ;;  %v1758_v7 = vsel %vm6856_vm9, %v1753_v51, %v7869_v45 }
  0xe6   : > { %6447 = vmatmul.mubr.msk.bf16.gmra.mxu1 %vm2636_vm7, %v9743_v8  ;;  %v7927_v31 = vld [vmem:[#allocation2 + $0x1c] sm:$0xf]  ;;  %v2047_v44 = vshrl.u32 %v7923_v3, 16  ;;  %v2050_v48 = vshll.u32 %v7923_v3, 16  ;;  %v4673_v63 = vrot.slane %v7902_v59, 2  ;;  %v2023_v22 = vshrl.u32 %v7921_v17, 16 }
  0xe7   : > { %6450 = vmatprep.mubr.msk.bf16.mxu1 %vm2636_vm7, %v9744_v26  ;;  %v2026_v56 = vshll.u32 %v7921_v17, 16  ;;  %v5691_v47 = vrot.slane %v1794_v32, 9  ;;  %v1768_v8 = vsel %vm6856_vm9, %v1763_v30, %v1767_v61  ;;  %v1862_v34 = vrot.slane %v1860_v52, 4  ;;  %v9745_v4 = vld [vmem:[#allocation8_spill] sm:$0xff]  ;;  %v7950_v45 = vld [vmem:[#allocation2 + $0x28] sm:$0xf] }
  0xe8   : > { %v1863_v41 = vrot.slane %v9745_v4, 5  ;;  %6650 = vmatprep.subr.msk.bf16.mxu1 %vm2685_vm0, %v4673_v63  ;;  %v5869_v33 = vcombine.low %v1734_v54, %v1744_v5  ;;  %v9746_v1 = vcombine.low %v7641_v25, %v7653_v53  ;;  %v2049_v51 = vrot.slane %v2047_v44, 4  ;;  %v1795_v44 = vld [vmem:[#allocation2 + $0x18] sm:$0xe] }
  0xe9   : > { %v2052_v30 = vrot.slane %v2050_v48, 5  ;;  %v2056_v61 = vshll.u32 %v7950_v45, 16  ;;  %v2060_v32 = vshrl.u32 %v7950_v45, 16  ;;  %v7964_v54 = vrot.slane %v2023_v22, 4 }
  0xea   : > { %6493 = vmatmul.mubr.msk.bf16.gmra.mxu0 %vm2636_vm7, %v5867_v29  ;;  %v7956_v62 = vld [vmem:[#allocation2 + $0xc8] sm:$0x1]  ;;  %v7966_v5 = vrot.slane %v2026_v56, 5  ;;  %v7970_v4 = vsel %vm7225_vm12, %v5691_v47, %v1860_v52  ;;  %v7979_v55 = vsel %vm7225_vm12, %v1862_v34, %v1863_v41  ;;  %v5692_v36 = vrot.slane %v1795_v44, 9 }
  0xeb   : > { %6496 = vmatprep.mubr.msk.bf16.mxu0 %vm2636_vm7, %v5868_v13  ;;  %v5870_v13 = vcombine.low %v1758_v7, %v1768_v8  ;;  %v1789_v26 = vshll.u32 %v7956_v62, 16  ;;  %v2053_v8 = vor.u32 %v2052_v30, %v2049_v51  ;;  %v7988_v59 = vrot.slane %v2056_v61, 5  ;;  %v9750_v51 = vld [vmem:[#allocation5_spill] sm:$0xff] }
  0xec   : > { %v7972_v48 = vld [vmem:[#allocation2 + $0xc0] sm:$0xf]  ;;  %v2062_v60 = vrot.slane %v2060_v32, 4  ;;  %v1867_v6 = vrot.slane %v9737_v39, 5  ;;  %v1870_v30 = vrot.slane %v9750_v51, 5  ;;  %v8011_v51 = vsel %vm2685_vm0, %v4673_v63, 0 }
  0xed   : > { %v1770_v56 = vshrl.u32 %v7972_v48, 16  ;;  %v1773_v52 = vshll.u32 %v7972_v48, 16  ;;  %9748 = vst [vmem:[#allocation10_spill] sm:$0xff] %v7988_v59  ;;  %v1791_v44 = vrot.slane %v1789_v26, 5  ;;  %v8014_v26 = vld [vmem:[#allocation2 + $0x3c] sm:$0xf] }
  0xee   : > { %6451 = vmatmul.mubr.msk.bf16.gmra.mxu1 %vm2636_vm7, %v9746_v1  ;;  %v7974_v1 = vld [vmem:[#allocation2 + $0xc4] sm:$0xf]  ;;  %v2063_v39 = vor.u32 %v2062_v60, %v7988_v59  ;;  %v8024_v63 = vsel %vm2685_vm0, %v7693_v58, 0  ;;  %v8038_v58 = vsel %vm7225_vm12, %v5692_v36, %v1867_v6  ;;  %v1881_v59 = vrot.slane %v7517_v37, 5 }
  0xef   : > { %6454 = vmatprep.mubr.msk.bf16.mxu1 %vm2636_vm7, %v5832_v14  ;;  %v9661_v14 = vrot.slane %v7950_v45, 5  ;;  %v1779_v47 = vshll.u32 %v7974_v1, 16  ;;  %v1783_v7 = vshrl.u32 %v7974_v1, 16  ;;  %v1772_v34 = vrot.slane %v1770_v56, 4  ;;  %v8000_v56 = vld [vmem:[#allocation2 + $0x30] sm:$0xf] }
  0xf0   : > { %v1775_v41 = vrot.slane %v1773_v52, 5  ;;  %v1796_v52 = vld [vmem:[#allocation2 + $0x24] sm:$0xe]  ;;  %v2074_v60 = vshll.u32 %v8000_v56, 16  ;;  %v9757_v36 = vcombine.low %v7921_v17, %v7927_v31 }
  0xf1   : > { %v1781_v20 = vrot.slane %v1779_v47, 5  ;;  %v1785_v29 = vrot.slane %v1783_v7, 4  ;;  %v7995_v15 = vrot.slane %v9661_v14, 4  ;;  %v9751_v47 = vcombine.low %v7688_v57, %v7699_v28 }
  0xf2   : > { %6497 = vmatmul.mubr.msk.bf16.gmra.mxu0 %vm2636_vm7, %v5869_v33  ;;  %v1776_v61 = vor.u32 %v1775_v41, %v1772_v34  ;;  %v1874_v33 = vrot.slane %v7494_v43, 5  ;;  %v8007_v7 = vrot.slane %v2053_v8, 4  ;;  %v2095_v34 = vshrl.u32 %v8014_v26, 16 }
  0xf3   : > { %9749 = vst [vmem:[#allocation3_spill] sm:$0xff] %v7995_v15  ;;  %6500 = vmatprep.mubr.msk.bf16.mxu0 %vm2636_vm7, %v5870_v13  ;;  %v1786_v32 = vor.u32 %v1785_v29, %v1781_v20  ;;  %v2071_v29 = vshrl.u32 %v8000_v56, 16  ;;  %v9753_v13 = vcombine.low %v7728_v46, %v7740_v38  ;;  %v2098_v8 = vshll.u32 %v8014_v26, 16  ;;  %v8034_v15 = vld [vmem:[#allocation2 + $0x40] sm:$0xf] }
  0xf4   : > { %9752 = vst [vmem:[#allocation8_spill] sm:$0xff] %v8007_v7  ;;  %v1777_v43 = vrot.slane %v1776_v61, 4  ;;  %v1869_v41 = vrot.slane %v1867_v6, 4  ;;  %v8031_v61 = vld [vmem:[#allocation2 + $0x34] sm:$0xf]  ;;  %9755 = vst [vmem:[#allocation9_spill] sm:$0xff] %v8034_v15 }
  0xf5   : > { %v1787_v57 = vrot.slane %v1786_v32, 4  ;;  %v1876_v32 = vrot.slane %v1874_v33, 4  ;;  %v5923_v6 = vcombine.low %v8000_v56, %v8031_v61  ;;  %v1888_v56 = vrot.slane %v7539_v12, 5 }
  0xf6   : > { %6455 = vmatmul.mubr.msk.bf16.gmra.mxu1 %vm2636_vm7, %v9751_v47  ;;  %v5693_v47 = vrot.slane %v1796_v52, 9  ;;  %v1782_v14 = vsel %vm6856_vm9, %v1777_v43, %v1781_v20  ;;  %v8042_v20 = vrot.slane %v2063_v39, 4  ;;  %v8044_v43 = vrot.slane %v2071_v29, 4  ;;  %v1798_v29 = vld [vmem:[#allocation2 + $0x3c] sm:$0xe] }
  0xf7   : > { %6458 = vmatprep.mubr.msk.bf16.mxu1 %vm2636_vm7, %v9753_v13  ;;  %v1792_v46 = vsel %vm6856_vm9, %v1787_v57, %v1791_v44  ;;  %v9754_v13 = vld [vmem:[#allocation6_spill] sm:$0xff]  ;;  %v2097_v44 = vrot.slane %v2095_v34, 4  ;;  %v2100_v57 = vrot.slane %v2098_v8, 5  ;;  %v2104_v39 = vshll.u32 %v8034_v15, 16 }
  0xf8   : > { %v1877_v22 = vrot.slane %v9754_v13, 5  ;;  %v5871_v7 = vcombine.low %v1782_v14, %v1792_v46  ;;  %v8049_v14 = vsel %vm7225_vm12, %v1869_v41, %v1870_v30  ;;  %v8051_v46 = vrot.slane %v2074_v60, 5  ;;  %v8077_v60 = vld [vmem:[#allocation2 + $0x54] sm:$0xf] }
  0xf9   : > { %v9758_v34 = vcombine.low %v7771_v16, %v7775_v40  ;;  %v2108_v17 = vshrl.u32 %v8034_v15, 16  ;;  %v5694_v8 = vrot.slane %v1797_v42, 9  ;;  %v1883_v41 = vrot.slane %v1881_v59, 4  ;;  %v8085_v16 = vld [vmem:[#allocation2 + $0x48] sm:$0xf] }
  0xfa   : > { %6501 = vmatmul.mubr.msk.bf16.gmra.mxu0 %vm2636_vm7, %v5871_v7  ;;  %9756 = vst [vmem:[#allocation5_spill] sm:$0xff] %v8051_v46  ;;  %v8063_v7 = vsel %vm7225_vm12, %v5693_v47, %v1874_v33  ;;  %v8067_v30 = vsel %vm7225_vm12, %v1876_v32, %v1877_v22  ;;  %v1884_v33 = vrot.slane %v7547_v23, 5  ;;  %v9759_v22 = vcombine.low %v7791_v11, %v7797_v35  ;;  %v8110_v11 = vld [vmem:[#allocation2 + $0x58] sm:$0xf] }
  0xfb   : > { %6540 = vmatprep.mubr.msk.bf16.mxu0 %vm2636_vm7, %v9757_v36  ;;  %v2101_v47 = vor.u32 %v2100_v57, %v2097_v44  ;;  %v2143_v32 = vshrl.u32 %v8077_v60, 16  ;;  %v2146_v42 = vshll.u32 %v8077_v60, 16  ;;  %v2119_v36 = vshrl.u32 %v8085_v16, 16 }
  0xfc   : > { %v5695_v44 = vrot.slane %v1798_v29, 9  ;;  %v1890_v57 = vrot.slane %v1888_v56, 4  ;;  %v1891_v52 = vrot.slane %v7568_v0, 5  ;;  %v8100_v12 = vrot.slane %v2108_v17, 4  ;;  %v1799_v17 = vld [vmem:[#allocation2 + $0x48] sm:$0xe] }
  0xfd   : > { %v8104_v23 = vsel %vm7225_vm12, %v5694_v8, %v1881_v59  ;;  %v8108_v13 = vsel %vm7225_vm12, %v1883_v41, %v1884_v33  ;;  %v8113_v37 = vrot.slane %v2101_v47, 4  ;;  %v2122_v29 = vshll.u32 %v8085_v16, 16 }
  0xfe   : > { %6459 = vmatmul.mubr.msk.bf16.gmra.mxu1 %vm2636_vm7, %v9758_v34  ;;  %v8095_v34 = vrot.slane %v2104_v39, 5  ;;  %9762 = vst [vmem:[#allocation18_spill] sm:$0xff] %v8100_v12  ;;  %v1895_v39 = vrot.slane %v7585_v19, 5  ;;  %v2148_v0 = vrot.slane %v2146_v42, 5  ;;  %v9764_v12 = vcombine.low %v7923_v3, %v7950_v45 }
  0xff   : > { %6462 = vmatprep.mubr.msk.bf16.mxu1 %vm2636_vm7, %v9759_v22  ;;  %v8097_v22 = vld [vmem:[#allocation2 + $0x4c] sm:$0xf]  ;;  %9763 = vst [vmem:[#allocation19_spill] sm:$0xff] %v8113_v37  ;;  %v8120_v59 = vrot.slane %v2119_v36, 4  ;;  %v2152_v19 = vshll.u32 %v8110_v11, 16  ;;  %v8132_v3 = vsel %vm7225_vm12, %v5695_v44, %v1888_v56  ;;  %v2156_v47 = vshrl.u32 %v8110_v11, 16 }
 0x100   : > { %9760 = vst [vmem:[#allocation6_spill] sm:$0xff] %v8095_v34  ;;  %9761 = vst [vmem:[#allocation17_spill] sm:$0xff] %v8097_v22  ;;  %v2145_v34 = vrot.slane %v2143_v32, 4  ;;  %v5925_v41 = vcombine.low %v8085_v16, %v8097_v22  ;;  %v9766_v16 = vcombine.low %v7811_v9, %v7820_v21  ;;  %v9767_v32 = vld [vmem:[#allocation11_spill] sm:$0xff]  ;;  %v1800_v36 = vld [vmem:[#allocation2 + $0x54] sm:$0xe]  ;;  %v9768_v56 = vcombine.low %v7835_v27, %v7841_v24 }
 0x101   : > { %9765 = vst [vmem:[#allocation20_spill] sm:$0xff] %v8120_v59  ;;  %v1898_v42 = vrot.slane %v9767_v32, 5  ;;  %v1902_v8 = vrot.slane %v7619_v2, 5  ;;  %v8158_v32 = vrot.slane %v2152_v19, 5  ;;  %v8160_v2 = vld [vmem:[#allocation2 + $0x64] sm:$0xf] }
 0x102   : > { %6541 = vmatmul.mubr.msk.bf16.vlgmr.msra.gmra.mxu0 %vm2636_vm7, %v9764_v12  ;;  %v8136_v12 = vsel %vm7225_vm12, %v1890_v57, %v1891_v52  ;;  %v8149_v52 = vrot.slane %v2122_v29, 5  ;;  %v2149_v44 = vor.u32 %v2148_v0, %v2145_v34  ;;  %9771 = vst [vmem:[#allocation22_spill] sm:$0xff] %v8160_v2  ;;  %v8167_v0 = vrot.slane %v2156_v47, 4  ;;  %v8179_v22 = vld [vmem:[#allocation2 + $0x70] sm:$0xf] }
 0x103   : > { %6607 = vmatpush3.bf16.msra.mxu0 %v8024_v63  ;;  %6544 = vmatprep.mubr.msk.bf16.mxu0 %vm2636_vm7, %v5923_v6  ;;  %v5696_v63 = vrot.slane %v1799_v17, 9  ;;  %v1897_v6 = vrot.slane %v1895_v39, 4  ;;  %v8154_v17 = vld [vmem:[#allocation2 + $0x60] sm:$0xf]  ;;  %9770 = vst [vmem:[#allocation21_spill] sm:$0xff] %v8158_v32  ;;  %v5697_v33 = vrot.slane %v1800_v36, 9 }
 0x104   : > { %9769 = vst [vmem:[#allocation11_spill] sm:$0xff] %v8149_v52  ;;  %v2167_v27 = vshrl.u32 %v8154_v17, 16  ;;  %9772 = vst [vmem:[#allocation23_spill] sm:$0xff] %v8167_v0  ;;  %v2170_v57 = vshll.u32 %v8154_v17, 16  ;;  %v1904_v32 = vrot.slane %v1902_v8, 4  ;;  %v9773_v52 = vld [vmem:[#allocation12_spill] sm:$0xff]  ;;  %v5927_v36 = vcombine.low %v8154_v17, %v8160_v2  ;;  %v8194_v0 = vpop.f32.mrf.mxu0 }
 0x105   : > { %v8172_v19 = vsel %vm7225_vm12, %v5696_v63, %v1895_v39  ;;  %v8176_v9 = vsel %vm7225_vm12, %v1897_v6, %v1898_v42  ;;  %v1905_v59 = vrot.slane %v9773_v52, 5  ;;  %v8181_v37 = vrot.slane %v2149_v44, 4  ;;  %v1801_v34 = vld [vmem:[#allocation2 + $0x60] sm:$0xe]  ;;  %9777 = vst [vmem:[#allocation25_spill] sm:$0xff] %v8194_v0 }
 0x106   : > { %6463 = vmatmul.mubr.msk.bf16.gmra.mxu1 %vm2636_vm7, %v9766_v16  ;;  %v8156_v16 = vld [vmem:[#allocation2 + $0x6c] sm:$0xf]  ;;  %v1909_v39 = vrot.slane %v7653_v53, 5  ;;  %v9775_v63 = vcombine.low %v8014_v26, %v8034_v15  ;;  %v8191_v6 = vrot.slane %v2167_v27, 4  ;;  %v2200_v44 = vshll.u32 %v8179_v22, 16 }
 0x107   : > { %6466 = vmatprep.mubr.msk.bf16.mxu1 %vm2636_vm7, %v9768_v56  ;;  %v2191_v56 = vshrl.u32 %v8156_v16, 16  ;;  %v2194_v29 = vshll.u32 %v8156_v16, 16  ;;  %9774 = vst [vmem:[#allocation12_spill] sm:$0xff] %v8181_v37  ;;  %v8199_v47 = vrot.slane %v2170_v57, 5  ;;  %v8203_v53 = vsel %vm7225_vm12, %v5697_v33, %v1902_v8  ;;  %v1802_v26 = vld [vmem:[#allocation2 + $0x6c] sm:$0xe] }
 0x108   : > { %9776 = vst [vmem:[#allocation24_spill] sm:$0xff] %v8191_v6  ;;  %v1916_v27 = vrot.slane %v7667_v10, 5  ;;  %v8216_v17 = vld [vmem:[#allocation2 + $0x84] sm:$0xf]  ;;  %v9780_v8 = vcombine.low %v7970_v4, %v7979_v55  ;;  %v1911_v10 = vrot.slane %v1909_v39, 4  ;;  %v8227_v2 = vrot.slane %v2200_v44, 5  ;;  %v8232_v4 = vpop.f32.mrf.mxu0 }
 0x109   : > { %v2193_v42 = vrot.slane %v2191_v56, 4  ;;  %v2196_v52 = vrot.slane %v2194_v29, 5  ;;  %9778 = vst [vmem:[#allocation26_spill] sm:$0xff] %v8199_v47  ;;  %v9779_v56 = vcombine.low %v7972_v48, %v7974_v1  ;;  %v2204_v29 = vshrl.u32 %v8179_v22, 16  ;;  %v9781_v48 = vld [vmem:[#allocation13_spill] sm:$0xff]  ;;  %9783 = vst [vmem:[#allocation27_spill] sm:$0xff] %v8232_v4 }
 0x10a   : > { %6545 = vmatmul.mubr.msk.bf16.gmra.mxu0 %vm2636_vm7, %v9775_v63  ;;  %v5698_v63 = vrot.slane %v1801_v34, 9  ;;  %v1912_v33 = vrot.slane %v9781_v48, 5  ;;  %9782 = vst [vmem:[#allocation13_spill] sm:$0xff] %v8227_v2  ;;  %v8234_v55 = vld [vmem:[#allocation2 + $0x7c] sm:$0xf]  ;;  %v5699_v48 = vrot.slane %v1802_v26, 9 }
 0x10b   : > { %6548 = vmatprep.mubr.msk.bf16.mxu0 %vm2636_vm7, %v5925_v41  ;;  %v8212_v41 = vsel %vm7225_vm12, %v1904_v32, %v1905_v59  ;;  %v2239_v59 = vshrl.u32 %v8216_v17, 16  ;;  %v2242_v32 = vshll.u32 %v8216_v17, 16  ;;  %v2197_v0 = vor.u32 %v2196_v52, %v2193_v42  ;;  %v9784_v6 = vld [vmem:[#allocation14_spill] sm:$0xff]  ;;  %v8246_v34 = vld [vmem:[#allocation2 + $0x88] sm:$0xf] }
 0x10c   : > { %v1918_v47 = vrot.slane %v1916_v27, 4  ;;  %v1919_v37 = vrot.slane %v9784_v6, 5  ;;  %v8240_v52 = vrot.slane %v2204_v29, 4  ;;  %v8244_v44 = vsel %vm7225_vm12, %v5698_v63, %v1909_v39  ;;  %v1803_v4 = vld [vmem:[#allocation2 + $0x78] sm:$0xe] }
 0x10d   : > { %v1923_v2 = vrot.slane %v7699_v28, 5  ;;  %v8251_v26 = vsel %vm7225_vm12, %v1911_v10, %v1912_v33  ;;  %v2241_v15 = vrot.slane %v2239_v59, 4  ;;  %v2244_v6 = vrot.slane %v2242_v32, 5  ;;  %v8265_v10 = vpop.f32.mrf.mxu0  ;;  %v9790_v32 = vld [vmem:[#allocation15_spill] sm:$0xff] }
 0x10e   : > { %6467 = vmatmul.mubr.msk.bf16.gmra.mxu1 %vm2636_vm7, %v9779_v56  ;;  %v8223_v56 = vld [vmem:[#allocation2 + $0x78] sm:$0xf]  ;;  %v2248_v46 = vshll.u32 %v8246_v34, 16  ;;  %v9785_v29 = vcombine.low %v8077_v60, %v8110_v11  ;;  %v8258_v39 = vrot.slane %v2197_v0, 4  ;;  %9787 = vst [vmem:[#allocation28_spill] sm:$0xff] %v8265_v10  ;;  %v8272_v60 = vsel %vm7225_vm12, %v5699_v48, %v1916_v27 }
 0x10f   : > { %6506 = vmatprep.mubr.msk.bf16.mxu1 %vm2636_vm7, %v9780_v8  ;;  %v2215_v57 = vshrl.u32 %v8223_v56, 16  ;;  %v2218_v8 = vshll.u32 %v8223_v56, 16  ;;  %v5929_v28 = vcombine.low %v8223_v56, %v8234_v55  ;;  %v8276_v0 = vsel %vm7225_vm12, %v1918_v47, %v1919_v37  ;;  %v8295_v48 = vld [vmem:[#allocation2 + $0x90] sm:$0xf] }
 0x110   : > { %v9789_v59 = vcombine.low %v8038_v58, %v8049_v14  ;;  %v1930_v27 = vrot.slane %v7740_v38, 5  ;;  %v9791_v37 = vcombine.low %v8063_v7, %v8067_v30  ;;  %v2245_v47 = vor.u32 %v2244_v6, %v2241_v15  ;;  %v8303_v7 = vld [vmem:[#allocation2 + $0x94] sm:$0xf]  ;;  %v8307_v30 = vld [vmem:[#allocation2 + $0x9c] sm:$0xf] }
 0x111   : > { %v8260_v63 = vrot.slane %v2215_v57, 4  ;;  %v8268_v33 = vrot.slane %v2218_v8, 5  ;;  %v5700_v57 = vrot.slane %v1803_v4, 9  ;;  %v1926_v8 = vrot.slane %v9790_v32, 5  ;;  %9794 = vst [vmem:[#allocation31_spill] sm:$0xff] %v8303_v7  ;;  %v9795_v38 = vld [vmem:[#allocation7_spill] sm:$0xff] }
 0x112   : > { %6549 = vmatmul.mubr.msk.bf16.gmra.mxu0 %vm2636_vm7, %v9785_v29  ;;  %v1804_v29 = vld [vmem:[#allocation2 + $0x84] sm:$0xe]  ;;  %v8291_v58 = vrot.slane %v2248_v46, 5  ;;  %v2252_v14 = vshrl.u32 %v8246_v34, 16  ;;  %v2263_v15 = vshrl.u32 %v8295_v48, 16  ;;  %v2266_v46 = vshll.u32 %v8295_v48, 16 }
 0x113   : > { %9786 = vst [vmem:[#allocation14_spill] sm:$0xff] %v8260_v63  ;;  %6552 = vmatprep.mubr.msk.bf16.mxu0 %vm2636_vm7, %v5927_v36  ;;  %9788 = vst [vmem:[#allocation29_spill] sm:$0xff] %v8268_v33  ;;  %v1925_v36 = vrot.slane %v1923_v2, 4  ;;  %v8311_v6 = vsel %vm7225_vm12, %v5700_v57, %v1923_v2  ;;  %v5701_v32 = vrot.slane %v1804_v29, 9  ;;  %v2287_v4 = vshrl.u32 %v8307_v30, 16 }
 0x114   : > { %9792 = vst [vmem:[#allocation15_spill] sm:$0xff] %v8291_v58  ;;  %v2290_v42 = vshll.u32 %v8307_v30, 16  ;;  %v1932_v56 = vrot.slane %v1930_v27, 4  ;;  %v8323_v33 = vrot.slane %v2245_v47, 4  ;;  %v8325_v2 = vrot.slane %v2252_v14, 4 }
 0x115   : > { %v1805_v29 = vld [vmem:[#allocation2 + $0x90] sm:$0xe]  ;;  %v1937_v63 = vrot.slane %v7775_v40, 5  ;;  %v9796_v58 = vcombine.low %v8156_v16, %v8179_v22  ;;  %v5931_v47 = vcombine.low %v8295_v48, %v8303_v7  ;;  %v1806_v14 = vld [vmem:[#allocation2 + $0x9c] sm:$0xe]  ;;  %v1944_v57 = vrot.slane %v7797_v35, 5  ;;  %v8353_v48 = vpop.f32.mrf.mxu1 }
 0x116   : > { %6507 = vmatmul.mubr.msk.bf16.vlgmr.msra.gmra.mxu1 %vm2636_vm7, %v9789_v59  ;;  %v8319_v59 = vsel %vm7225_vm12, %v1925_v36, %v1926_v8  ;;  %v8333_v36 = vrot.slane %v2263_v15, 4  ;;  %v8335_v8 = vrot.slane %v2266_v46, 5  ;;  %v8347_v16 = vsel %vm7225_vm12, %v5701_v32, %v1930_v27  ;;  %9801 = vst [vmem:[#allocation34_spill] sm:$0xff] %v8353_v48  ;;  %v8368_v48 = vld [vmem:[#allocation2 + $0xb4] sm:$0xf] }
 0x117   : > { %6573 = vmatpush3.bf16.msra.mxu1 %v8011_v51  ;;  %6510 = vmatprep.mubr.msk.bf16.mxu1 %vm2636_vm7, %v9791_v37  ;;  %v8301_v51 = vpop.f32.mrf.mxu0  ;;  %v8313_v37 = vld [vmem:[#allocation2 + $0xa0] sm:$0xf]  ;;  %v2292_v15 = vrot.slane %v2290_v42, 5  ;;  %v9800_v46 = vcombine.low %v8104_v23, %v8108_v13  ;;  %v9803_v42 = vcombine.low %v8132_v3, %v8136_v12  ;;  %v5702_v23 = vrot.slane %v1805_v29, 9  ;;  %v1807_v7 = vld [vmem:[#allocation2 + $0xa8] sm:$0xe] }
 0x118   : > { %9793 = vst [vmem:[#allocation30_spill] sm:$0xff] %v8301_v51  ;;  %v1933_v51 = vrot.slane %v9795_v38, 5  ;;  %v2296_v10 = vshll.u32 %v8313_v37, 16  ;;  %9797 = vst [vmem:[#allocation7_spill] sm:$0xff] %v8333_v36  ;;  %v2300_v40 = vshrl.u32 %v8313_v37, 16  ;;  %v1939_v13 = vrot.slane %v1937_v63, 4 }
 0x119   : > { %9798 = vst [vmem:[#allocation32_spill] sm:$0xff] %v8335_v8  ;;  %v8339_v38 = vpop.f32.mrf.mxu0  ;;  %v2335_v27 = vshrl.u32 %v8368_v48, 16  ;;  %v2338_v3 = vshll.u32 %v8368_v48, 16  ;;  %v9808_v36 = vcombine.low %v8216_v17, %v8246_v34 }
 0x11a   : > { %6553 = vmatmul.mubr.msk.bf16.gmra.mxu0 %vm2636_vm7, %v9796_v58  ;;  %9799 = vst [vmem:[#allocation33_spill] sm:$0xff] %v8339_v38  ;;  %v2289_v58 = vrot.slane %v2287_v4, 4  ;;  %v8357_v35 = vsel %vm7225_vm12, %v1932_v56, %v1933_v51  ;;  %v9804_v4 = vld [vmem:[#allocation16_spill] sm:$0xff]  ;;  %v1946_v51 = vrot.slane %v1944_v57, 4  ;;  %v1947_v38 = vrot.slane %v7831_v18, 5 }
 0x11b   : > { %6556 = vmatprep.mubr.msk.bf16.mxu0 %vm2636_vm7, %v5929_v28  ;;  %v8359_v28 = vrot.slane %v2296_v10, 5  ;;  %v1940_v32 = vrot.slane %v9804_v4, 5  ;;  %v8370_v56 = vpop.f32.mrf.mxu0  ;;  %v8372_v10 = vld [vmem:[#allocation2 + $0xa8] sm:$0xf]  ;;  %v8388_v18 = vrot.slane %v2300_v40, 4 }
 0x11c   : > { %9805 = vst [vmem:[#allocation16_spill] sm:$0xff] %v8370_v56  ;;  %v2293_v29 = vor.u32 %v2292_v15, %v2289_v58  ;;  %v2311_v4 = vshrl.u32 %v8372_v10, 16  ;;  %v8384_v56 = vld [vmem:[#allocation2 + $0xb8] sm:$0xf]  ;;  %v2314_v8 = vshll.u32 %v8372_v10, 16  ;;  %v1951_v58 = vrot.slane %v7820_v21, 5 }
 0x11d   : > { %9802 = vst [vmem:[#allocation35_spill] sm:$0xff] %v8359_v28  ;;  %9806 = vst [vmem:[#allocation36_spill] sm:$0xff] %v8384_v56  ;;  %v8386_v28 = vpop.f32.mrf.mxu1  ;;  %v8399_v15 = vsel %vm7225_vm12, %v1939_v13, %v1940_v32  ;;  %v2344_v40 = vshll.u32 %v8384_v56, 16  ;;  %v8410_v21 = vpop.f32.mrf.mxu0  ;;  %v8418_v13 = vrot.slane %v2338_v3, 5 }
 0x11e   : > { %6511 = vmatmul.mubr.msk.bf16.gmra.mxu1 %vm2636_vm7, %v9800_v46  ;;  %v5703_v46 = vrot.slane %v1806_v14, 9  ;;  %v5932_v14 = vcombine.low %v8307_v30, %v8313_v37  ;;  %9807 = vst [vmem:[#allocation37_spill] sm:$0xff] %v8386_v28  ;;  %v8395_v30 = vsel %vm7225_vm12, %v5702_v23, %v1937_v63  ;;  %9809 = vst [vmem:[#allocation38_spill] sm:$0xff] %v8410_v21  ;;  %v8416_v23 = vrot.slane %v2335_v27, 4  ;;  %v1809_v28 = vld [vmem:[#allocation2 + $0xc0] sm:$0xe] }
 0x11f   : > { %6514 = vmatprep.mubr.msk.bf16.mxu1 %vm2636_vm7, %v9803_v42  ;;  %v8381_v42 = vld [vmem:[#allocation2 + $0xac] sm:$0xf]  ;;  %v8414_v63 = vsel %vm7225_vm12, %v1946_v51, %v1947_v38  ;;  %v8422_v32 = vrot.slane %v2293_v29, 4  ;;  %v9811_v38 = vcombine.low %v8172_v19, %v8176_v9  ;;  %v8432_v27 = vpop.f32.mrf.mxu1  ;;  %v1953_v3 = vrot.slane %v1951_v58, 4  ;;  %v8452_v51 = vld [vmem:[#allocation2 + $0xc4] sm:$0xf] }
 0x120   : > { %v8403_v12 = vsel %vm7225_vm12, %v5703_v46, %v1944_v57  ;;  %v2348_v57 = vshrl.u32 %v8384_v56, 16  ;;  %v8424_v46 = vrot.slane %v2311_v4, 4  ;;  %v5933_v17 = vcombine.low %v8372_v10, %v8381_v42  ;;  %9812 = vst [vmem:[#allocation40_spill] sm:$0xff] %v8432_v27  ;;  %v1808_v4 = vld [vmem:[#allocation2 + $0xb4] sm:$0xe]  ;;  %9817 = vst [vmem:[#allocation44_spill] sm:$0xff] %v8452_v51 }
 0x121   : > { %v1954_v29 = vrot.slane %v7864_v50, 5  ;;  %v8445_v19 = vrot.slane %v2344_v40, 5  ;;  %v8454_v50 = vpop.f32.mrf.mxu0  ;;  %v5706_v40 = vrot.slane %v1809_v28, 9  ;;  %v1965_v27 = vrot.slane %v7974_v1, 5  ;;  %v8468_v21 = vpop.f32.mrf.mxu1 }
 0x122   : > { %6557 = vmatmul.mubr.msk.bf16.gmra.mxu0 %vm2636_vm7, %v9808_v36  ;;  %9810 = vst [vmem:[#allocation39_spill] sm:$0xff] %v8424_v46  ;;  %v5704_v36 = vrot.slane %v1807_v7, 9  ;;  %v9814_v7 = vcombine.low %v8203_v53, %v8212_v41  ;;  %9818 = vst [vmem:[#allocation45_spill] sm:$0xff] %v8454_v50  ;;  %v8458_v41 = vrot.slane %v2348_v57, 4  ;;  %v5705_v28 = vrot.slane %v1808_v4, 9 }
 0x123   : > { %6560 = vmatprep.mubr.msk.bf16.mxu0 %vm2636_vm7, %v5931_v47  ;;  %v8436_v47 = vrot.slane %v2314_v8, 5  ;;  %9815 = vst [vmem:[#allocation42_spill] sm:$0xff] %v8445_v19  ;;  %v1958_v8 = vrot.slane %v7841_v24, 5  ;;  %9820 = vst [vmem:[#allocation47_spill] sm:$0xff] %v8468_v21  ;;  %v8472_v53 = vsel %vm7225_vm12, %v1953_v3, %v1954_v29  ;;  %v1961_v9 = vrot.slane %v7867_v49, 5  ;;  %v8486_v29 = vpop.f32.mrf.mxu0 }
 0x124   : > { %9819 = vst [vmem:[#allocation46_spill] sm:$0xff] %v8458_v41  ;;  %v8463_v10 = vsel %vm7225_vm12, %v5704_v36, %v1951_v58  ;;  %v1968_v58 = vrot.slane %v7956_v62, 5  ;;  %v2006_v36 = vld [vmem:[#allocation2 + $0x20] sm:$0x1]  ;;  %v8482_v24 = vsel %vm7225_vm12, %v5706_v40, %v1965_v27  ;;  %v1967_v1 = vrot.slane %v1965_v27, 4  ;;  %9821 = vst [vmem:[#allocation48_spill] sm:$0xff] %v8486_v29 }
 0x125   : > { %9813 = vst [vmem:[#allocation41_spill] sm:$0xff] %v8436_v47  ;;  %v2407_v21 = vld [vmem:[#allocation2 + $0x18] sm:$0xe]  ;;  %v2473_v3 = vrot.slane %v7927_v31, 5  ;;  %v2032_v62 = vshll.u32 %v7927_v31, 16  ;;  %v9822_v49 = vshrl.u32 %v7927_v31, 16  ;;  %v2029_v4 = vor.u32 %v7966_v5, %v7964_v54  ;;  %v8506_v31 = vpop.f32.mrf.mxu1 }
 0x126   : > { %6515 = vmatmul.mubr.msk.bf16.gmra.mxu1 %vm2636_vm7, %v9811_v38  ;;  %v8450_v38 = vld [vmem:[#allocation2 + $0xc0] sm:$0xf]  ;;  %v2408_v47 = vld [vmem:[#allocation2 + $0x24] sm:$0xe]  ;;  %v1960_v40 = vrot.slane %v1958_v8, 4  ;;  %v9823_v29 = vcombine.low %v8244_v44, %v8251_v26  ;;  %9824 = vst [vmem:[#allocation49_spill] sm:$0xff] %v8506_v31  ;;  %v8518_v31 = vpop.f32.mrf.mxu0 }
 0x127   : > { %6518 = vmatprep.mubr.msk.bf16.mxu1 %vm2636_vm7, %v9814_v7  ;;  %9816 = vst [vmem:[#allocation43_spill] sm:$0xff] %v8450_v38  ;;  %v5935_v57 = vcombine.low %v8450_v38, %v8452_v51  ;;  %v8476_v7 = vld [vmem:[#allocation2 + $0xcc] sm:$0xf]  ;;  %v2038_v50 = vrot.slane %v9822_v49, 4  ;;  %v5710_v49 = vrot.slane %v2407_v21, 9  ;;  %v2034_v27 = vrot.slane %v2032_v62, 5 }
 0x128   : > { %v2007_v38 = vld [vmem:[#allocation2 + $0x2c] sm:$0x1]  ;;  %v2042_v46 = vshll.u32 %v2006_v36, 16  ;;  %v2475_v54 = vrot.slane %v2473_v3, 4  ;;  %v2476_v5 = vrot.slane %v2006_v36, 5  ;;  %v9826_v41 = vld [vmem:[#allocation10_spill] sm:$0xff]  ;;  %v8522_v21 = vsel %vm7225_vm12, %v5705_v28, %v1958_v8 }
 0x129   : > { %v9827_v44 = vld [vmem:[#allocation8_spill] sm:$0xff]  ;;  %9829 = vst [vmem:[#allocation10_spill] sm:$0xff] %v8518_v31  ;;  %v8524_v62 = vld [vmem:[#allocation2 + $0xd0] sm:$0xf]  ;;  %v8528_v36 = vsel %vm7225_vm12, %v1960_v40, %v1961_v9  ;;  %v8534_v51 = vld [vmem:[#allocation2 + $0x38] sm:$0x1]  ;;  %v2474_v9 = vsel %vm7225_vm12, %v5710_v49, %v2473_v3 }
 0x12a   : > { %6561 = vmatmul.mubr.msk.bf16.gmra.mxu0 %vm2636_vm7, %v5932_v14  ;;  %v8498_v14 = vsel %vm7225_vm12, %v1967_v1, %v1968_v58  ;;  %v9825_v58 = vcombine.low %v8272_v60, %v8276_v0  ;;  %v5711_v1 = vrot.slane %v2408_v47, 9  ;;  %v2483_v60 = vrot.slane %v2007_v38, 5  ;;  %v2409_v19 = vld [vmem:[#allocation2 + $0x30] sm:$0xe]  ;;  %v9834_v47 = vld [vmem:[#allocation3_spill] sm:$0xff] }
 0x12b   : > { %6564 = vmatprep.mubr.msk.bf16.mxu0 %vm2636_vm7, %v5933_v17  ;;  %v2039_v17 = vor.u32 %v2038_v50, %v2034_v27  ;;  %v2066_v0 = vshll.u32 %v2007_v38, 16  ;;  %v2044_v8 = vrot.slane %v2042_v46, 5  ;;  %v2080_v50 = vshll.u32 %v8031_v61, 16 }
 0x12c   : > { %v5936_v38 = vcombine.low %v8476_v7, %v8524_v62  ;;  %v9831_v40 = vrot.slane %v7950_v45, 5  ;;  %v9832_v46 = vcombine.low %v8368_v48, %v8384_v56  ;;  %v8558_v3 = vsel %vm7225_vm12, %v9834_v47, %v2483_v60  ;;  %v2009_v60 = vld [vmem:[#allocation2 + $0x44] sm:$0x1] }
 0x12d   : > { %v2040_v31 = vrot.slane %v2039_v17, 4  ;;  %v2068_v28 = vrot.slane %v2066_v0, 5  ;;  %v8553_v0 = vpop.f32.mrf.mxu0  ;;  %v5712_v49 = vrot.slane %v2409_v19, 9  ;;  %v9836_v47 = vcombine.low %v8311_v6, %v8319_v59 }
 0x12e   : > { %6519 = vmatmul.mubr.msk.bf16.gmra.mxu1 %vm2636_vm7, %v9823_v29  ;;  %v2059_v29 = vsel %vm6856_vm9, %v9827_v44, %v9826_v41  ;;  %v2487_v41 = vrot.slane %v8031_v61, 5  ;;  %v8532_v44 = vpop.f32.mrf.mxu1  ;;  %v8547_v17 = vsel %vm7225_vm12, %v5711_v1, %v9831_v40  ;;  %9833 = vst [vmem:[#allocation4_spill] sm:$0xff] %v8553_v0  ;;  %v2497_v0 = vrot.slane %v2009_v60, 5 }
 0x12f   : > { %6522 = vmatprep.mubr.msk.bf16.mxu1 %vm2636_vm7, %v9825_v58  ;;  %v2030_v58 = vrot.slane %v2029_v4, 4  ;;  %9830 = vst [vmem:[#allocation8_spill] sm:$0xff] %v8532_v44  ;;  %v2477_v4 = vsel %vm7225_vm12, %v2475_v54, %v2476_v5  ;;  %v2069_v45 = vsel %vm6856_vm9, %v8042_v20, %v2068_v28  ;;  %v9835_v54 = vld [vmem:[#allocation5_spill] sm:$0xff]  ;;  %v2045_v19 = vsel %vm6856_vm9, %v2040_v31, %v2044_v8 }
 0x130   : > { %v2077_v5 = vor.u32 %v9835_v54, %v8044_v43  ;;  %v8568_v1 = vcombine.low %v2059_v29, %v2069_v45  ;;  %v2489_v40 = vrot.slane %v2487_v41, 4  ;;  %v8575_v20 = vpop.f32.mrf.mxu1  ;;  %v9838_v29 = vshrl.u32 %v8031_v61, 16  ;;  %v2410_v54 = vld [vmem:[#allocation2 + $0x3c] sm:$0xe]  ;;  %v8597_v61 = vpop.f32.mrf.mxu0 }
 0x131   : > { %9837 = vst [vmem:[#allocation3_spill] sm:$0xff] %v8575_v20  ;;  %v2035_v43 = vsel %vm6856_vm9, %v2030_v58, %v2034_v27  ;;  %v9839_v45 = vcombine.low %v8347_v16, %v8357_v35  ;;  %v5986_v59 = vcombine.low %v2474_v9, %v2477_v4  ;;  %v9841_v27 = vld [vmem:[#allocation19_spill] sm:$0xff]  ;;  %v9842_v58 = vld [vmem:[#allocation18_spill] sm:$0xff]  ;;  %9843 = vst [vmem:[#allocation5_spill] sm:$0xff] %v8597_v61  ;;  %v2114_v9 = vshll.u32 %v2009_v60, 16 }
 0x132   : > { %6565 = vmatmul.mubr.msk.bf16.gmra.mxu0 %vm2636_vm7, %v9832_v46  ;;  %v2490_v46 = vrot.slane %v8534_v51, 5  ;;  %v2086_v28 = vrot.slane %v9838_v29, 4  ;;  %v8601_v16 = vsel %vm7225_vm12, %v5712_v49, %v2487_v41  ;;  %v8603_v35 = vrot.slane %v2077_v5, 4  ;;  %v2411_v4 = vld [vmem:[#allocation2 + $0x48] sm:$0xe]  ;;  %v8613_v6 = vpop.f32.mrf.mxu1  ;;  %v9846_v20 = vld [vmem:[#allocation20_spill] sm:$0xff] }
 0x133   : > { %6568 = vmatprep.mubr.msk.bf16.mxu0 %vm2636_vm7, %v5935_v57  ;;  %v8581_v57 = vrot.slane %v2080_v50, 5  ;;  %v2090_v50 = vshll.u32 %v8534_v51, 16  ;;  %v8606_v29 = vcombine.low %v2035_v43, %v2045_v19  ;;  %v5713_v49 = vrot.slane %v2410_v54, 9  ;;  %v9847_v51 = vld [vmem:[#allocation11_spill] sm:$0xff]  ;;  %v9848_v61 = vld [vmem:[#allocation9_spill] sm:$0xff] }
 0x134   : > { %v2116_v5 = vrot.slane %v2114_v9, 5  ;;  %v2125_v44 = vor.u32 %v9847_v51, %v9846_v20  ;;  %v9849_v43 = vrot.slane %v9848_v61, 5  ;;  %v5714_v56 = vrot.slane %v2411_v4, 9 }
 0x135   : > { %v2087_v41 = vor.u32 %v2086_v28, %v8581_v57 }
 0x136   : > { %6523 = vmatmul.mubr.msk.bf16.gmra.mxu1 %vm2636_vm7, %v9836_v47  ;;  %v9840_v47 = vld [vmem:[#allocation6_spill] sm:$0xff]  ;;  %v2496_v19 = vrot.slane %v9849_v43, 4  ;;  %v2126_v28 = vrot.slane %v2125_v44, 4  ;;  %v8631_v43 = vld [vmem:[#allocation2 + $0x5c] sm:$0x1] }
 0x137   : > { %6526 = vmatprep.mubr.msk.bf16.mxu1 %vm2636_vm7, %v9839_v45  ;;  %v2107_v31 = vsel %vm6856_vm9, %v9841_v27, %v9840_v47  ;;  %v2111_v8 = vor.u32 %v9842_v58, %v9840_v47  ;;  %v8610_v45 = vsel %vm7225_vm12, %v2489_v40, %v2490_v46  ;;  %v2010_v47 = vld [vmem:[#allocation2 + $0x50] sm:$0x1]  ;;  %v9844_v58 = vld [vmem:[#allocation17_spill] sm:$0xff]  ;;  %9845 = vst [vmem:[#allocation6_spill] sm:$0xff] %v8613_v6 }
 0x138   : > { %v2501_v48 = vrot.slane %v9844_v58, 5  ;;  %v2128_v40 = vshll.u32 %v9844_v58, 16  ;;  %v9850_v54 = vshrl.u32 %v9844_v58, 16  ;;  %v2138_v6 = vshll.u32 %v2010_v47, 16 }
 0x139   : > { %v2112_v27 = vrot.slane %v2111_v8, 4  ;;  %v2504_v4 = vrot.slane %v2010_v47, 5  ;;  %v5988_v58 = vcombine.low %v8601_v16, %v8610_v45  ;;  %v8649_v47 = vrot.slane %v2090_v50, 5  ;;  %v9855_v45 = vld [vmem:[#allocation21_spill] sm:$0xff] }
 0x13a   : > { %v8621_v46 = vpop.f32.mrf.mxu0  ;;  %6569 = vmatmul.mubr.msk.bf16.gmra.mxu0 %vm2636_vm7, %v5936_v38  ;;  %v2134_v9 = vrot.slane %v9850_v54, 4  ;;  %v2503_v60 = vrot.slane %v2501_v48, 4  ;;  %v2130_v51 = vrot.slane %v2128_v40, 5  ;;  %v9851_v38 = vcombine.low %v8395_v30, %v8399_v15 }
 0x13b   : > { %v2117_v8 = vsel %vm6856_vm9, %v2112_v27, %v2116_v5  ;;  %6608 = vmatprep.mubr.msk.bf16.mxu0 %vm2636_vm7, %v5986_v59  ;;  %v8637_v27 = vpop.f32.mrf.mxu1  ;;  %v2412_v5 = vld [vmem:[#allocation2 + $0x54] sm:$0xe]  ;;  %v9854_v30 = vcombine.low %v8403_v12, %v8414_v63  ;;  %v2140_v16 = vrot.slane %v2138_v6, 5  ;;  %v9858_v50 = vrot.slane %v9848_v61, 5  ;;  %v9859_v63 = vld [vmem:[#allocation23_spill] sm:$0xff] }
 0x13c   : > { %v8629_v20 = vcombine.low %v2107_v31, %v2117_v8  ;;  %9852 = vst [vmem:[#allocation19_spill] sm:$0xff] %v8637_v27  ;;  %v8639_v44 = vpop.f32.mrf.mxu0  ;;  %v8647_v31 = vrot.slane %v2087_v41, 4  ;;  %v2131_v15 = vsel %vm6856_vm9, %v2126_v28, %v2130_v51  ;;  %v2135_v40 = vor.u32 %v2134_v9, %v2130_v51  ;;  %v9856_v8 = vld [vmem:[#allocation12_spill] sm:$0xff]  ;;  %v9863_v59 = vld [vmem:[#allocation26_spill] sm:$0xff] }
 0x13d   : > { %9853 = vst [vmem:[#allocation18_spill] sm:$0xff] %v8639_v44  ;;  %v2155_v54 = vsel %vm6856_vm9, %v9856_v8, %v9855_v45  ;;  %v8671_v12 = vsel %vm7225_vm12, %v2496_v19, %v2497_v0  ;;  %v2159_v6 = vor.u32 %v9859_v63, %v9855_v45  ;;  %v2162_v28 = vshll.u32 %v8631_v43, 16  ;;  %v8684_v8 = vpop.f32.mrf.mxu1  ;;  %v2413_v45 = vld [vmem:[#allocation2 + $0x60] sm:$0xe]  ;;  %v2013_v44 = vld [vmem:[#allocation2 + $0x74] sm:$0x1] }
 0x13e   : > { %6527 = vmatmul.mubr.msk.bf16.gmra.mxu1 %vm2636_vm7, %v9851_v38  ;;  %v8661_v41 = vpop.f32.mrf.mxu0  ;;  %v8667_v38 = vsel %vm7225_vm12, %v5713_v49, %v9858_v50  ;;  %v8678_v9 = vsel %vm7225_vm12, %v5714_v56, %v2501_v48  ;;  %v8682_v61 = vsel %vm7225_vm12, %v2503_v60, %v2504_v4  ;;  %v2136_v51 = vrot.slane %v2135_v40, 4  ;;  %9860 = vst [vmem:[#allocation20_spill] sm:$0xff] %v8684_v8  ;;  %v9862_v63 = vld [vmem:[#allocation24_spill] sm:$0xff] }
 0x13f   : > { %6530 = vmatprep.mubr.msk.bf16.mxu1 %vm2636_vm7, %v9854_v30  ;;  %9857 = vst [vmem:[#allocation17_spill] sm:$0xff] %v8661_v41  ;;  %v5715_v49 = vrot.slane %v2412_v5, 9  ;;  %v2012_v30 = vld [vmem:[#allocation2 + $0x68] sm:$0x1]  ;;  %v2160_v19 = vrot.slane %v2159_v6, 4  ;;  %v2164_v50 = vrot.slane %v2162_v28, 5  ;;  %v2173_v27 = vor.u32 %v9863_v59, %v9862_v63 }
 0x140   : > { %v8686_v0 = vpop.f32.mrf.mxu0  ;;  %v9864_v41 = vld [vmem:[#allocation22_spill] sm:$0xff]  ;;  %v2141_v48 = vsel %vm6856_vm9, %v2136_v51, %v2140_v16  ;;  %v9865_v60 = vrot.slane %v8110_v11, 5  ;;  %v9867_v6 = vcombine.low %v8547_v17, %v8558_v3  ;;  %v2511_v63 = vrot.slane %v8631_v43, 5  ;;  %v8716_v3 = vpop.f32.mrf.mxu1 }
 0x141   : > { %9861 = vst [vmem:[#allocation11_spill] sm:$0xff] %v8686_v0  ;;  %v2176_v56 = vshll.u32 %v9864_v41, 16  ;;  %v2515_v5 = vrot.slane %v9864_v41, 5  ;;  %v9866_v40 = vshrl.u32 %v9864_v41, 16  ;;  %v8704_v59 = vcombine.low %v2131_v15, %v2141_v48  ;;  %9869 = vst [vmem:[#allocation9_spill] sm:$0xff] %v8716_v3 }
 0x142   : > { %v2510_v4 = vrot.slane %v9865_v60, 4  ;;  %v8698_v0 = vpop.f32.mrf.mxu0  ;;  %6609 = vmatmul.mubr.msk.bf16.vlgmr.msra.gmra.mxu0 %vm2636_vm7, %v9867_v6  ;;  %v2165_v16 = vsel %vm6856_vm9, %v2160_v19, %v2164_v50  ;;  %v2174_v28 = vrot.slane %v2173_v27, 4  ;;  %v5716_v60 = vrot.slane %v2413_v45, 9  ;;  %v2414_v19 = vld [vmem:[#allocation2 + $0x6c] sm:$0xe]  ;;  %v8756_v6 = vpop.f32.mrf.mxu1 }
 0x143   : > { %v2182_v8 = vrot.slane %v9866_v40, 4  ;;  %v2178_v51 = vrot.slane %v2176_v56, 5  ;;  %6612 = vmatprep.mubr.msk.bf16.mxu0 %vm2636_vm7, %v5988_v58  ;;  %v8710_v41 = vcombine.low %v2155_v54, %v2165_v16  ;;  %v2186_v40 = vshll.u32 %v2012_v30, 16  ;;  %v9871_v56 = vld [vmem:[#allocation13_spill] sm:$0xff]  ;;  %9873 = vst [vmem:[#allocation21_spill] sm:$0xff] %v8756_v6 }
 0x144   : > { %v9868_v17 = vcombine.low %v8463_v10, %v8472_v53  ;;  %v8718_v15 = vpop.f32.mrf.mxu0  ;;  %v2093_v27 = vsel %vm6856_vm9, %v8647_v31, %v8649_v47  ;;  %v5989_v43 = vcombine.low %v8667_v38, %v8671_v12  ;;  %v9870_v10 = vcombine.low %v8522_v21, %v8528_v36 }
 0x145   : > { %v2179_v58 = vsel %vm6856_vm9, %v2174_v28, %v2178_v51  ;;  %v2183_v54 = vor.u32 %v2182_v8, %v2178_v51  ;;  %v2517_v53 = vrot.slane %v2515_v5, 4  ;;  %v2518_v50 = vrot.slane %v2012_v30, 5 }
 0x146   : > { %6531 = vmatmul.mubr.msk.bf16.gmra.mxu1 %vm2636_vm7, %v9868_v17  ;;  %v2188_v45 = vrot.slane %v2186_v40, 5  ;;  %v2203_v31 = vsel %vm6856_vm9, %v8258_v39, %v9871_v56  ;;  %v8736_v47 = vpop.f32.mrf.mxu0  ;;  %v5990_v38 = vcombine.low %v8678_v9, %v8682_v61  ;;  %v2207_v8 = vor.u32 %v8240_v52, %v9871_v56  ;;  %v2415_v61 = vld [vmem:[#allocation2 + $0x78] sm:$0xe]  ;;  %v8769_v40 = vld [vmem:[#allocation2 + $0x80] sm:$0x1] }
 0x147   : > { %6534 = vmatprep.mubr.msk.bf16.mxu1 %vm2636_vm7, %v9870_v10  ;;  %v2184_v12 = vrot.slane %v2183_v54, 4  ;;  %v2210_v21 = vshll.u32 %v2013_v44, 16  ;;  %v9872_v36 = vrot.slane %v8110_v11, 5  ;;  %v8750_v48 = vsel %vm7225_vm12, %v2510_v4, %v2511_v63 }
 0x148   : > { %v8754_v39 = vsel %vm7225_vm12, %v5716_v60, %v2515_v5  ;;  %v5717_v9 = vrot.slane %v2414_v19, 9  ;;  %v8758_v52 = vpop.f32.mrf.mxu0  ;;  %v2208_v16 = vrot.slane %v2207_v8, 4  ;;  %v2529_v28 = vrot.slane %v8234_v55, 5 }
 0x149   : > { %v8746_v30 = vsel %vm7225_vm12, %v5715_v49, %v9872_v36  ;;  %v2189_v11 = vsel %vm6856_vm9, %v2184_v12, %v2188_v45  ;;  %v2212_v49 = vrot.slane %v2210_v21, 5  ;;  %v2519_v4 = vsel %vm7225_vm12, %v2517_v53, %v2518_v50  ;;  %v8781_v50 = vld [vmem:[#allocation2 + $0x8c] sm:$0x1] }
 0x14a   : > { %v8765_v51 = vcombine.low %v2179_v58, %v2189_v11  ;;  %v9874_v5 = vrot.slane %v8179_v22, 5  ;;  %v2525_v60 = vrot.slane %v2013_v44, 5  ;;  %v9875_v17 = vshrl.u32 %v8476_v7, 16  ;;  %v8775_v19 = vpop.f32.mrf.mxu0  ;;  %6613 = vmatmul.mubr.msk.bf16.gmra.mxu0 %vm2636_vm7, %v5989_v43  ;;  %v9883_v11 = vld [vmem:[#allocation14_spill] sm:$0xff] }
 0x14b   : > { %v2213_v10 = vsel %vm6856_vm9, %v2208_v16, %v2212_v49  ;;  %v5718_v53 = vrot.slane %v2415_v61, 9  ;;  %v2224_v58 = vshll.u32 %v8234_v55, 16  ;;  %v9876_v44 = vshll.u32 %v8476_v7, 16  ;;  %6616 = vmatprep.mubr.msk.bf16.mxu0 %vm2636_vm7, %v5990_v38  ;;  %v9881_v38 = vld [vmem:[#allocation15_spill] sm:$0xff]  ;;  %v9884_v16 = vld [vmem:[#allocation29_spill] sm:$0xff] }
 0x14c   : > { %v2524_v63 = vrot.slane %v9874_v5, 4  ;;  %v8773_v54 = vrot.slane %v9875_v17, 4  ;;  %v9877_v56 = vsel %vm6856_vm9, %v8603_v35, %v8581_v57  ;;  %v5991_v43 = vcombine.low %v8746_v30, %v8750_v48  ;;  %v8803_v36 = vpop.f32.mrf.mxu0  ;;  %v9886_v17 = vld [vmem:[#allocation31_spill] sm:$0xff] }
 0x14d   : > { %v8785_v45 = vrot.slane %v9876_v44, 5  ;;  %v5955_v12 = vcombine.low %v9877_v56, %v2093_v27  ;;  %v8795_v8 = vcombine.low %v2203_v31, %v2213_v10  ;;  %v9879_v7 = vcombine.low %v8482_v24, %v8498_v14  ;;  %v2416_v14 = vld [vmem:[#allocation2 + $0x84] sm:$0xe] }
 0x14e   : > { %v8797_v21 = vpop.f32.mrf.mxu1  ;;  %v5992_v61 = vcombine.low %v8754_v39, %v2519_v4  ;;  %v9880_v57 = vmov %v9874_v5  ;;  %v2531_v27 = vrot.slane %v2529_v28, 4  ;;  %v2532_v31 = vrot.slane %v8769_v40, 5 }
 0x14f   : > { %9878 = vst [vmem:[#allocation12_spill] sm:$0xff] %v8797_v21  ;;  %6535 = vmatmul.mubr.msk.bf16.gmra.mxu1 %vm2636_vm7, %v9879_v7  ;;  %v8810_v35 = vsel %vm7225_vm12, %v5717_v9, %v9880_v57  ;;  %v8817_v24 = vsel %vm7225_vm12, %v2524_v63, %v2525_v60  ;;  %v2251_v22 = vsel %vm6856_vm9, %v8323_v33, %v9881_v38  ;;  %v2258_v48 = vshll.u32 %v8781_v50, 16  ;;  %v8828_v9 = vpop.f32.mrf.mxu0  ;;  %v2417_v7 = vld [vmem:[#allocation2 + $0x90] sm:$0xe]  ;;  %v9888_v57 = vld [vmem:[#allocation7_spill] sm:$0xff] }
 0x150   : > { %6574 = vmatprep.mubr.msk.bf16.mxu1 %vm2636_vm7, %v8606_v29  ;;  %v2255_v30 = vor.u32 %v8325_v2, %v9881_v38  ;;  %v8826_v39 = vpop.f32.mrf.mxu1  ;;  %v8832_v29 = vsel %vm7225_vm12, %v5718_v53, %v2529_v28  ;;  %v2221_v49 = vor.u32 %v9884_v16, %v9883_v11  ;;  %v8836_v4 = vrot.slane %v2224_v58, 5  ;;  %v2016_v58 = vld [vmem:[#allocation2 + $0x98] sm:$0x1] }
 0x151   : > { %9882 = vst [vmem:[#allocation23_spill] sm:$0xff] %v8826_v39  ;;  %v9885_v33 = vshrl.u32 %v8234_v55, 16  ;;  %v2234_v2 = vshll.u32 %v8769_v40, 16  ;;  %v2260_v60 = vrot.slane %v2258_v48, 5  ;;  %v2543_v10 = vrot.slane %v9886_v17, 5  ;;  %v8844_v56 = vpop.f32.mrf.mxu0  ;;  %v9889_v55 = vld [vmem:[#allocation32_spill] sm:$0xff] }
 0x152   : > { %v2256_v63 = vrot.slane %v2255_v30, 4  ;;  %v8842_v44 = vpop.f32.mrf.mxu1  ;;  %v8848_v28 = vsel %vm7225_vm12, %v2531_v27, %v2532_v31  ;;  %v5719_v53 = vrot.slane %v2416_v14, 9  ;;  %v2269_v38 = vor.u32 %v9889_v55, %v9888_v57  ;;  %6617 = vmatmul.mubr.msk.bf16.gmra.mxu0 %vm2636_vm7, %v5991_v43 }
 0x153   : > { %v2230_v5 = vrot.slane %v9885_v33, 4  ;;  %9887 = vst [vmem:[#allocation24_spill] sm:$0xff] %v8842_v44  ;;  %v2272_v40 = vshll.u32 %v9886_v17, 16  ;;  %v9890_v30 = vrot.slane %v8246_v34, 5  ;;  %v2539_v11 = vrot.slane %v8781_v50, 5  ;;  %v8862_v14 = vpop.f32.mrf.mxu0  ;;  %6620 = vmatprep.mubr.msk.bf16.mxu0 %vm2636_vm7, %v5992_v61 }
 0x154   : > { %v2261_v16 = vsel %vm6856_vm9, %v2256_v63, %v2260_v60  ;;  %v9891_v33 = vshrl.u32 %v9886_v17, 16  ;;  %v8860_v31 = vpop.f32.mrf.mxu1  ;;  %v2270_v44 = vrot.slane %v2269_v38, 4  ;;  %v5720_v50 = vrot.slane %v2417_v7, 9  ;;  %v2017_v17 = vld [vmem:[#allocation2 + $0xa4] sm:$0x1] }
 0x155   : > { %v2538_v48 = vrot.slane %v9890_v30, 4  ;;  %9892 = vst [vmem:[#allocation26_spill] sm:$0xff] %v8860_v31  ;;  %v2231_v57 = vor.u32 %v2230_v5, %v8836_v4  ;;  %v8866_v55 = vcombine.low %v2251_v22, %v2261_v16  ;;  %v2274_v30 = vrot.slane %v2272_v40, 5  ;;  %v8873_v31 = vpop.f32.mrf.mxu0  ;;  %v9895_v16 = vld [vmem:[#allocation35_spill] sm:$0xff] }
 0x156   : > { %v2278_v27 = vrot.slane %v9891_v33, 4  ;;  %v2545_v39 = vrot.slane %v2543_v10, 4  ;;  %v2546_v63 = vrot.slane %v2016_v58, 5  ;;  %v2282_v60 = vshll.u32 %v2016_v58, 16  ;;  %v8869_v33 = vpop.f32.mrf.mxu1 }
 0x157   : > { %9893 = vst [vmem:[#allocation22_spill] sm:$0xff] %v8866_v55  ;;  %6575 = vmatmul.mubr.msk.bf16.vlgmr.msra.gmra.mxu1 %vm2636_vm7, %v8568_v1  ;;  %v5993_v43 = vcombine.low %v8810_v35, %v8817_v24  ;;  %v8877_v22 = vrot.slane %v2221_v49, 4  ;;  %v2275_v61 = vsel %vm6856_vm9, %v2270_v44, %v2274_v30  ;;  %v5994_v58 = vcombine.low %v8832_v29, %v8848_v28  ;;  %v2418_v24 = vld [vmem:[#allocation2 + $0x9c] sm:$0xe]  ;;  %v8894_v40 = vpop.f32.mrf.mxu0 }
 0x158   : > { %v2279_v5 = vor.u32 %v2278_v27, %v2274_v30  ;;  %6578 = vmatprep.mubr.msk.bf16.mxu1 %vm2636_vm7, %v5955_v12  ;;  %v8884_v7 = vrot.slane %v2234_v2, 5  ;;  %v9894_v1 = vrot.slane %v8246_v34, 5  ;;  %v2284_v35 = vrot.slane %v2282_v60, 5  ;;  %v8892_v49 = vpop.f32.mrf.mxu1 }
 0x159   : > { %v2299_v12 = vsel %vm6856_vm9, %v8422_v32, %v9895_v16  ;;  %v2303_v29 = vor.u32 %v8388_v18, %v9895_v16  ;;  %v2306_v34 = vshll.u32 %v2017_v17, 16  ;;  %v2232_v2 = vrot.slane %v2231_v57, 4  ;;  %v8916_v32 = vpop.f32.mrf.mxu0  ;;  %v9899_v16 = vld [vmem:[#allocation44_spill] sm:$0xff] }
 0x15a   : > { %v8890_v38 = vsel %vm7225_vm12, %v5719_v53, %v9894_v1  ;;  %v2280_v44 = vrot.slane %v2279_v5, 4  ;;  %v8904_v28 = vsel %vm7225_vm12, %v2538_v48, %v2539_v11  ;;  %v8908_v53 = vsel %vm7225_vm12, %v5720_v50, %v2543_v10  ;;  %v8914_v30 = vpop.f32.mrf.mxu1  ;;  %6621 = vmatmul.mubr.msk.bf16.gmra.mxu0 %vm2636_vm7, %v5993_v43  ;;  %v2420_v43 = vld [vmem:[#allocation2 + $0xb4] sm:$0xe] }
 0x15b   : > { %v8912_v27 = vsel %vm7225_vm12, %v2545_v39, %v2546_v63  ;;  %v5721_v57 = vrot.slane %v2418_v24, 9  ;;  %v2304_v60 = vrot.slane %v2303_v29, 4  ;;  %v2308_v5 = vrot.slane %v2306_v34, 5  ;;  %6624 = vmatprep.mubr.msk.bf16.mxu0 %vm2636_vm7, %v5994_v58 }
 0x15c   : > { %v2285_v18 = vsel %vm6856_vm9, %v2280_v44, %v2284_v35  ;;  %v9897_v11 = vrot.slane %v8313_v37, 5  ;;  %v2553_v50 = vrot.slane %v2017_v17, 5  ;;  %v2557_v1 = vrot.slane %v8381_v42, 5  ;;  %v8932_v24 = vpop.f32.mrf.mxu1  ;;  %v8934_v44 = vpop.f32.mrf.mxu0 }
 0x15d   : > { %v8920_v48 = vcombine.low %v2275_v61, %v2285_v18  ;;  %v9898_v39 = vor.u32 %v8418_v13, %v8416_v23  ;;  %v2396_v35 = vshrl.u32 %v8524_v62, 16  ;;  %9900 = vst [vmem:[#allocation15_spill] sm:$0xff] %v8934_v44  ;;  %v2309_v17 = vsel %vm6856_vm9, %v2304_v60, %v2308_v5  ;;  %v2419_v61 = vld [vmem:[#allocation2 + $0xa8] sm:$0xe]  ;;  %v2019_v5 = vld [vmem:[#allocation2 + $0xbc] sm:$0x1] }
 0x15e   : > { %v2552_v10 = vrot.slane %v9897_v11, 4  ;;  %v2389_v29 = vor.u32 %v8785_v45, %v8773_v54  ;;  %v9901_v23 = vshll.u32 %v8524_v62, 16  ;;  %v8947_v18 = vcombine.low %v2299_v12, %v2309_v17  ;;  %v8949_v11 = vld [vmem:[#allocation2 + $0xb0] sm:$0x1]  ;;  %v8953_v60 = vpop.f32.mrf.mxu0 }
 0x15f   : > { %9896 = vst [vmem:[#allocation13_spill] sm:$0xff] %v8920_v48  ;;  %v8928_v63 = vrot.slane %v9898_v39, 4  ;;  %v6376_v39 = vpop.f32.mrf.mxu1  ;;  %6579 = vmatmul.mubr.msk.bf16.gmra.mxu1 %vm2636_vm7, %v8629_v20  ;;  %9903 = vst [vmem:[#allocation29_spill] sm:$0xff] %v8953_v60  ;;  %v2227_v54 = vsel %vm6856_vm9, %v8877_v22, %v8836_v4  ;;  %v2237_v45 = vsel %vm6856_vm9, %v2232_v2, %v8884_v7  ;;  %v9904_v20 = vrot.slane %v8313_v37, 5  ;;  %v9910_v48 = vld [vmem:[#allocation25_spill] sm:$0xff] }
 0x160   : > { %v8943_v13 = vrot.slane %v9901_v23, 5  ;;  %9902 = vst [vmem:[#allocation14_spill] sm:$0xff] %v8947_v18  ;;  %v5995_v58 = vcombine.low %v8890_v38, %v8904_v28  ;;  %v5996_v12 = vcombine.low %v8908_v53, %v8912_v27  ;;  %6582 = vmatprep.mubr.msk.bf16.mxu1 %vm2636_vm7, %v8704_v59  ;;  %v8976_v4 = vsel %vm7225_vm12, %v2552_v10, %v2553_v50  ;;  %v8978_v2 = vpop.f32.mrf.mxu0  ;;  %v9906_v27 = vld [vmem:[#allocation36_spill] sm:$0xff]  ;;  %v9909_v50 = vld [vmem:[#allocation46_spill] sm:$0xff] }
 0x161   : > { %v8972_v17 = vsel %vm7225_vm12, %v5721_v57, %v9904_v20  ;;  %v5722_v22 = vrot.slane %v2419_v61, 9  ;;  %v2559_v7 = vrot.slane %v2557_v1, 4  ;;  %v3015_v38 = vpop.f32.mrf.mxu1  ;;  %9905 = vst [vmem:[#allocation31_spill] sm:$0xff] %v8978_v2  ;;  %v2560_v28 = vrot.slane %v8949_v11, 5  ;;  %v9908_v57 = vld [vmem:[#allocation42_spill] sm:$0xff]  ;;  %v9911_v2 = vld [vmem:[#allocation27_spill] sm:$0xff] }
 0x162   : > { %v2320_v53 = vshll.u32 %v8381_v42, 16  ;;  %v5723_v59 = vrot.slane %v2420_v43, 9  ;;  %v9907_v37 = vrot.slane %v9906_v27, 5  ;;  %v2567_v21 = vrot.slane %v2019_v5, 5  ;;  %v8992_v18 = vpop.f32.mrf.mxu0  ;;  %6625 = vmatmul.mubr.msk.bf16.gmra.mxu0 %vm2636_vm7, %v5995_v58 }
 0x163   : > { %v2347_v10 = vsel %vm6856_vm9, %v8928_v63, %v9908_v57  ;;  %v2351_v61 = vor.u32 %v9909_v50, %v9908_v57  ;;  %v2354_v20 = vshll.u32 %v2019_v5, 16  ;;  %v8990_v34 = vrot.slane %v2389_v29, 4  ;;  %v6377_v3 = vpop.f32.mrf.mxu1  ;;  %v9001_v57 = vld [vmem:[#allocation2 + $0xc8] sm:$0x1]  ;;  %v2421_v29 = vld [vmem:[#allocation2 + $0xc0] sm:$0xe]  ;;  %6628 = vmatprep.mubr.msk.bf16.mxu0 %vm2636_vm7, %v5996_v12 }
 0x164   : > { %v2566_v23 = vrot.slane %v9907_v37, 4  ;;  %v2398_v6 = vrot.slane %v2396_v35, 4  ;;  %v8994_v43 = vcombine.low %v2227_v54, %v2237_v45  ;;  %v2571_v37 = vrot.slane %v9899_v16, 5  ;;  %v9003_v35 = vpop.f32.mrf.mxu0 }
 0x165   : > { %v3008_v55 = vadd.f32 %v8869_v33, %v9910_v48  ;;  %v3000_v63 = vadd.f32 %v8892_v49, %v9911_v2  ;;  %v2352_v60 = vrot.slane %v2351_v61, 4  ;;  %v2356_v44 = vrot.slane %v2354_v20, 5  ;;  %v3018_v5 = vpop.f32.mrf.mxu1  ;;  %v9919_v20 = vld [vmem:[#allocation16_spill] sm:$0xff] }
 0x166   : > { %v5997_v54 = vcombine.low %v8972_v17, %v8976_v4  ;;  %v2558_v45 = vsel %vm7225_vm12, %v5722_v22, %v2557_v1  ;;  %v9010_v33 = vrot.slane %v2320_v53, 5  ;;  %v9912_v49 = vshrl.u32 %v8381_v42, 16  ;;  %v9033_v12 = vpop.f32.mrf.mxu0  ;;  %v9914_v53 = vld [vmem:[#allocation28_spill] sm:$0xff] }
 0x167   : > { %v2561_v2 = vsel %vm7225_vm12, %v2559_v7, %v2560_v28  ;;  %v9913_v50 = vrot.slane %v9906_v27, 5  ;;  %v9027_v1 = vsel %vm7225_vm12, %v2566_v23, %v2567_v21  ;;  %v2357_v42 = vsel %vm6856_vm9, %v2352_v60, %v2356_v44  ;;  %v6380_v17 = vpop.f32.mrf.mxu1  ;;  %6583 = vmatmul.mubr.msk.bf16.gmra.mxu1 %vm2636_vm7, %v8710_v41  ;;  %v9915_v21 = vld [vmem:[#allocation30_spill] sm:$0xff]  ;;  %v9916_v44 = vld [vmem:[#allocation39_spill] sm:$0xff]  ;;  %v9917_v60 = vld [vmem:[#allocation41_spill] sm:$0xff] }
 0x168   : > { %v9014_v48 = vrot.slane %v9912_v49, 4  ;;  %v9035_v4 = vcombine.low %v2347_v10, %v2357_v42  ;;  %v5724_v22 = vrot.slane %v2421_v29, 9  ;;  %v2573_v7 = vrot.slane %v2571_v37, 4  ;;  %6586 = vmatprep.mubr.msk.bf16.mxu1 %vm2636_vm7, %v8765_v51  ;;  %v9918_v10 = vld [vmem:[#allocation33_spill] sm:$0xff] }
 0x169   : > { %v9023_v58 = vsel %vm7225_vm12, %v5723_v59, %v9913_v50  ;;  %v2574_v28 = vrot.slane %v9001_v57, 5  ;;  %v3011_v59 = vadd.f32 %v8914_v30, %v9914_v53  ;;  %v3003_v27 = vadd.f32 %v8932_v24, %v9915_v21  ;;  %v3031_v49 = vpop.f32.mrf.mxu1  ;;  %v9049_v50 = vpop.f32.mrf.mxu0  ;;  %v9053_v24 = vld [vmem:[#allocation2 + $0xd4] sm:$0x1] }
 0x16a   : > { %v2317_v41 = vor.u32 %v9917_v60, %v9916_v44  ;;  %v2330_v23 = vshll.u32 %v8949_v11, 16  ;;  %v3024_v61 = vadd.f32 %v6376_v39, %v9918_v10  ;;  %v3016_v29 = vadd.f32 %v3015_v38, %v9919_v20  ;;  %v9920_v53 = vld [vmem:[#allocation38_spill] sm:$0xff]  ;;  %v9921_v38 = vld [vmem:[#allocation45_spill] sm:$0xff]  ;;  %6629 = vmatmul.mubr.msk.bf16.gmra.mxu0 %vm2636_vm7, %v5997_v54 }
 0x16b   : > { %v5998_v42 = vcombine.low %v2558_v45, %v2561_v2  ;;  %v2327_v30 = vor.u32 %v9014_v48, %v9010_v33  ;;  %v3027_v51 = vadd.f32 %v6377_v3, %v9920_v53  ;;  %v5999_v21 = vcombine.low %v9023_v58, %v9027_v1  ;;  %v6381_v45 = vpop.f32.mrf.mxu1  ;;  %v9064_v2 = vpop.f32.mrf.mxu0  ;;  %v9922_v1 = vld [vmem:[#allocation48_spill] sm:$0xff]  ;;  %v9923_v10 = vld [vmem:[#allocation10_spill] sm:$0xff] }
 0x16c   : > { %v2395_v11 = vsel %vm6856_vm9, %v8990_v34, %v8943_v13  ;;  %v2399_v39 = vor.u32 %v2398_v6, %v8943_v13  ;;  %v3019_v44 = vadd.f32 %v3018_v5, %v9921_v38  ;;  %v2572_v48 = vsel %vm7225_vm12, %v5724_v22, %v2571_v37  ;;  %v9924_v13 = vld [vmem:[#allocation4_spill] sm:$0xff]  ;;  %v2422_v37 = vld [vmem:[#allocation2 + $0xcc] sm:$0xe] }
 0x16d   : > { %v2575_v3 = vsel %vm7225_vm12, %v2573_v7, %v2574_v28  ;;  %v2368_v58 = vshll.u32 %v9899_v16, 16  ;;  %v3040_v60 = vadd.f32 %v6380_v17, %v9922_v1  ;;  %v3032_v20 = vadd.f32 %v3031_v49, %v9923_v10  ;;  %v3034_v53 = vpop.f32.mrf.mxu1  ;;  %v9075_v38 = vpop.f32.mrf.mxu0  ;;  %v9925_v28 = vld [vmem:[#allocation5_spill] sm:$0xff]  ;;  %6632 = vmatprep.mubr.msk.bf16.mxu0 %vm2636_vm7, %v5998_v42 }
 0x16e   : > { %v2400_v34 = vrot.slane %v2399_v39, 4  ;;  %v2402_v6 = vshll.u32 %v9053_v24, 16  ;;  %v3043_v5 = vadd.f32 %v6381_v45, %v9924_v13  ;;  %v9079_v22 = vadd.f32 %v8698_v0, %v3008_v55 }
 0x16f   : > { %v9082_v7 = vadd.f32 %v8718_v15, %v3000_v63  ;;  %v9085_v17 = vadd.f32 %v8736_v47, %v3011_v59  ;;  %v3035_v49 = vadd.f32 %v3034_v53, %v9925_v28  ;;  %v9090_v45 = vadd.f32 %v8758_v52, %v3003_v27  ;;  %v6384_v1 = vpop.f32.mrf.mxu1  ;;  %6587 = vmatmul.mubr.msk.bf16.gmra.mxu1 %vm2636_vm7, %v8795_v8  ;;  %v9097_v0 = vpop.f32.mrf.mxu0 }
 0x170   : > { %v2404_v39 = vrot.slane %v2402_v6, 5  ;;  %v9093_v54 = vadd.f32 %v8775_v19, %v3024_v61  ;;  %v6000_v15 = vcombine.low %v2572_v48, %v2575_v3  ;;  %v9100_v47 = vadd.f32 %v8803_v36, %v3016_v29  ;;  %6590 = vmatprep.mubr.msk.bf16.mxu1 %vm2636_vm7, %v8994_v43  ;;  %v9926_v61 = vld [vmem:[#allocation18_spill] sm:$0xff]  ;;  %v9931_v6 = vld [vmem:[#allocation43_spill] sm:$0xff] }
 0x171   : > { %v9103_v55 = vadd.f32 %v8828_v9, %v3027_v51  ;;  %v9106_v63 = vadd.f32 %v8844_v56, %v3019_v44  ;;  %v3056_v52 = vadd.f32 %v6384_v1, %v8621_v46  ;;  %v5725_v19 = vrot.slane %v2422_v37, 9  ;;  %v3047_v36 = vpop.f32.mrf.mxu1  ;;  %v9116_v27 = vpop.f32.mrf.mxu0  ;;  %v9928_v44 = vld [vmem:[#allocation15_spill] sm:$0xff] }
 0x172   : > { %v2405_v8 = vsel %vm6856_vm9, %v2400_v34, %v2404_v39  ;;  %v9114_v59 = vadd.f32 %v8862_v14, %v3040_v60  ;;  %v9121_v56 = vadd.f32 %v8873_v31, %v3032_v20  ;;  %v9124_v46 = vadd.f32 %v8894_v40, %v3043_v5  ;;  %v9929_v60 = vld [vmem:[#allocation17_spill] sm:$0xff]  ;;  %6633 = vmatmul.mubr.msk.bf16.gmra.mxu0 %vm2636_vm7, %v5999_v21 }
 0x173   : > { %v9118_v9 = vcombine.low %v2395_v11, %v2405_v8  ;;  %v9127_v43 = vadd.f32 %v8916_v32, %v3035_v49  ;;  %v3048_v29 = vadd.f32 %v3047_v36, %v9926_v61  ;;  %v9927_v42 = vrot.slane %v8524_v62, 5  ;;  %v6385_v11 = vpop.f32.mrf.mxu1  ;;  %v9136_v3 = vpop.f32.mrf.mxu0  ;;  %v9930_v32 = vld [vmem:[#allocation29_spill] sm:$0xff]  ;;  %6636 = vmatprep.mubr.msk.bf16.mxu0 %vm2636_vm7, %v6000_v15  ;;  %v9937_v36 = vld [vmem:[#allocation31_spill] sm:$0xff] }
 0x174   : > { %v2581_v51 = vrot.slane %v9053_v24, 5  ;;  %v9134_v48 = vadd.f32 %v9928_v44, %v3056_v52  ;;  %v2318_v31 = vrot.slane %v2317_v41, 4  ;;  %v3059_v40 = vadd.f32 %v6385_v11, %v9929_v60  ;;  %v9940_v44 = vld [vmem:[#allocation13_spill] sm:$0xff] }
 0x175   : > { %v2580_v14 = vrot.slane %v9927_v42, 4  ;;  %v2328_v10 = vrot.slane %v2327_v30, 4  ;;  %v2332_v20 = vrot.slane %v2330_v23, 5  ;;  %v9140_v34 = vadd.f32 %v9930_v32, %v3048_v29  ;;  %v3050_v37 = vpop.f32.mrf.mxu1  ;;  %v9146_v28 = vpop.f32.mrf.mxu0  ;;  %v9935_v30 = vld [vmem:[#allocation11_spill] sm:$0xff]  ;;  %v9939_v29 = vld [vmem:[#allocation34_spill] sm:$0xff]  ;;  %v9941_v32 = vld [vmem:[#allocation37_spill] sm:$0xff] }
 0x176   : > { %v9932_v13 = vshrl.u32 %v9931_v6, 16  ;;  %v9933_v53 = vshll.u32 %v9931_v6, 16  ;;  %v2370_v49 = vrot.slane %v2368_v58, 5  ;;  %v9934_v41 = vshrl.u32 %v9899_v16, 16  ;;  %v9938_v58 = vld [vmem:[#allocation22_spill] sm:$0xff] }
 0x177   : > { %v3051_v23 = vadd.f32 %v3050_v37, %v9935_v30  ;;  %v9936_v1 = vmov %v9927_v42  ;;  %v2582_v8 = vsel %vm7225_vm12, %v2580_v14, %v2581_v51  ;;  %v9160_v61 = vadd.f32 %v9937_v36, %v3059_v40  ;;  %v6388_v21 = vpop.f32.mrf.mxu1  ;;  %6591 = vmatmul.mubr.msk.bf16.gmra.mxu1 %vm2636_vm7, %v9938_v58  ;;  %v3355_v16 = vpop.f32.mrf.mxu0 }
 0x178   : > { %v2361_v5 = vrot.slane %v9932_v13, 4  ;;  %v2364_v24 = vrot.slane %v9933_v53, 5  ;;  %v2374_v39 = vrot.slane %v9934_v41, 4  ;;  %v2579_v52 = vsel %vm7225_vm12, %v5725_v19, %v9936_v1  ;;  %6594 = vmatprep.mubr.msk.bf16.mxu1 %vm2636_vm7, %v9940_v44  ;;  %v9944_v1 = vld [vmem:[#allocation14_spill] sm:$0xff] }
 0x179   : > { %v3072_v42 = vadd.f32 %v6388_v21, %v9939_v29  ;;  %v2323_v62 = vsel %vm6856_vm9, %v2318_v31, %v9010_v33  ;;  %v2333_v25 = vsel %vm6856_vm9, %v2328_v10, %v2332_v20  ;;  %v9173_v15 = vadd.f32 %v8992_v18, %v3051_v23  ;;  %v3063_v19 = vpop.f32.mrf.mxu1  ;;  %v6431_v14 = vpop.f32.mrf.mxu0  ;;  %v9942_v31 = vld [vmem:[#allocation40_spill] sm:$0xff] }
 0x17a   : > { %v2365_v51 = vor.u32 %v2364_v24, %v2361_v5  ;;  %v2375_v11 = vor.u32 %v2374_v39, %v2370_v49  ;;  %v2378_v60 = vshll.u32 %v9001_v57, 16  ;;  %v6001_v40 = vcombine.low %v2579_v52, %v2582_v8  ;;  %v9943_v57 = vld [vmem:[#allocation47_spill] sm:$0xff]  ;;  %v9945_v8 = vld [vmem:[#allocation49_spill] sm:$0xff] }
 0x17b   : > { %v3064_v6 = vadd.f32 %v3063_v19, %v9941_v32  ;;  %v9178_v13 = vadd.f32 %v9003_v35, %v3072_v42  ;;  %v6389_v53 = vpop.f32.mrf.mxu1  ;;  %v3358_v33 = vpop.f32.mrf.mxu0  ;;  %v5965_v10 = vcombine.low %v2323_v62, %v2333_v25  ;;  %v9946_v42 = vld [vmem:[#allocation8_spill] sm:$0xff] }
 0x17c   : > { %v3075_v37 = vadd.f32 %v6389_v53, %v9942_v31  ;;  %v2366_v5 = vrot.slane %v2365_v51, 4  ;;  %v2376_v24 = vrot.slane %v2375_v11, 4  ;;  %v2380_v39 = vrot.slane %v2378_v60, 5  ;;  %6637 = vmatmul.mubr.msk.bf16.gmra.mxu0 %vm2636_vm7, %v6001_v40  ;;  %v9947_v51 = vld [vmem:[#allocation3_spill] sm:$0xff] }
 0x17d   : > { %v9182_v18 = vadd.f32 %v9033_v12, %v3064_v6  ;;  %v3066_v20 = vpop.f32.mrf.mxu1  ;;  %v6434_v41 = vpop.f32.mrf.mxu0  ;;  %v9949_v31 = vld [vmem:[#allocation19_spill] sm:$0xff] }
 0x17e   : > { %v3067_v30 = vadd.f32 %v3066_v20, %v9943_v57  ;;  %v9187_v35 = vadd.f32 %v9049_v50, %v3075_v37  ;;  %v2371_v58 = vsel %vm6856_vm9, %v2366_v5, %v2370_v49  ;;  %v2381_v50 = vsel %vm6856_vm9, %v2376_v24, %v2380_v39  ;;  %v9948_v49 = vld [vmem:[#allocation6_spill] sm:$0xff]  ;;  %v9950_v5 = vld [vmem:[#allocation20_spill] sm:$0xff] }
 0x17f   : > { %v6392_v23 = vpop.f32.mrf.mxu1  ;;  %6595 = vmatmul.mubr.msk.bf16.gmra.mxu1 %vm2636_vm7, %v9944_v1  ;;  %v3371_v52 = vpop.f32.mrf.mxu0  ;;  %v5967_v60 = vcombine.low %v2371_v58, %v2381_v50 }
 0x180   : > { %v3088_v12 = vadd.f32 %v6392_v23, %v9945_v8  ;;  %6598 = vmatprep.mubr.msk.bf16.mxu1 %vm2636_vm7, %v5965_v10  ;;  %v9194_v36 = vadd.f32 %v9064_v2, %v3067_v30  ;;  %v9951_v30 = vld [vmem:[#allocation9_spill] sm:$0xff] }
 0x181   : > { %v3079_v21 = vpop.f32.mrf.mxu1  ;;  %v6435_v29 = vpop.f32.mrf.mxu0 }
 0x182   : > { %v3080_v44 = vadd.f32 %v3079_v21, %v9946_v42  ;;  %v9202_v62 = vadd.f32 %v9075_v38, %v3088_v12  ;;  %v9952_v12 = vld [vmem:[#allocation21_spill] sm:$0xff]  ;;  %v9953_v42 = vld [vmem:[#allocation12_spill] sm:$0xff] }
 0x183   : > { %v6393_v25 = vpop.f32.mrf.mxu1  ;;  %v3374_v19 = vpop.f32.mrf.mxu0 }
 0x184   : > { %v3091_v11 = vadd.f32 %v6393_v25, %v9947_v51  ;;  %v9206_v2 = vadd.f32 %v9097_v0, %v3080_v44 }
 0x185   : > { %v3082_v40 = vpop.f32.mrf.mxu1  ;;  %v6474_v32 = vpop.f32.mrf.mxu0 }
 0x186   : > { %v3083_v6 = vadd.f32 %v3082_v40, %v9948_v49  ;;  %v9210_v26 = vadd.f32 %v9116_v27, %v3091_v11  ;;  %v9954_v11 = vld [vmem:[#allocation23_spill] sm:$0xff] }
 0x187   : > { %v6396_v53 = vpop.f32.mrf.mxu1  ;;  %6599 = vmatmul.mubr.msk.bf16.gmra.mxu1 %vm2636_vm7, %v9035_v4  ;;  %v3863_v38 = vpop.f32.mrf.mxu0 }
 0x188   : > { %v3104_v37 = vadd.f32 %v6396_v53, %v9949_v31  ;;  %6602 = vmatprep.mubr.msk.bf16.mxu1 %vm2636_vm7, %v5967_v60  ;;  %v9217_v10 = vadd.f32 %v9136_v3, %v3083_v6  ;;  %v9955_v6 = vld [vmem:[#allocation24_spill] sm:$0xff] }
 0x189   : > { %v3095_v0 = vpop.f32.mrf.mxu1  ;;  %v6475_v20 = vpop.f32.mrf.mxu0 }
 0x18a   : > { %v3096_v24 = vadd.f32 %v3095_v0, %v9950_v5  ;;  %v9221_v39 = vadd.f32 %v9146_v28, %v3104_v37 }
 0x18b   : > { %v6397_v27 = vpop.f32.mrf.mxu1  ;;  %v3866_v57 = vpop.f32.mrf.mxu0 }
 0x18c   : > { %v3107_v23 = vadd.f32 %v6397_v27, %v9951_v30  ;;  %v9224_v4 = vadd.f32 %v3355_v16, %v3096_v24 }
 0x18d   : > { %v3098_v1 = vpop.f32.mrf.mxu1  ;;  %v6478_v8 = vpop.f32.mrf.mxu0 }
 0x18e   : > { %v3099_v21 = vadd.f32 %v3098_v1, %v9952_v12  ;;  %v9227_v58 = vadd.f32 %v6431_v14, %v3107_v23 }
 0x18f   : > { %v6400_v3 = vpop.f32.mrf.mxu1  ;;  %6603 = vmatmul.mubr.msk.bf16.gmra.mxu1 %vm2636_vm7, %v9118_v9  ;;  %v3879_v50 = vpop.f32.mrf.mxu0  ;;  %v9956_v9 = vld [vmem:[#allocation26_spill] sm:$0xff] }
 0x190   : > { %v3120_v28 = vadd.f32 %v6400_v3, %v9953_v42  ;;  %v9232_v44 = vadd.f32 %v3358_v33, %v3099_v21 }
 0x191   : > { %v3111_v25 = vpop.f32.mrf.mxu1  ;;  %v6479_v51 = vpop.f32.mrf.mxu0 }
 0x192   : > { %v3112_v16 = vadd.f32 %v3111_v25, %v9954_v11  ;;  %v9235_v60 = vadd.f32 %v6434_v41, %v3120_v28 }
 0x193   : > { %v6401_v40 = vpop.f32.mrf.mxu1  ;;  %v3882_v49 = vpop.f32.mrf.mxu0 }
 0x194   : > { %v3123_v14 = vadd.f32 %v6401_v40, %v9955_v6  ;;  %v9238_v53 = vadd.f32 %v3371_v52, %v3112_v16 }
 0x195   : > { %v3114_v31 = vpop.f32.mrf.mxu1  ;;  %v6482_v37 = vpop.f32.mrf.mxu0 }
 0x196   : > { %v3115_v0 = vadd.f32 %v3114_v31, %v9956_v9  ;;  %v9241_v5 = vadd.f32 %v6435_v29, %v3123_v14 }
 0x197   : > { %v6440_v33 = vpop.f32.mrf.mxu1  ;;  %v3895_v24 = vpop.f32.mrf.mxu0 }
 0x198   : > { %v3696_v27 = vadd.f32 %v6440_v33, %v9079_v22  ;;  %v9244_v30 = vadd.f32 %v3374_v19, %v3115_v0 }
 0x199   : > { %v3567_v41 = vpop.f32.mrf.mxu1  ;;  %v6483_v23 = vpop.f32.mrf.mxu0 }
 0x19a   : > { %v3694_v1 = vadd.f32 %v3567_v41, %v9082_v7  ;;  %v9247_v12 = vadd.f32 %v6474_v32, %v3696_v27 }
 0x19b   : > { %v6441_v52 = vpop.f32.mrf.mxu1  ;;  %v3898_v21 = vpop.f32.mrf.mxu0 }
 0x19c   : > { %v3697_v3 = vadd.f32 %v6441_v52, %v9085_v17  ;;  %v9250_v42 = vadd.f32 %v3863_v38, %v3694_v1 }
 0x19d   : > { %v3570_v29 = vpop.f32.mrf.mxu1  ;;  %v6486_v28 = vpop.f32.mrf.mxu0 }
 0x19e   : > { %v3695_v25 = vadd.f32 %v3570_v29, %v9090_v45  ;;  %v9253_v11 = vadd.f32 %v6475_v20, %v3697_v3 }
 0x19f   : > { %v6444_v22 = vpop.f32.mrf.mxu1  ;;  %v3911_v19 = vpop.f32.mrf.mxu0 }
 0x1a0   : > { %v3700_v16 = vadd.f32 %v6444_v22, %v9093_v54  ;;  %v9256_v40 = vadd.f32 %v3866_v57, %v3695_v25 }
 0x1a1   : > { %v3583_v7 = vpop.f32.mrf.mxu1  ;;  %v6487_v32 = vpop.f32.mrf.mxu0 }
 0x1a2   : > { %v3698_v6 = vadd.f32 %v3583_v7, %v9100_v47  ;;  %v9259_v14 = vadd.f32 %v6478_v8, %v3700_v16 }
 0x1a3   : > { %v6445_v17 = vpop.f32.mrf.mxu1  ;;  %v3914_v38 = vpop.f32.mrf.mxu0 }
 0x1a4   : > { %v3701_v31 = vadd.f32 %v6445_v17, %v9103_v55  ;;  %v9262_v9 = vadd.f32 %v3879_v50, %v3698_v6 }
 0x1a5   : > { %v3586_v45 = vpop.f32.mrf.mxu1  ;;  %v6490_v20 = vpop.f32.mrf.mxu0 }
 0x1a6   : > { %v3699_v0 = vadd.f32 %v3586_v45, %v9106_v63  ;;  %v9265_v33 = vadd.f32 %v6479_v51, %v3701_v31 }
 0x1a7   : > { %v6448_v54 = vpop.f32.mrf.mxu1  ;;  %v3927_v57 = vpop.f32.mrf.mxu0 }
 0x1a8   : > { %v3704_v27 = vadd.f32 %v6448_v54, %v9114_v59  ;;  %v9268_v41 = vadd.f32 %v3882_v49, %v3699_v0 }
 0x1a9   : > { %v3599_v47 = vpop.f32.mrf.mxu1  ;;  %v6491_v8 = vpop.f32.mrf.mxu0 }
 0x1aa   : > { %v3702_v1 = vadd.f32 %v3599_v47, %v9121_v56  ;;  %v9271_v52 = vadd.f32 %v6482_v37, %v3704_v27 }
 0x1ab   : > { %v6449_v55 = vpop.f32.mrf.mxu1  ;;  %v3930_v50 = vpop.f32.mrf.mxu0 }
 0x1ac   : > { %v3705_v3 = vadd.f32 %v6449_v55, %v9124_v46  ;;  %v9274_v29 = vadd.f32 %v3895_v24, %v3702_v1 }
 0x1ad   : > { %v3602_v63 = vpop.f32.mrf.mxu1  ;;  %v6494_v51 = vpop.f32.mrf.mxu0 }
 0x1ae   : > { %v3703_v25 = vadd.f32 %v3602_v63, %v9127_v43  ;;  %v9277_v22 = vadd.f32 %v6483_v23, %v3705_v3 }
 0x1af   : > { %v6452_v59 = vpop.f32.mrf.mxu1  ;;  %v3943_v49 = vpop.f32.mrf.mxu0 }
 0x1b0   : > { %v3708_v16 = vadd.f32 %v6452_v59, %v9134_v48  ;;  %v9280_v7 = vadd.f32 %v3898_v21, %v3703_v25 }
 0x1b1   : > { %v3615_v56 = vpop.f32.mrf.mxu1  ;;  %v6495_v37 = vpop.f32.mrf.mxu0 }
 0x1b2   : > { %v3706_v6 = vadd.f32 %v3615_v56, %v9140_v34  ;;  %v9283_v17 = vadd.f32 %v6486_v28, %v3708_v16 }
 0x1b3   : > { %v6453_v46 = vpop.f32.mrf.mxu1  ;;  %v3946_v24 = vpop.f32.mrf.mxu0 }
 0x1b4   : > { %v3709_v31 = vadd.f32 %v6453_v46, %v9160_v61  ;;  %v9286_v45 = vadd.f32 %v3911_v19, %v3706_v6 }
 0x1b5   : > { %v3618_v43 = vpop.f32.mrf.mxu1  ;;  %v6498_v23 = vpop.f32.mrf.mxu0 }
 0x1b6   : > { %v3707_v0 = vadd.f32 %v3618_v43, %v9173_v15  ;;  %v9289_v54 = vadd.f32 %v6487_v32, %v3709_v31 }
 0x1b7   : > { %v6456_v48 = vpop.f32.mrf.mxu1  ;;  %v3959_v21 = vpop.f32.mrf.mxu0 }
 0x1b8   : > { %v3712_v27 = vadd.f32 %v6456_v48, %v9178_v13  ;;  %v9292_v47 = vadd.f32 %v3914_v38, %v3707_v0 }
 0x1b9   : > { %v3631_v34 = vpop.f32.mrf.mxu1  ;;  %v6499_v28 = vpop.f32.mrf.mxu0 }
 0x1ba   : > { %v3710_v1 = vadd.f32 %v3631_v34, %v9182_v18  ;;  %v9295_v55 = vadd.f32 %v6490_v20, %v3712_v27 }
 0x1bb   : > { %v6457_v61 = vpop.f32.mrf.mxu1  ;;  %v3962_v19 = vpop.f32.mrf.mxu0 }
 0x1bc   : > { %v3713_v3 = vadd.f32 %v6457_v61, %v9187_v35  ;;  %v9298_v63 = vadd.f32 %v3927_v57, %v3710_v1 }
 0x1bd   : > { %v3634_v15 = vpop.f32.mrf.mxu1  ;;  %v6502_v32 = vpop.f32.mrf.mxu0 }
 0x1be   : > { %v3711_v25 = vadd.f32 %v3634_v15, %v9194_v36  ;;  %v9301_v59 = vadd.f32 %v6491_v8, %v3713_v3 }
 0x1bf   : > { %v6460_v13 = vpop.f32.mrf.mxu1  ;;  %v3975_v38 = vpop.f32.mrf.mxu0 }
 0x1c0   : > { %v3716_v16 = vadd.f32 %v6460_v13, %v9202_v62  ;;  %v9304_v56 = vadd.f32 %v3930_v50, %v3711_v25 }
 0x1c1   : > { %v3647_v18 = vpop.f32.mrf.mxu1  ;;  %v6503_v20 = vpop.f32.mrf.mxu0 }
 0x1c2   : > { %9957 = vst [vmem:[#allocation7_spill] sm:$0xff] %v9304_v56  ;;  %v3714_v6 = vadd.f32 %v3647_v18, %v9206_v2  ;;  %v9307_v46 = vadd.f32 %v6494_v51, %v3716_v16 }
 0x1c3   : > { %v6461_v35 = vpop.f32.mrf.mxu1  ;;  %v3978_v57 = vpop.f32.mrf.mxu0 }
 0x1c4   : > { %v3717_v31 = vadd.f32 %v6461_v35, %v9210_v26  ;;  %v9310_v43 = vadd.f32 %v3943_v49, %v3714_v6 }
 0x1c5   : > { %v3650_v36 = vpop.f32.mrf.mxu1  ;;  %v6542_v8 = vpop.f32.mrf.mxu0 }
 0x1c6   : > { %9958 = vst [vmem:[#allocation32_spill] sm:$0xff] %v9310_v43  ;;  %v3715_v0 = vadd.f32 %v3650_v36, %v9217_v10  ;;  %v9313_v48 = vadd.f32 %v6495_v37, %v3717_v31 }
 0x1c7   : > { %v6464_v62 = vpop.f32.mrf.mxu1  ;;  %v4463_v50 = vpop.f32.mrf.mxu0 }
 0x1c8   : > { %9959 = vst [vmem:[#allocation35_spill] sm:$0xff] %v9313_v48  ;;  %v3720_v27 = vadd.f32 %v6464_v62, %v9221_v39  ;;  %v9316_v34 = vadd.f32 %v3946_v24, %v3715_v0 }
 0x1c9   : > { %v3663_v2 = vpop.f32.mrf.mxu1  ;;  %v9318_v51 = vpop.f32.mrf.mxu0 }
 0x1ca   : > { %9960 = vst [vmem:[#allocation44_spill] sm:$0xff] %v9316_v34  ;;  %v3718_v1 = vadd.f32 %v3663_v2, %v9224_v4  ;;  %v9321_v26 = vadd.f32 %v6498_v23, %v3720_v27 }
 0x1cb   : > { %v6465_v49 = vpop.f32.mrf.mxu1  ;;  %v9323_v61 = vpop.f32.mrf.mxu0 }
 0x1cc   : > { %v3721_v10 = vadd.f32 %v6465_v49, %v9227_v58  ;;  %v9326_v37 = vadd.f32 %v3959_v21, %v3718_v1 }
 0x1cd   : > { %v3666_v3 = vpop.f32.mrf.mxu1  ;;  %v6546_v15 = vpop.f32.mrf.mxu0 }
 0x1ce   : > { %9961 = vst [vmem:[#allocation36_spill] sm:$0xff] %v9326_v37  ;;  %v3719_v39 = vadd.f32 %v3666_v3, %v9232_v44  ;;  %v9329_v24 = vadd.f32 %v6499_v28, %v3721_v10 }
 0x1cf   : > { %v6468_v25 = vpop.f32.mrf.mxu1  ;;  %v9331_v13 = vpop.f32.mrf.mxu0 }
 0x1d0   : > { %9962 = vst [vmem:[#allocation42_spill] sm:$0xff] %v9329_v24  ;;  %v3724_v4 = vadd.f32 %v6468_v25, %v9235_v60  ;;  %v9334_v23 = vadd.f32 %v3962_v19, %v3719_v39 }
 0x1d1   : > { %v3679_v16 = vpop.f32.mrf.mxu1  ;;  %v9336_v18 = vpop.f32.mrf.mxu0 }
 0x1d2   : > { %9963 = vst [vmem:[#allocation46_spill] sm:$0xff] %v9334_v23  ;;  %v3722_v58 = vadd.f32 %v3679_v16, %v9238_v53  ;;  %v9339_v21 = vadd.f32 %v6502_v32, %v3724_v4 }
 0x1d3   : > { %v6469_v6 = vpop.f32.mrf.mxu1  ;;  %v9341_v35 = vpop.f32.mrf.mxu0 }
 0x1d4   : > { %v3725_v44 = vadd.f32 %v6469_v6, %v9241_v5  ;;  %v9344_v28 = vadd.f32 %v3975_v38, %v3722_v58 }
 0x1d5   : > { %v3682_v31 = vpop.f32.mrf.mxu1  ;;  %v6550_v36 = vpop.f32.mrf.mxu0 }
 0x1d6   : > { %9964 = vst [vmem:[#allocation25_spill] sm:$0xff] %v9344_v28  ;;  %v3723_v60 = vadd.f32 %v3682_v31, %v9244_v30  ;;  %v9347_v19 = vadd.f32 %v6503_v20, %v3725_v44 }
 0x1d7   : > { %v6508_v0 = vpop.f32.mrf.mxu1  ;;  %v9349_v62 = vpop.f32.mrf.mxu0 }
 0x1d8   : > { %9965 = vst [vmem:[#allocation27_spill] sm:$0xff] %v9347_v19  ;;  %v4284_v53 = vadd.f32 %v6508_v0, %v9247_v12  ;;  %v9352_v32 = vadd.f32 %v3978_v57, %v3723_v60 }
 0x1d9   : > { %v4155_v27 = vpop.f32.mrf.mxu1  ;;  %v9354_v2 = vpop.f32.mrf.mxu0 }
 0x1da   : > { %9966 = vst [vmem:[#allocation28_spill] sm:$0xff] %v9352_v32  ;;  %v4282_v5 = vadd.f32 %v4155_v27, %v9250_v42  ;;  %v9357_v38 = vadd.f32 %v6542_v8, %v4284_v53 }
 0x1db   : > { %v9359_v1 = vpop.f32.mrf.mxu1  ;;  %v9361_v49 = vpop.f32.mrf.mxu0 }
 0x1dc   : > { %v9363_v30 = vadd.f32 %v4463_v50, %v4282_v5 }
 0x1dd   : > { %v9365_v20 = vpop.f32.mrf.mxu1  ;;  %v6554_v10 = vpop.f32.mrf.mxu0 }
 0x1df   : > { %v6512_v3 = vpop.f32.mrf.mxu1  ;;  %v9367_v12 = vpop.f32.mrf.mxu0 }
 0x1e0   : > { %v4288_v57 = vadd.f32 %v6512_v3, %v9259_v14 }
 0x1e1   : > { %v9370_v39 = vpop.f32.mrf.mxu1  ;;  %v9372_v25 = vpop.f32.mrf.mxu0 }
 0x1e2   : > { %v9374_v42 = vadd.f32 %v6546_v15, %v4288_v57 }
 0x1e3   : > { %v9376_v8 = vpop.f32.mrf.mxu1  ;;  %v9378_v4 = vpop.f32.mrf.mxu0 }
 0x1e5   : > { %v9380_v50 = vpop.f32.mrf.mxu1  ;;  %v6558_v16 = vpop.f32.mrf.mxu0 }
 0x1e7   : > { %v6516_v58 = vpop.f32.mrf.mxu1  ;;  %v9382_v6 = vpop.f32.mrf.mxu0 }
 0x1e8   : > { %9967 = vst [vmem:[#allocation30_spill] sm:$0xff] %v9382_v6  ;;  %v4292_v44 = vadd.f32 %v6516_v58, %v9271_v52 }
 0x1e9   : > { %v9385_v31 = vpop.f32.mrf.mxu1  ;;  %v9387_v14 = vpop.f32.mrf.mxu0 }
 0x1ea   : > { %9968 = vst [vmem:[#allocation39_spill] sm:$0xff] %v9387_v14  ;;  %v9389_v60 = vadd.f32 %v6550_v36, %v4292_v44 }
 0x1eb   : > { %v9391_v15 = vpop.f32.mrf.mxu1  ;;  %v9393_v0 = vpop.f32.mrf.mxu0 }
 0x1ec   : > { %9969 = vst [vmem:[#allocation41_spill] sm:$0xff] %v9393_v0 }
 0x1ed   : > { %v9395_v53 = vpop.f32.mrf.mxu1  ;;  %v6562_v27 = vpop.f32.mrf.mxu0 }
 0x1ef   : > { %v6520_v5 = vpop.f32.mrf.mxu1  ;;  %v9397_v3 = vpop.f32.mrf.mxu0 }
 0x1f0   : > { %9970 = vst [vmem:[#allocation33_spill] sm:$0xff] %v9397_v3  ;;  %v4296_v57 = vadd.f32 %v6520_v5, %v9283_v17 }
 0x1f1   : > { %v9400_v32 = vpop.f32.mrf.mxu1  ;;  %v9402_v52 = vpop.f32.mrf.mxu0 }
 0x1f2   : > { %9971 = vst [vmem:[#allocation16_spill] sm:$0xff] %v9402_v52  ;;  %v9404_v58 = vadd.f32 %v6554_v10, %v4296_v57 }
 0x1f3   : > { %v9406_v36 = vpop.f32.mrf.mxu1  ;;  %v9408_v44 = vpop.f32.mrf.mxu0 }
 0x1f4   : > { %9972 = vst [vmem:[#allocation38_spill] sm:$0xff] %v9408_v44 }
 0x1f5   : > { %v9410_v19 = vpop.f32.mrf.mxu1  ;;  %v6566_v28 = vpop.f32.mrf.mxu0 }
 0x1f7   : > { %v6524_v23 = vpop.f32.mrf.mxu1  ;;  %v9412_v24 = vpop.f32.mrf.mxu0 }
 0x1f8   : > { %9973 = vst [vmem:[#allocation45_spill] sm:$0xff] %v9412_v24  ;;  %v4300_v37 = vadd.f32 %v6524_v23, %v9295_v55 }
 0x1f9   : > { %v9415_v3 = vpop.f32.mrf.mxu1  ;;  %v9417_v17 = vpop.f32.mrf.mxu0 }
 0x1fa   : > { %9974 = vst [vmem:[#allocation48_spill] sm:$0xff] %v9417_v17  ;;  %v9419_v5 = vadd.f32 %v6558_v16, %v4300_v37 }
 0x1fb   : > { %v9421_v10 = vpop.f32.mrf.mxu1  ;;  %v9423_v57 = vpop.f32.mrf.mxu0 }
 0x1fc   : > { %9975 = vst [vmem:[#allocation10_spill] sm:$0xff] %v9419_v5  ;;  %9976 = vst [vmem:[#allocation4_spill] sm:$0xff] %v9423_v57 }
 0x1fd   : > { %v9425_v52 = vpop.f32.mrf.mxu1  ;;  %v6570_v44 = vpop.f32.mrf.mxu0 }
 0x1fe   : > { %9977 = vst [vmem:[#allocation5_spill] sm:$0xff] %v9425_v52 }
 0x1ff   : > { %v6528_v34 = vpop.f32.mrf.mxu1  ;;  %v9427_v0 = vpop.f32.mrf.mxu0 }
 0x200   : > { %9978 = vst [vmem:[#allocation18_spill] sm:$0xff] %v9427_v0  ;;  %v4304_v24 = vadd.f32 %v6528_v34, %v9307_v46 }
 0x201   : > { %v9430_v48 = vpop.f32.mrf.mxu1  ;;  %v9432_v55 = vpop.f32.mrf.mxu0 }
 0x202   : > { %9979 = vst [vmem:[#allocation15_spill] sm:$0xff] %v9430_v48  ;;  %9980 = vst [vmem:[#allocation17_spill] sm:$0xff] %v9432_v55  ;;  %v9434_v23 = vadd.f32 %v6562_v27, %v4304_v24 }
 0x203   : > { %v9436_v37 = vpop.f32.mrf.mxu1  ;;  %v9438_v16 = vpop.f32.mrf.mxu0 }
 0x204   : > { %9981 = vst [vmem:[#allocation29_spill] sm:$0xff] %v9434_v23  ;;  %9982 = vst [vmem:[#allocation43_spill] sm:$0xff] %v9436_v37 }
 0x205   : > { %9983 = vst [vmem:[#allocation11_spill] sm:$0xff] %v9438_v16  ;;  %v9440_v17 = vpop.f32.mrf.mxu1  ;;  %v6610_v57 = vpop.f32.mrf.mxu0 }
 0x206   : > { %9984 = vst [vmem:[#allocation31_spill] sm:$0xff] %v9440_v17 }
 0x207   : > { %v6532_v43 = vpop.f32.mrf.mxu1  ;;  %v5051_v5 = vpop.f32.mrf.mxu0 }
 0x208   : > { %v4308_v14 = vadd.f32 %v6532_v43, %v9321_v26 }
 0x209   : > { %v9443_v0 = vpop.f32.mrf.mxu1  ;;  %v6611_v46 = vpop.f32.mrf.mxu0 }
 0x20a   : > { %9985 = vst [vmem:[#allocation22_spill] sm:$0xff] %v9443_v0  ;;  %v9445_v34 = vadd.f32 %v6566_v28, %v4308_v14  ;;  %v4286_v0 = vadd.f32 %v9370_v39, %v9262_v9 }
 0x20b   : > { %v9447_v48 = vpop.f32.mrf.mxu1  ;;  %v5054_v24 = vpop.f32.mrf.mxu0 }
 0x20c   : > { %9986 = vst [vmem:[#allocation34_spill] sm:$0xff] %v9445_v34  ;;  %9987 = vst [vmem:[#allocation13_spill] sm:$0xff] %v9447_v48  ;;  %v4285_v34 = vadd.f32 %v9359_v1, %v9253_v11 }
 0x20d   : > { %v9449_v27 = vpop.f32.mrf.mxu1  ;;  %v6614_v55 = vpop.f32.mrf.mxu0 }
 0x20e   : > { %9988 = vst [vmem:[#allocation37_spill] sm:$0xff] %v9449_v27 }
 0x20f   : > { %v6536_v23 = vpop.f32.mrf.mxu1  ;;  %v5067_v16 = vpop.f32.mrf.mxu0 }
 0x210   : > { %v4312_v17 = vadd.f32 %v6536_v23, %v9339_v21  ;;  %v4283_v21 = vadd.f32 %v9365_v20, %v9256_v40  ;;  %v4289_v40 = vadd.f32 %v9376_v8, %v9265_v33 }
 0x211   : > { %v9452_v37 = vpop.f32.mrf.mxu1  ;;  %v6615_v6 = vpop.f32.mrf.mxu0 }
 0x212   : > { %9989 = vst [vmem:[#allocation40_spill] sm:$0xff] %v9452_v37  ;;  %v9454_v52 = vadd.f32 %v6570_v44, %v4312_v17  ;;  %v4591_v1 = vadd.f32 %v9323_v61, %v4283_v21 }
 0x213   : > { %v9456_v43 = vpop.f32.mrf.mxu1  ;;  %v9458_v26 = vpop.f32.mrf.mxu0 }
 0x214   : > { %9990 = vst [vmem:[#allocation47_spill] sm:$0xff] %v9454_v52  ;;  %9991 = vst [vmem:[#allocation14_spill] sm:$0xff] %v9456_v43 }
 0x215   : > { %v9460_v28 = vpop.f32.mrf.mxu1  ;;  %v9462_v14 = vpop.f32.mrf.mxu0 }
 0x216   : > { %9992 = vst [vmem:[#allocation49_spill] sm:$0xff] %v9460_v28  ;;  %v4593_v28 = vadd.f32 %v9318_v51, %v4285_v34  ;;  %v4287_v51 = vadd.f32 %v9380_v50, %v9268_v41  ;;  %v4597_v41 = vadd.f32 %v9336_v18, %v4289_v40 }
 0x217   : > { %v6576_v27 = vpop.f32.mrf.mxu1  ;;  %v9466_v48 = vpop.f32.mrf.mxu0 }
 0x218   : > { %v4888_v17 = vadd.f32 %v6576_v27, %v9357_v38 }
 0x219   : > { %v4759_v23 = vpop.f32.mrf.mxu1  ;;  %v9470_v44 = vpop.f32.mrf.mxu0 }
 0x21a   : > { %v4886_v52 = vadd.f32 %v4759_v23, %v9363_v30  ;;  %v5180_v38 = vadd.f32 %v6610_v57, %v4888_v17 }
 0x21b   : > { %v6577_v43 = vpop.f32.mrf.mxu1  ;;  %v9475_v37 = vpop.f32.mrf.mxu0 }
 0x21c   : > { %v4889_v11 = vadd.f32 %v6577_v43, %v4593_v28  ;;  %v5178_v27 = vadd.f32 %v5051_v5, %v4886_v52  ;;  %v4594_v52 = vadd.f32 %v9331_v13, %v4286_v0  ;;  %v4290_v28 = vadd.f32 %v9385_v31, %v9274_v29 }
 0x21d   : > { %v4762_v20 = vpop.f32.mrf.mxu1  ;;  %v9482_v56 = vpop.f32.mrf.mxu0  ;;  %v5409_v13 = vmul.f32 %v5180_v38, %v5180_v38 }
 0x21e   : > { %v5181_v30 = vadd.f32 %v6611_v46, %v4889_v11  ;;  %v4887_v23 = vadd.f32 %v4762_v20, %v4591_v1  ;;  %v5407_v57 = vmul.f32 %v5178_v27, %v5178_v27  ;;  %v4293_v1 = vadd.f32 %v9391_v15, %v9277_v22 }
 0x21f   : > { %v6580_v9 = vpop.f32.mrf.mxu1  ;;  %v9493_v61 = vpop.f32.mrf.mxu0 }
 0x220   : > { %v6094_v33 = vpack.c.bf16 %v5181_v30, %v5180_v38  ;;  %v5179_v39 = vadd.f32 %v5054_v24, %v4887_v23  ;;  %v4892_v8 = vadd.f32 %v6580_v9, %v9374_v42  ;;  %v4595_v42 = vadd.f32 %v9341_v35, %v4287_v51 }
 0x221   : > { %v4775_v5 = vpop.f32.mrf.mxu1  ;;  %v9498_v50 = vpop.f32.mrf.mxu0  ;;  %v5410_v40 = vmul.f32 %v5181_v30, %v5181_v30 }
 0x222   : > { %6166 = vst [vmem:[%s9491_s17 + $0x8] sm:$0xff] %v6094_v33   ;;  %v6089_v46 = vpack.c.bf16 %v5179_v39, %v5178_v27  ;;  %v5370_v34 = vadd.f32 %v5179_v39, %v5178_v27  ;;  %v5408_v43 = vmul.f32 %v5179_v39, %v5179_v39  ;;  %v4890_v21 = vadd.f32 %v4775_v5, %v4594_v52 }
 0x223   : > { %v6581_v24 = vpop.f32.mrf.mxu1  ;;  %v9504_v17 = vpop.f32.mrf.mxu0  ;;  %v5184_v20 = vadd.f32 %v6614_v55, %v4892_v8  ;;  %v4291_v33 = vadd.f32 %v9395_v53, %v9280_v7  ;;  %v4598_v39 = vadd.f32 %v9349_v62, %v4290_v28  ;;  %v4601_v53 = vadd.f32 %v9354_v2, %v4293_v1 }
 0x224   : > { %6090 = vst [vmem:[%s9491_s17] sm:$0xff] %v6089_v46   ;;  %v5371_v0 = vadd.f32 %v5370_v34, %v5180_v38  ;;  %v5439_v18 = vadd.f32 %v5408_v43, %v5407_v57  ;;  %v4893_v11 = vadd.f32 %v6581_v24, %v4597_v41  ;;  %v5182_v27 = vadd.f32 %v5067_v16, %v4890_v21 }
 0x225   : > { %v4778_v23 = vpop.f32.mrf.mxu1  ;;  %v9509_v9 = vpop.f32.mrf.mxu0  ;;  %v4297_v28 = vadd.f32 %v9406_v36, %v9289_v54  ;;  %v4599_v24 = vadd.f32 %v9361_v49, %v4291_v33 }
 0x226   : > { %v5440_v29 = vadd.f32 %v5439_v18, %v5409_v13  ;;  %v5372_v31 = vadd.f32 %v5371_v0, %v5181_v30  ;;  %v5185_v35 = vadd.f32 %v6615_v6, %v4893_v11  ;;  %v4891_v51 = vadd.f32 %v4778_v23, %v4595_v42 }
 0x227   : > { %v6584_v38 = vpop.f32.mrf.mxu1  ;;  %v9514_v52 = vpop.f32.mrf.mxu0  ;;  %v5411_v15 = vmul.f32 %v5182_v27, %v5182_v27  ;;  %v5413_v42 = vmul.f32 %v5184_v20, %v5184_v20 }
 0x228   : > { %v5373_v22 = vadd.f32 %v5372_v31, %v5182_v27  ;;  %v5441_v55 = vadd.f32 %v5440_v29, %v5410_v40  ;;  %v6104_v16 = vpack.c.bf16 %v5185_v35, %v5184_v20  ;;  %v5183_v8 = vadd.f32 %v9458_v26, %v4891_v51 }
 0x229   : > { %v4791_v5 = vpop.f32.mrf.mxu1  ;;  %v9517_v41 = vpop.f32.mrf.mxu0  ;;  %v4896_v30 = vadd.f32 %v6584_v38, %v9389_v60  ;;  %v4294_v26 = vadd.f32 %v9400_v32, %v9286_v45  ;;  %v5414_v32 = vmul.f32 %v5185_v35, %v5185_v35  ;;  %v4605_v51 = vadd.f32 %v9372_v25, %v4297_v28 }
 0x22a   : > { %v5442_v6 = vadd.f32 %v5441_v55, %v5411_v15  ;;  %6168 = vst [vmem:[%s9491_s17 + $0x18] sm:$0xff] %v6104_v16   ;;  %v4894_v7 = vadd.f32 %v4791_v5, %v4598_v39  ;;  %v6099_v62 = vpack.c.bf16 %v5183_v8, %v5182_v27  ;;  %v5374_v57 = vadd.f32 %v5373_v22, %v5183_v8 }
 0x22b   : > { %v5412_v46 = vmul.f32 %v5183_v8, %v5183_v8  ;;  %v6585_v34 = vpop.f32.mrf.mxu1  ;;  %v9522_v43 = vpop.f32.mrf.mxu0  ;;  %v5188_v11 = vadd.f32 %v9462_v14, %v4896_v30  ;;  %v4602_v23 = vadd.f32 %v9367_v12, %v4294_v26  ;;  %v4298_v12 = vadd.f32 %v9415_v3, %v9298_v63 }
 0x22c   : > { %v4897_v21 = vadd.f32 %v6585_v34, %v4601_v53  ;;  %6167 = vst [vmem:[%s9491_s17 + $0x10] sm:$0xff] %v6099_v62   ;;  %v5375_v60 = vadd.f32 %v5374_v57, %v5184_v20  ;;  %v5186_v2 = vadd.f32 %v9466_v48, %v4894_v7  ;;  %v4295_v20 = vadd.f32 %v9410_v19, %v9292_v47  ;;  %v9993_v57 = vld [vmem:[#allocation7_spill] sm:$0xff] }
 0x22d   : > { %v5443_v13 = vadd.f32 %v5442_v6, %v5412_v46  ;;  %v4794_v0 = vpop.f32.mrf.mxu1  ;;  %v9531_v18 = vpop.f32.mrf.mxu0  ;;  %v5417_v16 = vmul.f32 %v5188_v11, %v5188_v11 }
 0x22e   : > { %v5189_v1 = vadd.f32 %v9470_v44, %v4897_v21  ;;  %v4895_v45 = vadd.f32 %v4794_v0, %v4599_v24  ;;  %v5376_v36 = vadd.f32 %v5375_v60, %v5185_v35  ;;  %v5415_v14 = vmul.f32 %v5186_v2, %v5186_v2  ;;  %v9997_v0 = vld [vmem:[#allocation10_spill] sm:$0xff] }
 0x22f   : > { %v5444_v54 = vadd.f32 %v5443_v13, %v5413_v42  ;;  %v6588_v40 = vpop.f32.mrf.mxu1  ;;  %v9535_v49 = vpop.f32.mrf.mxu0  ;;  %v4603_v25 = vadd.f32 %v9378_v4, %v4295_v20  ;;  %v9994_v4 = vld [vmem:[#allocation5_spill] sm:$0xff]  ;;  %v9996_v42 = vld [vmem:[#allocation39_spill] sm:$0xff] }
 0x230   : > { %v6114_v27 = vpack.c.bf16 %v5189_v1, %v5188_v11  ;;  %v5187_v48 = vadd.f32 %v9475_v37, %v4895_v45  ;;  %v5377_v29 = vadd.f32 %v5376_v36, %v5186_v2  ;;  %v4900_v38 = vadd.f32 %v6588_v40, %v9404_v58  ;;  %v9999_v40 = vld [vmem:[#allocation15_spill] sm:$0xff] }
 0x231   : > { %v5445_v44 = vadd.f32 %v5444_v54, %v5414_v32  ;;  %v4807_v31 = vpop.f32.mrf.mxu1  ;;  %v9544_v15 = vpop.f32.mrf.mxu0  ;;  %v4301_v37 = vadd.f32 %v9421_v10, %v9301_v59  ;;  %v5418_v63 = vmul.f32 %v5189_v1, %v5189_v1  ;;  %v4299_v46 = vadd.f32 %v9994_v4, %v9993_v57  ;;  %v10007_v57 = vld [vmem:[#allocation29_spill] sm:$0xff] }
 0x232   : > { %6170 = vst [vmem:[%s9491_s17 + $0x28] sm:$0xff] %v6114_v27   ;;  %v6109_v35 = vpack.c.bf16 %v5187_v48, %v5186_v2  ;;  %v5416_v33 = vmul.f32 %v5187_v48, %v5187_v48  ;;  %v4898_v39 = vadd.f32 %v4807_v31, %v4602_v23  ;;  %v5378_v47 = vadd.f32 %v5377_v29, %v5187_v48  ;;  %v10000_v27 = vld [vmem:[#allocation35_spill] sm:$0xff] }
 0x233   : > { %v5446_v22 = vadd.f32 %v5445_v44, %v5415_v14  ;;  %v6589_v19 = vpop.f32.mrf.mxu1  ;;  %v5192_v30 = vadd.f32 %v9482_v56, %v4900_v38  ;;  %v9555_v10 = vpop.f32.mrf.mxu0  ;;  %v4609_v60 = vadd.f32 %v9996_v42, %v4301_v37  ;;  %v10001_v48 = vld [vmem:[#allocation43_spill] sm:$0xff]  ;;  %v10002_v14 = vld [vmem:[#allocation41_spill] sm:$0xff] }
 0x234   : > { %6169 = vst [vmem:[%s9491_s17 + $0x20] sm:$0xff] %v6109_v35   ;;  %v4901_v55 = vadd.f32 %v6589_v19, %v4605_v51  ;;  %v5379_v8 = vadd.f32 %v5378_v47, %v5188_v11  ;;  %v5190_v58 = vadd.f32 %v9493_v61, %v4898_v39  ;;  %v9995_v61 = vld [vmem:[#allocation30_spill] sm:$0xff]  ;;  %v4305_v23 = vadd.f32 %v10001_v48, %v10000_v27 }
 0x235   : > { %v5447_v5 = vadd.f32 %v5446_v22, %v5416_v33  ;;  %v4810_v6 = vpop.f32.mrf.mxu1  ;;  %v4606_v28 = vadd.f32 %v9995_v61, %v4298_v12  ;;  %v9564_v36 = vpop.f32.mrf.mxu0  ;;  %v4607_v44 = vadd.f32 %v10002_v14, %v4299_v46  ;;  %v5421_v31 = vmul.f32 %v5192_v30, %v5192_v30  ;;  %v10013_v14 = vld [vmem:[#allocation46_spill] sm:$0xff] }
 0x236   : > { %v5193_v7 = vadd.f32 %v9498_v50, %v4901_v55  ;;  %v4899_v53 = vadd.f32 %v4810_v6, %v4603_v25  ;;  %v5380_v62 = vadd.f32 %v5379_v8, %v5189_v1  ;;  %v5419_v56 = vmul.f32 %v5190_v58, %v5190_v58  ;;  %v10004_v8 = vld [vmem:[#allocation31_spill] sm:$0xff] }
 0x237   : > { %v5448_v3 = vadd.f32 %v5447_v5, %v5417_v16  ;;  %v6592_v59 = vpop.f32.mrf.mxu1  ;;  %v9575_v25 = vpop.f32.mrf.mxu0  ;;  %v10003_v16 = vld [vmem:[#allocation44_spill] sm:$0xff] }
 0x238   : > { %v6124_v34 = vpack.c.bf16 %v5193_v7, %v5192_v30  ;;  %v5191_v26 = vadd.f32 %v9504_v17, %v4899_v53  ;;  %v5381_v21 = vadd.f32 %v5380_v62, %v5190_v58  ;;  %v4904_v11 = vadd.f32 %v6592_v59, %v9997_v0  ;;  %v9998_v17 = vld [vmem:[#allocation32_spill] sm:$0xff] }
 0x239   : > { %v5449_v50 = vadd.f32 %v5448_v3, %v5418_v63  ;;  %v4823_v24 = vpop.f32.mrf.mxu1  ;;  %v4302_v20 = vadd.f32 %v9999_v40, %v9998_v17  ;;  %v5422_v19 = vmul.f32 %v5193_v7, %v5193_v7  ;;  %v4303_v5 = vadd.f32 %v10004_v8, %v10003_v16  ;;  %v10006_v3 = vld [vmem:[#allocation16_spill] sm:$0xff] }
 0x23a   : > { %6172 = vst [vmem:[%s9491_s17 + $0x38] sm:$0xff] %v6124_v34   ;;  %v6119_v13 = vpack.c.bf16 %v5191_v26, %v5190_v58  ;;  %v5420_v2 = vmul.f32 %v5191_v26, %v5191_v26  ;;  %v4902_v1 = vadd.f32 %v4823_v24, %v4606_v28  ;;  %v5382_v32 = vadd.f32 %v5381_v21, %v5191_v26  ;;  %v6635_v28 = vpop.f32.mrf.mxu0  ;;  %v10009_v21 = vld [vmem:[#allocation22_spill] sm:$0xff]  ;;  %v10011_v24 = vld [vmem:[#allocation13_spill] sm:$0xff] }
 0x23b   : > { %v5450_v45 = vadd.f32 %v5449_v50, %v5419_v56  ;;  %v6593_v54 = vpop.f32.mrf.mxu1  ;;  %v5196_v39 = vadd.f32 %v9509_v9, %v4904_v11  ;;  %v4613_v62 = vadd.f32 %v10006_v3, %v4305_v23  ;;  %v10010_v50 = vld [vmem:[#allocation42_spill] sm:$0xff]  ;;  %v10022_v3 = vld [vmem:[#allocation4_spill] sm:$0xff] }
 0x23c   : > { %6171 = vst [vmem:[%s9491_s17 + $0x30] sm:$0xff] %v6119_v13   ;;  %v4905_v29 = vadd.f32 %v6593_v54, %v4609_v60  ;;  %v5383_v51 = vadd.f32 %v5382_v32, %v5192_v30  ;;  %v5194_v33 = vadd.f32 %v9514_v52, %v4902_v1  ;;  %v10005_v52 = vld [vmem:[#allocation33_spill] sm:$0xff]  ;;  %v4309_v42 = vadd.f32 %v10011_v24, %v10010_v50  ;;  %v10012_v13 = vld [vmem:[#allocation38_spill] sm:$0xff] }
 0x23d   : > { %v5451_v35 = vadd.f32 %v5450_v45, %v5420_v2  ;;  %v4826_v38 = vpop.f32.mrf.mxu1  ;;  %v4610_v30 = vadd.f32 %v10005_v52, %v4302_v20  ;;  %v4611_v2 = vadd.f32 %v10012_v13, %v4303_v5  ;;  %v5425_v0 = vmul.f32 %v5196_v39, %v5196_v39  ;;  %v10019_v52 = vld [vmem:[#allocation40_spill] sm:$0xff] }
 0x23e   : > { %v5197_v22 = vadd.f32 %v9517_v41, %v4905_v29  ;;  %v4903_v47 = vadd.f32 %v4826_v38, %v4607_v44  ;;  %v5384_v37 = vadd.f32 %v5383_v51, %v5193_v7  ;;  %v5423_v9 = vmul.f32 %v5194_v33, %v5194_v33  ;;  %v5150_v29 = vpop.f32.mrf.mxu0  ;;  %v10014_v44 = vld [vmem:[#allocation37_spill] sm:$0xff] }
 0x23f   : > { %v5452_v12 = vadd.f32 %v5451_v35, %v5421_v31  ;;  %v6596_v55 = vpop.f32.mrf.mxu1  ;;  %v4307_v31 = vadd.f32 %v10014_v44, %v10013_v14 }
 0x240   : > { %v6134_v58 = vpack.c.bf16 %v5197_v22, %v5196_v39  ;;  %v5195_v6 = vadd.f32 %v9522_v43, %v4903_v47  ;;  %v5385_v53 = vadd.f32 %v5384_v37, %v5194_v33  ;;  %v4908_v4 = vadd.f32 %v6596_v55, %v10007_v57  ;;  %v10008_v43 = vld [vmem:[#allocation36_spill] sm:$0xff]  ;;  %v10017_v37 = vld [vmem:[#allocation34_spill] sm:$0xff] }
 0x241   : > { %v5453_v41 = vadd.f32 %v5452_v12, %v5422_v19  ;;  %v4839_v63 = vpop.f32.mrf.mxu1  ;;  %v4306_v56 = vadd.f32 %v10009_v21, %v10008_v43  ;;  %v5426_v20 = vmul.f32 %v5197_v22, %v5197_v22  ;;  %v10016_v47 = vld [vmem:[#allocation48_spill] sm:$0xff] }
 0x242   : > { %6174 = vst [vmem:[%s9491_s17 + $0x48] sm:$0xff] %v6134_v58   ;;  %v6129_v7 = vpack.c.bf16 %v5195_v6, %v5194_v33  ;;  %v5424_v59 = vmul.f32 %v5195_v6, %v5195_v6  ;;  %v4906_v46 = vadd.f32 %v4839_v63, %v4610_v30  ;;  %v5386_v26 = vadd.f32 %v5385_v53, %v5195_v6  ;;  %v10015_v33 = vld [vmem:[#allocation45_spill] sm:$0xff]  ;;  %v6638_v6 = vpop.f32.mrf.mxu0  ;;  %v10020_v53 = vld [vmem:[#allocation27_spill] sm:$0xff] }
 0x243   : > { %v5454_v34 = vadd.f32 %v5453_v41, %v5423_v9  ;;  %v6597_v61 = vpop.f32.mrf.mxu1  ;;  %v5200_v54 = vadd.f32 %v9531_v18, %v4908_v4  ;;  %v4617_v19 = vadd.f32 %v10016_v47, %v4309_v42  ;;  %v10021_v9 = vld [vmem:[#allocation14_spill] sm:$0xff]  ;;  %v10023_v42 = vld [vmem:[#allocation28_spill] sm:$0xff] }
 0x244   : > { %6173 = vst [vmem:[%s9491_s17 + $0x40] sm:$0xff] %v6129_v7   ;;  %v4909_v60 = vadd.f32 %v6597_v61, %v4613_v62  ;;  %v5387_v11 = vadd.f32 %v5386_v26, %v5196_v39  ;;  %v5198_v45 = vadd.f32 %v9535_v49, %v4906_v46  ;;  %v4614_v49 = vadd.f32 %v10015_v33, %v4306_v56  ;;  %v5163_v24 = vpop.f32.mrf.mxu0 }
 0x245   : > { %v5455_v1 = vadd.f32 %v5454_v34, %v5424_v59  ;;  %v4842_v32 = vpop.f32.mrf.mxu1  ;;  %v4313_v41 = vadd.f32 %v10021_v9, %v10020_v53  ;;  %v4615_v62 = vadd.f32 %v10022_v3, %v4307_v31  ;;  %v5429_v7 = vmul.f32 %v5200_v54, %v5200_v54 }
 0x246   : > { %v5201_v17 = vadd.f32 %v9544_v15, %v4909_v60  ;;  %v4907_v40 = vadd.f32 %v4842_v32, %v4611_v2  ;;  %v5388_v48 = vadd.f32 %v5387_v11, %v5197_v22  ;;  %v5427_v18 = vmul.f32 %v5198_v45, %v5198_v45  ;;  %v10024_v60 = vld [vmem:[#allocation49_spill] sm:$0xff]  ;;  %v10025_v11 = vld [vmem:[#allocation18_spill] sm:$0xff]  ;;  %v6639_v44 = vpop.f32.mrf.mxu0 }
 0x247   : > { %v5456_v27 = vadd.f32 %v5455_v1, %v5425_v0  ;;  %v6600_v23 = vpop.f32.mrf.mxu1  ;;  %v4311_v13 = vadd.f32 %v10024_v60, %v10023_v42 }
 0x248   : > { %v6144_v51 = vpack.c.bf16 %v5201_v17, %v5200_v54  ;;  %v5199_v35 = vadd.f32 %v9555_v10, %v4907_v40  ;;  %v5389_v38 = vadd.f32 %v5388_v48, %v5198_v45  ;;  %v4912_v55 = vadd.f32 %v6600_v23, %v10017_v37  ;;  %v10018_v10 = vld [vmem:[#allocation25_spill] sm:$0xff] }
 0x249   : > { %v5457_v39 = vadd.f32 %v5456_v27, %v5426_v20  ;;  %v4855_v15 = vpop.f32.mrf.mxu1  ;;  %v4310_v30 = vadd.f32 %v10019_v52, %v10018_v10  ;;  %v5430_v43 = vmul.f32 %v5201_v17, %v5201_v17 }
 0x24a   : > { %6176 = vst [vmem:[%s9491_s17 + $0x58] sm:$0xff] %v6144_v51   ;;  %v6139_v12 = vpack.c.bf16 %v5199_v35, %v5198_v45  ;;  %v5428_v22 = vmul.f32 %v5199_v35, %v5199_v35  ;;  %v4910_v16 = vadd.f32 %v4855_v15, %v4614_v49  ;;  %v5390_v5 = vadd.f32 %v5389_v38, %v5199_v35  ;;  %v10028_v51 = vld [vmem:[#allocation11_spill] sm:$0xff] }
 0x24b   : > { %v5458_v8 = vadd.f32 %v5457_v39, %v5427_v18  ;;  %v6601_v58 = vpop.f32.mrf.mxu1  ;;  %v5204_v34 = vadd.f32 %v9564_v36, %v4912_v55  ;;  %v4618_v1 = vadd.f32 %v10025_v11, %v4310_v30  ;;  %v4619_v35 = vadd.f32 %v10028_v51, %v4311_v13  ;;  %v5166_v55 = vpop.f32.mrf.mxu0 }
 0x24c   : > { %6175 = vst [vmem:[%s9491_s17 + $0x50] sm:$0xff] %v6139_v12   ;;  %v4913_v63 = vadd.f32 %v6601_v58, %v4617_v19  ;;  %v5391_v59 = vadd.f32 %v5390_v5, %v5200_v54  ;;  %v5202_v4 = vadd.f32 %v9575_v25, %v4910_v16 }
 0x24d   : > { %v5459_v57 = vadd.f32 %v5458_v8, %v5428_v22  ;;  %v4858_v46 = vpop.f32.mrf.mxu1  ;;  %v5433_v33 = vmul.f32 %v5204_v34, %v5204_v34 }
 0x24e   : > { %v5205_v26 = vadd.f32 %v6635_v28, %v4913_v63  ;;  %v4911_v61 = vadd.f32 %v4858_v46, %v4615_v62  ;;  %v5392_v56 = vadd.f32 %v5391_v59, %v5201_v17  ;;  %v5431_v45 = vmul.f32 %v5202_v4, %v5202_v4  ;;  %v10026_v28 = vld [vmem:[#allocation17_spill] sm:$0xff]  ;;  %v10027_v17 = vld [vmem:[#allocation47_spill] sm:$0xff] }
 0x24f   : > { %v5460_v21 = vadd.f32 %v5459_v57, %v5429_v7  ;;  %v6604_v50 = vpop.f32.mrf.mxu1  ;;  %v4621_v54 = vadd.f32 %v10026_v28, %v4313_v41 }
 0x250   : > { %v6154_v2 = vpack.c.bf16 %v5205_v26, %v5204_v34  ;;  %v5203_v0 = vadd.f32 %v5150_v29, %v4911_v61  ;;  %v5393_v25 = vadd.f32 %v5392_v56, %v5202_v4  ;;  %v4916_v27 = vadd.f32 %v6604_v50, %v10027_v17 }
 0x251   : > { %v5461_v32 = vadd.f32 %v5460_v21, %v5430_v43  ;;  %v4871_v36 = vpop.f32.mrf.mxu1  ;;  %v5434_v12 = vmul.f32 %v5205_v26, %v5205_v26 }
 0x252   : > { %6178 = vst [vmem:[%s9491_s17 + $0x68] sm:$0xff] %v6154_v2   ;;  %v6149_v40 = vpack.c.bf16 %v5203_v0, %v5202_v4  ;;  %v5432_v20 = vmul.f32 %v5203_v0, %v5203_v0  ;;  %v4914_v48 = vadd.f32 %v4871_v36, %v4618_v1  ;;  %v5394_v14 = vadd.f32 %v5393_v25, %v5203_v0 }
 0x253   : > { %v5462_v23 = vadd.f32 %v5461_v32, %v5431_v45  ;;  %v6605_v31 = vpop.f32.mrf.mxu1  ;;  %v5208_v15 = vadd.f32 %v6638_v6, %v4916_v27 }
 0x254   : > { %6177 = vst [vmem:[%s9491_s17 + $0x60] sm:$0xff] %v6149_v40   ;;  %v4917_v29 = vadd.f32 %v6605_v31, %v4621_v54  ;;  %v5395_v49 = vadd.f32 %v5394_v14, %v5204_v34  ;;  %v5206_v18 = vadd.f32 %v5163_v24, %v4914_v48 }
 0x255   : > { %v5463_v38 = vadd.f32 %v5462_v23, %v5432_v20  ;;  %v4874_v39 = vpop.f32.mrf.mxu1  ;;  %v5437_v41 = vmul.f32 %v5208_v15, %v5208_v15 }
 0x256   : > { %v5209_v47 = vadd.f32 %v6639_v44, %v4917_v29  ;;  %v4915_v19 = vadd.f32 %v4874_v39, %v4619_v35  ;;  %v5396_v37 = vadd.f32 %v5395_v49, %v5205_v26  ;;  %v5435_v58 = vmul.f32 %v5206_v18, %v5206_v18 }
 0x257   : > { %v5464_v22 = vadd.f32 %v5463_v38, %v5433_v33 }
 0x258   : > { %v6164_v16 = vpack.c.bf16 %v5209_v47, %v5208_v15  ;;  %v5207_v8 = vadd.f32 %v5166_v55, %v4915_v19  ;;  %v5397_v5 = vadd.f32 %v5396_v37, %v5206_v18  ;;  %v5438_v3 = vmul.f32 %v5209_v47, %v5209_v47 }
 0x259   : > { %v5465_v10 = vadd.f32 %v5464_v22, %v5434_v12 }
 0x25a   : > { %6180 = vst [vmem:[%s9491_s17 + $0x78] sm:$0xff] %v6164_v16   ;;  %v6159_v52 = vpack.c.bf16 %v5207_v8, %v5206_v18  ;;  %v5436_v30 = vmul.f32 %v5207_v8, %v5207_v8  ;;  %v5398_v9 = vadd.f32 %v5397_v5, %v5207_v8 }
 0x25b   : > { %v5466_v53 = vadd.f32 %v5465_v10, %v5435_v58 }
 0x25c   : > { %6179 = vst [vmem:[%s9491_s17 + $0x70] sm:$0xff] %v6159_v52   ;;  %v5399_v6 = vadd.f32 %v5398_v9, %v5208_v15 }
 0x25d   : > { %v5467_v63 = vadd.f32 %v5466_v53, %v5436_v30 }
 0x25e   : > { %v5400_v62 = vadd.f32 %v5399_v6, %v5209_v47 }
 0x25f   : > { %v5468_v7 = vadd.f32 %v5467_v63, %v5437_v41 }
 0x260   : > { %v5401_v59 = vrot.slane %v5400_v62, 4 }
 0x261   : > { %v5469_v57 = vadd.f32 %v5468_v7, %v5438_v3 }
 0x262   : > { %v5402_v4 = vadd.f32 %v5401_v59, %v5400_v62 }
 0x263   : > { %v5470_v46 = vrot.slane %v5469_v57, 4 }
 0x264   : > { %v5403_v34 = vrot.slane %v5402_v4, 2 }
 0x265   : > { %v5471_v26 = vadd.f32 %v5470_v46, %v5469_v57 }
 0x266   : > { %v5404_v61 = vadd.f32 %v5403_v34, %v5402_v4 }
 0x267   : > { %v5472_v43 = vrot.slane %v5471_v26, 2 }
 0x268   : > { %v5405_v21 = vrot.slane %v5404_v61, 1 }
 0x269   : > { %v5473_v56 = vadd.f32 %v5472_v43, %v5471_v26 }
 0x26a   : > { %v5406_v24 = vadd.f32 %v5405_v21, %v5404_v61 }
 0x26b   : > { %v5474_v50 = vrot.slane %v5473_v56, 1 }
 0x26d   : > { %v5475_v42 = vadd.f32 %v5474_v50, %v5473_v56 }
 0x26f   : > { %v5477_v60 = vsel %vm467_vm6, %v5406_v24, %v5475_v42 }
 0x270   : > { %5478 = vst [vmem:[%s209_s21] sm:$0x3] %v5477_v60 }
 0x271 PF: > { %s14_s14 = sadd.s32 1, %s6759_s14   ;;  %s10029_s12 = smov %s6755_s13 }
 0x272   : > { %p11_p5 = scmp.ge.s32.totalorder %s14_s14, 4   ;;  %s10030_s13 = smov %s10032_s15 }
 0x274   :  { %13 = sbr.rel (!%p11_p5) target bundleno = 2 (0x2), region = 74 }

</bundles_post_ra>
